<compile_context>
chip_gen: v5e
topology: v5e:2x2
jax: 0.10.0
libtpu: 0.0.40
codegen_flags: <defaults>
</compile_context>

<pallas_src>
import math

import jax
import jax.numpy as jnp
from jax.experimental import pallas as pl
from jax.experimental.pallas import tpu as pltpu

# ---- static configuration (small shapes consistent with the module) ----
HEIGHT = 16
WIDTH = 16
HIDDEN = 32          # hidden_features
NUM_LAYERS = 3       # num_layers
MODUL_FEATURES = 8   # modul_features
FREQ = 30.0
TILE_N = 256         # pixels per grid step; here = H*W -> a single grid step


def _modulated_siren_kernel(shiftb_ref, w0_ref, wh_ref, wrgb_ref, brgb_ref, o_ref):
    """Transposed-activation SIREN step.

    shiftb_ref : (HIDDEN, NUM_LAYERS)  FREQ * (modul(phi) + b_l), one column per layer
    w0_ref     : (HIDDEN, 2)           FREQ * W_0            (PyTorch (out, in) layout)
    wh_ref     : (NUM_LAYERS-1, HIDDEN, HIDDEN)  FREQ * W_l  (PyTorch (out, in) layout)
    wrgb_ref   : (1, HIDDEN)           hidden2rgb weight
    brgb_ref   : (1,) in SMEM          hidden2rgb bias (scalar)
    o_ref      : (1, TILE_N)           lane-dense output row for this tile
    """
    f32 = jnp.float32
    hp = jax.lax.Precision.HIGHEST
    tile_n = o_ref.shape[-1]

    # --- coordinates generated in-kernel (no HBM coords DMA) ---------------
    # global pixel index k -> row = k // WIDTH, col = k % WIDTH.
    # Done in f32 (exact here: WIDTH is a power of two and k < 2**24).
    ki = (pl.program_id(0) * tile_n
          + jax.lax.broadcasted_iota(jnp.int32, (1, tile_n), 1))     # (1, TILE_N) int32
    kf = ki.astype(f32)
    row = jnp.floor(kf * (1.0 / WIDTH))                              # (1, TILE_N)
    col = kf - row * WIDTH                                           # (1, TILE_N)

    # --- layer 0 on the VPU (K=2 outer-product form; FREQ already fused) ---
    w0 = w0_ref[...]                                                 # (HIDDEN, 2)
    z = w0[:, 0:1] * row + w0[:, 1:2] * col + shiftb_ref[:, 0:1]     # (HIDDEN, TILE_N)
    h = jnp.sin(z)

    # --- hidden layers 1..NUM_LAYERS-1 on the MXU (static unroll) ----------
    # activations stay transposed: features on sublanes, pixels on lanes.
    for l in range(1, NUM_LAYERS):
        z = (jnp.dot(wh_ref[l - 1], h, preferred_element_type=f32, precision=hp)
             + shiftb_ref[:, l:l + 1])                               # (HIDDEN, TILE_N)
        h = jnp.sin(z)

    # --- hidden2rgb: (1, HIDDEN) @ (HIDDEN, TILE_N) -> lane-dense row ------
    out_row = (jnp.dot(wrgb_ref[...], h, preferred_element_type=f32, precision=hp)
               + brgb_ref[0])                                        # (1, TILE_N)
    o_ref[...] = out_row


@jax.jit
def modulated_siren_forward(phi, params):
    """phi: (MODUL_FEATURES,) f32 -> (HEIGHT*WIDTH, 1) f32."""
    wmod, bmod, w0, wh, b_all, wrgb, brgb = params
    n = HEIGHT * WIDTH
    assert n % TILE_N == 0 and TILE_N % 128 == 0
    grid = n // TILE_N

    # Grid-invariant modulation hoisted out of the kernel:
    #   shiftb[:, l] = FREQ * (modul(phi)[l*H:(l+1)*H] + b_l)
    hp = jax.lax.Precision.HIGHEST
    shift = jnp.dot(wmod, phi, precision=hp) + bmod                  # (HIDDEN*NUM_LAYERS,)
    shiftb = (FREQ * (shift.reshape(NUM_LAYERS, HIDDEN) + b_all)).T  # (HIDDEN, NUM_LAYERS)

    # FREQ pre-fused into the affine weights (constant fold, fused under jit).
    w0f = FREQ * w0                                                  # (HIDDEN, 2)
    whf = FREQ * wh                                                  # (NUM_LAYERS-1, HIDDEN, HIDDEN)

    out_rows = pl.pallas_call(
        _modulated_siren_kernel,
        out_shape=jax.ShapeDtypeStruct((grid, TILE_N), jnp.float32),
        grid_spec=pltpu.PrefetchScalarGridSpec(
            num_scalar_prefetch=0,
            grid=(grid,),
            in_specs=[
                pl.BlockSpec((HIDDEN, NUM_LAYERS), lambda i: (0, 0)),            # shiftb
                pl.BlockSpec((HIDDEN, 2), lambda i: (0, 0)),                     # FREQ*W0
                pl.BlockSpec((NUM_LAYERS - 1, HIDDEN, HIDDEN),
                             lambda i: (0, 0, 0)),                               # FREQ*W_l
                pl.BlockSpec((1, HIDDEN), lambda i: (0, 0)),                     # W_rgb
                pl.BlockSpec(memory_space=pltpu.MemorySpace.SMEM),               # b_rgb scalar
            ],
            out_specs=pl.BlockSpec((1, TILE_N), lambda i: (i, 0)),               # lane-dense row
        ),
        compiler_params=pltpu.CompilerParams(
            dimension_semantics=("arbitrary",)),   # tiny work: do not force a megacore split
    )(shiftb, w0f, whf, wrgb, brgb)

    # (grid, TILE_N) row-major == pixel order -> (H*W, 1)
    return out_rows.reshape(n, 1)


def init_params(key):
    """Deterministic parameter init mirroring the PyTorch module (PyTorch layouts)."""
    k0, k1, k2, k3, k4 = jax.random.split(key, 5)
    hl = HIDDEN * NUM_LAYERS
    # modul = nn.Linear(modul_features, hidden*num_layers): PyTorch default init.
    bm = 1.0 / math.sqrt(MODUL_FEATURES)
    wmod = jax.random.uniform(k0, (hl, MODUL_FEATURES), jnp.float32, -bm, bm)
    bmod = jax.random.uniform(k1, (hl,), jnp.float32, -bm, bm)
    # SIREN layer 0 (start=True): uniform(-1/in, 1/in) with in=2, bias = 0.
    b0 = 1.0 / 2.0
    w0 = jax.random.uniform(k2, (HIDDEN, 2), jnp.float32, -b0, b0)
    # Hidden layers: uniform(-sqrt(6/hidden)/freq, +...), bias = 0.
    bh = math.sqrt(6.0 / HIDDEN) / FREQ
    wh = jax.random.uniform(k3, (NUM_LAYERS - 1, HIDDEN, HIDDEN), jnp.float32, -bh, bh)
    b_all = jnp.zeros((NUM_LAYERS, HIDDEN), jnp.float32)
    # hidden2rgb: same bound, bias = 0.
    wrgb = jax.random.uniform(k4, (1, HIDDEN), jnp.float32, -bh, bh)
    brgb = jnp.zeros((1,), jnp.float32)
    return wmod, bmod, w0, wh, b_all, wrgb, brgb


def reference_forward(phi, params):
    """Pure-JAX reference in the original (untransposed, unfused) math order."""
    wmod, bmod, w0, wh, b_all, wrgb, brgb = params
    hp = jax.lax.Precision.HIGHEST
    shift = jnp.dot(wmod, phi, precision=hp) + bmod                  # (HIDDEN*NUM_LAYERS,)
    ii, jj = jnp.meshgrid(jnp.arange(HEIGHT), jnp.arange(WIDTH), indexing="ij")
    coords = jnp.stack([ii.reshape(-1), jj.reshape(-1)], axis=1).astype(jnp.float32)
    h = coords                                                       # (N, 2)
    for l in range(NUM_LAYERS):
        w = w0 if l == 0 else wh[l - 1]
        z = (jnp.dot(h, w.T, precision=hp) + b_all[l]
             + shift[l * HIDDEN:(l + 1) * HIDDEN])
        h = jnp.sin(FREQ * z)
    return jnp.dot(h, wrgb.T, precision=hp) + brgb                   # (N, 1)


if __name__ == "__main__":
    key = jax.random.PRNGKey(0)
    pkey, phikey = jax.random.split(key)
    params = init_params(pkey)
    # phi: the modulation parameter (1-D of size modul_features, as in PyTorch).
    phi = jax.random.normal(phikey, (MODUL_FEATURES,), dtype=jnp.float32)

    out = modulated_siren_forward(phi, params)
    out = jax.block_until_ready(out)

    assert out.shape == (HEIGHT * WIDTH, 1) and out.dtype == jnp.float32
    ref = reference_forward(phi, params)
    max_err = float(jnp.max(jnp.abs(out - ref)))
    if not (max_err < 5e-2):
        raise AssertionError(f"kernel mismatch vs reference, max abs err = {max_err}")
    print("KERNEL_OK")
</pallas_src>

<mosaic_0001>
module attributes {stable_mosaic.version = 11 : i64} {
  func.func @_modulated_siren_kernel(%arg0: i32, %arg1: memref<32x3xf32, #tpu.memory_space<vmem>>, %arg2: memref<32x2xf32, #tpu.memory_space<vmem>>, %arg3: memref<2x32x32xf32, #tpu.memory_space<vmem>>, %arg4: memref<1x32xf32, #tpu.memory_space<vmem>>, %arg5: memref<1xf32, #tpu.memory_space<smem>>, %arg6: memref<1x256xf32, #tpu.memory_space<vmem>>) attributes {dimension_semantics = [#tpu.dimension_semantics<arbitrary>], iteration_bounds = array<i64: 1>, scalar_prefetch = 0 : i64, scratch_operands = 0 : i64, tpu.core_type = #tpu.core_type<tc>, window_params = [{pipeline_mode = #tpu.pipeline_mode<synchronous>, transform_indices = @transform_0, window_bounds = array<i64: 32, 3>}, {pipeline_mode = #tpu.pipeline_mode<synchronous>, transform_indices = @transform_1, window_bounds = array<i64: 32, 2>}, {pipeline_mode = #tpu.pipeline_mode<synchronous>, transform_indices = @transform_2, window_bounds = array<i64: 2, 32, 32>}, {pipeline_mode = #tpu.pipeline_mode<synchronous>, transform_indices = @transform_3, window_bounds = array<i64: 1, 32>}, {transform_indices = @transform_4, window_bounds = array<i64: 1>}, {transform_indices = @transform_5, window_bounds = array<i64: 1, 256>}]} {
    %c256_i32 = arith.constant 256 : i32
    %0 = arith.muli %arg0, %c256_i32 : i32
    %1 = tpu.iota {dimensions = array<i32: 1>} : vector<1x256xi32>
    %2 = vector.broadcast %0 : i32 to vector<1x256xi32>
    %3 = arith.addi %2, %1 : vector<1x256xi32>
    %4 = arith.sitofp %3 : vector<1x256xi32> to vector<1x256xf32>
    %cst = arith.constant 6.250000e-02 : f32
    %5 = vector.broadcast %cst : f32 to vector<1x256xf32>
    %6 = arith.mulf %4, %5 : vector<1x256xf32>
    %7 = math.floor %6 : vector<1x256xf32>
    %cst_0 = arith.constant 1.600000e+01 : f32
    %8 = vector.broadcast %cst_0 : f32 to vector<1x256xf32>
    %9 = arith.mulf %7, %8 : vector<1x256xf32>
    %10 = arith.subf %4, %9 : vector<1x256xf32>
    %c0 = arith.constant 0 : index
    %c0_1 = arith.constant 0 : index
    %11 = vector.load %arg2[%c0, %c0_1] : memref<32x2xf32, #tpu.memory_space<vmem>>, vector<32x2xf32>
    %12 = vector.extract_strided_slice %11 {offsets = [0, 0], sizes = [32, 1], strides = [1, 1]} : vector<32x2xf32> to vector<32x1xf32>
    %13 = vector.broadcast %12 : vector<32x1xf32> to vector<32x256xf32>
    %14 = vector.broadcast %7 : vector<1x256xf32> to vector<32x256xf32>
    %15 = arith.mulf %13, %14 : vector<32x256xf32>
    %16 = vector.extract_strided_slice %11 {offsets = [0, 1], sizes = [32, 1], strides = [1, 1]} : vector<32x2xf32> to vector<32x1xf32>
    %17 = vector.broadcast %16 : vector<32x1xf32> to vector<32x256xf32>
    %18 = vector.broadcast %10 : vector<1x256xf32> to vector<32x256xf32>
    %19 = arith.mulf %17, %18 : vector<32x256xf32>
    %20 = arith.addf %15, %19 : vector<32x256xf32>
    %c0_2 = arith.constant 0 : index
    %c0_3 = arith.constant 0 : index
    %21 = vector.load %arg1[%c0_2, %c0_3] : memref<32x3xf32, #tpu.memory_space<vmem>>, vector<32x1xf32>
    %22 = vector.broadcast %21 : vector<32x1xf32> to vector<32x256xf32>
    %23 = arith.addf %20, %22 : vector<32x256xf32>
    %24 = math.sin %23 : vector<32x256xf32>
    %c0_4 = arith.constant 0 : index
    %c0_5 = arith.constant 0 : index
    %c0_6 = arith.constant 0 : index
    %25 = vector.load %arg3[%c0_4, %c0_5, %c0_6] : memref<2x32x32xf32, #tpu.memory_space<vmem>>, vector<1x32x32xf32>
    %26 = vector.shape_cast %25 : vector<1x32x32xf32> to vector<32x32xf32>
    %cst_7 = arith.constant dense<0.000000e+00> : vector<32x256xf32>
    %27 = tpu.matmul %26, %24, %cst_7 {dimension_numbers = #tpu.dot_dimension_numbers<[1], [0], [0], [1], [0, 0, 1, 1], [], []>, precision = #tpu.contract_precision<fp32>} : vector<32x32xf32>, vector<32x256xf32>, vector<32x256xf32> -> vector<32x256xf32>
    %c0_8 = arith.constant 0 : index
    %c1 = arith.constant 1 : index
    %28 = vector.load %arg1[%c0_8, %c1] : memref<32x3xf32, #tpu.memory_space<vmem>>, vector<32x1xf32>
    %29 = vector.broadcast %28 : vector<32x1xf32> to vector<32x256xf32>
    %30 = arith.addf %27, %29 : vector<32x256xf32>
    %31 = math.sin %30 : vector<32x256xf32>
    %c1_9 = arith.constant 1 : index
    %c0_10 = arith.constant 0 : index
    %c0_11 = arith.constant 0 : index
    %32 = vector.load %arg3[%c1_9, %c0_10, %c0_11] : memref<2x32x32xf32, #tpu.memory_space<vmem>>, vector<1x32x32xf32>
    %33 = vector.shape_cast %32 : vector<1x32x32xf32> to vector<32x32xf32>
    %cst_12 = arith.constant dense<0.000000e+00> : vector<32x256xf32>
    %34 = tpu.matmul %33, %31, %cst_12 {dimension_numbers = #tpu.dot_dimension_numbers<[1], [0], [0], [1], [0, 0, 1, 1], [], []>, precision = #tpu.contract_precision<fp32>} : vector<32x32xf32>, vector<32x256xf32>, vector<32x256xf32> -> vector<32x256xf32>
    %c0_13 = arith.constant 0 : index
    %c2 = arith.constant 2 : index
    %35 = vector.load %arg1[%c0_13, %c2] : memref<32x3xf32, #tpu.memory_space<vmem>>, vector<32x1xf32>
    %36 = vector.broadcast %35 : vector<32x1xf32> to vector<32x256xf32>
    %37 = arith.addf %34, %36 : vector<32x256xf32>
    %38 = math.sin %37 : vector<32x256xf32>
    %c0_14 = arith.constant 0 : index
    %c0_15 = arith.constant 0 : index
    %39 = vector.load %arg4[%c0_14, %c0_15] : memref<1x32xf32, #tpu.memory_space<vmem>>, vector<1x32xf32>
    %cst_16 = arith.constant dense<0.000000e+00> : vector<1x256xf32>
    %40 = tpu.matmul %39, %38, %cst_16 {dimension_numbers = #tpu.dot_dimension_numbers<[1], [0], [0], [1], [0, 0, 1, 1], [], []>, precision = #tpu.contract_precision<fp32>} : vector<1x32xf32>, vector<32x256xf32>, vector<1x256xf32> -> vector<1x256xf32>
    %c0_17 = arith.constant 0 : index
    %41 = memref.load %arg5[%c0_17] : memref<1xf32, #tpu.memory_space<smem>>
    %42 = vector.broadcast %41 : f32 to vector<1x256xf32>
    %43 = arith.addf %40, %42 : vector<1x256xf32>
    %c0_18 = arith.constant 0 : index
    %c0_19 = arith.constant 0 : index
    %44 = vector.load %arg6[%c0_18, %c0_19] : memref<1x256xf32, #tpu.memory_space<vmem>>, vector<1x256xf32>
    tpu.vector_store %arg6[%c0_18, %c0_19], %43 {strides = array<i32>} : memref<1x256xf32, #tpu.memory_space<vmem>>, vector<1x256xf32>,
    return
  }
  func.func @transform_0(%arg0: i32) -> (i32, i32) {
    %c0_i32 = arith.constant 0 : i32
    %c0_i32_0 = arith.constant 0 : i32
    %c0_i32_1 = arith.constant 0 : i32
    return %c0_i32, %c0_i32_0 : i32, i32
  }
  func.func @transform_1(%arg0: i32) -> (i32, i32) {
    %c0_i32 = arith.constant 0 : i32
    %c0_i32_0 = arith.constant 0 : i32
    %c0_i32_1 = arith.constant 0 : i32
    return %c0_i32, %c0_i32_0 : i32, i32
  }
  func.func @transform_2(%arg0: i32) -> (i32, i32, i32) {
    %c0_i32 = arith.constant 0 : i32
    %c0_i32_0 = arith.constant 0 : i32
    %c0_i32_1 = arith.constant 0 : i32
    %c0_i32_2 = arith.constant 0 : i32
    return %c0_i32, %c0_i32_0, %c0_i32_1 : i32, i32, i32
  }
  func.func @transform_3(%arg0: i32) -> (i32, i32) {
    %c0_i32 = arith.constant 0 : i32
    %c0_i32_0 = arith.constant 0 : i32
    %c0_i32_1 = arith.constant 0 : i32
    return %c0_i32, %c0_i32_0 : i32, i32
  }
  func.func @transform_4(%arg0: i32) -> i32 {
    %c0_i32 = arith.constant 0 : i32
    %c0_i32_0 = arith.constant 0 : i32
    return %c0_i32 : i32
  }
  func.func @transform_5(%arg0: i32) -> (i32, i32) {
    %c0_i32 = arith.constant 0 : i32
    %c0_i32_0 = arith.constant 0 : i32
    return %arg0, %c0_i32 : i32, i32
  }
}

</mosaic_0001>

<bundles_post_ra>
// kernel: modulated_siren_forward.1
= control target key start
LH: loop header
LB: loop body
LE: loop exit
PB: predicated region body
PF: predicated region fallthrough
CT: control target
= control target key end

     0   :  { %v9456_v3 = vmov 0   ;;  %s9435_s0 = inlined_call_operand.vmem [shape: f32[32,3], index: 0, kind: input, shape index: {}]   ;;  %s9436_s1 = inlined_call_operand.vmem [shape: f32[32,2], index: 1, kind: input, shape index: {}]   ;;  %s9437_s2 = inlined_call_operand.vmem [shape: f32[2,32,32], index: 2, kind: input, shape index: {}]   ;;  %s9438_s3 = inlined_call_operand.vmem [shape: f32[1,32], index: 3, kind: input, shape index: {}]   ;;  %s9439_s4 = inlined_call_operand.<no memory space> [shape: f32[1], index: 4, kind: input, shape index: {}]   ;;  %s9440_s5 = inlined_call_operand.hbm [shape: f32[1,256], index: 5, kind: output, shape index: {}]  }
   0x1   :  { %v42_v0 = vld [vmem:[%s9436_s1 + $0x18] sm:$0xff]  ;;  %v41_v1 = vld [vmem:[%s9436_s1 + $0x10] sm:$0xff]  ;;  %v40_v2 = vld [vmem:[%s9436_s1 + $0x8] sm:$0xff]  ;;  %5526 = vset.pattern.permute.xlu2 %v9456_v3  ;;  %5524 = vset.pattern.permute.xlu1 %v9456_v3 }
   0x2   :  { %5522 = vset.pattern.permute.xlu0 %v9456_v3  ;;  %55 = vperm.xlu1 %5524, %v41_v1  }
   0x3   :  { %11 = vsyncpa [#allocation4], 0  ;;  %60 = vperm.xlu0 %5522, %v42_v0   ;;  %50 = vperm.xlu2 %5526, %v40_v2   ;;  %v5567_v4 = vmov 1   ;;  %v39_v5 = vld [vmem:[%s9436_s1] sm:$0xff]  ;;  %v106_v6 = vld [vmem:[%s9435_s0 + $0x18] sm:$0xff]  ;;  %v9441_v10 = vlaneseq  ;;  %s5427_s10 = sshll.u32 %s9440_s5, 4  ;;  %s5428_s10 = int_to_ptr.hbm [resolvable:$true] %s5427_s10 }
   0x4   :  { %v105_v7 = vld [vmem:[%s9435_s0 + $0x10] sm:$0xff]  ;;  %v103_v8 = vld [vmem:[%s9435_s0] sm:$0xff]  ;;  %v104_v9 = vld [vmem:[%s9435_s0 + $0x8] sm:$0xff]  ;;  %v9459_v58 = vmov 683565275  }
   0x5   :  { %v24_v11 = vand.u32 127, %v9441_v10  ;;  %v9452_v60 = vmov 2475754826   ;;  %v9450_v62 = vmov 2131351028  }
   0x7   :  { %v25_v12 = vadd.s32 128, %v24_v11  ;;  %v29_v14 = vcvt.s32.f32 %v24_v11 }
   0x9   :  { %v30_v15 = vcvt.s32.f32 %v25_v12  ;;  %v31_v16 = vmul.f32 0.0625, %v29_v14 }
   0xa   :  { %5525 = vset.pattern.permute.xlu1 %v5567_v4 }
   0xb   :  { %5523 = vset.pattern.permute.xlu0 %v5567_v4  ;;  %5527 = vset.pattern.permute.xlu2 %v5567_v4  ;;  %v32_v17 = vmul.f32 0.0625, %v30_v15  ;;  %v5637_v18 = vfloor.f32 %v31_v16 }
   0xc   :  { %84 = vperm.xlu0 %5523, %v42_v0   ;;  %80 = vperm.xlu1 %5525, %v41_v1   ;;  %v9448_v1 = vmov 2102212464  }
   0xd   :  { %76 = vperm.xlu2 %5527, %v40_v2   ;;  %v5639_v19 = vfloor.f32 %v32_v17  ;;  %v35_v21 = vmul.f32 16.0, %v5637_v18 }
   0xf   :  { %v36_v22 = vmul.f32 16.0, %v5639_v19  ;;  %v5643_v23 = vsub.f32 %v29_v14, %v35_v21 }
  0x11   :  { %v5645_v24 = vsub.f32 %v30_v15, %v36_v22 }
  0x14   :  { %5528 = vset.pattern.permute.xlu1 %v9456_v3  ;;  %72 = vperm.xlu0 %5523, %v39_v5  }
  0x15   :  { %5529 = vset.pattern.permute.xlu2 %v9456_v3  ;;  %124 = vperm.xlu1 %5528, %v106_v6  }
  0x16   :  { %45 = vperm.xlu2 %5529, %v39_v5  }
  0x1c   :  { %5530 = vset.pattern.permute.xlu0 %v9456_v3 }
  0x1d   :  { %119 = vperm.xlu1 %5528, %v105_v7   ;;  %109 = vperm.xlu0 %5530, %v103_v8  }
  0x1e   :  { %114 = vperm.xlu2 %5529, %v104_v9  }
  0x25   :  { %5531 = vset.pattern.permute.xlu1 %v5567_v4 }
  0x26   :  { %1392 = vperm.xlu1 %5531, %v106_v6   ;;  %5532 = vset.pattern.permute.xlu2 %v5567_v4  ;;  %v9446_v4 = vmov 920167782  }
  0x27   :  { %1388 = vperm.xlu2 %5532, %v105_v7  }
  0x2e   :  { %1384 = vperm.xlu1 %5531, %v104_v9  }
  0x2f   :  { %1380 = vperm.xlu2 %5532, %v103_v8  }
  0x5d   :  { %v51_v13 = vpop.permute.xlu2 %50 }
  0x5e   :  { %v65_v26 = vmul.f32 %v51_v13, %v5637_v18  ;;  %v66_v27 = vmul.f32 %v51_v13, %v5639_v19  ;;  %v9444_v13 = vmov 1326507024  }
  0x67   :  { %v77_v20 = vpop.permute.xlu2 %76 }
  0x68   :  { %v89_v28 = vmul.f32 %v77_v20, %v5643_v23  ;;  %v90_v29 = vmul.f32 %v77_v20, %v5645_v24 }
  0x6a   :  { %v97_v30 = vadd.f32 %v89_v28, %v65_v26  ;;  %v98_v31 = vadd.f32 %v90_v29, %v66_v27 }
  0x70   :  { %v5647_v25 = vpop.permute.xlu2 %45 }
  0x75   :  { %v5657_v35 = vpop.permute.xlu0 %60 }
  0x76   :  { %v5680_v0 = vmul.f32 %v5657_v35, %v5637_v18 }
  0x78   :  { %v115_v32 = vpop.permute.xlu2 %114 }
  0x79   :  { %v5653_v33 = vadd.f32 %v115_v32, %v97_v30  ;;  %v5655_v34 = vadd.f32 %v115_v32, %v98_v31 }
  0x7b   :  { %9510 = vst [vmem:[#allocation6_spill] sm:$0xff] %v5655_v34  ;;  %v445_v36 = vand.u32 2147483647, %v5653_v33  ;;  %v448_v37 = vand.u32 2139095040, %v5653_v33  ;;  %v603_v38 = vand.u32 2139095040, %v5655_v34 }
  0x7c   :  { %v600_v40 = vand.u32 2147483647, %v5655_v34 }
  0x7d   :  { %v449_v39 = vshrl.u32 %v448_v37, 23  ;;  %v452_v41 = vand.u32 8388607, %v445_v36  ;;  %v604_v42 = vshrl.u32 %v603_v38, 23 }
  0x7e   :  { %v607_v46 = vand.u32 8388607, %v600_v40  ;;  %v5667_v53 = vpop.permute.xlu0 %84 }
  0x7f   :  { %v5442_v43 = vadd.s32 4294967169, %v449_v39  ;;  %v5445_v44 = vadd.s32 4294967169, %v604_v42  ;;  %v453_v47 = vor.u32 8388608, %v452_v41  ;;  %v5686_v6 = vmul.f32 %v5667_v53, %v5643_v23 }
  0x80   :  { %v608_v51 = vor.u32 8388608, %v607_v46 }
  0x81   :  { %v455_v45 = vadd.s32 1, %v5442_v43  ;;  %v610_v48 = vadd.s32 1, %v5445_v44  ;;  %v5671_v55 = vshll.u32 %v453_v47, 8 }
  0x82   :  { %v5691_v11 = vshll.u32 %v608_v51, 8 }
  0x83   :  { %vm456_vm0 = vcmp.gt.s32.totalorder %v455_v45, 0  ;;  %vm611_vm1 = vcmp.gt.s32.totalorder %v610_v48, 0  ;;  %v494_v15 = vand.u32 65535, %v5671_v55 }
  0x84   :  { %v457_v49 = vsel %vm456_vm0, %v455_v45, 0  ;;  %v612_v52 = vsel %vm611_vm1, %v610_v48, 0  ;;  %v495_v45 = vshrl.u32 %v5671_v55, 16 }
  0x85   :  { %v459_v50 = vand.u32 31, %v457_v49  ;;  %v5669_v54 = vshrl.u32 %v457_v49, 5  ;;  %v5673_v56 = vand.u32 31, %v612_v52 }
  0x87   :  { %v460_v57 = vsub.s32 32, %v459_v50  ;;  %v462_v59 = vshll.u32 %v9459_v58, %v459_v50  ;;  %v465_v61 = vshll.u32 %v9452_v60, %v459_v50  ;;  %v468_v63 = vshll.u32 %v9450_v62, %v459_v50 }
  0x88   :  { %v471_v2 = vshll.u32 %v9448_v1, %v459_v50  ;;  %v474_v5 = vshll.u32 %v9446_v4, %v459_v50  ;;  %vm477_vm2 = vcmp.lt.s32.totalorder %v5669_v54, 1  ;;  %v5698_v21 = vsub.s32 32, %v5673_v56 }
  0x89   :  { %v463_v7 = vshrl.u32 %v9452_v60, %v460_v57  ;;  %v466_v8 = vshrl.u32 %v9450_v62, %v460_v57  ;;  %v469_v9 = vshrl.u32 %v9448_v1, %v460_v57  ;;  %v472_v12 = vshrl.u32 %v9446_v4, %v460_v57 }
  0x8a   :  { %v475_v14 = vshrl.u32 %v9444_v13, %v460_v57  ;;  %v461_v22 = vshrl.u32 %v9459_v58, %v460_v57  ;;  %vm478_vm3 = vcmp.lt.s32.totalorder %v5669_v54, 2  ;;  %vm479_vm4 = vcmp.lt.s32.totalorder %v5669_v54, 3 }
  0x8b   :  { %v464_v16 = vor.u32 %v463_v7, %v462_v59  ;;  %v467_v17 = vor.u32 %v466_v8, %v465_v61  ;;  %v470_v20 = vor.u32 %v469_v9, %v468_v63  ;;  %v473_v26 = vor.u32 %v472_v12, %v471_v2 }
  0x8c   :  { %v476_v27 = vor.u32 %v475_v14, %v474_v5  ;;  %vm480_vm5 = vcmp.lt.s32.totalorder %v5669_v54, 4  ;;  %v617_v32 = vshll.u32 %v9459_v58, %v5673_v56  ;;  %v620_v37 = vshll.u32 %v9452_v60, %v5673_v56 }
  0x8d   :  { %v485_v28 = vsel %vm477_vm2, %v464_v16, %v467_v17  ;;  %v489_v29 = vsel %vm477_vm2, %v467_v17, %v470_v20  ;;  %v486_v30 = vsel %vm480_vm5, %v473_v26, 920167782  ;;  %v482_v38 = vsel %vm480_vm5, %v470_v20, 2102212464 }
  0x8e   :  { %v490_v31 = vsel %vm480_vm5, %v476_v27, 1326507024  ;;  %v487_v39 = vsel %vm479_vm4, %v470_v20, %v486_v30  ;;  %v618_v42 = vshrl.u32 %v9452_v60, %v5698_v21  ;;  %v621_v46 = vshrl.u32 %v9450_v62, %v5698_v21 }
  0x8f   :  { %v491_v41 = vsel %vm479_vm4, %v473_v26, %v490_v31  ;;  %v488_v43 = vsel %vm478_vm3, %v485_v28, %v487_v39  ;;  %v481_v51 = vsel %vm477_vm2, %v461_v22, %v464_v16  ;;  %v483_v57 = vsel %vm479_vm4, %v467_v17, %v482_v38  ;;  %v5739_v16 = vpop.permute.xlu1 %55 }
  0x90   :  { %v492_v44 = vsel %vm478_vm3, %v489_v29, %v491_v41  ;;  %v518_v49 = vand.u32 65535, %v488_v43  ;;  %v519_v50 = vshrl.u32 %v488_v43, 16  ;;  %v5729_v59 = vshrl.u32 %v612_v52, 5 }
  0x91   :  { %v496_v47 = vand.u32 65535, %v492_v44  ;;  %v497_v48 = vshrl.u32 %v492_v44, 16  ;;  %v5731_v61 = vor.u32 %v618_v42, %v617_v32  ;;  %v5733_v5 = vor.u32 %v621_v46, %v620_v37 }
  0x92   :  { %v623_v7 = vshll.u32 %v9450_v62, %v5673_v56  ;;  %v521_v9 = vmul.u32 %v519_v50, %v494_v15  ;;  %v522_v12 = vmul.u32 %v518_v49, %v495_v45  ;;  %v624_v14 = vshrl.u32 %v9448_v1, %v5698_v21 }
  0x93   :  { %v499_v63 = vmul.u32 %v497_v48, %v494_v15  ;;  %v500_v2 = vmul.u32 %v496_v47, %v495_v45  ;;  %v498_v8 = vmul.u32 %v496_v47, %v494_v15  ;;  %v501_v17 = vmul.u32 %v497_v48, %v495_v45 }
  0x94   :  { %v520_v20 = vmul.u32 %v518_v49, %v494_v15  ;;  %v523_v22 = vmul.u32 %v519_v50, %v495_v45  ;;  %v524_v29 = vshll.u32 %v521_v9, 16  ;;  %v526_v31 = vshll.u32 %v522_v12, 16 }
  0x95   :  { %v502_v52 = vshll.u32 %v499_v63, 16  ;;  %v503_v26 = vshrl.u32 %v499_v63, 16  ;;  %v504_v27 = vshll.u32 %v500_v2, 16  ;;  %v505_v28 = vshrl.u32 %v500_v2, 16 }
  0x96   :  { %v626_v32 = vshll.u32 %v9448_v1, %v5673_v56  ;;  %vm528_vm7 = vc.u32 %v520_v20, %v524_v29  ;;  %v530_v38 = vadd.s32 %v524_v29, %v520_v20  ;;  %v627_v39 = vshrl.u32 %v9446_v4, %v5698_v21 }
  0x97   :  { %vm506_vm6 = vc.u32 %v498_v8, %v502_v52  ;;  %v508_v30 = vadd.s32 %v502_v52, %v498_v8  ;;  %v529_v15 = vsel %vm528_vm7, 1, %v9456_v3  ;;  %v629_v42 = vshll.u32 %v9446_v4, %v5673_v56 }
  0x98   :  { %v507_v37 = vsel %vm506_vm6, 1, %v9456_v3  ;;  %v531_v44 = vadd.s32 %v529_v15, %v523_v22  ;;  %vm532_vm9 = vc.u32 %v530_v38, %v526_v31  ;;  %v625_v45 = vor.u32 %v624_v14, %v623_v7  ;;  %v5772_v22 = vpop.permute.xlu1 %80 }
  0x99   :  { %v509_v41 = vadd.s32 %v507_v37, %v501_v17  ;;  %vm510_vm8 = vc.u32 %v508_v30, %v504_v27  ;;  %v533_v47 = vsel %vm532_vm9, 1, %v9456_v3  ;;  %v628_v48 = vor.u32 %v627_v39, %v626_v32 }
  0x9a   :  { %v511_v43 = vsel %vm510_vm8, 1, %v9456_v3  ;;  %v630_v49 = vshrl.u32 %v9444_v13, %v5698_v21  ;;  %v525_v50 = vshrl.u32 %v521_v9, 16  ;;  %v527_v63 = vshrl.u32 %v522_v12, 16 }
  0x9b   :  { %v513_v46 = vadd.s32 %v511_v43, %v509_v41  ;;  %v5753_v2 = vadd.s32 %v530_v38, %v526_v31  ;;  %v535_v8 = vadd.s32 %v533_v47, %v531_v44  ;;  %vm632_vm10 = vcmp.lt.s32.totalorder %v5729_v59, 1 }
  0x9c   :  { %v631_v52 = vor.u32 %v630_v49, %v629_v42  ;;  %vm635_vm11 = vcmp.lt.s32.totalorder %v5729_v59, 4  ;;  %vm634_vm12 = vcmp.lt.s32.totalorder %v5729_v59, 3  ;;  %v640_v7 = vsel %vm632_vm10, %v5731_v61, %v5733_v5 }
  0x9d   :  { %v514_v17 = vadd.s32 %v513_v46, %v503_v26  ;;  %v536_v56 = vadd.s32 %v535_v8, %v525_v50  ;;  %v641_v9 = vsel %vm635_vm11, %v628_v48, 920167782  ;;  %vm633_vm13 = vcmp.lt.s32.totalorder %v5729_v59, 2 }
  0x9e   :  { %v642_v14 = vsel %vm634_vm12, %v625_v45, %v641_v9  ;;  %v644_v20 = vsel %vm632_vm10, %v5733_v5, %v625_v45  ;;  %v484_v26 = vsel %vm478_vm3, %v481_v51, %v483_v57  ;;  %v649_v31 = vand.u32 65535, %v5691_v11 }
  0x9f   :  { %v5764_v12 = vadd.s32 %v514_v17, %v505_v28  ;;  %v537_v27 = vadd.s32 %v536_v56, %v527_v63  ;;  %v643_v29 = vsel %vm633_vm13, %v640_v7, %v642_v14  ;;  %v645_v28 = vsel %vm635_vm11, %v631_v52, 1326507024 }
  0xa0   :  { %v646_v30 = vsel %vm634_vm12, %v628_v48, %v645_v28  ;;  %v673_v32 = vand.u32 65535, %v643_v29  ;;  %v650_v51 = vshrl.u32 %v5691_v11, 16  ;;  %v674_v57 = vshrl.u32 %v643_v29, 16 }
  0xa1   :  { %vm540_vm14 = vc.u32 %v5764_v12, %v5753_v2  ;;  %v541_v37 = vadd.s32 1, %v537_v27  ;;  %v647_v54 = vsel %vm633_vm13, %v644_v20, %v646_v30  ;;  %v538_v38 = vmul.u32 %v5671_v55, %v484_v26  ;;  %v125_v26 = vpop.permute.xlu1 %124 }
  0xa2   :  { %v651_v39 = vand.u32 65535, %v647_v54  ;;  %v652_v41 = vshrl.u32 %v647_v54, 16  ;;  %v676_v42 = vmul.u32 %v674_v57, %v649_v31  ;;  %v677_v43 = vmul.u32 %v673_v32, %v650_v51 }
  0xa3   :  { %v542_v15 = vsel %vm540_vm14, %v541_v37, %v537_v27  ;;  %v101_v44 = vadd.f32 %v5686_v6, %v5680_v0  ;;  %v616_v47 = vshrl.u32 %v9459_v58, %v5698_v21  ;;  %v637_v50 = vsel %vm635_vm11, %v625_v45, 2102212464 }
  0xa4   :  { %v543_v46 = vadd.s32 %v542_v15, %v538_v38  ;;  %v654_v48 = vmul.u32 %v652_v41, %v649_v31  ;;  %v655_v49 = vmul.u32 %v651_v39, %v650_v51  ;;  %v675_v63 = vmul.u32 %v673_v32, %v649_v31 }
  0xa5   :  { %v678_v8 = vmul.u32 %v674_v57, %v650_v51  ;;  %v679_v55 = vshll.u32 %v676_v42, 16  ;;  %v653_v52 = vmul.u32 %v651_v39, %v649_v31  ;;  %v656_v56 = vmul.u32 %v652_v41, %v650_v51 }
  0xa6   :  { %v544_v17 = vadd.s32 536870912, %v543_v46  ;;  %v657_v7 = vshll.u32 %v654_v48, 16  ;;  %v659_v9 = vshll.u32 %v655_v49, 16  ;;  %v681_v14 = vshll.u32 %v677_v43, 16 }
  0xa7   :  { %vm683_vm15 = vc.u32 %v675_v63, %v679_v55  ;;  %v685_v0 = vadd.s32 %v679_v55, %v675_v63  ;;  %v636_v45 = vsel %vm632_vm10, %v616_v47, %v5731_v61  ;;  %v638_v30 = vsel %vm634_vm12, %v5733_v5, %v637_v50 }
  0xa8   :  { %v5795_v6 = vshrl.u32 %v544_v17, 30  ;;  %vm661_vm0 = vc.u32 %v653_v52, %v657_v7  ;;  %v663_v21 = vadd.s32 %v657_v7, %v653_v52  ;;  %v684_v20 = vsel %vm683_vm15, 1, %v9456_v3 }
  0xa9   :  { %v662_v27 = vsel %vm661_vm0, 1, %v9456_v3  ;;  %v686_v29 = vadd.s32 %v684_v20, %v678_v8  ;;  %vm687_vm1 = vc.u32 %v685_v0, %v681_v14  ;;  %v680_v37 = vshrl.u32 %v676_v42, 16 }
  0xaa   :  { %v546_v28 = vshll.u32 %v5795_v6, 30  ;;  %v664_v31 = vadd.s32 %v662_v27, %v656_v56  ;;  %vm665_vm2 = vc.u32 %v663_v21, %v659_v9  ;;  %v688_v54 = vsel %vm687_vm1, 1, %v9456_v3 }
  0xab   :  { %v666_v32 = vsel %vm665_vm2, 1, %v9456_v3  ;;  %v5808_v51 = vadd.f32 %v125_v26, %v101_v44  ;;  %v658_v57 = vshrl.u32 %v654_v48, 16  ;;  %v690_v39 = vadd.s32 %v688_v54, %v686_v29 }
  0xac   :  { %v547_v61 = vsub.s32 %v543_v46, %v546_v28  ;;  %v668_v38 = vadd.s32 %v666_v32, %v664_v31  ;;  %v660_v41 = vshrl.u32 %v655_v49, 16  ;;  %v682_v15 = vshrl.u32 %v677_v43, 16 }
  0xad   :  { %v1068_v47 = vand.u32 2139095040, %v5808_v51  ;;  %v691_v50 = vadd.s32 %v690_v39, %v680_v37  ;;  %v639_v8 = vsel %vm633_vm13, %v636_v45, %v638_v30  ;;  %v94_v42 = vmul.f32 %v5667_v53, %v5645_v24 }
  0xae   :  { %vm548_vm3 = vcmp.lt.s32.totalorder %v547_v61, 0  ;;  %v549_v63 = vsub.s32 0, %v547_v61  ;;  %v669_v5 = vadd.s32 %v668_v38, %v658_v57  ;;  %v5817_v48 = vadd.s32 %v685_v0, %v681_v14 }
  0xaf   :  { %v1069_v44 = vshrl.u32 %v1068_v47, 23  ;;  %v692_v49 = vadd.s32 %v691_v50, %v682_v15  ;;  %v70_v52 = vmul.f32 %v5657_v35, %v5639_v19  ;;  %v1065_v56 = vand.u32 2147483647, %v5808_v51 }
  0xb0   :  { %v550_v55 = vsel %vm548_vm3, %v549_v63, %v547_v61  ;;  %v5815_v46 = vadd.s32 %v669_v5, %v660_v41  ;;  %v693_v53 = vmul.u32 %v5691_v11, %v639_v8  ;;  %v539_v29 = vadd.s32 %v5753_v2, %v5764_v12 }
  0xb1   :  { %v551_v43 = vclz %v550_v55  ;;  %v5454_v17 = vadd.s32 4294967169, %v1069_v44  ;;  %v696_v59 = vadd.s32 1, %v692_v49  ;;  %v102_v20 = vadd.f32 %v94_v42, %v70_v52 }
  0xb2   :  { %vm695_vm4 = vc.u32 %v5815_v46, %v5817_v48  ;;  %v1072_v35 = vand.u32 8388607, %v1065_v56  ;;  %vm447_vm12 = vcmp.lt.s32.totalorder %v5653_v33, 0  ;;  %vm5889_vm13 = vcmp.le.f32.partialorder %v445_v36, 0.7853982 }
  0xb3   :  { %v5443_v7 = vadd.s32 4294967294, %v551_v43  ;;  %v1075_v9 = vadd.s32 1, %v5454_v17  ;;  %v697_v21 = vsel %vm695_vm4, %v696_v59, %v692_v49  ;;  %v5825_v45 = vadd.f32 %v125_v26, %v102_v20 }
  0xb4   :  { %v698_v14 = vadd.s32 %v697_v21, %v693_v53  ;;  %v1073_v38 = vor.u32 8388608, %v1072_v35 }
  0xb5   :  { %vm5444_vm5 = vcmp.lt.s32.totalorder %v5443_v7, 0  ;;  %vm1076_vm6 = vcmp.gt.s32.totalorder %v1075_v9, 0  ;;  %v1223_v26 = vand.u32 2139095040, %v5825_v45 }
  0xb6   :  { %v554_v0 = vsel %vm5444_vm5, 0, %v5443_v7  ;;  %v1077_v27 = vsel %vm1076_vm6, %v1075_v9, 0  ;;  %v699_v31 = vadd.s32 536870912, %v698_v14  ;;  %v5851_v20 = vshll.u32 %v1073_v38, 8 }
  0xb7   :  { %v555_v28 = vsub.s32 32, %v554_v0  ;;  %v559_v30 = vsub.s32 4294967266, %v554_v0  ;;  %v1079_v11 = vand.u32 31, %v1077_v27  ;;  %v556_v32 = vshll.u32 %v547_v61, %v554_v0 }
  0xb8   :  { %v5831_v57 = vshrl.u32 %v699_v31, 30  ;;  %v5842_v42 = vshrl.u32 %v1077_v27, 5  ;;  %v1224_v27 = vshrl.u32 %v1223_v26, 23  ;;  %v5868_v38 = vmul.f32 %v5647_v25, %v5637_v18 }
  0xb9   :  { %v557_v37 = vshrl.u32 %v539_v29, %v555_v28  ;;  %v560_v54 = vadd.s32 127, %v559_v30  ;;  %v1080_v39 = vsub.s32 32, %v1079_v11  ;;  %v1082_v63 = vshll.u32 %v9459_v58, %v1079_v11 }
  0xba   :  { %v701_v47 = vshll.u32 %v5831_v57, 30  ;;  %v1085_v12 = vshll.u32 %v9452_v60, %v1079_v11  ;;  %v1088_v44 = vshll.u32 %v9450_v62, %v1079_v11  ;;  %v1091_v17 = vshll.u32 %v9448_v1, %v1079_v11 }
  0xbb   :  { %v558_v41 = vor.u32 %v557_v37, %v556_v32  ;;  %v561_v15 = vshll.u32 %v560_v54, 23  ;;  %v1083_v2 = vshrl.u32 %v9452_v60, %v1080_v39  ;;  %v1086_v61 = vshrl.u32 %v9450_v62, %v1080_v39 }
  0xbc   :  { %v1089_v5 = vshrl.u32 %v9448_v1, %v1080_v39  ;;  %v5840_v8 = vsub.s32 %v698_v14, %v701_v47  ;;  %v1092_v7 = vshrl.u32 %v9446_v4, %v1080_v39  ;;  %v1094_v9 = vshll.u32 %v9446_v4, %v1079_v11 }
  0xbd   :  { %v562_v50 = vor.u32 4788187, %v561_v15  ;;  %v565_v55 = vcvt.s32.f32 %v558_v41  ;;  %v1084_v49 = vor.u32 %v1083_v2, %v1082_v63  ;;  %v1087_v43 = vor.u32 %v1086_v61, %v1085_v12 }
  0xbe   :  { %vm703_vm7 = vcmp.lt.s32.totalorder %v5840_v8, 0  ;;  %v704_v59 = vsub.s32 0, %v5840_v8  ;;  %v1090_v53 = vor.u32 %v1089_v5, %v1088_v44  ;;  %v1095_v21 = vshrl.u32 %v9444_v13, %v1080_v39 }
  0xbf   :  { %v563_v52 = vand.u32 2147483647, %v562_v50  ;;  %v1093_v35 = vor.u32 %v1092_v7, %v1091_v17  ;;  %vm1097_vm8 = vcmp.lt.s32.totalorder %v5842_v42, 1  ;;  %vm1100_vm9 = vcmp.lt.s32.totalorder %v5842_v42, 4 }
  0xc0   :  { %v705_v0 = vsel %vm703_vm7, %v704_v59, %v5840_v8  ;;  %v1096_v28 = vor.u32 %v1095_v21, %v1094_v9  ;;  %vm1099_vm10 = vcmp.lt.s32.totalorder %v5842_v42, 3  ;;  %v1105_v31 = vsel %vm1097_vm8, %v1084_v49, %v1087_v43 }
  0xc1   :  { %v566_v14 = vmul.f32 %v565_v55, %v563_v52  ;;  %v706_v29 = vclz %v705_v0  ;;  %v1106_v11 = vsel %vm1100_vm9, %v1093_v35, 920167782  ;;  %vm1098_vm11 = vcmp.lt.s32.totalorder %v5842_v42, 2 }
  0xc2   :  { %v1107_v37 = vsel %vm1099_vm10, %v1090_v53, %v1106_v11  ;;  %v1109_v54 = vsel %vm1097_vm8, %v1087_v43, %v1090_v53  ;;  %v1110_v41 = vsel %vm1100_vm9, %v1096_v28, 1326507024  ;;  %v5877_v15 = vmul.f32 %v5647_v25, %v5639_v19 }
  0xc3   :  { %v567_v30 = vxor.u32 2147483648, %v566_v14  ;;  %v5446_v32 = vadd.s32 4294967294, %v706_v29  ;;  %v1108_v26 = vsel %vm1098_vm11, %v1105_v31, %v1107_v37  ;;  %v5881_v47 = vmul.f32 %v5739_v16, %v5637_v18 }
  0xc4   :  { %v1111_v2 = vsel %vm1099_vm10, %v1093_v35, %v1110_v41  ;;  %v1139_v61 = vshrl.u32 %v1108_v26, 16  ;;  %v1114_v18 = vand.u32 65535, %v5851_v20  ;;  %v9442_v50 = vand.u32 2147483647, %v5825_v45 }
  0xc5   :  { %v568_v63 = vsel %vm447_vm12, %v567_v30, %v566_v14  ;;  %vm5447_vm14 = vcmp.lt.s32.totalorder %v5446_v32, 0  ;;  %v1112_v25 = vsel %vm1098_vm11, %v1109_v54, %v1111_v2  ;;  %v5457_v44 = vadd.s32 4294967169, %v1224_v27 }
  0xc6   :  { %v1116_v5 = vand.u32 65535, %v1112_v25  ;;  %v5900_v55 = vsel %vm5889_vm13, %v5653_v33, %v568_v63  ;;  %v1081_v36 = vshrl.u32 %v9459_v58, %v1080_v39  ;;  %v1115_v17 = vshrl.u32 %v5851_v20, 16 }
  0xc7   :  { %v1117_v52 = vshrl.u32 %v1112_v25, 16  ;;  %v709_v59 = vsel %vm5447_vm14, 0, %v5446_v32  ;;  %v1102_v7 = vsel %vm1100_vm9, %v1090_v53, 2102212464  ;;  %v1138_v9 = vand.u32 65535, %v1108_v26 }
  0xc8   :  { %v1141_v21 = vmul.u32 %v1139_v61, %v1114_v18  ;;  %v694_v14 = vadd.s32 %v5817_v48, %v5815_v46  ;;  %v5910_v0 = vmul.f32 %v5772_v22, %v5643_v23  ;;  %v1120_v27 = vmul.u32 %v1116_v5, %v1115_v17 }
  0xc9   :  { %v1119_v35 = vmul.u32 %v1117_v52, %v1114_v18  ;;  %v5914_v39 = vmul.f32 %v5900_v55, %v5900_v55  ;;  %v1101_v29 = vsel %vm1097_vm8, %v1081_v36, %v1084_v49  ;;  %v5920_v53 = vand.u32 8388607, %v9442_v50 }
  0xca   :  { %v1230_v28 = vadd.s32 1, %v5457_v44  ;;  %v710_v30 = vsub.s32 32, %v709_v59  ;;  %v1103_v46 = vsel %vm1099_vm10, %v1087_v43, %v1102_v7  ;;  %v1118_v48 = vmul.u32 %v1116_v5, %v1114_v18 }
  0xcb   :  { %v1122_v31 = vshll.u32 %v1119_v35, 16  ;;  %v714_v11 = vsub.s32 4294967266, %v709_v59  ;;  %v1140_v32 = vmul.u32 %v1138_v9, %v1114_v18  ;;  %v1142_v37 = vmul.u32 %v1138_v9, %v1115_v17 }
  0xcc   :  { %v1144_v54 = vshll.u32 %v1141_v21, 16  ;;  %v1121_v26 = vmul.u32 %v1117_v52, %v1115_v17  ;;  %v1124_v41 = vshll.u32 %v1120_v27, 16  ;;  %v581_v49 = vmul.f32 -0.00019511016, %v5914_v39 }
  0xcd   :  { %vm1126_vm15 = vc.u32 %v1118_v48, %v1122_v31  ;;  %v1128_v63 = vadd.s32 %v1122_v31, %v1118_v48  ;;  %v1143_v25 = vmul.u32 %v1139_v61, %v1115_v17  ;;  %v712_v44 = vshrl.u32 %v694_v14, %v710_v30 }
  0xce   :  { %v1127_v2 = vsel %vm1126_vm15, 1, %v9456_v3  ;;  %vm1148_vm0 = vc.u32 %v1140_v32, %v1144_v54  ;;  %v1146_v18 = vshll.u32 %v1142_v37, 16  ;;  %v1150_v7 = vadd.s32 %v1144_v54, %v1140_v32 }
  0xcf   :  { %v1129_v36 = vadd.s32 %v1127_v2, %v1121_v26  ;;  %vm1130_vm1 = vc.u32 %v1128_v63, %v1124_v41  ;;  %v1149_v43 = vsel %vm1148_vm0, 1, %v9456_v3  ;;  %v715_v52 = vadd.s32 127, %v714_v11 }
  0xd0   :  { %v1131_v5 = vsel %vm1130_vm1, 1, %v9456_v3  ;;  %v1151_v9 = vadd.s32 %v1149_v43, %v1143_v25  ;;  %v1123_v10 = vshrl.u32 %v1119_v35, 16  ;;  %vm1231_vm2 = vcmp.gt.s32.totalorder %v1230_v28, 0 }
  0xd1   :  { %v1133_v50 = vadd.s32 %v1131_v5, %v1129_v36  ;;  %v1104_v48 = vsel %vm1098_vm11, %v1101_v29, %v1103_v46  ;;  %vm1152_vm3 = vc.u32 %v1150_v7, %v1146_v18  ;;  %v1228_v61 = vor.u32 8388608, %v5920_v53 }
  0xd2   :  { %v1232_v17 = vsel %vm1231_vm2, %v1230_v28, 0  ;;  %v711_v14 = vshll.u32 %v5840_v8, %v709_v59  ;;  %v1125_v30 = vshrl.u32 %v1120_v27, 16  ;;  %v1153_v26 = vsel %vm1152_vm3, 1, %v9456_v3 }
  0xd3   :  { %v1134_v31 = vadd.s32 %v1133_v50, %v1123_v10  ;;  %v582_v41 = vadd.f32 0.008332121, %v581_v49  ;;  %v1145_v32 = vshrl.u32 %v1141_v21, 16  ;;  %v1155_v54 = vadd.s32 %v1153_v26, %v1151_v9 }
  0xd4   :  { %v1234_v11 = vand.u32 31, %v1232_v17  ;;  %v5933_v35 = vor.u32 %v712_v44, %v711_v14  ;;  %v716_v63 = vshll.u32 %v715_v52, 23  ;;  %v5937_v42 = vadd.s32 %v1150_v7, %v1146_v18 }
  0xd5   :  { %v5935_v2 = vadd.s32 %v1134_v31, %v1125_v30  ;;  %v1147_v29 = vshrl.u32 %v1142_v37, 16  ;;  %v1156_v53 = vadd.s32 %v1155_v54, %v1145_v32  ;;  %v1158_v28 = vmul.u32 %v5851_v20, %v1104_v48 }
  0xd6   :  { %v1235_v8 = vsub.s32 32, %v1234_v11  ;;  %v5942_v10 = vshrl.u32 %v1232_v17, 5  ;;  %v1237_v50 = vshll.u32 %v9459_v58, %v1234_v11  ;;  %v1240_v59 = vshll.u32 %v9452_v60, %v1234_v11 }
  0xd7   :  { %vm1160_vm4 = vc.u32 %v5935_v2, %v5937_v42  ;;  %v1157_v21 = vadd.s32 %v1156_v53, %v1147_v29  ;;  %v1243_v37 = vshll.u32 %v9450_v62, %v1234_v11  ;;  %v1246_v20 = vshll.u32 %v9448_v1, %v1234_v11 }
  0xd8   :  { %v1238_v27 = vshrl.u32 %v9452_v60, %v1235_v8  ;;  %v1241_v46 = vshrl.u32 %v9450_v62, %v1235_v8  ;;  %v1244_v49 = vshrl.u32 %v9448_v1, %v1235_v8  ;;  %v1247_v25 = vshrl.u32 %v9446_v4, %v1235_v8 }
  0xd9   :  { %v1249_v44 = vshll.u32 %v9446_v4, %v1234_v11  ;;  %v1161_v36 = vadd.s32 1, %v1157_v21  ;;  %v1250_v18 = vshrl.u32 %v9444_v13, %v1235_v8  ;;  %vm1252_vm5 = vcmp.lt.s32.totalorder %v5942_v10, 1 }
  0xda   :  { %v5953_v43 = vor.u32 %v1238_v27, %v1237_v50  ;;  %v5955_v5 = vor.u32 %v1241_v46, %v1240_v59  ;;  %v1245_v7 = vor.u32 %v1244_v49, %v1243_v37  ;;  %v1248_v9 = vor.u32 %v1247_v25, %v1246_v20 }
  0xdb   :  { %v5959_v52 = vshll.u32 %v1228_v61, 8  ;;  %v1162_v48 = vsel %vm1160_vm4, %v1161_v36, %v1157_v21  ;;  %v1251_v17 = vor.u32 %v1250_v18, %v1249_v44  ;;  %vm1255_vm6 = vcmp.lt.s32.totalorder %v5942_v10, 4 }
  0xdc   :  { %v1260_v14 = vsel %vm1252_vm5, %v5953_v43, %v5955_v5  ;;  %v1163_v30 = vadd.s32 %v1162_v48, %v1158_v28  ;;  %vm1254_vm7 = vcmp.lt.s32.totalorder %v5942_v10, 3  ;;  %v1261_v31 = vsel %vm1255_vm6, %v1248_v9, 920167782 }
  0xdd   :  { %v1264_v61 = vsel %vm1252_vm5, %v5955_v5, %v1245_v7  ;;  %v717_v26 = vor.u32 4788187, %v716_v63  ;;  %vm1253_vm8 = vcmp.lt.s32.totalorder %v5942_v10, 2  ;;  %v1262_v32 = vsel %vm1254_vm7, %v1245_v7, %v1261_v31 }
  0xde   :  { %v1265_v54 = vsel %vm1255_vm6, %v1251_v17, 1326507024  ;;  %v1164_v11 = vadd.s32 536870912, %v1163_v30  ;;  %v1263_v29 = vsel %vm1253_vm8, %v1260_v14, %v1262_v32  ;;  %v1269_v28 = vand.u32 65535, %v5959_v52 }
  0xdf   :  { %v1266_v53 = vsel %vm1254_vm7, %v1248_v9, %v1265_v54  ;;  %v1270_v50 = vshrl.u32 %v5959_v52, 16  ;;  %v1293_v59 = vand.u32 65535, %v1263_v29  ;;  %v1294_v21 = vshrl.u32 %v1263_v29, 16 }
  0xe0   :  { %v1267_v63 = vsel %vm1253_vm8, %v1264_v61, %v1266_v53  ;;  %v5990_v27 = vmul.f32 %v5739_v16, %v5639_v19  ;;  %v5992_v46 = vshrl.u32 %v1164_v11, 30  ;;  %v5995_v20 = vmul.f32 %v582_v41, %v5914_v39  ;;  %v6006_v11 = vpop.permute.xlu1 %119 }
  0xe1   :  { %v1271_v37 = vand.u32 65535, %v1267_v63  ;;  %v1272_v49 = vshrl.u32 %v1267_v63, 16  ;;  %v1296_v25 = vmul.u32 %v1294_v21, %v1269_v28  ;;  %v1297_v44 = vmul.u32 %v1293_v59, %v1270_v50 }
  0xe2   :  { %v99_v36 = vadd.f32 %v5910_v0, %v5881_v47  ;;  %v718_v18 = vand.u32 2147483647, %v717_v26  ;;  %v720_v9 = vcvt.s32.f32 %v5933_v35  ;;  %v1166_v48 = vshll.u32 %v5992_v46, 30 }
  0xe3   :  { %v1274_v17 = vmul.u32 %v1272_v49, %v1269_v28  ;;  %v1236_v19 = vshrl.u32 %v9459_v58, %v1235_v8  ;;  %v1257_v16 = vsel %vm1255_vm6, %v1245_v7, 2102212464  ;;  %v1275_v14 = vmul.u32 %v1271_v37, %v1270_v50 }
  0xe4   :  { %v1299_v31 = vshll.u32 %v1296_v25, 16  ;;  %v6004_v41 = vsub.s32 %v1163_v30, %v1166_v48  ;;  %v1273_v61 = vmul.u32 %v1271_v37, %v1269_v28  ;;  %v1295_v54 = vmul.u32 %v1293_v59, %v1269_v28 }
  0xe5   :  { %v1277_v32 = vshll.u32 %v1274_v17, 16  ;;  %v1276_v47 = vmul.u32 %v1272_v49, %v1270_v50  ;;  %v1279_v0 = vshll.u32 %v1275_v14, 16  ;;  %v1298_v35 = vmul.u32 %v1294_v21, %v1270_v50 }
  0xe6   :  { %v1301_v26 = vshll.u32 %v1297_v44, 16  ;;  %vm1168_vm9 = vcmp.lt.s32.totalorder %v6004_v41, 0  ;;  %v1169_v8 = vsub.s32 0, %v6004_v41  ;;  %vm1303_vm11 = vc.u32 %v1295_v54, %v1299_v31 }
  0xe7   :  { %vm1281_vm10 = vc.u32 %v1273_v61, %v1277_v32  ;;  %v1283_v29 = vadd.s32 %v1277_v32, %v1273_v61  ;;  %v1305_v30 = vadd.s32 %v1299_v31, %v1295_v54  ;;  %v6012_v53 = vadd.f32 %v6006_v11, %v99_v36 }
  0xe8   :  { %v1282_v7 = vsel %vm1281_vm10, 1, %v9456_v3  ;;  %v1170_v28 = vsel %vm1168_vm9, %v1169_v8, %v6004_v41  ;;  %v1304_v50 = vsel %vm1303_vm11, 1, %v9456_v3  ;;  %v721_v49 = vmul.f32 %v720_v9, %v718_v18 }
  0xe9   :  { %v1284_v63 = vadd.s32 %v1282_v7, %v1276_v47  ;;  %vm1285_vm14 = vc.u32 %v1283_v29, %v1279_v0  ;;  %v1171_v59 = vclz %v1170_v28  ;;  %v1306_v37 = vadd.s32 %v1304_v50, %v1298_v35 }
  0xea   :  { %v1286_v21 = vsel %vm1285_vm14, 1, %v9456_v3  ;;  %vm1307_vm15 = vc.u32 %v1305_v30, %v1301_v26  ;;  %v1278_v48 = vshrl.u32 %v1274_v17, 16  ;;  %v1256_v36 = vsel %vm1252_vm5, %v1236_v19, %v5953_v43 }
  0xeb   :  { %v1288_v61 = vadd.s32 %v1286_v21, %v1284_v63  ;;  %v1308_v32 = vsel %vm1307_vm15, 1, %v9456_v3  ;;  %v5455_v31 = vadd.s32 4294967294, %v1171_v59  ;;  %v1300_v54 = vshrl.u32 %v1296_v25, 16 }
  0xec   :  { %v1310_v47 = vadd.s32 %v1308_v32, %v1306_v37  ;;  %v1258_v0 = vsel %vm1254_vm7, %v5955_v5, %v1257_v16  ;;  %v1280_v8 = vshrl.u32 %v1275_v14, 16  ;;  %v758_v35 = vand.u32 2139095040, %v6012_v53 }
  0xed   :  { %v1289_v29 = vadd.s32 %v1288_v61, %v1278_v48  ;;  %v1159_v18 = vadd.s32 %v5937_v42, %v5935_v2  ;;  %vm5456_vm0 = vcmp.lt.s32.totalorder %v5455_v31, 0  ;;  %v1302_v9 = vshrl.u32 %v1297_v44, 16  ;;  %v73_v44 = vpop.permute.xlu0 %72 }
  0xee   :  { %v1311_v17 = vadd.s32 %v1310_v47, %v1300_v54  ;;  %v1174_v7 = vsel %vm5456_vm0, 0, %v5455_v31  ;;  %v6029_v43 = vadd.s32 %v1305_v30, %v1301_v26  ;;  %v759_v25 = vshrl.u32 %v758_v35, 23 }
  0xef   :  { %v6027_v28 = vadd.s32 %v1289_v29, %v1280_v8  ;;  %v1175_v19 = vsub.s32 32, %v1174_v7  ;;  %v1179_v63 = vsub.s32 4294967266, %v1174_v7  ;;  %v1259_v5 = vsel %vm1253_vm8, %v1256_v36, %v1258_v0 }
  0xf0   :  { %v1312_v16 = vadd.s32 %v1311_v17, %v1302_v9  ;;  %vm602_vm1 = vcmp.lt.s32.totalorder %v5655_v34, 0  ;;  %v9454_v2 = vand.u32 2147483647, %v6012_v53  ;;  %v5448_v42 = vadd.s32 4294967169, %v759_v25 }
  0xf1   :  { %vm1315_vm2 = vc.u32 %v6027_v28, %v6029_v43  ;;  %v1176_v14 = vshll.u32 %v6004_v41, %v1174_v7  ;;  %v1177_v26 = vshrl.u32 %v1159_v18, %v1175_v19  ;;  %v1180_v30 = vadd.s32 127, %v1179_v63 }
  0xf2   :  { %v1316_v50 = vadd.s32 1, %v1312_v16  ;;  %v584_v59 = vadd.f32 -0.16666654, %v5995_v20  ;;  %v92_v10 = vmul.f32 %v5772_v22, %v5645_v24  ;;  %v1313_v21 = vmul.u32 %v5959_v52, %v1259_v5 }
  0xf3   :  { %v765_v37 = vadd.s32 1, %v5448_v42  ;;  %v722_v48 = vxor.u32 2147483648, %v721_v49  ;;  %v1178_v61 = vor.u32 %v1177_v26, %v1176_v14  ;;  %v1181_v32 = vshll.u32 %v1180_v30, 23 }
  0xf4   :  { %v1317_v31 = vsel %vm1315_vm2, %v1316_v50, %v1312_v16  ;;  %v6043_v36 = vmul.f32 %v73_v44, %v5643_v23  ;;  %v762_v41 = vand.u32 8388607, %v9454_v2  ;;  %v569_v20 = vsub.s32 4, %v5795_v6 }
  0xf5   :  { %v1318_v54 = vadd.s32 %v1317_v31, %v1313_v21  ;;  %vm766_vm3 = vcmp.gt.s32.totalorder %v765_v37, 0  ;;  %v6049_v47 = vmul.f32 %v73_v44, %v5645_v24  ;;  %v1182_v22 = vor.u32 4788187, %v1181_v32 }
  0xf6   :  { %v767_v52 = vsel %vm766_vm3, %v765_v37, 0  ;;  %vm6053_vm4 = vcmp.le.f32.partialorder %v600_v40, 0.7853982  ;;  %v9513_v0 = vmov 0  ;;  %vm1067_vm5 = vcmp.lt.s32.totalorder %v5808_v51, 0 }
  0xf7   :  { %v9514_v0 = vsel %vm6053_vm4, 4294967295, %v9513_v0  ;;  %v1319_v23 = vadd.s32 536870912, %v1318_v54  ;;  %v100_v8 = vadd.f32 %v92_v10, %v5990_v27  ;;  %v769_v29 = vand.u32 31, %v767_v52 }
  0xf8   :  { %9515 = vst [vmem:[#allocation7_spill] sm:$0xff] %v9514_v0  ;;  %v585_v35 = vmul.f32 %v584_v59, %v5914_v39  ;;  %v723_v24 = vsel %vm602_vm1, %v722_v48, %v721_v49  ;;  %vm6064_vm6 = vcmp.le.f32.partialorder %v1065_v56, 0.7853982  ;;  %v1183_v40 = vand.u32 2147483647, %v1182_v22 }
  0xf9   :  { %v1185_v9 = vcvt.s32.f32 %v1178_v61  ;;  %v6068_v17 = vshrl.u32 %v1319_v23, 30  ;;  %v6071_v7 = vadd.f32 %v6006_v11, %v100_v8  ;;  %v763_v27 = vor.u32 8388608, %v762_v41 }
  0xfa   :  { %v770_v25 = vsub.s32 32, %v769_v29  ;;  %v6073_v63 = vshrl.u32 %v767_v52, 5  ;;  %v772_v49 = vshll.u32 %v9459_v58, %v769_v29  ;;  %v775_v5 = vshll.u32 %v9452_v60, %v769_v29 }
  0xfb   :  { %v1186_v19 = vmul.f32 %v1185_v9, %v1183_v40  ;;  %v1321_v56 = vshll.u32 %v6068_v17, 30  ;;  %v778_v42 = vshll.u32 %v9450_v62, %v769_v29  ;;  %v781_v44 = vshll.u32 %v9448_v1, %v769_v29 }
  0xfc   :  { %v773_v16 = vshrl.u32 %v9452_v60, %v770_v25  ;;  %v776_v11 = vshrl.u32 %v9450_v62, %v770_v25  ;;  %v779_v26 = vshrl.u32 %v9448_v1, %v770_v25  ;;  %v782_v30 = vshrl.u32 %v9446_v4, %v770_v25 }
  0xfd   :  { %v1187_v14 = vxor.u32 2147483648, %v1186_v19  ;;  %v6084_v50 = vsub.s32 %v1318_v54, %v1321_v56  ;;  %v784_v10 = vshll.u32 %v9446_v4, %v769_v29  ;;  %v785_v21 = vshrl.u32 %v9444_v13, %v770_v25 }
  0xfe   :  { %v774_v59 = vor.u32 %v773_v16, %v772_v49  ;;  %v777_v48 = vor.u32 %v776_v11, %v775_v5  ;;  %v783_v61 = vor.u32 %v782_v30, %v781_v44  ;;  %v913_v32 = vand.u32 2139095040, %v6071_v7 }
  0xff   :  { %v1188_v37 = vsel %vm1067_vm5, %v1187_v14, %v1186_v19  ;;  %vm1323_vm7 = vcmp.lt.s32.totalorder %v6084_v50, 0  ;;  %v1324_v31 = vsub.s32 0, %v6084_v50  ;;  %v780_v41 = vor.u32 %v779_v26, %v778_v42 }
 0x100   :  { %v786_v22 = vor.u32 %v785_v21, %v784_v10  ;;  %v586_v54 = vadd.f32 1.0, %v585_v35  ;;  %v724_v52 = vsub.s32 4, %v5831_v57  ;;  %v6097_v23 = vsel %vm6053_vm4, %v5655_v34, %v723_v24 }
 0x101   :  { %9518 = vst [vmem:[#allocation8_spill] sm:$0xff] %v6097_v23  ;;  %vm787_vm8 = vcmp.lt.s32.totalorder %v6073_v63, 1  ;;  %v6103_v8 = vsel %vm6064_vm6, %v5808_v51, %v1188_v37  ;;  %v1325_v29 = vsel %vm1323_vm7, %v1324_v31, %v6084_v50  ;;  %vm790_vm9 = vcmp.lt.s32.totalorder %v6073_v63, 4 }
 0x102   :  { %v795_v35 = vsel %vm787_vm8, %v774_v59, %v777_v48  ;;  %vm789_vm10 = vcmp.lt.s32.totalorder %v6073_v63, 3  ;;  %v796_v24 = vsel %vm790_vm9, %v783_v61, 920167782  ;;  %v6112_v40 = vshll.u32 %v763_v27, 8 }
 0x103   :  { %v914_v9 = vshrl.u32 %v913_v32, 23  ;;  %vm788_vm11 = vcmp.lt.s32.totalorder %v6073_v63, 2  ;;  %v797_v19 = vsel %vm789_vm10, %v780_v41, %v796_v24  ;;  %v799_v49 = vsel %vm787_vm8, %v777_v48, %v780_v41 }
 0x104   :  { %v800_v5 = vsel %vm790_vm9, %v786_v22, 1326507024  ;;  %v6124_v56 = vsel %vm447_vm12, %v569_v20, %v5795_v6  ;;  %v6128_v27 = vmul.f32 %v6103_v8, %v6103_v8  ;;  %v1326_v16 = vclz %v1325_v29 }
 0x105   :  { %v798_v42 = vsel %vm788_vm11, %v795_v35, %v797_v19  ;;  %v6133_v44 = vmul.f32 %v586_v54, %v5900_v55  ;;  %v6138_v14 = vsel %vm602_vm1, %v724_v52, %v5831_v57  ;;  %v6142_v6 = vmul.f32 %v6097_v23, %v6097_v23 }
 0x106   :  { %9519 = vst [vmem:[#allocation9_spill] sm:$0xff] %v6138_v14  ;;  %v801_v20 = vsel %vm789_vm10, %v783_v61, %v800_v5  ;;  %v829_v26 = vshrl.u32 %v798_v42, 16  ;;  %v9443_v30 = vand.u32 2147483647, %v6071_v7  ;;  %v5451_v55 = vadd.s32 4294967169, %v914_v9 }
 0x107   :  { %9520 = vst [vmem:[#allocation10_spill] sm:$0xff] %v6142_v6  ;;  %v802_v11 = vsel %vm788_vm11, %v799_v49, %v801_v20  ;;  %v804_v10 = vand.u32 65535, %v6112_v40  ;;  %v805_v21 = vshrl.u32 %v6112_v40, 16  ;;  %v1201_v32 = vmul.f32 -0.00019511016, %v6128_v27 }
 0x108   :  { %v806_v57 = vand.u32 65535, %v802_v11  ;;  %v807_v37 = vshrl.u32 %v802_v11, 16  ;;  %v5458_v31 = vadd.s32 4294967294, %v1326_v16  ;;  %v792_v22 = vsel %vm790_vm9, %v780_v41, 2102212464 }
 0x109   :  { %v828_v61 = vand.u32 65535, %v798_v42  ;;  %v6156_v54 = vadd.s32 %v6029_v43, %v6027_v28  ;;  %v771_v52 = vshrl.u32 %v9459_v58, %v770_v25  ;;  %v831_v24 = vmul.u32 %v829_v26, %v804_v10 }
 0x10a   :  { %v809_v29 = vmul.u32 %v807_v37, %v804_v10  ;;  %v810_v35 = vmul.u32 %v806_v57, %v805_v21  ;;  %v6161_v9 = vand.u32 8388607, %v9443_v30  ;;  %v920_v19 = vadd.s32 1, %v5451_v55 }
 0x10b   :  { %v6165_v49 = vadd.f32 %v6043_v36, %v5868_v38  ;;  %v791_v41 = vsel %vm787_vm8, %v771_v52, %v774_v59  ;;  %v793_v28 = vsel %vm789_vm10, %v777_v48, %v792_v22  ;;  %v808_v43 = vmul.u32 %v806_v57, %v804_v10 }
 0x10c   :  { %v812_v25 = vshll.u32 %v809_v29, 16  ;;  %v1202_v5 = vadd.f32 0.008332121, %v1201_v32  ;;  %vm5459_vm12 = vcmp.lt.s32.totalorder %v5458_v31, 0  ;;  %v811_v16 = vmul.u32 %v807_v37, %v805_v21 }
 0x10d   :  { %v832_v42 = vmul.u32 %v828_v61, %v805_v21  ;;  %v814_v20 = vshll.u32 %v810_v35, 16  ;;  %v834_v55 = vshll.u32 %v831_v24, 16  ;;  %v6173_v38 = vsel %vm788_vm11, %v791_v41, %v793_v28 }
 0x10e   :  { %vm816_vm14 = vc.u32 %v808_v43, %v812_v25  ;;  %v818_v11 = vadd.s32 %v812_v25, %v808_v43  ;;  %v830_v59 = vmul.u32 %v828_v61, %v804_v10  ;;  %vm921_vm15 = vcmp.gt.s32.totalorder %v920_v19, 0 }
 0x10f   :  { %v817_v36 = vsel %vm816_vm14, 1, %v9456_v3  ;;  %v6176_v52 = vsel %vm5459_vm12, 0, %v5458_v31  ;;  %v813_v48 = vshrl.u32 %v809_v29, 16  ;;  %v833_v32 = vmul.u32 %v829_v26, %v805_v21 }
 0x110   :  { %v819_v57 = vadd.s32 %v817_v36, %v811_v16  ;;  %vm820_vm0 = vc.u32 %v818_v11, %v814_v20  ;;  %v836_v22 = vshll.u32 %v832_v42, 16  ;;  %vm838_vm1 = vc.u32 %v830_v59, %v834_v55 }
 0x111   :  { %v821_v37 = vsel %vm820_vm0, 1, %v9456_v3  ;;  %v839_v25 = vsel %vm838_vm1, 1, %v9456_v3  ;;  %v840_v63 = vadd.s32 %v834_v55, %v830_v59  ;;  %v922_v41 = vsel %vm921_vm15, %v920_v19, 0 }
 0x112   :  { %v823_v43 = vadd.s32 %v821_v37, %v819_v57  ;;  %v841_v28 = vadd.s32 %v839_v25, %v833_v32  ;;  %v848_v10 = vmul.u32 %v6112_v40, %v6173_v38  ;;  %v918_v31 = vor.u32 8388608, %v6161_v9 }
 0x113   :  { %v924_v61 = vand.u32 31, %v922_v41  ;;  %v6184_v29 = vmul.f32 %v1202_v5, %v6128_v27  ;;  %v1330_v16 = vsub.s32 32, %v6176_v52  ;;  %vm842_vm2 = vc.u32 %v840_v63, %v836_v22 }
 0x114   :  { %v824_v26 = vadd.s32 %v823_v43, %v813_v48  ;;  %v1331_v21 = vshll.u32 %v6084_v50, %v6176_v52  ;;  %v815_v20 = vshrl.u32 %v810_v35, 16  ;;  %v843_v19 = vsel %vm842_vm2, 1, %v9456_v3 }
 0x115   :  { %v6190_v11 = vsub.s32 32, %v924_v61  ;;  %v1334_v40 = vsub.s32 4294967266, %v6176_v52  ;;  %v835_v55 = vshrl.u32 %v831_v24, 16  ;;  %v845_v9 = vadd.s32 %v843_v19, %v841_v28 }
 0x116   :  { %v927_v38 = vshll.u32 %v9459_v58, %v924_v61  ;;  %v6194_v5 = vadd.s32 %v824_v26, %v815_v20  ;;  %v930_v59 = vshll.u32 %v9452_v60, %v924_v61  ;;  %v837_v35 = vshrl.u32 %v832_v42, 16 }
 0x117   :  { %v928_v36 = vshrl.u32 %v9452_v60, %v6190_v11  ;;  %v931_v50 = vshrl.u32 %v9450_v62, %v6190_v11  ;;  %v6201_v48 = vadd.s32 %v840_v63, %v836_v22  ;;  %v846_v57 = vadd.s32 %v845_v9, %v835_v55 }
 0x118   :  { %v6203_v37 = vshrl.u32 %v922_v41, 5  ;;  %v933_v32 = vshll.u32 %v9450_v62, %v924_v61  ;;  %v934_v43 = vshrl.u32 %v9448_v1, %v6190_v11  ;;  %v1335_v25 = vadd.s32 127, %v1334_v40 }
 0x119   :  { %v6205_v24 = vor.u32 %v928_v36, %v927_v38  ;;  %v6207_v52 = vor.u32 %v931_v50, %v930_v59  ;;  %v847_v28 = vadd.s32 %v846_v57, %v837_v35  ;;  %v936_v26 = vshll.u32 %v9448_v1, %v924_v61 }
 0x11a   :  { %v937_v42 = vshrl.u32 %v9446_v4, %v6190_v11  ;;  %vm850_vm3 = vc.u32 %v6194_v5, %v6201_v48  ;;  %v6217_v22 = vor.u32 %v934_v43, %v933_v32  ;;  %v939_v63 = vshll.u32 %v9446_v4, %v924_v61 }
 0x11b   :  { %v940_v41 = vshrl.u32 %v9444_v13, %v6190_v11  ;;  %v851_v20 = vadd.s32 1, %v847_v28  ;;  %vm942_vm7 = vcmp.lt.s32.totalorder %v6203_v37, 1  ;;  %v6223_v40 = vshll.u32 %v918_v31, 8 }
 0x11c   :  { %v938_v19 = vor.u32 %v937_v42, %v936_v26  ;;  %v1332_v55 = vshrl.u32 %v6156_v54, %v1330_v16  ;;  %vm945_vm8 = vcmp.lt.s32.totalorder %v6203_v37, 4  ;;  %v950_v38 = vsel %vm942_vm7, %v6205_v24, %v6207_v52  ;;  %v6251_v42 = vpop.permute.xlu0 %109 }
 0x11d   :  { %v941_v9 = vor.u32 %v940_v41, %v939_v63  ;;  %v852_v61 = vsel %vm850_vm3, %v851_v20, %v847_v28  ;;  %vm944_vm9 = vcmp.lt.s32.totalorder %v6203_v37, 3  ;;  %v954_v31 = vsel %vm942_vm7, %v6207_v52, %v6217_v22 }
 0x11e   :  { %v951_v36 = vsel %vm945_vm8, %v938_v19, 920167782  ;;  %v853_v54 = vadd.s32 %v852_v61, %v848_v10  ;;  %vm943_vm10 = vcmp.lt.s32.totalorder %v6203_v37, 2  ;;  %v1336_v50 = vshll.u32 %v1335_v25, 23 }
 0x11f   :  { %v952_v16 = vsel %vm944_vm9, %v6217_v22, %v951_v36  ;;  %v955_v59 = vsel %vm945_vm8, %v941_v9, 1326507024  ;;  %v959_v32 = vand.u32 65535, %v6223_v40  ;;  %v6253_v63 = vor.u32 %v1332_v55, %v1331_v21 }
 0x120   :  { %v953_v35 = vsel %vm943_vm10, %v950_v38, %v952_v16  ;;  %v956_v57 = vsel %vm944_vm9, %v938_v19, %v955_v59  ;;  %v854_v43 = vadd.s32 536870912, %v853_v54  ;;  %v960_v25 = vshrl.u32 %v6223_v40, 16 }
 0x121   :  { %v957_v10 = vsel %vm943_vm10, %v954_v31, %v956_v57  ;;  %v983_v28 = vand.u32 65535, %v953_v35  ;;  %v984_v26 = vshrl.u32 %v953_v35, 16  ;;  %v6261_v61 = vadd.f32 %v6049_v47, %v5877_v15 }
 0x122   :  { %v961_v41 = vand.u32 65535, %v957_v10  ;;  %v962_v20 = vshrl.u32 %v957_v10, 16  ;;  %v6257_v38 = vshrl.u32 %v854_v43, 30  ;;  %v6265_v21 = vadd.f32 %v6251_v42, %v6165_v49 }
 0x123   :  { %v986_v19 = vmul.u32 %v984_v26, %v959_v32  ;;  %v987_v16 = vmul.u32 %v983_v28, %v960_v25  ;;  %v6268_v55 = vadd.f32 -0.16666654, %v6184_v29  ;;  %v1337_v59 = vor.u32 4788187, %v1336_v50 }
 0x124   :  { %v964_v36 = vmul.u32 %v962_v20, %v959_v32  ;;  %v965_v31 = vmul.u32 %v961_v41, %v960_v25  ;;  %v856_v35 = vshll.u32 %v6257_v38, 30  ;;  %v1340_v43 = vcvt.s32.f32 %v6253_v63 }
 0x125   :  { %v989_v57 = vshll.u32 %v986_v19, 16  ;;  %v963_v10 = vmul.u32 %v961_v41, %v959_v32  ;;  %v985_v15 = vmul.u32 %v983_v28, %v959_v32  ;;  %v966_v13 = vmul.u32 %v962_v20, %v960_v25 }
 0x126   :  { %v967_v30 = vshll.u32 %v964_v36, 16  ;;  %v857_v47 = vsub.s32 %v853_v54, %v856_v35  ;;  %v969_v4 = vshll.u32 %v965_v31, 16  ;;  %v988_v1 = vmul.u32 %v984_v26, %v960_v25 }
 0x127   :  { %v991_v49 = vshll.u32 %v987_v16, 16  ;;  %vm993_vm12 = vc.u32 %v985_v15, %v989_v57  ;;  %v995_v63 = vadd.s32 %v989_v57, %v985_v15  ;;  %v1338_v9 = vand.u32 2147483647, %v1337_v59 }
 0x128   :  { %vm971_vm11 = vc.u32 %v963_v10, %v967_v30  ;;  %v973_v62 = vadd.s32 %v967_v30, %v963_v10  ;;  %vm858_vm14 = vcmp.lt.s32.totalorder %v857_v47, 0  ;;  %v859_v29 = vsub.s32 0, %v857_v47 }
 0x129   :  { %v972_v50 = vsel %vm971_vm11, 1, %v9456_v3  ;;  %v994_v60 = vsel %vm993_vm12, 1, %v9456_v3  ;;  %v947_v54 = vsel %vm945_vm8, %v6217_v22, 2102212464  ;;  %v968_v26 = vshrl.u32 %v964_v36, 16 }
 0x12a   :  { %v974_v2 = vadd.s32 %v972_v50, %v966_v13  ;;  %vm975_vm15 = vc.u32 %v973_v62, %v969_v4  ;;  %v996_v41 = vadd.s32 %v994_v60, %v988_v1  ;;  %v860_v32 = vsel %vm858_vm14, %v859_v29, %v857_v47 }
 0x12b   :  { %v976_v30 = vsel %vm975_vm15, 1, %v9456_v3  ;;  %v861_v28 = vclz %v860_v32  ;;  %vm997_vm0 = vc.u32 %v995_v63, %v991_v49  ;;  %v926_v20 = vshrl.u32 %v9459_v58, %v6190_v11 }
 0x12c   :  { %v978_v25 = vadd.s32 %v976_v30, %v974_v2  ;;  %v970_v35 = vshrl.u32 %v965_v31, 16  ;;  %v998_v62 = vsel %vm997_vm0, 1, %v9456_v3  ;;  %v138_v60 = vand.u32 2139095040, %v6265_v21 }
 0x12d   :  { %v5449_v1 = vadd.s32 4294967294, %v861_v28  ;;  %v990_v13 = vshrl.u32 %v986_v19, 16  ;;  %v1000_v59 = vadd.s32 %v998_v62, %v996_v41  ;;  %v946_v22 = vsel %vm942_vm7, %v926_v20, %v6205_v24 }
 0x12e   :  { %v979_v4 = vadd.s32 %v978_v25, %v968_v26  ;;  %v948_v2 = vsel %vm944_vm9, %v6207_v52, %v947_v54  ;;  %v9455_v36 = vand.u32 2147483647, %v6265_v21  ;;  %v139_v11 = vshrl.u32 %v138_v60, 23 }
 0x12f   :  { %vm5450_vm1 = vcmp.lt.s32.totalorder %v5449_v1, 0  ;;  %v992_v57 = vshrl.u32 %v987_v16, 16  ;;  %v1001_v10 = vadd.s32 %v1000_v59, %v990_v13  ;;  %v849_v19 = vadd.s32 %v6201_v48, %v6194_v5 }
 0x130   :  { %v6289_v31 = vadd.s32 %v979_v4, %v970_v35  ;;  %v864_v15 = vsel %vm5450_vm1, 0, %v5449_v1  ;;  %v6293_v29 = vadd.s32 %v995_v63, %v991_v49  ;;  %v5436_v50 = vadd.s32 4294967169, %v139_v11 }
 0x131   :  { %v865_v24 = vsub.s32 32, %v864_v15  ;;  %v869_v41 = vsub.s32 4294967266, %v864_v15  ;;  %v949_v52 = vsel %vm943_vm10, %v946_v22, %v948_v2  ;;  %v1002_v32 = vadd.s32 %v1001_v10, %v992_v57 }
 0x132   :  { %v1341_v54 = vmul.f32 %v1340_v43, %v1338_v9  ;;  %vm1005_vm2 = vc.u32 %v6289_v31, %v6293_v29  ;;  %v142_v16 = vand.u32 8388607, %v9455_v36  ;;  %v145_v30 = vadd.s32 1, %v5436_v50 }
 0x133   :  { %v866_v28 = vshll.u32 %v857_v47, %v864_v15  ;;  %v867_v5 = vshrl.u32 %v849_v19, %v865_v24  ;;  %v870_v48 = vadd.s32 127, %v869_v41  ;;  %v1006_v49 = vadd.s32 1, %v1002_v32 }
 0x134   :  { %v9521_v63 = vsub.s32 4, %v5992_v46  ;;  %v1003_v9 = vmul.u32 %v6223_v40, %v949_v52  ;;  %v6311_v43 = vadd.f32 %v6251_v42, %v6261_v61  ;;  %vm146_vm3 = vcmp.gt.s32.totalorder %v145_v30, 0 }
 0x135   :  { %vm1222_vm7 = vcmp.lt.s32.totalorder %v5825_v45, 0  ;;  %v868_v47 = vor.u32 %v867_v5, %v866_v28  ;;  %v871_v26 = vshll.u32 %v870_v48, 23  ;;  %v1007_v25 = vsel %vm1005_vm2, %v1006_v49, %v1002_v32 }
 0x136   :  { %v6306_v37 = vsel %vm1067_vm5, %v9521_v63, %v5992_v46  ;;  %9522 = vst [vmem:[#allocation11_spill] sm:$0xff] %v6311_v43  ;;  %v147_v20 = vsel %vm146_vm3, %v145_v30, 0  ;;  %vm757_vm8 = vcmp.lt.s32.totalorder %v6012_v53, 0  ;;  %v1008_v62 = vadd.s32 %v1007_v25, %v1003_v9 }
 0x137   :  { %v149_v46 = vand.u32 31, %v147_v20  ;;  %v1205_v40 = vmul.f32 %v6268_v55, %v6128_v27  ;;  %v1342_v60 = vxor.u32 2147483648, %v1341_v54  ;;  %v9523_v42 = vand.u32 2147483647, %v6012_v53 }
 0x138   :  { %v872_v1 = vor.u32 4788187, %v871_v26  ;;  %v143_v4 = vor.u32 8388608, %v142_v16  ;;  %v1009_v13 = vadd.s32 536870912, %v1008_v62  ;;  %v6324_v59 = vshrl.u32 %v147_v20, 5 }
 0x139   :  { %vm6320_vm5 = vcmp.le.f32.partialorder %v9523_v42, 0.7853982  ;;  %v150_v22 = vsub.s32 32, %v149_v46  ;;  %v293_v2 = vand.u32 2139095040, %v6311_v43  ;;  %v875_v57 = vcvt.s32.f32 %v868_v47 }
 0x13a   :  { %v873_v11 = vand.u32 2147483647, %v872_v1  ;;  %v152_v10 = vshll.u32 %v9459_v58, %v149_v46  ;;  %v9526_v55 = vmov 2475754826   ;;  %v6329_v15 = vshrl.u32 %v1009_v13, 30 }
 0x13b   :  { %v155_v19 = vshll.u32 %v9526_v55, %v149_v46  ;;  %v153_v50 = vshrl.u32 %v9526_v55, %v150_v22  ;;  %v9527_v24 = vmov 2131351028   ;;  %v9528_v52 = vmov 2102212464  }
 0x13c   :  { %v156_v41 = vshrl.u32 %v9527_v24, %v150_v22  ;;  %v161_v32 = vshll.u32 %v9528_v52, %v149_v46  ;;  %v876_v16 = vmul.f32 %v875_v57, %v873_v11  ;;  %v159_v30 = vshrl.u32 %v9528_v52, %v150_v22 }
 0x13d   :  { %v9529_v28 = vmov 920167782   ;;  %v9530_v48 = vmov 1326507024   ;;  %v6337_v63 = vadd.f32 1.0, %v1205_v40  ;;  %v1011_v9 = vshll.u32 %v6329_v15, 30 }
 0x13e   :  { %v162_v5 = vshrl.u32 %v9529_v28, %v150_v22  ;;  %v165_v49 = vshrl.u32 %v9530_v48, %v150_v22  ;;  %v158_v47 = vshll.u32 %v9527_v24, %v149_v46  ;;  %v164_v26 = vshll.u32 %v9529_v28, %v149_v46 }
 0x13f   :  { %v877_v25 = vxor.u32 2147483648, %v876_v16  ;;  %v154_v20 = vor.u32 %v153_v50, %v152_v10  ;;  %v157_v42 = vor.u32 %v156_v41, %v155_v19  ;;  %v1343_v13 = vsel %vm1222_vm7, %v1342_v60, %v1341_v54 }
 0x140   :  { %v163_v1 = vor.u32 %v162_v5, %v161_v32  ;;  %v6344_v11 = vsub.s32 %v1008_v62, %v1011_v9  ;;  %v160_v57 = vor.u32 %v159_v30, %v158_v47  ;;  %v6346_v36 = vshll.u32 %v143_v4, 8 }
 0x141   :  { %v878_v40 = vsel %vm757_vm8, %v877_v25, %v876_v16  ;;  %v166_v35 = vor.u32 %v165_v49, %v164_v26  ;;  %vm167_vm9 = vcmp.lt.s32.totalorder %v6324_v59, 1  ;;  %v294_v3 = vshrl.u32 %v293_v2, 23 }
 0x142   :  { %v9531_v46 = vand.u32 2147483647, %v5825_v45  ;;  %v6360_v54 = vsel %vm6320_vm5, %v6012_v53, %v878_v40  ;;  %vm1013_vm11 = vcmp.lt.s32.totalorder %v6344_v11, 0  ;;  %v1014_v62 = vsub.s32 0, %v6344_v11 }
 0x143   :  { %vm170_vm12 = vcmp.lt.s32.totalorder %v6324_v59, 4  ;;  %v6367_v60 = vmul.f32 %v6360_v54, %v6360_v54  ;;  %vm169_vm14 = vcmp.lt.s32.totalorder %v6324_v59, 3  ;;  %v175_v4 = vsel %vm167_vm9, %v154_v20, %v157_v42 }
 0x144   :  { %vm6353_vm10 = vcmp.le.f32.partialorder %v9531_v46, 0.7853982  ;;  %v176_v2 = vsel %vm170_vm12, %v163_v1, 920167782  ;;  %v1015_v19 = vsel %vm1013_vm11, %v1014_v62, %v6344_v11  ;;  %vm168_vm15 = vcmp.lt.s32.totalorder %v6324_v59, 2 }
 0x145   :  { %v177_v50 = vsel %vm169_vm14, %v160_v57, %v176_v2  ;;  %v179_v41 = vsel %vm167_vm9, %v157_v42, %v160_v57  ;;  %v1016_v32 = vclz %v1015_v19  ;;  %v180_v30 = vsel %vm170_vm12, %v166_v35, 1326507024 }
 0x146   :  { %v178_v16 = vsel %vm168_vm15, %v175_v4, %v177_v50  ;;  %v9458_v5 = vand.u32 2147483647, %v6311_v43  ;;  %v172_v49 = vsel %vm170_vm12, %v160_v57, 2102212464  ;;  %v181_v9 = vsel %vm169_vm14, %v163_v1, %v180_v30 }
 0x147   :  { %v209_v47 = vshrl.u32 %v178_v16, 16  ;;  %v5439_v26 = vadd.s32 4294967169, %v294_v3  ;;  %v891_v25 = vmul.f32 -0.00019511016, %v6367_v60  ;;  %v5452_v40 = vadd.s32 4294967294, %v1016_v32 }
 0x148   :  { %v151_v46 = vshrl.u32 %v9459_v58, %v150_v22  ;;  %v182_v62 = vsel %vm168_vm15, %v179_v41, %v181_v9  ;;  %v184_v2 = vand.u32 65535, %v6346_v36  ;;  %v185_v35 = vshrl.u32 %v6346_v36, 16 }
 0x149   :  { %v186_v4 = vand.u32 65535, %v182_v62  ;;  %v187_v19 = vshrl.u32 %v182_v62, 16  ;;  %v173_v3 = vsel %vm169_vm14, %v157_v42, %v172_v49  ;;  %v208_v1 = vand.u32 65535, %v178_v16 }
 0x14a   :  { %v171_v57 = vsel %vm167_vm9, %v151_v46, %v154_v20  ;;  %v6395_v50 = vand.u32 8388607, %v9458_v5  ;;  %vm5453_vm0 = vcmp.lt.s32.totalorder %v5452_v40, 0  ;;  %v211_v32 = vmul.u32 %v209_v47, %v184_v2 }
 0x14b   :  { %v189_v22 = vmul.u32 %v187_v19, %v184_v2  ;;  %v190_v41 = vmul.u32 %v186_v4, %v185_v35  ;;  %v6400_v30 = vsel %vm6353_vm10, %v5825_v45, %v1343_v13  ;;  %v892_v20 = vadd.f32 0.008332121, %v891_v25 }
 0x14c   :  { %v300_v46 = vadd.s32 1, %v5439_v26  ;;  %v6405_v42 = vadd.s32 %v6293_v29, %v6289_v31  ;;  %v6409_v16 = vsel %vm168_vm15, %v171_v57, %v173_v3  ;;  %v188_v49 = vmul.u32 %v186_v4, %v184_v2 }
 0x14d   :  { %v192_v62 = vshll.u32 %v189_v22, 16  ;;  %v6411_v5 = vsel %vm5453_vm0, 0, %v5452_v40  ;;  %v191_v58 = vmul.u32 %v187_v19, %v185_v35  ;;  %v212_v34 = vmul.u32 %v208_v1, %v185_v35 }
 0x14e   :  { %v194_v23 = vshll.u32 %v190_v41, 16  ;;  %v214_v26 = vshll.u32 %v211_v32, 16  ;;  %v893_v9 = vmul.f32 %v892_v20, %v6367_v60  ;;  %v9534_v31 = vmov 0  }
 0x14f   :  { %vm196_vm1 = vc.u32 %v188_v49, %v192_v62  ;;  %v198_v25 = vadd.s32 %v192_v62, %v188_v49  ;;  %vm301_vm2 = vcmp.gt.s32.totalorder %v300_v46, 0  ;;  %v210_v40 = vmul.u32 %v208_v1, %v184_v2 }
 0x150   :  { %v197_v29 = vsel %vm196_vm1, 1, %v9534_v31  ;;  %v213_v57 = vmul.u32 %v209_v47, %v185_v35  ;;  %v1024_v19 = vsub.s32 4294967266, %v6411_v5  ;;  %v193_v3 = vshrl.u32 %v189_v22, 16 }
 0x151   :  { %v199_v4 = vadd.s32 %v197_v29, %v191_v58  ;;  %vm200_vm3 = vc.u32 %v198_v25, %v194_v23  ;;  %v216_v6 = vshll.u32 %v212_v34, 16  ;;  %vm218_vm9 = vc.u32 %v210_v40, %v214_v26 }
 0x152   :  { %v201_v13 = vsel %vm200_vm3, 1, %v9534_v31  ;;  %v220_v62 = vadd.s32 %v214_v26, %v210_v40  ;;  %v302_v20 = vsel %vm301_vm2, %v300_v46, 0  ;;  %v894_v0 = vadd.f32 -0.16666654, %v893_v9 }
 0x153   :  { %v203_v49 = vadd.s32 %v201_v13, %v199_v4  ;;  %v1020_v14 = vsub.s32 32, %v6411_v5  ;;  %v219_v59 = vsel %vm218_vm9, 1, %v9534_v31  ;;  %v304_v43 = vand.u32 31, %v302_v20 }
 0x154   :  { %v1021_v58 = vshll.u32 %v6344_v11, %v6411_v5  ;;  %v221_v47 = vadd.s32 %v219_v59, %v213_v57  ;;  %vm222_vm11 = vc.u32 %v220_v62, %v216_v6  ;;  %v1025_v2 = vadd.s32 127, %v1024_v19 }
 0x155   :  { %v204_v23 = vadd.s32 %v203_v49, %v193_v3  ;;  %v195_v35 = vshrl.u32 %v190_v41, 16  ;;  %v223_v1 = vsel %vm222_vm11, 1, %v9534_v31  ;;  %v6425_v22 = vsub.s32 32, %v304_v43 }
 0x156   :  { %v215_v13 = vshrl.u32 %v211_v32, 16  ;;  %v217_v46 = vshrl.u32 %v212_v34, 16  ;;  %v225_v9 = vadd.s32 %v223_v1, %v221_v47  ;;  %v9535_v25 = vmov 683565275  }
 0x157   :  { %v307_v26 = vshll.u32 %v9535_v25, %v304_v43  ;;  %v6428_v29 = vadd.s32 %v204_v23, %v195_v35  ;;  %v308_v4 = vshrl.u32 %v9526_v55, %v6425_v22  ;;  %v310_v11 = vshll.u32 %v9526_v55, %v304_v43 }
 0x158   :  { %v311_v5 = vshrl.u32 %v9527_v24, %v6425_v22  ;;  %v226_v41 = vadd.s32 %v225_v9, %v215_v13  ;;  %v6435_v59 = vshrl.u32 %v302_v20, 5  ;;  %v313_v40 = vshll.u32 %v9527_v24, %v304_v43 }
 0x159   :  { %v314_v34 = vshrl.u32 %v9528_v52, %v6425_v22  ;;  %v1026_v32 = vshll.u32 %v1025_v2, 23  ;;  %v6440_v57 = vadd.s32 %v220_v62, %v216_v6  ;;  %v6442_v19 = vor.u32 %v308_v4, %v307_v26 }
 0x15a   :  { %v6444_v3 = vor.u32 %v311_v5, %v310_v11  ;;  %v227_v49 = vadd.s32 %v226_v41, %v217_v46  ;;  %v316_v47 = vshll.u32 %v9528_v52, %v304_v43  ;;  %v317_v20 = vshrl.u32 %v9529_v28, %v6425_v22 }
 0x15b   :  { %v6446_v23 = vor.u32 %v314_v34, %v313_v40  ;;  %v895_v35 = vmul.f32 %v894_v0, %v6367_v60  ;;  %vm230_vm12 = vc.u32 %v6428_v29, %v6440_v57  ;;  %v319_v6 = vshll.u32 %v9529_v28, %v304_v43 }
 0x15c   :  { %v320_v62 = vshrl.u32 %v9530_v48, %v6425_v22  ;;  %v1022_v2 = vshrl.u32 %v6405_v42, %v1020_v14  ;;  %v231_v1 = vadd.s32 1, %v227_v49  ;;  %v318_v13 = vor.u32 %v317_v20, %v316_v47 }
 0x15d   :  { %vm322_vm14 = vcmp.lt.s32.totalorder %v6435_v59, 1  ;;  %v1027_v46 = vor.u32 4788187, %v1026_v32  ;;  %vm325_vm15 = vcmp.lt.s32.totalorder %v6435_v59, 4  ;;  %vm324_vm0 = vcmp.lt.s32.totalorder %v6435_v59, 3 }
 0x15e   :  { %v321_v9 = vor.u32 %v320_v62, %v319_v6  ;;  %v330_v0 = vsel %vm322_vm14, %v6442_v19, %v6444_v3  ;;  %v232_v26 = vsel %vm230_vm12, %v231_v1, %v227_v49  ;;  %v331_v43 = vsel %vm325_vm15, %v318_v13, 920167782 }
 0x15f   :  { %v334_v14 = vsel %vm322_vm14, %v6444_v3, %v6446_v23  ;;  %v9536_v42 = vmul.u32 %v6346_v36, %v6409_v16  ;;  %vm323_vm1 = vcmp.lt.s32.totalorder %v6435_v59, 2  ;;  %v332_v11 = vsel %vm324_vm0, %v6446_v23, %v331_v43 }
 0x160   :  { %v335_v5 = vsel %vm325_vm15, %v321_v9, 1326507024  ;;  %v1023_v41 = vor.u32 %v1022_v2, %v1021_v58  ;;  %v333_v40 = vsel %vm323_vm1, %v330_v0, %v332_v11  ;;  %v9537_v32 = vor.u32 8388608, %v6395_v50 }
 0x161   :  { %v233_v4 = vadd.s32 %v232_v26, %v9536_v42  ;;  %v336_v34 = vsel %vm324_vm0, %v318_v13, %v335_v5  ;;  %v1028_v16 = vand.u32 2147483647, %v1027_v46  ;;  %v364_v20 = vshrl.u32 %v333_v40, 16 }
 0x162   :  { %v6486_v36 = vshll.u32 %v9537_v32, 8  ;;  %v337_v47 = vsel %vm323_vm1, %v334_v14, %v336_v34  ;;  %v6494_v1 = vmul.f32 %v6337_v63, %v6103_v8  ;;  %v9538_v50 = vsub.s32 4, %v6068_v17 }
 0x163   :  { %v234_v49 = vadd.s32 536870912, %v233_v4  ;;  %v341_v62 = vand.u32 65535, %v337_v47  ;;  %v342_v2 = vshrl.u32 %v337_v47, 16  ;;  %v363_v9 = vand.u32 65535, %v333_v40 }
 0x164   :  { %v339_v6 = vand.u32 65535, %v6486_v36  ;;  %v340_v58 = vshrl.u32 %v6486_v36, 16  ;;  %v6501_v13 = vsel %vm1222_vm7, %v9538_v50, %v6068_v17  ;;  %v6507_v0 = vmul.f32 %v6400_v30, %v6400_v30 }
 0x165   :  { %v6503_v46 = vshrl.u32 %v234_v49, 30  ;;  %v1030_v26 = vcvt.s32.f32 %v1023_v41  ;;  %v9539_v8 = vsub.s32 4, %v6257_v38  ;;  %v6518_v5 = vadd.f32 1.0, %v895_v35 }
 0x166   :  { %v344_v43 = vmul.u32 %v342_v2, %v339_v6  ;;  %v345_v14 = vmul.u32 %v341_v62, %v340_v58  ;;  %v366_v11 = vmul.u32 %v364_v20, %v339_v6  ;;  %v343_v34 = vmul.u32 %v341_v62, %v339_v6 }
 0x167   :  { %v6514_v63 = vsel %vm757_vm8, %v9539_v8, %v6257_v38  ;;  %v236_v42 = vshll.u32 %v6503_v46, 30  ;;  %v1031_v40 = vmul.f32 %v1030_v26, %v1028_v16  ;;  %v346_v49 = vmul.u32 %v342_v2, %v340_v58 }
 0x168   :  { %v347_v32 = vshll.u32 %v344_v43, 16  ;;  %v365_v47 = vmul.u32 %v363_v9, %v339_v6  ;;  %v367_v50 = vmul.u32 %v363_v9, %v340_v58  ;;  %v349_v48 = vshll.u32 %v345_v14, 16 }
 0x169   :  { %v6520_v41 = vsub.s32 %v233_v4, %v236_v42  ;;  %v369_v38 = vshll.u32 %v366_v11, 16  ;;  %v368_v35 = vmul.u32 %v364_v20, %v340_v58  ;;  %vm912_vm2 = vcmp.lt.s32.totalorder %v6071_v7, 0 }
 0x16a   :  { %vm351_vm7 = vc.u32 %v343_v34, %v347_v32  ;;  %v353_v28 = vadd.s32 %v347_v32, %v343_v34  ;;  %v371_v4 = vshll.u32 %v367_v50, 16  ;;  %v348_v42 = vshrl.u32 %v344_v43, 16 }
 0x16b   :  { %vm238_vm8 = vcmp.lt.s32.totalorder %v6520_v41, 0  ;;  %v239_v8 = vsub.s32 0, %v6520_v41  ;;  %v352_v17 = vsel %vm351_vm7, 1, %v9534_v31  ;;  %vm373_vm9 = vc.u32 %v365_v47, %v369_v38 }
 0x16c   :  { %v354_v16 = vadd.s32 %v352_v17, %v346_v49  ;;  %vm355_vm3 = vc.u32 %v353_v28, %v349_v48  ;;  %v374_v2 = vsel %vm373_vm9, 1, %v9534_v31  ;;  %v375_v9 = vadd.s32 %v369_v38, %v365_v47 }
 0x16d   :  { %v240_v6 = vsel %vm238_vm8, %v239_v8, %v6520_v41  ;;  %v356_v62 = vsel %vm355_vm3, 1, %v9534_v31  ;;  %v376_v32 = vadd.s32 %v374_v2, %v368_v35  ;;  %v9540_v52 = vand.u32 2147483647, %v6071_v7 }
 0x16e   :  { %v241_v26 = vclz %v240_v6  ;;  %v358_v34 = vadd.s32 %v356_v62, %v354_v16  ;;  %v1032_v28 = vxor.u32 2147483648, %v1031_v40  ;;  %v306_v48 = vshrl.u32 %v9535_v25, %v6425_v22 }
 0x16f   :  { %vm6531_vm11 = vcmp.le.f32.partialorder %v9540_v52, 0.7853982  ;;  %v327_v58 = vsel %vm325_vm15, %v6446_v23, 2102212464  ;;  %vm377_vm12 = vc.u32 %v375_v9, %v371_v4  ;;  %v350_v49 = vshrl.u32 %v345_v14, 16 }
 0x170   :  { %v5437_v17 = vadd.s32 4294967294, %v241_v26  ;;  %v359_v43 = vadd.s32 %v358_v34, %v348_v42  ;;  %v378_v47 = vsel %vm377_vm12, 1, %v9534_v31  ;;  %v229_v52 = vadd.s32 %v6440_v57, %v6428_v29 }
 0x171   :  { %v326_v38 = vsel %vm322_vm14, %v306_v48, %v6442_v19  ;;  %v370_v8 = vshrl.u32 %v366_v11, 16  ;;  %v380_v35 = vadd.s32 %v378_v47, %v376_v32  ;;  %vm137_vm7 = vcmp.lt.s32.totalorder %v6265_v21, 0 }
 0x172   :  { %vm5438_vm8 = vcmp.lt.s32.totalorder %v5437_v17, 0  ;;  %v328_v22 = vsel %vm324_vm0, %v6444_v3, %v327_v58  ;;  %v360_v23 = vadd.s32 %v359_v43, %v350_v49  ;;  %v572_v14 = vsel %vm5889_vm13, 0, %v6124_v56 }
 0x173   :  { %v244_v16 = vsel %vm5438_vm8, 0, %v5437_v17  ;;  %v372_v29 = vshrl.u32 %v367_v50, 16  ;;  %v381_v57 = vadd.s32 %v380_v35, %v370_v8  ;;  %v1192_v19 = vsel %vm6064_vm6, 0, %v6306_v37 }
 0x174   :  { %v245_v11 = vsub.s32 32, %v244_v16  ;;  %v249_v6 = vsub.s32 4294967266, %v244_v16  ;;  %v379_v62 = vadd.s32 %v375_v9, %v371_v4  ;;  %v882_v2 = vsel %vm6320_vm5, 0, %v6514_v63 }
 0x175   :  { %v1033_v3 = vsel %vm912_vm2, %v1032_v28, %v1031_v40  ;;  %v329_v12 = vsel %vm323_vm1, %v326_v38, %v328_v22  ;;  %v382_v56 = vadd.s32 %v381_v57, %v372_v29  ;;  %v589_v50 = vadd.s32 3, %v572_v14 }
 0x176   :  { %v246_v26 = vshll.u32 %v6520_v41, %v244_v16  ;;  %v247_v42 = vshrl.u32 %v229_v52, %v245_v11  ;;  %v250_v18 = vadd.s32 127, %v249_v6  ;;  %vm385_vm13 = vc.u32 %v360_v23, %v379_v62 }
 0x177   :  { %v259_v37 = vsub.s32 4, %v6503_v46  ;;  %v386_v4 = vadd.s32 1, %v382_v56  ;;  %v1209_v9 = vadd.s32 3, %v1192_v19  ;;  %v899_v34 = vadd.s32 3, %v882_v2 }
 0x178   :  { %v6568_v61 = vsel %vm6531_vm11, %v6071_v7, %v1033_v3  ;;  %v248_v63 = vor.u32 %v247_v42, %v246_v26  ;;  %v251_v59 = vshll.u32 %v250_v18, 23  ;;  %v383_v40 = vmul.u32 %v6486_v36, %v329_v12 }
 0x179   :  { %v9543_v41 = vsub.s32 4, %v6329_v15  ;;  %v9544_v28 = vand.u32 2147483647, %v6265_v21  ;;  %v387_v58 = vsel %vm385_vm13, %v386_v4, %v382_v56  ;;  %v6584_v17 = vand.u32 3, %v589_v50 }
 0x17a   :  { %v6588_v49 = vmul.f32 %v6518_v5, %v6360_v54  ;;  %v252_v36 = vor.u32 4788187, %v251_v59  ;;  %v388_v43 = vadd.s32 %v387_v58, %v383_v40  ;;  %v574_v47 = vmul.f32 -0.001358992, %v5914_v39 }
 0x17b   :  { %v6576_v32 = vsel %vm912_vm2, %v9543_v41, %v6329_v15  ;;  %vm6580_vm6 = vcmp.le.f32.partialorder %v9544_v28, 0.7853982  ;;  %v6593_v15 = vmul.f32 %v6568_v61, %v6568_v61  ;;  %v260_v52 = vsel %vm137_vm7, %v259_v37, %v6503_v46 }
 0x17c   :  { %v6598_v38 = vand.u32 3, %v1209_v9  ;;  %v6600_v8 = vand.u32 3, %v899_v34  ;;  %v253_v35 = vand.u32 2147483647, %v252_v36  ;;  %v255_v22 = vcvt.s32.f32 %v248_v63  ;;  %v1375_v63 = vld [vmem:[%s9437_s2] sm:$0xff] }
 0x17d   :  { %v389_v54 = vadd.s32 536870912, %v388_v43  ;;  %v575_v5 = vadd.f32 0.041655596, %v574_v47  ;;  %v6602_v14 = vadd.s32 %v379_v62, %v360_v23  ;;  %v1194_v16 = vmul.f32 -0.001358992, %v6128_v27 }
 0x17e   :  { %v884_v29 = vmul.f32 -0.001358992, %v6367_v60  ;;  %vm592_vm5 = vcmp.eq.s32.totalorder %v6584_v17, 0  ;;  %v256_v57 = vmul.f32 %v255_v22, %v253_v35  ;;  %v262_v11 = vsel %vm6580_vm6, 0, %v260_v52 }
 0x17f   :  { %v6607_v19 = vshrl.u32 %v389_v54, 30  ;;  %v576_v46 = vmul.f32 %v575_v5, %v5914_v39  ;;  %v1195_v6 = vadd.f32 0.041655596, %v1194_v16  ;;  %v1213_v2 = vxor.u32 2147483648, %v6494_v1 }
 0x180   :  { %v885_v3 = vadd.f32 0.041655596, %v884_v29  ;;  %vm595_vm14 = vcmp.eq.s32.totalorder %v6584_v17, 2  ;;  %v1347_v23 = vsel %vm6353_vm10, 0, %v6501_v13  ;;  %v257_v62 = vxor.u32 2147483648, %v256_v57 }
 0x181   :  { %v391_v12 = vshll.u32 %v6607_v19, 30  ;;  %vm1212_vm15 = vcmp.eq.s32.totalorder %v6598_v38, 0  ;;  %vm902_vm0 = vcmp.eq.s32.totalorder %v6600_v8, 0  ;;  %v903_v56 = vxor.u32 2147483648, %v6588_v49 }
 0x182   :  { %v577_v50 = vadd.f32 -0.4999988, %v576_v46  ;;  %v1196_v26 = vmul.f32 %v1195_v6, %v6128_v27  ;;  %v886_v42 = vmul.f32 %v885_v3, %v6367_v60  ;;  %vm591_vm1 = vcmp.lt.s32.totalorder %v6584_v17, 2 }
 0x183   :  { %v593_v18 = vxor.u32 2147483648, %v6133_v44  ;;  %v279_v37 = vadd.s32 3, %v262_v11  ;;  %v258_v4 = vsel %vm137_vm7, %v257_v62, %v256_v57  ;;  %v6627_v9 = vsub.s32 %v388_v43, %v391_v12 }
 0x184   :  { %vm1215_vm2 = vcmp.eq.s32.totalorder %v6598_v38, 2  ;;  %v578_v34 = vmul.f32 %v577_v50, %v5914_v39  ;;  %vm588_vm3 = vweird.f32 %v5653_v33  ;;  %vm9509_vm9 = vcmask 261120  }
 0x185   :  { %v6638_v59 = vsel %vm6580_vm6, %v6265_v21, %v258_v4  ;;  %v414_v40 = vsub.s32 4, %v6607_v19  ;;  %v1197_v41 = vadd.f32 -0.4999988, %v1196_v26  ;;  %vm1211_vm12 = vcmp.lt.s32.totalorder %v6598_v38, 2 }
 0x186   :  { %v887_v28 = vadd.f32 -0.4999988, %v886_v42  ;;  %v6645_v39 = vmul.f32 %v6638_v59, %v6638_v59  ;;  %vm393_vm8 = vcmp.lt.s32.totalorder %v6627_v9, 0  ;;  %v394_v58 = vsub.s32 0, %v6627_v9 }
 0x187   :  { %vm1208_vm13 = vweird.f32 %v5808_v51  ;;  %v579_v48 = vadd.f32 1.0, %v578_v34  ;;  %v1198_v36 = vmul.f32 %v1197_v41, %v6128_v27  ;;  %vm901_vm6 = vcmp.lt.s32.totalorder %v6600_v8, 2 }
 0x188   :  { %v888_v43 = vmul.f32 %v887_v28, %v6367_v60  ;;  %v6653_v47 = vand.u32 3, %v279_v37  ;;  %v1397_v52 = vsel %vm9509_vm9, %v1375_v63, 0  ;;  %v271_v35 = vmul.f32 -0.00019511016, %v6645_v39 }
 0x189   :  { %v395_v22 = vsel %vm393_vm8, %v394_v58, %v6627_v9  ;;  %vm898_vm7 = vweird.f32 %v6012_v53  ;;  %v594_v54 = vsel %vm592_vm5, %v579_v48, %v593_v18  ;;  %v596_v5 = vxor.u32 2147483648, %v579_v48 }
 0x18a   :  { %v396_v16 = vclz %v395_v22  ;;  %v1199_v27 = vadd.f32 1.0, %v1198_v36  ;;  %v889_v29 = vadd.f32 1.0, %v888_v43  ;;  %v264_v60 = vmul.f32 -0.001358992, %v6645_v39  ;;  %v9548_v22 = vld [vmem:[#allocation11_spill] sm:$0xff] }
 0x18b   :  { %v272_v57 = vadd.f32 0.008332121, %v271_v35  ;;  %v597_v46 = vsel %vm595_vm14, %v596_v5, %v6133_v44  ;;  %v6665_v11 = vand.u32 4294901760, %v1397_v52  ;;  %v1349_v6 = vmul.f32 -0.001358992, %v6507_v0 }
 0x18c   :  { %v5440_v3 = vadd.s32 4294967294, %v396_v16  ;;  %v1214_v62 = vsel %vm1212_vm15, %v1199_v27, %v1213_v2  ;;  %v1216_v12 = vxor.u32 2147483648, %v1199_v27  ;;  %v904_v50 = vsel %vm902_vm0, %v889_v29, %v903_v56 }
 0x18d   :  { %v273_v26 = vmul.f32 %v272_v57, %v6645_v39  ;;  %v906_v42 = vxor.u32 2147483648, %v889_v29  ;;  %v598_v18 = vsel %vm591_vm1, %v594_v54, %v597_v46  ;;  %v265_v37 = vadd.f32 0.041655596, %v264_v60 }
 0x18e   :  { %vm5441_vm5 = vcmp.lt.s32.totalorder %v5440_v3, 0  ;;  %v1217_v44 = vsel %vm1215_vm2, %v1216_v12, %v6494_v1  ;;  %v599_v4 = vsel %vm588_vm3, nan, %v598_v18  ;;  %v6681_v2 = vsub.f32 %v1397_v52, %v6665_v11 }
 0x18f   :  { %v274_v34 = vadd.f32 -0.16666654, %v273_v26  ;;  %v399_v56 = vsel %vm5441_vm5, 0, %v5440_v3  ;;  %v1218_v63 = vsel %vm1211_vm12, %v1214_v62, %v1217_v44  ;;  %vm9547_vm14 = vcmp.eq.s32.totalorder %v6600_v8, 2 }
 0x190   :  { %v907_v17 = vsel %vm9547_vm14, %v906_v42, %v6588_v49  ;;  %v400_v41 = vsub.s32 32, %v399_v56  ;;  %v401_v28 = vshll.u32 %v6627_v9, %v399_v56  ;;  %v404_v58 = vsub.s32 4294967266, %v399_v56 }
 0x191   :  { %v1219_v33 = vsel %vm1208_vm13, nan, %v1218_v63  ;;  %v275_v1 = vmul.f32 %v274_v34, %v6645_v39  ;;  %v908_v36 = vsel %vm901_vm6, %v904_v50, %v907_v17  ;;  %v6696_v38 = vand.u32 4294901760, %v599_v4 }
 0x192   :  { %v6692_v48 = vand.u32 4294901760, %v1219_v33  ;;  %v402_v43 = vshrl.u32 %v6602_v14, %v400_v41  ;;  %v405_v52 = vadd.s32 127, %v404_v58  ;;  %v909_v49 = vsel %vm898_vm7, nan, %v908_v36  ;;  %v9552_v36 = vld [vmem:[#allocation9_spill] sm:$0xff] }
 0x193   :  { %v266_v9 = vmul.f32 %v265_v37, %v6645_v39  ;;  %v276_v35 = vadd.f32 1.0, %v275_v1  ;;  %v6707_v8 = vand.u32 4294901760, %v909_v49  ;;  %vm282_vm15 = vcmp.eq.s32.totalorder %v6653_v47, 0 }
 0x194   :  { %1421 = vmatpush.msra.mxu0 %v6692_v48  ;;  %1572 = vmatpush.msra.mxu3 %v6692_v48  ;;  %v6705_v51 = vsub.f32 %v1219_v33, %v6692_v48  ;;  %vm292_vm0 = vcmp.lt.s32.totalorder %v9548_v22, 0  ;;  %v403_v14 = vor.u32 %v402_v43, %v401_v28  ;;  %v406_v54 = vshll.u32 %v405_v52, 23 }
 0x195   :  { %v267_v53 = vadd.f32 -0.4999988, %v266_v9  ;;  %vm285_vm1 = vcmp.eq.s32.totalorder %v6653_v47, 2  ;;  %v277_v5 = vmul.f32 %v276_v35, %v6638_v59  ;;  %v6717_v27 = vsub.f32 %v909_v49, %v6707_v8 }
 0x196   :  { %1528 = vmatpush.msra.mxu2 %v6705_v51  ;;  %1423 = vmatpush.msra.mxu0 %v6707_v8  ;;  %v1475_v16 = vand.u32 4294901760, %v6705_v51  ;;  %vm278_vm2 = vweird.f32 %v6265_v21  ;;  %v1350_v29 = vadd.f32 0.041655596, %v1349_v6  ;;  %v407_v60 = vor.u32 4788187, %v406_v54 }
 0x197   :  { %1574 = vmatpush.msra.mxu3 %v6707_v8  ;;  %v268_v57 = vmul.f32 %v267_v53, %v6645_v39  ;;  %v6723_v46 = vsub.f32 %v599_v4, %v6696_v38  ;;  %v6726_v59 = vand.u32 4294901760, %v6681_v2  ;;  %v283_v6 = vxor.u32 2147483648, %v277_v5 }
 0x198   :  { %v1476_v3 = vsub.f32 %v6705_v51, %v1475_v16  ;;  %1425 = vmatpush.msra.mxu0 %v6696_v38  ;;  %1531 = vmatpush.msra.mxu2 %v6717_v27  ;;  %v1351_v62 = vmul.f32 %v1350_v29, %v6507_v0  ;;  %v1356_v12 = vmul.f32 -0.00019511016, %v6507_v0  ;;  %v408_v39 = vand.u32 2147483647, %v407_v60 }
 0x199   :  { %v410_v50 = vcvt.s32.f32 %v403_v14  ;;  %1576 = vmatpush.msra.mxu3 %v6696_v38  ;;  %v269_v26 = vadd.f32 1.0, %v268_v57  ;;  %v1364_v42 = vadd.s32 3, %v1347_v23  ;;  %v1481_v4 = vand.u32 4294901760, %v6717_v27 }
 0x19a   :  { %v1477_v18 = vand.u32 4294901760, %v1476_v3  ;;  %1534 = vmatpush.msra.mxu2 %v6723_v46  ;;  %v1352_v37 = vadd.f32 -0.4999988, %v1351_v62  ;;  %v1357_v44 = vadd.f32 0.008332121, %v1356_v12  ;;  %v1431_v17 = vsub.f32 %v6681_v2, %v6726_v59  ;;  %v9554_v3 = vld [vmem:[#allocation10_spill] sm:$0xff] }
 0x19b   :  { %v411_v34 = vmul.f32 %v410_v50, %v408_v39  ;;  %v284_v56 = vsel %vm282_vm15, %v269_v26, %v283_v6  ;;  %v286_v63 = vxor.u32 2147483648, %v269_v26  ;;  %v9549_v10 = vand.u32 2147483647, %v9548_v22 }
 0x19c   :  { %1478 = vmatpush.msra.mxu1 %v1477_v18  ;;  %v1353_v23 = vmul.f32 %v1352_v37, %v6507_v0  ;;  %v1358_v41 = vmul.f32 %v1357_v44, %v6507_v0  ;;  %v6754_v28 = vand.u32 3, %v1364_v42  ;;  %v1482_v58 = vsub.f32 %v6717_v27, %v1481_v4 }
 0x19d   :  { %vm6748_vm3 = vcmp.le.f32.partialorder %v9549_v10, 0.7853982  ;;  %v412_v33 = vxor.u32 2147483648, %v411_v34  ;;  %vm281_vm10 = vcmp.lt.s32.totalorder %v6653_v47, 2  ;;  %v287_v1 = vsel %vm285_vm1, %v286_v63, %v277_v5 }
 0x19e   :  { %v727_v52 = vsel %vm6053_vm4, 0, %v9552_v36  ;;  %v6768_v49 = vsel %vm292_vm0, %v414_v40, %v6607_v19  ;;  %v288_v9 = vsel %vm281_vm10, %v284_v56, %v287_v1  ;;  %v1359_v35 = vadd.f32 -0.16666654, %v1358_v41 }
 0x19f   :  { %v1037_v14 = vsel %vm6531_vm11, 0, %v6576_v32  ;;  %v289_v47 = vsel %vm278_vm2, nan, %v288_v9  ;;  %v6775_v54 = vand.u32 4294901760, %v1431_v17  ;;  %v1483_v53 = vand.u32 4294901760, %v1482_v58 }
 0x1a0   :  { %v1039_v5 = vmul.f32 -0.001358992, %v6593_v15  ;;  %v6778_v27 = vand.u32 4294901760, %v289_v47  ;;  %v1354_v29 = vadd.f32 1.0, %v1353_v23  ;;  %v1360_v19 = vmul.f32 %v1359_v35, %v6507_v0 }
 0x1a1   :  { %vm1366_vm4 = vcmp.lt.s32.totalorder %v6754_v28, 2  ;;  %v413_v40 = vsel %vm292_vm0, %v412_v33, %v411_v34  ;;  %vm1363_vm11 = vweird.f32 %v5825_v45  ;;  %1484 = vmatpush.msra.mxu1 %v1483_v53  ;;  %v1046_v20 = vmul.f32 -0.00019511016, %v6593_v15 }
 0x1a2   :  { %v1040_v21 = vadd.f32 0.041655596, %v1039_v5  ;;  %v1054_v32 = vadd.s32 3, %v1037_v14  ;;  %1427 = vmatpush.msra.mxu0 %v6778_v27  ;;  %1578 = vmatpush.msra.mxu3 %v6778_v27  ;;  %v1361_v60 = vadd.f32 1.0, %v1360_v19  ;;  %v1492_v57 = vsub.f32 %v289_v47, %v6778_v27 }
 0x1a3   :  { %v1487_v0 = vand.u32 4294901760, %v6723_v46  ;;  %v729_v6 = vmul.f32 -0.001358992, %v9554_v3  ;;  %1433 = vmatmul.f32.vlgmr.msra.gmra.mxu0 %v6775_v54  ;;  %vm1367_vm12 = vcmp.eq.s32.totalorder %v6754_v28, 0  ;;  %v1047_v12 = vadd.f32 0.008332121, %v1046_v20  ;;  %1582 = vmatmul.f32.vlgmr.msra.gmra.mxu3 %v6726_v59 }
 0x1a4   :  { %v1041_v62 = vmul.f32 %v1040_v21, %v6593_v15  ;;  %v736_v39 = vmul.f32 -0.00019511016, %v9554_v3  ;;  %1619 = vmatpush.msrb.mxu0 %v1475_v16  ;;  %v1362_v50 = vmul.f32 %v1361_v60, %v6400_v30  ;;  %v1371_v26 = vxor.u32 2147483648, %v1354_v29  ;;  %1537 = vmatpush.msra.mxu2 %v1492_v57 }
 0x1a5   :  { %v1488_v42 = vsub.f32 %v6723_v46, %v1487_v0  ;;  %v730_v18 = vadd.f32 0.041655596, %v729_v6  ;;  %v6803_v37 = vsel %vm6748_vm3, %v9548_v22, %v413_v40  ;;  %vm1370_vm7 = vcmp.eq.s32.totalorder %v6754_v28, 2  ;;  %1540 = vmatmul.f32.vlgmr.msra.gmra.mxu2 %v6681_v2 }
 0x1a6   :  { %v1042_v44 = vadd.f32 -0.4999988, %v1041_v62  ;;  %v1048_v51 = vmul.f32 %v1047_v12, %v6593_v15  ;;  %v1368_v16 = vxor.u32 2147483648, %v1362_v50  ;;  %1623 = vmatpush.msrb.mxu0 %v1481_v4  ;;  %v1055_v30 = vand.u32 3, %v1054_v32 }
 0x1a7   :  { %v1489_v34 = vand.u32 4294901760, %v1488_v42  ;;  %v744_v56 = vadd.s32 3, %v727_v52  ;;  %v731_v17 = vmul.f32 %v730_v18, %v9554_v3  ;;  %v737_v10 = vadd.f32 0.008332121, %v736_v39 }
 0x1a8   :  { %v1043_v46 = vmul.f32 %v1042_v44, %v6593_v15  ;;  %v1049_v63 = vadd.f32 -0.16666654, %v1048_v51  ;;  %v6812_v23 = vmul.f32 %v6803_v37, %v6803_v37  ;;  %v1369_v41 = vsel %vm1367_vm12, %v1354_v29, %v1368_v16  ;;  %1627 = vmatpush.msrb.mxu0 %v1487_v0 }
 0x1a9   :  { %v1372_v58 = vsel %vm1370_vm7, %v1371_v26, %v1362_v50  ;;  %1490 = vmatpush.msra.mxu1 %v1489_v34  ;;  %v1493_v4 = vand.u32 4294901760, %v1492_v57  ;;  %v732_v43 = vadd.f32 -0.4999988, %v731_v17  ;;  %vm1053_vm8 = vweird.f32 %v6071_v7 }
 0x1aa   :  { %v1373_v33 = vsel %vm1366_vm4, %v1369_v41, %v1372_v58  ;;  %v1044_v1 = vadd.f32 1.0, %v1043_v46  ;;  %v1050_v36 = vmul.f32 %v1049_v63, %v6593_v15  ;;  %vm1056_vm13 = vcmp.lt.s32.totalorder %v1055_v30, 2  ;;  %v1377_v46 = vld [vmem:[%s9437_s2 + $0x10] sm:$0xff] }
 0x1ab   :  { %v1374_v52 = vsel %vm1363_vm11, nan, %v1373_v33  ;;  %vm1057_vm6 = vcmp.eq.s32.totalorder %v1055_v30, 0  ;;  %v738_v9 = vmul.f32 %v737_v10, %v9554_v3  ;;  %1631 = vmatpush.msrb.mxu0 %v1493_v4  ;;  %v733_v28 = vmul.f32 %v732_v43, %v9554_v3  ;;  %v9556_v43 = vld [vmem:[#allocation6_spill] sm:$0xff] }
 0x1ac   :  { %v6823_v35 = vand.u32 4294901760, %v1374_v52  ;;  %v1051_v14 = vadd.f32 1.0, %v1050_v36  ;;  %v745_v47 = vand.u32 3, %v744_v56  ;;  %v1061_v53 = vxor.u32 2147483648, %v1044_v1 }
 0x1ad   :  { %v739_v5 = vadd.f32 -0.16666654, %v738_v9  ;;  %v1494_v15 = vsub.f32 %v1492_v57, %v1493_v4  ;;  %v419_v29 = vmul.f32 -0.001358992, %v6812_v23  ;;  %v734_v40 = vadd.f32 1.0, %v733_v28  ;;  %v1376_v57 = vld [vmem:[%s9437_s2 + $0x8] sm:$0xff] }
 0x1ae   :  { %v6828_v45 = vsub.f32 %v1374_v52, %v6823_v35  ;;  %1699 = vmatpush.msrb.mxu2 %v6823_v35  ;;  %v1052_v19 = vmul.f32 %v1051_v14, %v6568_v61  ;;  %v426_v21 = vmul.f32 -0.00019511016, %v6812_v23  ;;  %vm1060_vm5 = vcmp.eq.s32.totalorder %v1055_v30, 2  ;;  %v1378_v4 = vld [vmem:[%s9437_s2 + $0x18] sm:$0xff] }
 0x1af   :  { %v740_v20 = vmul.f32 %v739_v5, %v9554_v3  ;;  %v1495_v32 = vand.u32 4294901760, %v1494_v15  ;;  %v420_v60 = vadd.f32 0.041655596, %v419_v29  ;;  %vm746_vm14 = vcmp.lt.s32.totalorder %v745_v47, 2 }
 0x1b0   :  { %v1753_v0 = vand.u32 4294901760, %v6828_v45  ;;  %v1058_v6 = vxor.u32 2147483648, %v1052_v19  ;;  %v417_v61 = vsel %vm6748_vm3, 0, %v6768_v49  ;;  %1806 = vmatpush.msra.mxu0 %v6828_v45  ;;  %v1062_v62 = vsel %vm1060_vm5, %v1061_v53, %v1052_v19  ;;  %v9555_v49 = vld [vmem:[#allocation8_spill] sm:$0xff] }
 0x1b1   :  { %v741_v12 = vadd.f32 1.0, %v740_v20  ;;  %1496 = vmatpush.msra.mxu1 %v1495_v32  ;;  %v421_v3 = vmul.f32 %v420_v60, %v6812_v23  ;;  %v427_v39 = vadd.f32 0.008332121, %v426_v21  ;;  %v751_v42 = vxor.u32 2147483648, %v734_v40 }
 0x1b2   :  { %v1754_v50 = vsub.f32 %v6828_v45, %v1753_v0  ;;  %v1059_v26 = vsel %vm1057_vm6, %v1044_v1, %v1058_v6  ;;  %v1400_v18 = vsel %vm9509_vm9, %v1376_v57, 0  ;;  %1498 = vmatmul.f32.vlgmr.msra.gmra.mxu1 %v6665_v11  ;;  %vm747_vm15 = vcmp.eq.s32.totalorder %v745_v47, 0 }
 0x1b3   :  { %v1063_v13 = vsel %vm1056_vm13, %v1059_v26, %v1062_v62  ;;  %v742_v44 = vmul.f32 %v741_v12, %v9555_v49  ;;  %v422_v51 = vadd.f32 -0.4999988, %v421_v3  ;;  %v428_v16 = vmul.f32 %v427_v39, %v6812_v23  ;;  %1662 = vmatpush.msrb.mxu1 %v6692_v48 }
 0x1b4   :  { %v1755_v34 = vand.u32 4294901760, %v1754_v50  ;;  %v1064_v56 = vsel %vm1053_vm8, nan, %v1063_v13  ;;  %vm750_vm0 = vcmp.eq.s32.totalorder %v745_v47, 2  ;;  %v434_v10 = vadd.s32 3, %v417_v61 }
 0x1b5   :  { %v6858_v63 = vand.u32 4294901760, %v1064_v56  ;;  %v748_v30 = vxor.u32 2147483648, %v742_v44  ;;  %v423_v17 = vmul.f32 %v422_v51, %v6812_v23  ;;  %1664 = vmatpush.msrb.mxu1 %v6707_v8  ;;  %v752_v48 = vsel %vm750_vm0, %v751_v42, %v742_v44 }
 0x1b6   :  { %1756 = vmatpush.msrb.mxu3 %v1755_v34  ;;  %v429_v41 = vadd.f32 -0.16666654, %v428_v16  ;;  %v6862_v58 = vand.u32 4294901760, %v1400_v18  ;;  %v1403_v7 = vsel %vm9509_vm9, %v1377_v46, 0  ;;  %vm743_vm1 = vweird.f32 %v9556_v43 }
 0x1b7   :  { %v6869_v33 = vsub.f32 %v1064_v56, %v6858_v63  ;;  %1701 = vmatpush.msrb.mxu2 %v6858_v63  ;;  %v749_v1 = vsel %vm747_vm15, %v734_v40, %v748_v30  ;;  %v424_v36 = vadd.f32 1.0, %v423_v17  ;;  %1666 = vmatpush.msrb.mxu1 %v6696_v38  ;;  %v6874_v8 = vand.u32 4294901760, %v1403_v7 }
 0x1b8   :  { %v753_v52 = vsel %vm746_vm14, %v749_v1, %v752_v48  ;;  %v430_v9 = vmul.f32 %v429_v41, %v6812_v23  ;;  %v6880_v14 = vsub.f32 %v1400_v18, %v6862_v58  ;;  %v1406_v5 = vsel %vm9509_vm9, %v1378_v4, 0 }
 0x1b9   :  { %v1759_v28 = vand.u32 4294901760, %v6869_v33  ;;  %v754_v53 = vsel %vm743_vm1, nan, %v753_v52  ;;  %1809 = vmatpush.msra.mxu0 %v6869_v33  ;;  %1668 = vmatpush.msrb.mxu1 %v6778_v27  ;;  %v6886_v38 = vsub.f32 %v1403_v7, %v6874_v8  ;;  %v435_v19 = vand.u32 3, %v434_v10 }
 0x1ba   :  { %v6889_v15 = vand.u32 4294901760, %v754_v53  ;;  %v431_v47 = vadd.f32 1.0, %v430_v9  ;;  %v6892_v23 = vand.u32 4294901760, %v6880_v14  ;;  %1545 = vmatmul.f32.gmra.mxu2 %v6880_v14  ;;  %v441_v40 = vxor.u32 2147483648, %v424_v36  ;;  %1502 = vmatmul.f32.gmra.mxu1 %v6862_v58 }
 0x1bb   :  { %1850 = vmatpush.msra.mxu1 %v6823_v35  ;;  %v1760_v29 = vsub.f32 %v6869_v33, %v1759_v28  ;;  %v6898_v27 = vand.u32 4294901760, %v6886_v38  ;;  %v6907_v60 = vand.u32 4294901760, %v1406_v5  ;;  %vm436_vm2 = vcmp.lt.s32.totalorder %v435_v19, 2 }
 0x1bc   :  { %v1764_v21 = vsub.f32 %v754_v53, %v6889_v15  ;;  %1703 = vmatpush.msrb.mxu2 %v6889_v15  ;;  %v432_v20 = vmul.f32 %v431_v47, %v6803_v37  ;;  %v1439_v32 = vsub.f32 %v6880_v14, %v6892_v23  ;;  %1588 = vmatmul.f32.gmra.mxu3 %v6892_v23  ;;  %vm437_vm3 = vcmp.eq.s32.totalorder %v435_v19, 0  ;;  %v6982_v47 = vpop.permute.xlu1 %1392 }
 0x1bd   :  { %v1761_v57 = vand.u32 4294901760, %v1760_v29  ;;  %1852 = vmatpush.msra.mxu1 %v6858_v63  ;;  %vm440_vm10 = vcmp.eq.s32.totalorder %v435_v19, 2  ;;  %v1447_v37 = vsub.f32 %v6886_v38, %v6898_v27  ;;  %v6914_v50 = vsub.f32 %v1406_v5, %v6907_v60 }
 0x1be   :  { %v1765_v6 = vand.u32 4294901760, %v1764_v21  ;;  %v438_v61 = vxor.u32 2147483648, %v432_v20  ;;  %v1440_v62 = vand.u32 4294901760, %v1439_v32  ;;  %1812 = vmatpush.msra.mxu0 %v1764_v21  ;;  %v442_v39 = vsel %vm440_vm10, %v441_v40, %v432_v20 }
 0x1bf   :  { %1762 = vmatpush.msrb.mxu3 %v1761_v57  ;;  %1854 = vmatpush.msra.mxu1 %v6889_v15  ;;  %vm433_vm4 = vweird.f32 %v9548_v22  ;;  %v1448_v49 = vand.u32 4294901760, %v1447_v37  ;;  %v1454_v44 = vand.u32 4294901760, %v6914_v50  ;;  %v9558_v32 = vmov 2102212464  }
 0x1c0   :  { %v1766_v12 = vsub.f32 %v1764_v21, %v1765_v6  ;;  %v439_v3 = vsel %vm437_vm3, %v424_v36, %v438_v61  ;;  %1441 = vmatmul.f32.gmra.mxu0 %v1440_v62  ;;  %v9560_v37 = vmov 1326507024  }
 0x1c1   :  { %v443_v26 = vsel %vm436_vm2, %v439_v3, %v442_v39  ;;  %v1455_v16 = vsub.f32 %v6914_v50, %v1454_v44 }
 0x1c2   :  { %v1767_v42 = vand.u32 4294901760, %v1766_v12  ;;  %v444_v18 = vsel %vm433_vm4, nan, %v443_v26  ;;  %1550 = vmatmul.f32.gmra.mxu2 %v6886_v38  ;;  %1506 = vmatmul.f32.gmra.mxu1 %v6874_v8 }
 0x1c3   :  { %v1704_v13 = vand.u32 4294901760, %v444_v18  ;;  %v1456_v46 = vand.u32 4294901760, %v1455_v16 }
 0x1c4   :  { %1768 = vmatpush.msrb.mxu3 %v1767_v42 }
 0x1c5   :  { %v1770_v51 = vsub.f32 %v444_v18, %v1704_v13  ;;  %1705 = vmatpush.msrb.mxu2 %v1704_v13  ;;  %1594 = vmatmul.f32.gmra.mxu3 %v6898_v27 }
 0x1c6   :  { %1856 = vmatpush.msra.mxu1 %v1704_v13 }
 0x1c7   :  { %1897 = vmatpush.msra.mxu2 %v1753_v0  ;;  %v1771_v22 = vand.u32 4294901760, %v1770_v51  ;;  %1815 = vmatpush.msra.mxu0 %v1770_v51 }
 0x1c8   :  { %1449 = vmatmul.f32.gmra.mxu0 %v1448_v49 }
 0x1c9   :  { %1901 = vmatpush.msra.mxu2 %v1759_v28  ;;  %v1772_v34 = vsub.f32 %v1770_v51, %v1771_v22 }
 0x1ca   :  { %1555 = vmatmul.f32.gmra.mxu2 %v6914_v50  ;;  %1510 = vmatmul.f32.gmra.mxu1 %v6907_v60 }
 0x1cb   :  { %1905 = vmatpush.msra.mxu2 %v1765_v6  ;;  %v1773_v56 = vand.u32 4294901760, %v1772_v34  ;;  %v9559_v6 = vmov 920167782  }
 0x1cd   :  { %1909 = vmatpush.msra.mxu2 %v1771_v22  ;;  %1774 = vmatpush.msrb.mxu3 %v1773_v56 }
 0x1ce   :  { %1600 = vmatmul.f32.gmra.mxu3 %v1454_v44 }
 0x1cf   :  { %1940 = vmatpush.msra.mxu3 %v6823_v35 }
 0x1d0   :  { %1457 = vmatmul.f32.gmra.mxu0 %v1456_v46 }
 0x1d1   :  { %1942 = vmatpush.msra.mxu3 %v6858_v63 }
 0x1d2   :  { %1711 = vmatmul.f32.vlgmr.msrb.gmra.mxu2 %v6775_v54  ;;  %1670 = vmatmul.f32.vlgmr.msrb.gmra.mxu1 %v6665_v11  ;;  %v6959_v54 = vpop.permute.xlu2 %1388 }
 0x1d3   :  { %1944 = vmatpush.msra.mxu3 %v6889_v15 }
 0x1d5   :  { %1946 = vmatpush.msra.mxu3 %v1704_v13 }
 0x1d6   :  { %1776 = vmatmul.f32.vlgmr.msrb.gmra.mxu3 %v6665_v11 }
 0x1d8   :  { %1633 = vmatmul.f32.vlgmr.msrb.gmra.mxu0 %v6665_v11 }
 0x1da   :  { %1719 = vmatmul.f32.gmra.mxu2 %v1440_v62  ;;  %1674 = vmatmul.f32.gmra.mxu1 %v6862_v58  ;;  %v6965_v0 = vpop.permute.xlu2 %1380 }
 0x1de   :  { %1780 = vmatmul.f32.gmra.mxu3 %v6862_v58 }
 0x1e0   :  { %1637 = vmatmul.f32.gmra.mxu0 %v6862_v58 }
 0x1e2   :  { %1727 = vmatmul.f32.gmra.mxu2 %v1448_v49  ;;  %1678 = vmatmul.f32.gmra.mxu1 %v6874_v8 }
 0x1e6   :  { %1784 = vmatmul.f32.gmra.mxu3 %v6874_v8 }
 0x1e8   :  { %1641 = vmatmul.f32.gmra.mxu0 %v6874_v8 }
 0x1ea   :  { %1735 = vmatmul.f32.gmra.mxu2 %v1456_v46  ;;  %1682 = vmatmul.f32.gmra.mxu1 %v6907_v60 }
 0x1ee   :  { %1788 = vmatmul.f32.gmra.mxu3 %v6907_v60 }
 0x1f0   :  { %1645 = vmatmul.f32.gmra.mxu0 %v6907_v60 }
 0x1f2   :  { %1911 = vmatmul.f32.vlgmr.msra.gmra.mxu2 %v6665_v11  ;;  %1860 = vmatmul.f32.vlgmr.msra.gmra.mxu1 %v6726_v59 }
 0x1f6   :  { %1948 = vmatmul.f32.vlgmr.msra.gmra.mxu3 %v6665_v11 }
 0x1f8   :  { %1818 = vmatmul.f32.vlgmr.msra.gmra.mxu0 %v6681_v2 }
 0x1fa   :  { %1915 = vmatmul.f32.gmra.mxu2 %v6862_v58  ;;  %1866 = vmatmul.f32.gmra.mxu1 %v6892_v23 }
 0x1fe   :  { %1952 = vmatmul.f32.gmra.mxu3 %v6862_v58 }
 0x200   :  { %1823 = vmatmul.f32.gmra.mxu0 %v6880_v14 }
 0x202   :  { %1919 = vmatmul.f32.gmra.mxu2 %v6874_v8  ;;  %1872 = vmatmul.f32.gmra.mxu1 %v6898_v27 }
 0x206   :  { %1956 = vmatmul.f32.gmra.mxu3 %v6874_v8 }
 0x208   :  { %1828 = vmatmul.f32.gmra.mxu0 %v6886_v38 }
 0x20a   :  { %1923 = vmatmul.f32.gmra.mxu2 %v6907_v60  ;;  %1878 = vmatmul.f32.gmra.mxu1 %v1454_v44 }
 0x20e   :  { %1960 = vmatmul.f32.gmra.mxu3 %v6907_v60 }
 0x210   :  { %1833 = vmatmul.f32.gmra.mxu0 %v6914_v50 }
 0x220   :  { %v1434_v2 = vpop.f32.mrf.mxu0 }
 0x221   :  { %v1435_v30 = vadd.f32 %v1434_v2, %v6965_v0 }
 0x226   :  { %v1583_v7 = vpop.f32.mrf.mxu3 }
 0x228   :  { %v1541_v41 = vpop.f32.mrf.mxu2 }
 0x22f   :  { %v1499_v11 = vpop.f32.mrf.mxu1 }
 0x230   :  { %v1500_v10 = vadd.f32 %v1499_v11, %v1435_v30 }
 0x232   :  { %v1542_v58 = vadd.f32 %v1541_v41, %v1500_v10 }
 0x234   :  { %v1584_v4 = vadd.f32 %v1583_v7, %v1542_v58  ;;  %v7025_v58 = vpop.permute.xlu1 %1384 }
 0x237   :  { %v6957_v59 = vpop.f32.mrf.mxu1 }
 0x23d   :  { %v6961_v35 = vpop.f32.mrf.mxu0 }
 0x23f   :  { %v6963_v45 = vpop.f32.mrf.mxu1 }
 0x245   :  { %v6967_v63 = vpop.f32.mrf.mxu0 }
 0x247   :  { %v6970_v17 = vpop.f32.mrf.mxu1 }
 0x24d   :  { %v6972_v48 = vpop.f32.mrf.mxu0 }
 0x24f   :  { %v1671_v1 = vpop.f32.mrf.mxu1 }
 0x255   :  { %v1634_v33 = vpop.f32.mrf.mxu0 }
 0x256   :  { %v1635_v36 = vadd.f32 %v1634_v33, %v1584_v4 }
 0x258   :  { %v6974_v8 = vadd.f32 %v1671_v1, %v1635_v36  ;;  %v1443_v36 = vadd.f32 %v6961_v35, %v7025_v58 }
 0x25a   :  { %9557 = vst [vmem:[#allocation11_spill] sm:$0xff] %v6974_v8  ;;  %v1967_v43 = vand.u32 2139095040, %v6974_v8  ;;  %v1964_v14 = vand.u32 2147483647, %v6974_v8 }
 0x25c   :  { %v1968_v52 = vshrl.u32 %v1967_v43, 23  ;;  %v1971_v53 = vand.u32 8388607, %v1964_v14 }
 0x25e   :  { %v5460_v9 = vadd.s32 4294967169, %v1968_v52  ;;  %v1972_v23 = vor.u32 8388608, %v1971_v53 }
 0x260   :  { %v1974_v28 = vadd.s32 1, %v5460_v9  ;;  %v7002_v18 = vshll.u32 %v1972_v23, 8 }
 0x262   :  { %vm1975_vm11 = vcmp.gt.s32.totalorder %v1974_v28, 0  ;;  %v2013_v46 = vand.u32 65535, %v7002_v18  ;;  %v2014_v11 = vshrl.u32 %v7002_v18, 16 }
 0x263   :  { %v1976_v38 = vsel %vm1975_vm11, %v1974_v28, 0 }
 0x264   :  { %v1978_v5 = vand.u32 31, %v1976_v38  ;;  %v6984_v29 = vshrl.u32 %v1976_v38, 5 }
 0x266   :  { %v6980_v15 = vsub.s32 32, %v1978_v5  ;;  %v1981_v19 = vshll.u32 %v9535_v25, %v1978_v5  ;;  %v1984_v40 = vshll.u32 %v9526_v55, %v1978_v5  ;;  %v1987_v20 = vshll.u32 %v9527_v24, %v1978_v5 }
 0x267   :  { %v1990_v57 = vshll.u32 %v9558_v32, %v1978_v5  ;;  %v1993_v62 = vshll.u32 %v9559_v6, %v1978_v5  ;;  %vm1996_vm12 = vcmp.lt.s32.totalorder %v6984_v29, 1  ;;  %vm1999_vm7 = vcmp.lt.s32.totalorder %v6984_v29, 4 }
 0x268   :  { %v1982_v27 = vshrl.u32 %v9526_v55, %v6980_v15  ;;  %v1985_v21 = vshrl.u32 %v9527_v24, %v6980_v15  ;;  %v1988_v60 = vshrl.u32 %v9558_v32, %v6980_v15  ;;  %v1991_v61 = vshrl.u32 %v9559_v6, %v6980_v15 }
 0x269   :  { %v1994_v12 = vshrl.u32 %v9560_v37, %v6980_v15  ;;  %vm1998_vm8 = vcmp.lt.s32.totalorder %v6984_v29, 3  ;;  %vm1997_vm13 = vcmp.lt.s32.totalorder %v6984_v29, 2  ;;  %v1451_v29 = vadd.f32 %v6967_v63, %v6959_v54 }
 0x26a   :  { %v1983_v3 = vor.u32 %v1982_v27, %v1981_v19  ;;  %v1986_v39 = vor.u32 %v1985_v21, %v1984_v40  ;;  %v1989_v50 = vor.u32 %v1988_v60, %v1987_v20  ;;  %v1992_v26 = vor.u32 %v1991_v61, %v1990_v57 }
 0x26b   :  { %v1995_v42 = vor.u32 %v1994_v12, %v1993_v62  ;;  %v1504_v21 = vadd.f32 %v6957_v59, %v1443_v36  ;;  %v1980_v62 = vshrl.u32 %v9535_v25, %v6980_v15 }
 0x26c   :  { %v2004_v13 = vsel %vm1996_vm12, %v1983_v3, %v1986_v39  ;;  %v2008_v49 = vsel %vm1996_vm12, %v1986_v39, %v1989_v50  ;;  %v2005_v44 = vsel %vm1999_vm7, %v1992_v26, 920167782  ;;  %v2001_v60 = vsel %vm1999_vm7, %v1989_v50, 2102212464 }
 0x26d   :  { %v2009_v51 = vsel %vm1999_vm7, %v1995_v42, 1326507024  ;;  %v2006_v22 = vsel %vm1998_vm8, %v1989_v50, %v2005_v44  ;;  %v2002_v44 = vsel %vm1998_vm8, %v1986_v39, %v2001_v60 }
 0x26e   :  { %v2010_v16 = vsel %vm1998_vm8, %v1992_v26, %v2009_v51  ;;  %v2007_v34 = vsel %vm1997_vm13, %v2004_v13, %v2006_v22  ;;  %v1546_v22 = vpop.f32.mrf.mxu2 }
 0x26f   :  { %v2011_v56 = vsel %vm1997_vm13, %v2008_v49, %v2010_v16  ;;  %v2037_v10 = vand.u32 65535, %v2007_v34  ;;  %v2038_v41 = vshrl.u32 %v2007_v34, 16  ;;  %v2000_v49 = vsel %vm1996_vm12, %v1980_v62, %v1983_v3  ;;  %v1589_v3 = vpop.f32.mrf.mxu3 }
 0x270   :  { %v2015_v2 = vand.u32 65535, %v2011_v56  ;;  %v2016_v30 = vshrl.u32 %v2011_v56, 16  ;;  %v1547_v56 = vadd.f32 %v1546_v22, %v1504_v21 }
 0x271   :  { %v2040_v33 = vmul.u32 %v2038_v41, %v2013_v46  ;;  %v2041_v1 = vmul.u32 %v2037_v10, %v2014_v11  ;;  %v2039_v28 = vmul.u32 %v2037_v10, %v2013_v46  ;;  %v2042_v23 = vmul.u32 %v2038_v41, %v2014_v11 }
 0x272   :  { %v2018_v7 = vmul.u32 %v2016_v30, %v2013_v46  ;;  %v2019_v4 = vmul.u32 %v2015_v2, %v2014_v11  ;;  %v2017_v43 = vmul.u32 %v2015_v2, %v2013_v46  ;;  %v2020_v9 = vmul.u32 %v2016_v30, %v2014_v11  ;;  %v1638_v30 = vpop.f32.mrf.mxu0 }
 0x273   :  { %v2043_v53 = vshll.u32 %v2040_v33, 16  ;;  %v2045_v40 = vshll.u32 %v2041_v1, 16  ;;  %v2044_v13 = vshrl.u32 %v2040_v33, 16  ;;  %v2046_v16 = vshrl.u32 %v2041_v1, 16  ;;  %v1675_v1 = vpop.f32.mrf.mxu1 }
 0x274   :  { %v2021_v52 = vshll.u32 %v2018_v7, 16  ;;  %v2023_v38 = vshll.u32 %v2019_v4, 16  ;;  %v2022_v12 = vshrl.u32 %v2018_v7, 16  ;;  %v2024_v50 = vshrl.u32 %v2019_v4, 16 }
 0x275   :  { %vm2047_vm5 = vc.u32 %v2039_v28, %v2043_v53  ;;  %v2049_v27 = vadd.s32 %v2043_v53, %v2039_v28  ;;  %v2003_v11 = vsel %vm1997_vm13, %v2000_v49, %v2002_v44  ;;  %v1590_v10 = vadd.f32 %v1589_v3, %v1547_v56 }
 0x276   :  { %vm2025_vm6 = vc.u32 %v2017_v43, %v2021_v52  ;;  %v2027_v5 = vadd.s32 %v2021_v52, %v2017_v43  ;;  %v2048_v35 = vsel %vm2047_vm5, 1, %v9534_v31  ;;  %v2057_v41 = vmul.u32 %v7002_v18, %v2003_v11 }
 0x277   :  { %v2026_v19 = vsel %vm2025_vm6, 1, %v9534_v31  ;;  %v2050_v61 = vadd.s32 %v2048_v35, %v2042_v23  ;;  %vm2051_vm15 = vc.u32 %v2049_v27, %v2045_v40  ;;  %v7044_v15 = vadd.s32 %v2049_v27, %v2045_v40  ;;  %v1595_v35 = vpop.f32.mrf.mxu3 }
 0x278   :  { %v2028_v20 = vadd.s32 %v2026_v19, %v2020_v9  ;;  %vm2029_vm14 = vc.u32 %v2027_v5, %v2023_v38  ;;  %v2052_v42 = vsel %vm2051_vm15, 1, %v9534_v31  ;;  %v1639_v4 = vadd.f32 %v1638_v30, %v1590_v10  ;;  %v1551_v19 = vpop.f32.mrf.mxu2 }
 0x279   :  { %v2030_v57 = vsel %vm2029_vm14, 1, %v9534_v31  ;;  %v2054_v59 = vadd.s32 %v2052_v42, %v2050_v61  ;;  %v1508_v38 = vadd.f32 %v6963_v45, %v1451_v29 }
 0x27a   :  { %v2032_v26 = vadd.s32 %v2030_v57, %v2028_v20  ;;  %v7051_v43 = vadd.f32 %v1675_v1, %v1639_v4  ;;  %v1642_v60 = vpop.f32.mrf.mxu0 }
 0x27b   :  { %v2055_v34 = vadd.s32 %v2054_v59, %v2044_v13  ;;  %v1552_v21 = vadd.f32 %v1551_v19, %v1508_v38 }
 0x27c   :  { %v2033_v51 = vadd.s32 %v2032_v26, %v2022_v12  ;;  %9561 = vst [vmem:[#allocation9_spill] sm:$0xff] %v7051_v43  ;;  %v2277_v9 = vand.u32 2139095040, %v7051_v43  ;;  %v9472_v23 = vand.u32 2147483647, %v7051_v43 }
 0x27d   :  { %v2056_v2 = vadd.s32 %v2055_v34, %v2046_v16  ;;  %v1596_v61 = vadd.f32 %v1595_v35, %v1552_v21 }
 0x27e   :  { %v7042_v46 = vadd.s32 %v2033_v51, %v2024_v50  ;;  %v2278_v53 = vshrl.u32 %v2277_v9, 23  ;;  %v2281_v63 = vand.u32 8388607, %v9472_v23  ;;  %v1679_v51 = vpop.f32.mrf.mxu1 }
 0x27f   :  { %v2060_v39 = vadd.s32 1, %v2056_v2  ;;  %v1643_v26 = vadd.f32 %v1642_v60, %v1596_v61 }
 0x280   :  { %vm2059_vm0 = vc.u32 %v7042_v46, %v7044_v15  ;;  %v5466_v5 = vadd.s32 4294967169, %v2278_v53  ;;  %v2282_v42 = vor.u32 8388608, %v2281_v63  ;;  %v1459_v53 = vadd.f32 %v6972_v48, %v6982_v47 }
 0x281   :  { %v2061_v7 = vsel %vm2059_vm0, %v2060_v39, %v2056_v2  ;;  %v7084_v10 = vadd.f32 %v1679_v51, %v1643_v26  ;;  %v2058_v61 = vadd.s32 %v7044_v15, %v7042_v46 }
 0x282   :  { %v2062_v33 = vadd.s32 %v2061_v7, %v2057_v41  ;;  %v2284_v27 = vadd.s32 1, %v5466_v5 }
 0x284   :  { %v2063_v36 = vadd.s32 536870912, %v2062_v33  ;;  %vm2285_vm2 = vcmp.gt.s32.totalorder %v2284_v27, 0 }
 0x285   :  { %v2286_v20 = vsel %vm2285_vm2, %v2284_v27, 0 }
 0x286   :  { %v7055_v52 = vshrl.u32 %v2063_v36, 30  ;;  %v2288_v57 = vand.u32 31, %v2286_v20  ;;  %v7068_v13 = vshrl.u32 %v2286_v20, 5  ;;  %v7095_v36 = vshll.u32 %v2282_v42, 8 }
 0x288   :  { %v2065_v28 = vshll.u32 %v7055_v52, 30  ;;  %v2289_v62 = vsub.s32 32, %v2288_v57  ;;  %v2291_v59 = vshll.u32 %v9535_v25, %v2288_v57  ;;  %v2294_v44 = vshll.u32 %v9526_v55, %v2288_v57 }
 0x289   :  { %v2297_v22 = vshll.u32 %v9527_v24, %v2288_v57  ;;  %v2300_v34 = vshll.u32 %v9558_v32, %v2288_v57  ;;  %v2303_v56 = vshll.u32 %v9559_v6, %v2288_v57  ;;  %vm2306_vm3 = vcmp.lt.s32.totalorder %v7068_v13, 1 }
 0x28a   :  { %v7060_v18 = vsub.s32 %v2062_v33, %v2065_v28  ;;  %v2292_v49 = vshrl.u32 %v9526_v55, %v2289_v62  ;;  %v2295_v50 = vshrl.u32 %v9527_v24, %v2289_v62  ;;  %v2298_v16 = vshrl.u32 %v9558_v32, %v2289_v62 }
 0x28b   :  { %v2301_v3 = vshrl.u32 %v9559_v6, %v2289_v62  ;;  %v2304_v30 = vshrl.u32 %v9560_v37, %v2289_v62  ;;  %vm2309_vm10 = vcmp.lt.s32.totalorder %v7068_v13, 4  ;;  %vm2308_vm4 = vcmp.lt.s32.totalorder %v7068_v13, 3 }
 0x28c   :  { %v2068_v40 = vsub.s32 0, %v7060_v18  ;;  %vm2067_vm1 = vcmp.lt.s32.totalorder %v7060_v18, 0  ;;  %v7078_v11 = vor.u32 %v2292_v49, %v2291_v59  ;;  %v7080_v2 = vor.u32 %v2295_v50, %v2294_v44 }
 0x28d   :  { %v2299_v39 = vor.u32 %v2298_v16, %v2297_v22  ;;  %v2302_v7 = vor.u32 %v2301_v3, %v2300_v34  ;;  %v2305_v4 = vor.u32 %v2304_v30, %v2303_v56  ;;  %vm2307_vm11 = vcmp.lt.s32.totalorder %v7068_v13, 2 }
 0x28e   :  { %v2069_v45 = vsel %vm2067_vm1, %v2068_v40, %v7060_v18  ;;  %v2314_v33 = vsel %vm2306_vm3, %v7078_v11, %v7080_v2  ;;  %v2587_v28 = vand.u32 2139095040, %v7084_v10  ;;  %v2323_v21 = vand.u32 65535, %v7095_v36 }
 0x28f   :  { %v2070_v12 = vclz %v2069_v45  ;;  %v2315_v1 = vsel %vm2309_vm10, %v2302_v7, 920167782  ;;  %v2318_v9 = vsel %vm2306_vm3, %v7080_v2, %v2299_v39  ;;  %v2319_v5 = vsel %vm2309_vm10, %v2305_v4, 1326507024 }
 0x290   :  { %v2316_v29 = vsel %vm2308_vm4, %v2299_v39, %v2315_v1  ;;  %v2320_v19 = vsel %vm2308_vm4, %v2302_v7, %v2319_v5  ;;  %v2324_v63 = vshrl.u32 %v7095_v36, 16  ;;  %v2588_v60 = vshrl.u32 %v2587_v28, 23 }
 0x291   :  { %v5461_v41 = vadd.s32 4294967294, %v2070_v12  ;;  %v2317_v38 = vsel %vm2307_vm11, %v2314_v33, %v2316_v29  ;;  %v2321_v27 = vsel %vm2307_vm11, %v2318_v9, %v2320_v19  ;;  %v7119_v57 = vadd.f32 %v6970_v17, %v1459_v53 }
 0x292   :  { %v2348_v40 = vshrl.u32 %v2317_v38, 16  ;;  %v2347_v20 = vand.u32 65535, %v2317_v38  ;;  %v2325_v35 = vand.u32 65535, %v2321_v27  ;;  %v2326_v45 = vshrl.u32 %v2321_v27, 16 }
 0x293   :  { %vm5462_vm12 = vcmp.lt.s32.totalorder %v5461_v41, 0  ;;  %v2290_v26 = vshrl.u32 %v9535_v25, %v2289_v62  ;;  %v9471_v49 = vand.u32 2147483647, %v7084_v10  ;;  %v5472_v56 = vadd.s32 4294967169, %v2588_v60 }
 0x294   :  { %v7116_v48 = vsel %vm5462_vm12, 0, %v5461_v41  ;;  %v2350_v12 = vmul.u32 %v2348_v40, %v2323_v21  ;;  %v2328_v42 = vmul.u32 %v2326_v45, %v2323_v21  ;;  %v2329_v59 = vmul.u32 %v2325_v35, %v2324_v63 }
 0x295   :  { %v2074_v44 = vsub.s32 32, %v7116_v48  ;;  %v2349_v50 = vmul.u32 %v2347_v20, %v2323_v21  ;;  %v2351_v51 = vmul.u32 %v2347_v20, %v2324_v63  ;;  %v2078_v16 = vsub.s32 4294967266, %v7116_v48 }
 0x296   :  { %v2353_v22 = vshll.u32 %v2350_v12, 16  ;;  %v2327_v34 = vmul.u32 %v2325_v35, %v2323_v21  ;;  %v2331_v17 = vshll.u32 %v2328_v42, 16  ;;  %v2311_v46 = vsel %vm2309_vm10, %v2299_v39, 2102212464 }
 0x297   :  { %v2330_v15 = vmul.u32 %v2326_v45, %v2324_v63  ;;  %v2352_v3 = vmul.u32 %v2348_v40, %v2324_v63  ;;  %v2333_v62 = vshll.u32 %v2329_v59, 16  ;;  %v2355_v4 = vshll.u32 %v2351_v51, 16 }
 0x298   :  { %vm2357_vm7 = vc.u32 %v2349_v50, %v2353_v22  ;;  %vm2335_vm8 = vc.u32 %v2327_v34, %v2331_v17  ;;  %v2337_v30 = vadd.s32 %v2331_v17, %v2327_v34  ;;  %v2359_v33 = vadd.s32 %v2353_v22, %v2349_v50 }
 0x299   :  { %v2358_v41 = vsel %vm2357_vm7, 1, %v9534_v31  ;;  %v2336_v7 = vsel %vm2335_vm8, 1, %v9534_v31  ;;  %v2079_v29 = vadd.s32 127, %v2078_v16  ;;  %v2594_v28 = vadd.s32 1, %v5472_v56 }
 0x29a   :  { %v2360_v1 = vadd.s32 %v2358_v41, %v2352_v3  ;;  %v2338_v9 = vadd.s32 %v2336_v7, %v2330_v15  ;;  %vm2339_vm13 = vc.u32 %v2337_v30, %v2333_v62  ;;  %v2310_v39 = vsel %vm2306_vm3, %v2290_v26, %v7078_v11  ;;  %v1556_v15 = vpop.f32.mrf.mxu2 }
 0x29b   :  { %v2312_v53 = vsel %vm2308_vm4, %v7080_v2, %v2311_v46  ;;  %v2340_v38 = vsel %vm2339_vm13, 1, %v9534_v31  ;;  %vm2361_vm6 = vc.u32 %v2359_v33, %v2355_v4  ;;  %v2332_v5 = vshrl.u32 %v2328_v42, 16 }
 0x29c   :  { %v2342_v19 = vadd.s32 %v2340_v38, %v2338_v9  ;;  %v2362_v40 = vsel %vm2361_vm6, 1, %v9534_v31  ;;  %vm2595_vm5 = vcmp.gt.s32.totalorder %v2594_v28, 0  ;;  %v2354_v27 = vshrl.u32 %v2350_v12, 16 }
 0x29d   :  { %v2364_v21 = vadd.s32 %v2362_v40, %v2360_v1  ;;  %v2591_v63 = vand.u32 8388607, %v9471_v49  ;;  %v2596_v20 = vsel %vm2595_vm5, %v2594_v28, 0  ;;  %v2313_v11 = vsel %vm2307_vm11, %v2310_v39, %v2312_v53 }
 0x29e   :  { %v2334_v35 = vshrl.u32 %v2329_v59, 16  ;;  %v2343_v45 = vadd.s32 %v2342_v19, %v2332_v5  ;;  %v2598_v2 = vand.u32 31, %v2596_v20  ;;  %v2075_v60 = vshll.u32 %v7060_v18, %v7116_v48  ;;  %v1601_v5 = vpop.f32.mrf.mxu3 }
 0x29f   :  { %v2076_v26 = vshrl.u32 %v2058_v61, %v2074_v44  ;;  %v2356_v42 = vshrl.u32 %v2351_v51, 16  ;;  %v2365_v50 = vadd.s32 %v2364_v21, %v2354_v27  ;;  %v2080_v22 = vshll.u32 %v2079_v29, 23 }
 0x2a0   :  { %v7145_v16 = vadd.s32 %v2343_v45, %v2334_v35  ;;  %v7147_v12 = vadd.s32 %v2359_v33, %v2355_v4  ;;  %v7149_v34 = vsub.s32 32, %v2598_v2  ;;  %v2367_v13 = vmul.u32 %v7095_v36, %v2313_v11 }
 0x2a1   :  { %v2366_v17 = vadd.s32 %v2365_v50, %v2356_v42  ;;  %v2592_v56 = vor.u32 8388608, %v2591_v63  ;;  %v7152_v59 = vshrl.u32 %v2596_v20, 5  ;;  %v2601_v18 = vshll.u32 %v9535_v25, %v2598_v2 }
 0x2a2   :  { %vm2369_vm14 = vc.u32 %v7145_v16, %v7147_v12  ;;  %v2604_v48 = vshll.u32 %v9526_v55, %v2598_v2  ;;  %v2607_v61 = vshll.u32 %v9527_v24, %v2598_v2  ;;  %v2602_v51 = vshrl.u32 %v9526_v55, %v7149_v34 }
 0x2a3   :  { %v2370_v44 = vadd.s32 1, %v2366_v17  ;;  %v2605_v46 = vshrl.u32 %v9527_v24, %v7149_v34  ;;  %v2608_v36 = vshrl.u32 %v9558_v32, %v7149_v34  ;;  %v2610_v3 = vshll.u32 %v9558_v32, %v2598_v2 }
 0x2a4   :  { %v2611_v62 = vshrl.u32 %v9559_v6, %v7149_v34  ;;  %v2613_v30 = vshll.u32 %v9559_v6, %v2598_v2  ;;  %v2614_v41 = vshrl.u32 %v9560_v37, %v7149_v34  ;;  %v7171_v4 = vor.u32 %v2602_v51, %v2601_v18  ;;  %v1646_v2 = vpop.f32.mrf.mxu0 }
 0x2a5   :  { %v2371_v7 = vsel %vm2369_vm14, %v2370_v44, %v2366_v17  ;;  %v7173_v33 = vor.u32 %v2605_v46, %v2604_v48  ;;  %v2609_v1 = vor.u32 %v2608_v36, %v2607_v61  ;;  %v1557_v39 = vadd.f32 %v1556_v15, %v7119_v57  ;;  %v1683_v61 = vpop.f32.mrf.mxu1  ;;  %v7206_v44 = vpop.f32.mrf.mxu2 }
 0x2a6   :  { %v2372_v29 = vadd.s32 %v2371_v7, %v2367_v13  ;;  %v2612_v9 = vor.u32 %v2611_v62, %v2610_v3  ;;  %v2615_v28 = vor.u32 %v2614_v41, %v2613_v30  ;;  %v2077_v53 = vor.u32 %v2076_v26, %v2075_v60 }
 0x2a7   :  { %v2081_v38 = vor.u32 4788187, %v2080_v22  ;;  %vm2616_vm15 = vcmp.lt.s32.totalorder %v7152_v59, 1  ;;  %vm2619_vm0 = vcmp.lt.s32.totalorder %v7152_v59, 4  ;;  %v7178_v40 = vshll.u32 %v2592_v56, 8 }
 0x2a8   :  { %v2373_v19 = vadd.s32 536870912, %v2372_v29  ;;  %vm2618_vm1 = vcmp.lt.s32.totalorder %v7152_v59, 3  ;;  %v2624_v27 = vsel %vm2616_vm15, %v7171_v4, %v7173_v33  ;;  %v2625_v57 = vsel %vm2619_vm0, %v2612_v9, 920167782 }
 0x2a9   :  { %v2628_v21 = vsel %vm2616_vm15, %v7173_v33, %v2609_v1  ;;  %vm2617_vm2 = vcmp.lt.s32.totalorder %v7152_v59, 2  ;;  %v2626_v20 = vsel %vm2618_vm1, %v2609_v1, %v2625_v57  ;;  %v2629_v11 = vsel %vm2619_vm0, %v2615_v28, 1326507024 }
 0x2aa   :  { %v7190_v63 = vshrl.u32 %v2373_v19, 30  ;;  %v1602_v35 = vadd.f32 %v1601_v5, %v1557_v39  ;;  %v2082_v45 = vand.u32 2147483647, %v2081_v38  ;;  %v2627_v60 = vsel %vm2617_vm2, %v2624_v27, %v2626_v20 }
 0x2ab   :  { %v2630_v26 = vsel %vm2618_vm1, %v2612_v9, %v2629_v11  ;;  %v2084_v42 = vcvt.s32.f32 %v2077_v53  ;;  %v2633_v17 = vand.u32 65535, %v7178_v40  ;;  %v2634_v13 = vshrl.u32 %v7178_v40, 16  ;;  %v7218_v53 = vpop.f32.mrf.mxu3 }
 0x2ac   :  { %v2375_v50 = vshll.u32 %v7190_v63, 30  ;;  %v2631_v22 = vsel %vm2617_vm2, %v2628_v21, %v2630_v26  ;;  %v2657_v48 = vand.u32 65535, %v2627_v60  ;;  %v1647_v46 = vadd.f32 %v1646_v2, %v1602_v35 }
 0x2ad   :  { %v2635_v56 = vand.u32 65535, %v2631_v22  ;;  %v2636_v18 = vshrl.u32 %v2631_v22, 16  ;;  %v2658_v36 = vshrl.u32 %v2627_v60, 16  ;;  %v2085_v15 = vmul.f32 %v2084_v42, %v2082_v45 }
 0x2ae   :  { %v7208_v51 = vsub.s32 %v2372_v29, %v2375_v50  ;;  %v2600_v41 = vshrl.u32 %v9535_v25, %v7149_v34  ;;  %v7214_v7 = vadd.f32 %v1683_v61, %v1647_v46  ;;  %v2621_v9 = vsel %vm2619_vm0, %v2609_v1, 2102212464 }
 0x2af   :  { %v2638_v3 = vmul.u32 %v2636_v18, %v2633_v17  ;;  %v2639_v62 = vmul.u32 %v2635_v56, %v2634_v13  ;;  %v2637_v28 = vmul.u32 %v2635_v56, %v2633_v17  ;;  %v2659_v39 = vmul.u32 %v2657_v48, %v2633_v17 }
 0x2b0   :  { %vm2377_vm3 = vcmp.lt.s32.totalorder %v7208_v51, 0  ;;  %v2378_v30 = vsub.s32 0, %v7208_v51  ;;  %v2640_v5 = vmul.u32 %v2636_v18, %v2634_v13  ;;  %v2660_v19 = vmul.u32 %v2658_v36, %v2633_v17 }
 0x2b1   :  { %v2641_v29 = vshll.u32 %v2638_v3, 16  ;;  %v2661_v27 = vmul.u32 %v2657_v48, %v2634_v13  ;;  %v2643_v21 = vshll.u32 %v2639_v62, 16  ;;  %v2642_v34 = vshrl.u32 %v2638_v3, 16 }
 0x2b2   :  { %v2379_v38 = vsel %vm2377_vm3, %v2378_v30, %v7208_v51  ;;  %v2662_v35 = vmul.u32 %v2658_v36, %v2634_v13  ;;  %v2663_v45 = vshll.u32 %v2660_v19, 16  ;;  %v2897_v60 = vand.u32 2139095040, %v7214_v7  ;;  %v1720_v13 = vpop.f32.mrf.mxu2 }
 0x2b3   :  { %v2380_v57 = vclz %v2379_v38  ;;  %vm2645_vm10 = vc.u32 %v2637_v28, %v2641_v29  ;;  %v2647_v20 = vadd.s32 %v2641_v29, %v2637_v28  ;;  %v2665_v42 = vshll.u32 %v2661_v27, 16 }
 0x2b4   :  { %v2646_v11 = vsel %vm2645_vm10, 1, %v9534_v31  ;;  %vm2667_vm11 = vc.u32 %v2659_v39, %v2663_v45  ;;  %v2669_v50 = vadd.s32 %v2663_v45, %v2659_v39  ;;  %v2898_v56 = vshrl.u32 %v2897_v60, 23 }
 0x2b5   :  { %v5467_v1 = vadd.s32 4294967294, %v2380_v57  ;;  %v2648_v2 = vadd.s32 %v2646_v11, %v2640_v5  ;;  %vm2649_vm4 = vc.u32 %v2647_v20, %v2643_v21  ;;  %v2668_v17 = vsel %vm2667_vm11, 1, %v9534_v31  ;;  %v1781_v21 = vpop.f32.mrf.mxu3 }
 0x2b6   :  { %v2650_v26 = vsel %vm2649_vm4, 1, %v9534_v31  ;;  %v2086_v18 = vxor.u32 2147483648, %v2085_v15  ;;  %v2670_v61 = vadd.s32 %v2668_v17, %v2662_v35  ;;  %vm2671_vm7 = vc.u32 %v2669_v50, %v2665_v42 }
 0x2b7   :  { %vm5468_vm12 = vcmp.lt.s32.totalorder %v5467_v1, 0  ;;  %v2652_v22 = vadd.s32 %v2650_v26, %v2648_v2  ;;  %v2620_v46 = vsel %vm2616_vm15, %v2600_v41, %v7171_v4  ;;  %v2622_v36 = vsel %vm2618_vm1, %v7173_v33, %v2621_v9 }
 0x2b8   :  { %v7225_v48 = vsel %vm5468_vm12, 0, %v5467_v1  ;;  %v9470_v30 = vand.u32 2147483647, %v7214_v7  ;;  %v2644_v29 = vshrl.u32 %v2639_v62, 16  ;;  %v2672_v39 = vsel %vm2671_vm7, 1, %v9534_v31 }
 0x2b9   :  { %v2653_v3 = vadd.s32 %v2652_v22, %v2642_v34  ;;  %v2388_v28 = vsub.s32 4294967266, %v7225_v48  ;;  %v5478_v38 = vadd.s32 4294967169, %v2898_v56  ;;  %v2664_v5 = vshrl.u32 %v2660_v19, 16 }
 0x2ba   :  { %v2674_v57 = vadd.s32 %v2672_v39, %v2670_v61  ;;  %vm1966_vm8 = vcmp.lt.s32.totalorder %v6974_v8, 0  ;;  %v2623_v41 = vsel %vm2617_vm2, %v2620_v46, %v2622_v36  ;;  %v2666_v9 = vshrl.u32 %v2661_v27, 16 }
 0x2bb   :  { %v7237_v20 = vadd.s32 %v2653_v3, %v2644_v29  ;;  %v2904_v4 = vadd.s32 1, %v5478_v38  ;;  %v2087_v33 = vsel %vm1966_vm8, %v2086_v18, %v2085_v15  ;;  %v2389_v62 = vadd.s32 127, %v2388_v28  ;;  %v1819_v28 = vpop.f32.mrf.mxu0 }
 0x2bc   :  { %v2675_v34 = vadd.s32 %v2674_v57, %v2664_v5  ;;  %v7243_v11 = vadd.s32 %v2669_v50, %v2665_v42  ;;  %v2901_v19 = vand.u32 8388607, %v9470_v30  ;;  %vm7249_vm6 = vcmp.le.f32.partialorder %v1964_v14, 0.7853982 }
 0x2bd   :  { %vm2905_vm13 = vcmp.gt.s32.totalorder %v2904_v4, 0  ;;  %v1713_v59 = vadd.f32 %v7206_v44, %v6965_v0  ;;  %v1721_v27 = vadd.f32 %v1720_v13, %v7025_v58  ;;  %v7261_v2 = vsel %vm7249_vm6, %v6974_v8, %v2087_v33  ;;  %v7267_v44 = vpop.f32.mrf.mxu2  ;;  %v7287_v38 = vpop.f32.mrf.mxu3 }
 0x2be   :  { %v2676_v45 = vadd.s32 %v2675_v34, %v2666_v9  ;;  %v2906_v15 = vsel %vm2905_vm13, %v2904_v4, 0  ;;  %vm2679_vm5 = vc.u32 %v7237_v20, %v7243_v11  ;;  %v2368_v14 = vadd.s32 %v7147_v12, %v7145_v16 }
 0x2bf   :  { %v2908_v1 = vand.u32 31, %v2906_v15  ;;  %v2677_v60 = vmul.u32 %v7178_v40, %v2623_v41  ;;  %v2384_v42 = vsub.s32 32, %v7225_v48  ;;  %v2390_v0 = vshll.u32 %v2389_v62, 23 }
 0x2c0   :  { %v2680_v26 = vadd.s32 1, %v2676_v45  ;;  %v2902_v58 = vor.u32 8388608, %v2901_v19  ;;  %v7271_v17 = vshrl.u32 %v2906_v15, 5  ;;  %v7295_v4 = vmul.f32 %v7261_v2, %v7261_v2 }
 0x2c1   :  { %v7269_v50 = vsub.s32 32, %v2908_v1  ;;  %v2911_v56 = vshll.u32 %v9535_v25, %v2908_v1  ;;  %v2914_v18 = vshll.u32 %v9526_v55, %v2908_v1  ;;  %v2917_v40 = vshll.u32 %v9527_v24, %v2908_v1 }
 0x2c2   :  { %v2681_v22 = vsel %vm2679_vm5, %v2680_v26, %v2676_v45  ;;  %v2920_v46 = vshll.u32 %v9558_v32, %v2908_v1  ;;  %v2386_v29 = vshrl.u32 %v2368_v14, %v2384_v42  ;;  %9564 = vst [vmem:[#allocation7_spill] sm:$0xff] %v7295_v4  ;;  %v2923_v9 = vshll.u32 %v9559_v6, %v2908_v1 }
 0x2c3   :  { %v2682_v13 = vadd.s32 %v2681_v22, %v2677_v60  ;;  %v2912_v16 = vshrl.u32 %v9526_v55, %v7269_v50  ;;  %v2915_v12 = vshrl.u32 %v9527_v24, %v7269_v50  ;;  %v2918_v61 = vshrl.u32 %v9558_v32, %v7269_v50 }
 0x2c4   :  { %v2921_v36 = vshrl.u32 %v9559_v6, %v7269_v50  ;;  %v2924_v3 = vshrl.u32 %v9560_v37, %v7269_v50  ;;  %v2385_v34 = vshll.u32 %v7208_v51, %v7225_v48  ;;  %v2391_v62 = vor.u32 4788187, %v2390_v0 }
 0x2c5   :  { %v2683_v39 = vadd.s32 536870912, %v2682_v13  ;;  %v7289_v5 = vor.u32 %v2912_v16, %v2911_v56  ;;  %v7291_v57 = vor.u32 %v2915_v12, %v2914_v18  ;;  %v2919_v33 = vor.u32 %v2918_v61, %v2917_v40  ;;  %v7325_v18 = vpop.f32.mrf.mxu2 }
 0x2c6   :  { %v2922_v41 = vor.u32 %v2921_v36, %v2920_v46  ;;  %vm2926_vm14 = vcmp.lt.s32.totalorder %v7271_v17, 1  ;;  %v2925_v45 = vor.u32 %v2924_v3, %v2923_v9  ;;  %vm2929_vm15 = vcmp.lt.s32.totalorder %v7271_v17, 4  ;;  %v1824_v3 = vpop.f32.mrf.mxu0 }
 0x2c7   :  { %v7300_v19 = vshrl.u32 %v2683_v39, 30  ;;  %v2934_v15 = vsel %vm2926_vm14, %v7289_v5, %v7291_v57  ;;  %v7308_v14 = vshll.u32 %v2902_v58, 8  ;;  %v2387_v60 = vor.u32 %v2386_v29, %v2385_v34  ;;  %v1861_v29 = vpop.f32.mrf.mxu1 }
 0x2c8   :  { %vm2928_vm0 = vcmp.lt.s32.totalorder %v7271_v17, 3  ;;  %v2935_v51 = vsel %vm2929_vm15, %v2922_v41, 920167782  ;;  %v1778_v48 = vadd.f32 %v7218_v53, %v1713_v59  ;;  %v1782_v26 = vadd.f32 %v1781_v21, %v1721_v27 }
 0x2c9   :  { %9565 = vst [vmem:[#allocation10_spill] sm:$0xff] %v7300_v19  ;;  %v2685_v1 = vshll.u32 %v7300_v19, 30  ;;  %vm2927_vm1 = vcmp.lt.s32.totalorder %v7271_v17, 2  ;;  %v2936_v42 = vsel %vm2928_vm0, %v2919_v33, %v2935_v51  ;;  %v2392_v0 = vand.u32 2147483647, %v2391_v62  ;;  %v7341_v62 = vpop.f32.mrf.mxu3 }
 0x2ca   :  { %v2937_v58 = vsel %vm2927_vm1, %v2934_v15, %v2936_v42  ;;  %v2938_v56 = vsel %vm2926_vm14, %v7291_v57, %v2919_v33  ;;  %v2100_v53 = vmul.f32 -0.00019511016, %v7295_v4  ;;  %v2939_v21 = vsel %vm2929_vm15, %v2925_v45, 1326507024  ;;  %9566 = vst [vmem:[#allocation8_spill] sm:$0xff] %v7341_v62 }
 0x2cb   :  { %v7318_v22 = vsub.s32 %v2682_v13, %v2685_v1  ;;  %v2943_v59 = vand.u32 65535, %v7308_v14  ;;  %v1820_v27 = vadd.f32 %v1819_v28, %v1778_v48  ;;  %v2394_v16 = vcvt.s32.f32 %v2387_v60 }
 0x2cc   :  { %v2940_v12 = vsel %vm2928_vm0, %v2922_v41, %v2939_v21  ;;  %v2944_v61 = vshrl.u32 %v7308_v14, 16  ;;  %v2967_v46 = vand.u32 65535, %v2937_v58  ;;  %v2968_v36 = vshrl.u32 %v2937_v58, 16 }
 0x2cd   :  { %vm2687_vm2 = vcmp.lt.s32.totalorder %v7318_v22, 0  ;;  %v2688_v13 = vsub.s32 0, %v7318_v22  ;;  %v2941_v40 = vsel %vm2927_vm1, %v2938_v56, %v2940_v12  ;;  %v7338_v39 = vmul.f32 %v2394_v16, %v2392_v0 }
 0x2ce   :  { %v2945_v9 = vand.u32 65535, %v2941_v40  ;;  %v2946_v34 = vshrl.u32 %v2941_v40, 16  ;;  %v2101_v45 = vadd.f32 0.008332121, %v2100_v53  ;;  %v2678_v41 = vadd.s32 %v7243_v11, %v7237_v20  ;;  %v1912_v40 = vpop.f32.mrf.mxu2 }
 0x2cf   :  { %v2689_v28 = vsel %vm2687_vm2, %v2688_v13, %v7318_v22  ;;  %v2970_v60 = vmul.u32 %v2968_v36, %v2943_v59  ;;  %v1825_v48 = vadd.f32 %v1824_v3, %v1782_v26  ;;  %v1862_v42 = vadd.f32 %v1861_v29, %v1820_v27 }
 0x2d0   :  { %v2690_v15 = vclz %v2689_v28  ;;  %v2948_v1 = vmul.u32 %v2946_v34, %v2943_v59  ;;  %v2949_v51 = vmul.u32 %v2945_v9, %v2944_v61  ;;  %v2910_v0 = vshrl.u32 %v9535_v25, %v7269_v50 }
 0x2d1   :  { %v2971_v56 = vmul.u32 %v2967_v46, %v2944_v61  ;;  %v2973_v21 = vshll.u32 %v2970_v60, 16  ;;  %v2396_v16 = vxor.u32 2147483648, %v7338_v39  ;;  %v2947_v13 = vmul.u32 %v2945_v9, %v2943_v59  ;;  %v1949_v9 = vpop.f32.mrf.mxu3 }
 0x2d2   :  { %v5473_v58 = vadd.s32 4294967294, %v2690_v15  ;;  %v2951_v12 = vshll.u32 %v2948_v1, 16  ;;  %v2969_v53 = vmul.u32 %v2967_v46, %v2943_v59  ;;  %v2931_v20 = vsel %vm2929_vm15, %v2919_v33, 2102212464 }
 0x2d3   :  { %v2953_v11 = vshll.u32 %v2949_v51, 16  ;;  %v2972_v28 = vmul.u32 %v2968_v36, %v2944_v61  ;;  %v2950_v29 = vmul.u32 %v2946_v34, %v2944_v61  ;;  %v2975_v15 = vshll.u32 %v2971_v56, 16 }
 0x2d4   :  { %vm5474_vm3 = vcmp.lt.s32.totalorder %v5473_v58, 0  ;;  %vm2955_vm10 = vc.u32 %v2947_v13, %v2951_v12  ;;  %v2957_v27 = vadd.s32 %v2951_v12, %v2947_v13  ;;  %vm2977_vm4 = vc.u32 %v2969_v53, %v2973_v21  ;;  %v1867_v12 = vpop.f32.mrf.mxu1 }
 0x2d5   :  { %v2693_v26 = vsel %vm5474_vm3, 0, %v5473_v58  ;;  %v2956_v30 = vsel %vm2955_vm10, 1, %v9534_v31  ;;  %v2978_v59 = vsel %vm2977_vm4, 1, %v9534_v31  ;;  %v2979_v46 = vadd.s32 %v2973_v21, %v2969_v53 }
 0x2d6   :  { %v2694_v3 = vsub.s32 32, %v2693_v26  ;;  %v2698_v50 = vsub.s32 4294967266, %v2693_v26  ;;  %vm2959_vm11 = vc.u32 %v2957_v27, %v2953_v11  ;;  %v2930_v33 = vsel %vm2926_vm14, %v2910_v0, %v7289_v5 }
 0x2d7   :  { %v2932_v36 = vsel %vm2928_vm0, %v7291_v57, %v2931_v20  ;;  %v2958_v58 = vadd.s32 %v2956_v30, %v2950_v29  ;;  %v2960_v61 = vsel %vm2959_vm11, 1, %v9534_v31  ;;  %v2980_v34 = vadd.s32 %v2978_v59, %v2972_v28  ;;  %v1916_v29 = vpop.f32.mrf.mxu2 }
 0x2d8   :  { %v2699_v49 = vadd.s32 127, %v2698_v50  ;;  %v2696_v13 = vshrl.u32 %v2678_v41, %v2694_v3  ;;  %vm2981_vm12 = vc.u32 %v2979_v46, %v2975_v15  ;;  %v2952_v27 = vshrl.u32 %v2948_v1, 16 }
 0x2d9   :  { %v2962_v21 = vadd.s32 %v2960_v61, %v2958_v58  ;;  %v2982_v53 = vsel %vm2981_vm12, 1, %v9534_v31  ;;  %v2695_v50 = vshll.u32 %v7318_v22, %v2693_v26  ;;  %v2974_v23 = vshrl.u32 %v2970_v60, 16  ;;  %v1953_v17 = vpop.f32.mrf.mxu3 }
 0x2da   :  { %v2700_v11 = vshll.u32 %v2699_v49, 23  ;;  %v2984_v5 = vadd.s32 %v2982_v53, %v2980_v34  ;;  %v1913_v0 = vadd.f32 %v1912_v40, %v1862_v42  ;;  %v2954_v62 = vshrl.u32 %v2949_v51, 16 }
 0x2db   :  { %v2963_v57 = vadd.s32 %v2962_v21, %v2952_v27  ;;  %v1868_v30 = vadd.f32 %v1867_v12, %v1825_v48  ;;  %v2697_v41 = vor.u32 %v2696_v13, %v2695_v50  ;;  %v2976_v20 = vshrl.u32 %v2971_v56, 16 }
 0x2dc   :  { %v2701_v19 = vor.u32 4788187, %v2700_v11  ;;  %v2985_v3 = vadd.s32 %v2984_v5, %v2974_v23  ;;  %v7361_v28 = vadd.f32 %v1949_v9, %v1913_v0  ;;  %v2102_v49 = vmul.f32 %v2101_v45, %v7295_v4 }
 0x2dd   :  { %v7364_v1 = vadd.s32 %v2963_v57, %v2954_v62  ;;  %v7366_v59 = vadd.s32 %v2979_v46, %v2975_v15  ;;  %v2933_v60 = vsel %vm2927_vm1, %v2930_v33, %v2932_v36  ;;  %vm2276_vm7 = vcmp.lt.s32.totalorder %v7051_v43, 0 }
 0x2de   :  { %v2702_v22 = vand.u32 2147483647, %v2701_v19  ;;  %v2986_v42 = vadd.s32 %v2985_v3, %v2976_v20  ;;  %v2122_v51 = vand.u32 2139095040, %v7361_v28  ;;  %v9476_v23 = vand.u32 2147483647, %v7361_v28 }
 0x2df   :  { %vm2989_vm13 = vc.u32 %v7364_v1, %v7366_v59  ;;  %v1917_v48 = vadd.f32 %v1916_v29, %v1868_v30  ;;  %v2397_v62 = vsel %vm2276_vm7, %v2396_v16, %v7338_v39  ;;  %v2704_v45 = vcvt.s32.f32 %v2697_v41 }
 0x2e0   :  { %v2990_v19 = vadd.s32 1, %v2986_v42  ;;  %v2123_v56 = vshrl.u32 %v2122_v51, 23  ;;  %v2088_v40 = vsub.s32 4, %v7055_v52  ;;  %v2103_v26 = vadd.f32 -0.16666654, %v2102_v49 }
 0x2e1   :  { %v2987_v15 = vmul.u32 %v7308_v14, %v2933_v60  ;;  %v9567_v46 = vand.u32 2147483647, %v7051_v43  ;;  %v2705_v33 = vmul.f32 %v2704_v45, %v2702_v22  ;;  %v2126_v13 = vand.u32 8388607, %v9476_v23 }
 0x2e2   :  { %v2991_v36 = vsel %vm2989_vm13, %v2990_v19, %v2986_v42  ;;  %v5463_v58 = vadd.s32 4294967169, %v2123_v56  ;;  %v7393_v61 = vadd.f32 %v1953_v17, %v1917_v48  ;;  %v7398_v34 = vsel %vm1966_vm8, %v2088_v40, %v7055_v52 }
 0x2e3   :  { %vm7382_vm5 = vcmp.le.f32.partialorder %v9567_v46, 0.7853982  ;;  %v2992_v16 = vadd.s32 %v2991_v36, %v2987_v15  ;;  %v2104_v12 = vmul.f32 %v2103_v26, %v7295_v4  ;;  %v1729_v11 = vadd.f32 %v7267_v44, %v6959_v54 }
 0x2e4   :  { %v7389_v39 = vsel %vm7382_vm5, %v7051_v43, %v2397_v62  ;;  %9570 = vst [vmem:[#allocation6_spill] sm:$0xff] %v7393_v61  ;;  %v2129_v14 = vadd.s32 1, %v5463_v58  ;;  %v2398_v21 = vsub.s32 4, %v7190_v63  ;;  %v2706_v50 = vxor.u32 2147483648, %v2705_v33 }
 0x2e5   :  { %v2993_v27 = vadd.s32 536870912, %v2992_v16  ;;  %v7406_v53 = vmul.f32 %v7389_v39, %v7389_v39  ;;  %v2127_v0 = vor.u32 8388608, %v2126_v13  ;;  %v2432_v52 = vand.u32 2139095040, %v7393_v61 }
 0x2e6   :  { %vm2130_vm14 = vcmp.gt.s32.totalorder %v2129_v14, 0  ;;  %vm2586_vm8 = vcmp.lt.s32.totalorder %v7084_v10, 0  ;;  %v7415_v44 = vadd.f32 1.0, %v2104_v12  ;;  %v9571_v41 = vand.u32 2147483647, %v7084_v10 }
 0x2e7   :  { %v7408_v5 = vshrl.u32 %v2993_v27, 30  ;;  %v2131_v57 = vsel %vm2130_vm14, %v2129_v14, 0  ;;  %v7424_v3 = vadd.f32 %v7287_v38, %v1729_v11  ;;  %v7430_v49 = vsel %vm2276_vm7, %v2398_v21, %v7190_v63 }
 0x2e8   :  { %v2133_v54 = vand.u32 31, %v2131_v57  ;;  %vm7419_vm15 = vcmp.le.f32.partialorder %v9571_v41, 0.7853982  ;;  %v7433_v22 = vmul.f32 -0.00019511016, %v7406_v53  ;;  %v2707_v60 = vsel %vm2586_vm8, %v2706_v50, %v2705_v33 }
 0x2e9   :  { %v2995_v29 = vshll.u32 %v7408_v5, 30  ;;  %v7437_v48 = vshrl.u32 %v2131_v57, 5  ;;  %v7439_v62 = vshll.u32 %v2127_v0, 8  ;;  %v2433_v38 = vshrl.u32 %v2432_v52, 23 }
 0x2ea   :  { %v2134_v42 = vsub.s32 32, %v2133_v54  ;;  %v2136_v45 = vshll.u32 %v9535_v25, %v2133_v54  ;;  %v2139_v63 = vshll.u32 %v9526_v55, %v2133_v54  ;;  %v2142_v40 = vshll.u32 %v9527_v24, %v2133_v54 }
 0x2eb   :  { %v2996_v51 = vsub.s32 %v2992_v16, %v2995_v29  ;;  %v2145_v26 = vshll.u32 %v9558_v32, %v2133_v54  ;;  %v2988_v58 = vadd.s32 %v7366_v59, %v7364_v1  ;;  %v2148_v13 = vshll.u32 %v9559_v6, %v2133_v54 }
 0x2ec   :  { %v2137_v19 = vshrl.u32 %v9526_v55, %v2134_v42  ;;  %v2140_v56 = vshrl.u32 %v9527_v24, %v2134_v42  ;;  %v2143_v33 = vshrl.u32 %v9558_v32, %v2134_v42  ;;  %v2146_v36 = vshrl.u32 %v9559_v6, %v2134_v42 }
 0x2ed   :  { %vm2997_vm0 = vcmp.lt.s32.totalorder %v2996_v51, 0  ;;  %v2998_v17 = vsub.s32 0, %v2996_v51  ;;  %v2149_v14 = vshrl.u32 %v9560_v37, %v2134_v42  ;;  %v9475_v21 = vand.u32 2147483647, %v7393_v61 }
 0x2ee   :  { %v2138_v15 = vor.u32 %v2137_v19, %v2136_v45  ;;  %v2141_v46 = vor.u32 %v2140_v56, %v2139_v63  ;;  %v2144_v11 = vor.u32 %v2143_v33, %v2142_v40  ;;  %v2147_v27 = vor.u32 %v2146_v36, %v2145_v26 }
 0x2ef   :  { %v2999_v16 = vsel %vm2997_vm0, %v2998_v17, %v2996_v51  ;;  %v7457_v50 = vsel %vm7419_vm15, %v7084_v10, %v2707_v60  ;;  %v2150_v0 = vor.u32 %v2149_v14, %v2148_v13  ;;  %vm2151_vm1 = vcmp.lt.s32.totalorder %v7437_v48, 1 }
 0x2f0   :  { %v3000_v12 = vclz %v2999_v16  ;;  %v5469_v57 = vadd.s32 4294967169, %v2433_v38  ;;  %vm2154_vm2 = vcmp.lt.s32.totalorder %v7437_v48, 4  ;;  %v2159_v59 = vsel %vm2151_vm1, %v2138_v15, %v2141_v46 }
 0x2f1   :  { %v2168_v52 = vand.u32 65535, %v7439_v62  ;;  %vm2152_vm3 = vcmp.lt.s32.totalorder %v7437_v48, 2  ;;  %vm2153_vm10 = vcmp.lt.s32.totalorder %v7437_v48, 3  ;;  %v2160_v54 = vsel %vm2154_vm2, %v2147_v27, 920167782 }
 0x2f2   :  { %v5479_v1 = vadd.s32 4294967294, %v3000_v12  ;;  %v2169_v41 = vshrl.u32 %v7439_v62, 16  ;;  %v2161_v29 = vsel %vm2153_vm10, %v2144_v11, %v2160_v54  ;;  %v2163_v60 = vsel %vm2151_vm1, %v2141_v46, %v2144_v11 }
 0x2f3   :  { %v2164_v38 = vsel %vm2154_vm2, %v2150_v0, 1326507024  ;;  %v2135_v19 = vshrl.u32 %v9535_v25, %v2134_v42  ;;  %v2162_v63 = vsel %vm2152_vm3, %v2159_v59, %v2161_v29  ;;  %v2439_v56 = vadd.s32 1, %v5469_v57 }
 0x2f4   :  { %vm5480_vm4 = vcmp.lt.s32.totalorder %v5479_v1, 0  ;;  %v2156_v26 = vsel %vm2154_vm2, %v2144_v11, 2102212464  ;;  %v2165_v33 = vsel %vm2153_vm10, %v2147_v27, %v2164_v38  ;;  %v2192_v13 = vand.u32 65535, %v2162_v63 }
 0x2f5   :  { %v3003_v45 = vsel %vm5480_vm4, 0, %v5479_v1  ;;  %v2166_v16 = vsel %vm2152_vm3, %v2163_v60, %v2165_v33  ;;  %v2193_v14 = vshrl.u32 %v2162_v63, 16  ;;  %v7486_v54 = vand.u32 8388607, %v9475_v21 }
 0x2f6   :  { %v3004_v17 = vsub.s32 32, %v3003_v45  ;;  %v3008_v40 = vsub.s32 4294967266, %v3003_v45  ;;  %v3005_v36 = vshll.u32 %v2996_v51, %v3003_v45  ;;  %v2170_v0 = vand.u32 65535, %v2166_v16 }
 0x2f7   :  { %v2171_v1 = vshrl.u32 %v2166_v16, 16  ;;  %v2195_v59 = vmul.u32 %v2193_v14, %v2168_v52  ;;  %v2196_v57 = vmul.u32 %v2192_v13, %v2169_v41  ;;  %vm2440_vm11 = vcmp.gt.s32.totalorder %v2439_v56, 0 }
 0x2f8   :  { %v3006_v12 = vshrl.u32 %v2988_v58, %v3004_v17  ;;  %v3009_v42 = vadd.s32 127, %v3008_v40  ;;  %v2155_v51 = vsel %vm2151_vm1, %v2135_v19, %v2138_v15  ;;  %v2157_v60 = vsel %vm2153_vm10, %v2141_v46, %v2156_v26 }
 0x2f9   :  { %v2173_v27 = vmul.u32 %v2171_v1, %v2168_v52  ;;  %v2174_v58 = vmul.u32 %v2170_v0, %v2169_v41  ;;  %v2194_v38 = vmul.u32 %v2192_v13, %v2168_v52  ;;  %v2198_v45 = vshll.u32 %v2195_v59, 16 }
 0x2fa   :  { %v3007_v11 = vor.u32 %v3006_v12, %v3005_v36  ;;  %v3010_v29 = vshll.u32 %v3009_v42, 23  ;;  %v2172_v17 = vmul.u32 %v2170_v0, %v2168_v52  ;;  %v2197_v33 = vmul.u32 %v2193_v14, %v2169_v41 }
 0x2fb   :  { %v2176_v40 = vshll.u32 %v2173_v27, 16  ;;  %v2175_v21 = vmul.u32 %v2171_v1, %v2169_v41  ;;  %v2178_v23 = vshll.u32 %v2174_v58, 16  ;;  %v2200_v30 = vshll.u32 %v2196_v57, 16 }
 0x2fc   :  { %v3011_v63 = vor.u32 4788187, %v3010_v29  ;;  %v3014_v16 = vcvt.s32.f32 %v3007_v11  ;;  %vm2202_vm7 = vc.u32 %v2194_v38, %v2198_v45  ;;  %vm2896_vm13 = vcmp.lt.s32.totalorder %v7214_v7, 0 }
 0x2fd   :  { %vm2180_vm12 = vc.u32 %v2172_v17, %v2176_v40  ;;  %v2182_v12 = vadd.s32 %v2176_v40, %v2172_v17  ;;  %v2203_v46 = vsel %vm2202_vm7, 1, %v9534_v31  ;;  %v2204_v19 = vadd.s32 %v2198_v45, %v2194_v38 }
 0x2fe   :  { %v3012_v36 = vand.u32 2147483647, %v3011_v63  ;;  %v2181_v15 = vsel %vm2180_vm12, 1, %v9534_v31  ;;  %v2441_v26 = vsel %vm2440_vm11, %v2439_v56, 0  ;;  %v2205_v14 = vadd.s32 %v2203_v46, %v2197_v33 }
 0x2ff   :  { %v2183_v13 = vadd.s32 %v2181_v15, %v2175_v21  ;;  %vm2184_vm14 = vc.u32 %v2182_v12, %v2178_v23  ;;  %v2411_v41 = vadd.f32 0.008332121, %v7433_v22  ;;  %v7499_v42 = vmul.f32 %v7457_v50, %v7457_v50 }
 0x300   :  { %v3015_v52 = vmul.f32 %v3014_v16, %v3012_v36  ;;  %v2185_v0 = vsel %vm2184_vm14, 1, %v9534_v31  ;;  %vm2206_vm0 = vc.u32 %v2204_v19, %v2200_v30  ;;  %v9574_v1 = vand.u32 2147483647, %v7214_v7 }
 0x301   :  { %v2177_v56 = vshrl.u32 %v2173_v27, 16  ;;  %v2187_v29 = vadd.s32 %v2185_v0, %v2183_v13  ;;  %v2207_v23 = vsel %vm2206_vm0, 1, %v9534_v31  ;;  %v2443_v21 = vand.u32 31, %v2441_v26 }
 0x302   :  { %vm7504_vm1 = vcmp.le.f32.partialorder %v9574_v1, 0.7853982  ;;  %v2158_v22 = vsel %vm2152_vm3, %v2155_v51, %v2157_v60  ;;  %v2199_v38 = vshrl.u32 %v2195_v59, 16  ;;  %v2209_v45 = vadd.s32 %v2207_v23, %v2205_v14 }
 0x303   :  { %v2437_v63 = vor.u32 8388608, %v7486_v54  ;;  %v3016_v17 = vxor.u32 2147483648, %v3015_v52  ;;  %v2179_v40 = vshrl.u32 %v2174_v58, 16  ;;  %v2188_v33 = vadd.s32 %v2187_v29, %v2177_v56 }
 0x304   :  { %v7512_v16 = vsub.s32 32, %v2443_v21  ;;  %v2201_v36 = vshrl.u32 %v2196_v57, 16  ;;  %v7514_v12 = vadd.s32 %v2204_v19, %v2200_v30  ;;  %v2210_v27 = vadd.s32 %v2209_v45, %v2199_v38 }
 0x305   :  { %v7516_v15 = vshrl.u32 %v2441_v26, 5  ;;  %v7518_v46 = vadd.s32 %v2188_v33, %v2179_v40  ;;  %v2446_v48 = vshll.u32 %v9535_v25, %v2443_v21  ;;  %v2449_v54 = vshll.u32 %v9526_v55, %v2443_v21 }
 0x306   :  { %v2447_v59 = vshrl.u32 %v9526_v55, %v7512_v16  ;;  %v2211_v51 = vadd.s32 %v2210_v27, %v2201_v36  ;;  %v2450_v60 = vshrl.u32 %v9527_v24, %v7512_v16  ;;  %v2452_v57 = vshll.u32 %v9527_v24, %v2443_v21 }
 0x307   :  { %v2453_v30 = vshrl.u32 %v9558_v32, %v7512_v16  ;;  %v3017_v58 = vsel %vm2896_vm13, %v3016_v17, %v3015_v52  ;;  %vm2214_vm2 = vc.u32 %v7518_v46, %v7514_v12  ;;  %v2455_v26 = vshll.u32 %v9558_v32, %v2443_v21 }
 0x308   :  { %v7533_v19 = vor.u32 %v2447_v59, %v2446_v48  ;;  %v2215_v13 = vadd.s32 1, %v2211_v51  ;;  %v7536_v14 = vor.u32 %v2450_v60, %v2449_v54  ;;  %v2456_v1 = vshrl.u32 %v9559_v6, %v7512_v16 }
 0x309   :  { %v7538_v0 = vor.u32 %v2453_v30, %v2452_v57  ;;  %v2212_v56 = vmul.u32 %v7439_v62, %v2158_v22  ;;  %v2458_v29 = vshll.u32 %v9559_v6, %v2443_v21  ;;  %v2459_v52 = vshrl.u32 %v9560_v37, %v7512_v16 }
 0x30a   :  { %v7546_v23 = vshll.u32 %v2437_v63, 8  ;;  %v7551_v38 = vsel %vm7504_vm1, %v7214_v7, %v3017_v58  ;;  %v2216_v45 = vsel %vm2214_vm2, %v2215_v13, %v2211_v51  ;;  %v2457_v17 = vor.u32 %v2456_v1, %v2455_v26 }
 0x30b   :  { %vm2461_vm3 = vcmp.lt.s32.totalorder %v7516_v15, 1  ;;  %v2217_v40 = vadd.s32 %v2216_v45, %v2212_v56  ;;  %v2460_v33 = vor.u32 %v2459_v52, %v2458_v29  ;;  %vm2462_vm10 = vcmp.lt.s32.totalorder %v7516_v15, 2 }
 0x30c   :  { %vm2464_vm4 = vcmp.lt.s32.totalorder %v7516_v15, 4  ;;  %vm2463_vm11 = vcmp.lt.s32.totalorder %v7516_v15, 3  ;;  %v2469_v62 = vsel %vm2461_vm3, %v7533_v19, %v7536_v14  ;;  %v2473_v22 = vsel %vm2461_vm3, %v7536_v14, %v7538_v0 }
 0x30d   :  { %v2470_v21 = vsel %vm2464_vm4, %v2457_v17, 920167782  ;;  %v7569_v63 = vmul.f32 %v7551_v38, %v7551_v38  ;;  %v2218_v36 = vadd.s32 536870912, %v2217_v40  ;;  %v2474_v48 = vsel %vm2464_vm4, %v2460_v33, 1326507024 }
 0x30e   :  { %v2471_v27 = vsel %vm2463_vm11, %v7538_v0, %v2470_v21  ;;  %v2412_v59 = vmul.f32 %v2411_v41, %v7406_v53  ;;  %v1737_v54 = vadd.f32 %v7325_v18, %v6982_v47  ;;  %v2475_v60 = vsel %vm2463_vm11, %v2457_v17, %v2474_v48  ;;  %v1829_v17 = vpop.f32.mrf.mxu0 }
 0x30f   :  { %v2472_v51 = vsel %vm2462_vm10, %v2469_v62, %v2471_v27  ;;  %v2720_v57 = vmul.f32 -0.00019511016, %v7499_v42  ;;  %v7584_v30 = vshrl.u32 %v2218_v36, 30  ;;  %v2476_v58 = vsel %vm2462_vm10, %v2473_v22, %v2475_v60 }
 0x310   :  { %v2478_v26 = vand.u32 65535, %v7546_v23  ;;  %v2479_v41 = vshrl.u32 %v7546_v23, 16  ;;  %v2480_v13 = vand.u32 65535, %v2476_v58  ;;  %v2481_v1 = vshrl.u32 %v2476_v58, 16 }
 0x311   :  { %v2503_v47 = vshrl.u32 %v2472_v51, 16  ;;  %v7592_v18 = vmul.f32 %v7415_v44, %v7261_v2  ;;  %v9577_v56 = vsel %vm7249_vm6, 0, %v7398_v34  ;;  %v3030_v52 = vmul.f32 -0.00019511016, %v7569_v63  ;;  %v9579_v44 = vld [vmem:[#allocation8_spill] sm:$0xff] }
 0x312   :  { %v7598_v29 = vadd.s32 3, %v9577_v56  ;;  %v2220_v45 = vshll.u32 %v7584_v30, 30  ;;  %v2483_v62 = vmul.u32 %v2481_v1, %v2478_v26  ;;  %v2484_v21 = vmul.u32 %v2480_v13, %v2479_v41 }
 0x313   :  { %v2502_v22 = vand.u32 65535, %v2472_v51  ;;  %v2413_v2 = vadd.f32 -0.16666654, %v2412_v59  ;;  %v7606_v36 = vadd.f32 %v9579_v44, %v1737_v54  ;;  %v2505_v34 = vmul.u32 %v2503_v47, %v2478_v26  ;;  %v1873_v44 = vpop.f32.mrf.mxu1 }
 0x314   :  { %9578 = vst [vmem:[#allocation12_spill] sm:$0xff] %v7598_v29  ;;  %v7608_v35 = vsub.s32 %v2217_v40, %v2220_v45  ;;  %v2721_v27 = vadd.f32 0.008332121, %v2720_v57  ;;  %v1830_v48 = vadd.f32 %v1829_v17, %v7424_v3  ;;  %v2482_v60 = vmul.u32 %v2480_v13, %v2478_v26 }
 0x315   :  { %v2486_v58 = vshll.u32 %v2483_v62, 16  ;;  %v3031_v56 = vadd.f32 0.008332121, %v3030_v52  ;;  %v2485_v29 = vmul.u32 %v2481_v1, %v2479_v41  ;;  %v2488_v8 = vshll.u32 %v2484_v21, 16 }
 0x316   :  { %vm2222_vm6 = vcmp.lt.s32.totalorder %v7608_v35, 0  ;;  %v2223_v33 = vsub.s32 0, %v7608_v35  ;;  %v2506_v51 = vmul.u32 %v2502_v22, %v2479_v41  ;;  %v2504_v45 = vmul.u32 %v2502_v22, %v2478_v26  ;;  %v9580_v26 = vld [vmem:[#allocation10_spill] sm:$0xff] }
 0x317   :  { %vm2490_vm12 = vc.u32 %v2482_v60, %v2486_v58  ;;  %v2492_v59 = vadd.s32 %v2486_v58, %v2482_v60  ;;  %v2508_v57 = vshll.u32 %v2505_v34, 16  ;;  %v2487_v13 = vshrl.u32 %v2483_v62, 16 }
 0x318   :  { %v2224_v54 = vsel %vm2222_vm6, %v2223_v33, %v7608_v35  ;;  %v2491_v40 = vsel %vm2490_vm12, 1, %v9534_v31  ;;  %v2507_v43 = vmul.u32 %v2503_v47, %v2479_v41  ;;  %v2510_v4 = vshll.u32 %v2506_v51, 16  ;;  %v1920_v33 = vpop.f32.mrf.mxu2  ;;  %v1957_v41 = vpop.f32.mrf.mxu3 }
 0x319   :  { %v2225_v3 = vclz %v2224_v54  ;;  %v2493_v17 = vadd.s32 %v2491_v40, %v2485_v29  ;;  %vm2494_vm7 = vc.u32 %v2492_v59, %v2488_v8  ;;  %vm2512_vm14 = vc.u32 %v2504_v45, %v2508_v57 }
 0x31a   :  { %v2495_v52 = vsel %vm2494_vm7, 1, %v9534_v31  ;;  %v2513_v60 = vsel %vm2512_vm14, 1, %v9534_v31  ;;  %v2514_v58 = vadd.s32 %v2508_v57, %v2504_v45  ;;  %v2414_v37 = vmul.f32 %v2413_v2, %v7406_v53 }
 0x31b   :  { %v5464_v1 = vadd.s32 4294967294, %v2225_v3  ;;  %v2497_v61 = vadd.s32 %v2495_v52, %v2493_v17  ;;  %v2708_v22 = vsub.s32 4, %v9580_v26  ;;  %v2515_v6 = vadd.s32 %v2513_v60, %v2507_v43 }
 0x31c   :  { %v1874_v54 = vadd.f32 %v1873_v44, %v1830_v48  ;;  %v2722_v29 = vmul.f32 %v2721_v27, %v7499_v42  ;;  %vm2516_vm2 = vc.u32 %v2514_v58, %v2510_v4  ;;  %v2466_v62 = vsel %vm2464_vm4, %v7538_v0, 2102212464  ;;  %v1834_v44 = vpop.f32.mrf.mxu0 }
 0x31d   :  { %vm5465_vm0 = vcmp.lt.s32.totalorder %v5464_v1, 0  ;;  %v2498_v8 = vadd.s32 %v2497_v61, %v2487_v13  ;;  %v2517_v59 = vsel %vm2516_vm2, 1, %v9534_v31  ;;  %v3032_v2 = vmul.f32 %v3031_v56, %v7569_v63 }
 0x31e   :  { %v2228_v47 = vsel %vm5465_vm0, 0, %v5464_v1  ;;  %v1921_v40 = vadd.f32 %v1920_v33, %v1874_v54  ;;  %v2445_v43 = vshrl.u32 %v9535_v25, %v7512_v16  ;;  %v2489_v48 = vshrl.u32 %v2484_v21, 16 }
 0x31f   :  { %v2233_v45 = vsub.s32 4294967266, %v2228_v47  ;;  %v3018_v27 = vsub.s32 4, %v7408_v5  ;;  %v2509_v61 = vshrl.u32 %v2505_v34, 16  ;;  %v2519_v57 = vadd.s32 %v2517_v59, %v2515_v6  ;;  %v1879_v6 = vpop.f32.mrf.mxu1 }
 0x320   :  { %v7628_v3 = vadd.f32 %v1957_v41, %v1921_v40  ;;  %v2723_v13 = vadd.f32 -0.16666654, %v2722_v29  ;;  %v2465_v0 = vsel %vm2461_vm3, %v2445_v43, %v7533_v19  ;;  %v2467_v56 = vsel %vm2463_vm11, %v7536_v14, %v2466_v62  ;;  %v1924_v40 = vpop.f32.mrf.mxu2 }
 0x321   :  { %v7636_v17 = vadd.s32 %v2498_v8, %v2489_v48  ;;  %v2234_v16 = vadd.s32 127, %v2233_v45  ;;  %v2511_v21 = vshrl.u32 %v2506_v51, 16  ;;  %v2520_v52 = vadd.s32 %v2519_v57, %v2509_v61 }
 0x322   :  { %v2742_v34 = vand.u32 2139095040, %v7628_v3  ;;  %v3033_v1 = vadd.f32 -0.16666654, %v3032_v2  ;;  %v2229_v60 = vsub.s32 32, %v2228_v47  ;;  %v7639_v33 = vadd.s32 %v2514_v58, %v2510_v4 }
 0x323   :  { %v1835_v54 = vadd.f32 %v1834_v44, %v7606_v36  ;;  %v2709_v19 = vsel %vm2586_vm8, %v2708_v22, %v9580_v26  ;;  %v2468_v14 = vsel %vm2462_vm10, %v2465_v0, %v2467_v56  ;;  %v2521_v29 = vadd.s32 %v2520_v52, %v2511_v21 }
 0x324   :  { %v2743_v8 = vshrl.u32 %v2742_v34, 23  ;;  %v2415_v51 = vadd.f32 1.0, %v2414_v37  ;;  %v2213_v41 = vadd.s32 %v7514_v12, %v7518_v46  ;;  %vm2524_vm3 = vc.u32 %v7636_v17, %v7639_v33 }
 0x325   :  { %v1880_v4 = vadd.f32 %v1879_v6, %v1835_v54  ;;  %v2724_v58 = vmul.f32 %v2723_v13, %v7499_v42  ;;  %v2235_v36 = vshll.u32 %v2234_v16, 23  ;;  %v2525_v62 = vadd.s32 1, %v2521_v29 }
 0x326   :  { %v5475_v59 = vadd.s32 4294967169, %v2743_v8  ;;  %v3019_v15 = vsel %vm2896_vm13, %v3018_v27, %v7408_v5  ;;  %v3034_v26 = vmul.f32 %v3033_v1, %v7569_v63  ;;  %v2231_v37 = vshrl.u32 %v2213_v41, %v2229_v60 }
 0x327   :  { %v2522_v22 = vmul.u32 %v7546_v23, %v2468_v14  ;;  %v2711_v12 = vsel %vm7419_vm15, 0, %v2709_v19  ;;  %v2526_v46 = vsel %vm2524_vm3, %v2525_v62, %v2521_v29  ;;  %v9488_v2 = vand.u32 2147483647, %v7628_v3  ;;  %v1961_v23 = vpop.f32.mrf.mxu3 }
 0x328   :  { %v2749_v45 = vadd.s32 1, %v5475_v59  ;;  %v7661_v43 = vmul.f32 %v2415_v51, %v7389_v39  ;;  %v2230_v48 = vshll.u32 %v7608_v35, %v2228_v47  ;;  %v1925_v57 = vadd.f32 %v1924_v40, %v1880_v4 }
 0x329   :  { %v2527_v61 = vadd.s32 %v2526_v46, %v2522_v22  ;;  %v2725_v5 = vadd.f32 1.0, %v2724_v58  ;;  %v3021_v27 = vsel %vm7504_vm1, 0, %v3019_v15  ;;  %v2236_v44 = vor.u32 4788187, %v2235_v36 }
 0x32a   :  { %vm2750_vm8 = vcmp.gt.s32.totalorder %v2749_v45, 0  ;;  %v3035_v20 = vadd.f32 1.0, %v3034_v26  ;;  %v2232_v13 = vor.u32 %v2231_v37, %v2230_v48  ;;  %v9581_v39 = vsel %vm7382_vm5, 0, %v7430_v49 }
 0x32b   :  { %v2528_v0 = vadd.s32 536870912, %v2527_v61  ;;  %v2751_v56 = vsel %vm2750_vm8, %v2749_v45, 0  ;;  %v7671_v35 = vadd.s32 3, %v9581_v39  ;;  %v2746_v47 = vand.u32 8388607, %v9488_v2 }
 0x32c   :  { %v2753_v11 = vand.u32 31, %v2751_v56  ;;  %v7676_v52 = vadd.s32 3, %v2711_v12  ;;  %v7680_v6 = vadd.f32 %v1961_v23, %v1925_v57  ;;  %v7683_v1 = vmul.f32 %v2725_v5, %v7457_v50 }
 0x32d   :  { %v7678_v34 = vshrl.u32 %v2528_v0, 30  ;;  %v7685_v9 = vadd.s32 3, %v3021_v27  ;;  %v2237_v49 = vand.u32 2147483647, %v2236_v44  ;;  %v7690_v54 = vmul.f32 %v3035_v20, %v7551_v38 }
 0x32e   :  { %v7687_v60 = vsub.s32 32, %v2753_v11  ;;  %v2239_v19 = vcvt.s32.f32 %v2232_v13  ;;  %v2243_v14 = vsub.s32 4, %v7584_v30  ;;  %v2747_v8 = vor.u32 8388608, %v2746_v47 }
 0x32f   :  { %v2530_v29 = vshll.u32 %v7678_v34, 30  ;;  %v2756_v38 = vshll.u32 %v9535_v25, %v2753_v11  ;;  %v2759_v58 = vshll.u32 %v9526_v55, %v2753_v11  ;;  %v3052_v36 = vand.u32 2139095040, %v7680_v6 }
 0x330   :  { %v2757_v51 = vshrl.u32 %v9526_v55, %v7687_v60  ;;  %v2760_v50 = vshrl.u32 %v9527_v24, %v7687_v60  ;;  %v2763_v41 = vshrl.u32 %v9558_v32, %v7687_v60  ;;  %v2240_v62 = vmul.f32 %v2239_v19, %v2237_v49 }
 0x331   :  { %v7700_v4 = vsub.s32 %v2527_v61, %v2530_v29  ;;  %v7705_v59 = vshrl.u32 %v2751_v56, 5  ;;  %v2762_v40 = vshll.u32 %v9527_v24, %v2753_v11  ;;  %v2765_v15 = vshll.u32 %v9558_v32, %v2753_v11 }
 0x332   :  { %vm2121_vm5 = vcmp.lt.s32.totalorder %v7361_v28, 0  ;;  %v2758_v37 = vor.u32 %v2757_v51, %v2756_v38  ;;  %v2761_v22 = vor.u32 %v2760_v50, %v2759_v58  ;;  %v9582_v46 = vmov 920167782  }
 0x333   :  { %vm2532_vm15 = vcmp.lt.s32.totalorder %v7700_v4, 0  ;;  %v2533_v26 = vsub.s32 0, %v7700_v4  ;;  %v2764_v12 = vor.u32 %v2763_v41, %v2762_v40  ;;  %v2766_v45 = vshrl.u32 %v9582_v46, %v7687_v60 }
 0x334   :  { %v2768_v48 = vshll.u32 %v9582_v46, %v2753_v11  ;;  %v9583_v61 = vmov 1326507024   ;;  %v2523_v5 = vadd.s32 %v7639_v33, %v7636_v17  ;;  %v9487_v44 = vand.u32 2147483647, %v7680_v6 }
 0x335   :  { %v2769_v57 = vshrl.u32 %v9583_v61, %v7687_v60  ;;  %v2534_v27 = vsel %vm2532_vm15, %v2533_v26, %v7700_v4  ;;  %v3053_v23 = vshrl.u32 %v3052_v36, 23  ;;  %v9584_v20 = vand.u32 2147483647, %v7361_v28 }
 0x336   :  { %v2535_v0 = vclz %v2534_v27  ;;  %v2767_v56 = vor.u32 %v2766_v45, %v2765_v15  ;;  %vm2771_vm1 = vcmp.lt.s32.totalorder %v7705_v59, 1  ;;  %v2241_v47 = vxor.u32 2147483648, %v2240_v62 }
 0x337   :  { %vm7723_vm13 = vcmp.le.f32.partialorder %v9584_v20, 0.7853982  ;;  %v2770_v39 = vor.u32 %v2769_v57, %v2768_v48  ;;  %vm2774_vm10 = vcmp.lt.s32.totalorder %v7705_v59, 4  ;;  %v2779_v17 = vsel %vm2771_vm1, %v2758_v37, %v2761_v22 }
 0x338   :  { %v7731_v33 = vshll.u32 %v2747_v8, 8  ;;  %v5470_v11 = vadd.s32 4294967294, %v2535_v0  ;;  %vm2773_vm4 = vcmp.lt.s32.totalorder %v7705_v59, 3  ;;  %v2780_v49 = vsel %vm2774_vm10, %v2767_v56, 920167782 }
 0x339   :  { %v2783_v19 = vsel %vm2771_vm1, %v2761_v22, %v2764_v12  ;;  %vm2772_vm11 = vcmp.lt.s32.totalorder %v7705_v59, 2  ;;  %v2781_v29 = vsel %vm2773_vm4, %v2764_v12, %v2780_v49  ;;  %v2784_v51 = vsel %vm2774_vm10, %v2770_v39, 1326507024 }
 0x33a   :  { %v7745_v8 = vand.u32 8388607, %v9487_v44  ;;  %vm5471_vm6 = vcmp.lt.s32.totalorder %v5470_v11, 0  ;;  %v2782_v50 = vsel %vm2772_vm11, %v2779_v17, %v2781_v29  ;;  %v2785_v41 = vsel %vm2773_vm4, %v2767_v56, %v2784_v51 }
 0x33b   :  { %v5481_v38 = vadd.s32 4294967169, %v3053_v23  ;;  %v2538_v58 = vsel %vm5471_vm6, 0, %v5470_v11  ;;  %v2786_v36 = vsel %vm2772_vm11, %v2783_v19, %v2785_v41  ;;  %v2788_v40 = vand.u32 65535, %v7731_v33 }
 0x33c   :  { %v2789_v15 = vshrl.u32 %v7731_v33, 16  ;;  %v2242_v26 = vsel %vm2121_vm5, %v2241_v47, %v2240_v62  ;;  %v2539_v45 = vsub.s32 32, %v2538_v58  ;;  %v2543_v48 = vsub.s32 4294967266, %v2538_v58 }
 0x33d   :  { %v2790_v57 = vand.u32 65535, %v2786_v36  ;;  %v2776_v27 = vsel %vm2774_vm10, %v2764_v12, 2102212464  ;;  %v2791_v20 = vshrl.u32 %v2786_v36, 16  ;;  %v2812_v0 = vand.u32 65535, %v2782_v50 }
 0x33e   :  { %v2813_v23 = vshrl.u32 %v2782_v50, 16  ;;  %v2541_v56 = vshrl.u32 %v2523_v5, %v2539_v45  ;;  %v2544_v39 = vadd.s32 127, %v2543_v48  ;;  %v2755_v17 = vshrl.u32 %v9535_v25, %v7687_v60 }
 0x33f   :  { %v3059_v11 = vadd.s32 1, %v5481_v38  ;;  %v7764_v49 = vsel %vm7723_vm13, %v7361_v28, %v2242_v26  ;;  %v2793_v62 = vmul.u32 %v2791_v20, %v2788_v40  ;;  %v2794_v47 = vmul.u32 %v2790_v57, %v2789_v15 }
 0x340   :  { %v2815_v19 = vmul.u32 %v2813_v23, %v2788_v40  ;;  %v2540_v29 = vshll.u32 %v7700_v4, %v2538_v58  ;;  %v2545_v12 = vshll.u32 %v2544_v39, 23  ;;  %v2775_v51 = vsel %vm2771_vm1, %v2755_v17, %v2758_v37 }
 0x341   :  { %v2777_v5 = vsel %vm2773_vm4, %v2761_v22, %v2776_v27  ;;  %v2792_v50 = vmul.u32 %v2790_v57, %v2788_v40  ;;  %v2796_v60 = vshll.u32 %v2793_v62, 16  ;;  %v2814_v41 = vmul.u32 %v2812_v0, %v2788_v40 }
 0x342   :  { %v2816_v38 = vmul.u32 %v2812_v0, %v2789_v15  ;;  %v2542_v36 = vor.u32 %v2541_v56, %v2540_v29  ;;  %v2546_v45 = vor.u32 4788187, %v2545_v12  ;;  %v2795_v26 = vmul.u32 %v2791_v20, %v2789_v15 }
 0x343   :  { %v2818_v48 = vshll.u32 %v2815_v19, 16  ;;  %v2798_v44 = vshll.u32 %v2794_v47, 16  ;;  %vm2800_vm12 = vc.u32 %v2792_v50, %v2796_v60  ;;  %v2802_v16 = vadd.s32 %v2796_v60, %v2792_v50 }
 0x344   :  { %v2817_v21 = vmul.u32 %v2813_v23, %v2789_v15  ;;  %v2801_v4 = vsel %vm2800_vm12, 1, %v9534_v31  ;;  %v2820_v58 = vshll.u32 %v2816_v38, 16  ;;  %vm3060_vm0 = vcmp.gt.s32.totalorder %v3059_v11, 0 }
 0x345   :  { %vm2822_vm7 = vc.u32 %v2814_v41, %v2818_v48  ;;  %v2824_v37 = vadd.s32 %v2818_v48, %v2814_v41  ;;  %v2803_v39 = vadd.s32 %v2801_v4, %v2795_v26  ;;  %vm2804_vm14 = vc.u32 %v2802_v16, %v2798_v44  ;;  %v9587_v44 = vld [vmem:[#allocation6_spill] sm:$0xff] }
 0x346   :  { %v2823_v22 = vsel %vm2822_vm7, 1, %v9534_v31  ;;  %v2547_v40 = vand.u32 2147483647, %v2546_v45  ;;  %v2805_v57 = vsel %vm2804_vm14, 1, %v9534_v31  ;;  %v2797_v20 = vshrl.u32 %v2793_v62, 16 }
 0x347   :  { %v2825_v27 = vadd.s32 %v2823_v22, %v2817_v21  ;;  %vm2826_vm2 = vc.u32 %v2824_v37, %v2820_v58  ;;  %v2807_v0 = vadd.s32 %v2805_v57, %v2803_v39  ;;  %v3061_v15 = vsel %vm3060_vm0, %v3059_v11, 0 }
 0x348   :  { %v2827_v56 = vsel %vm2826_vm2, 1, %v9534_v31  ;;  %v2549_v23 = vcvt.s32.f32 %v2542_v36  ;;  %v2819_v17 = vshrl.u32 %v2815_v19, 16  ;;  %v3063_v12 = vand.u32 31, %v3061_v15 }
 0x349   :  { %v2829_v29 = vadd.s32 %v2827_v56, %v2825_v27  ;;  %v2244_v16 = vsel %vm2121_vm5, %v2243_v14, %v7584_v30  ;;  %vm2431_vm3 = vcmp.lt.s32.totalorder %v9587_v44, 0  ;;  %v2778_v21 = vsel %vm2772_vm11, %v2775_v51, %v2777_v5 }
 0x34a   :  { %v2799_v62 = vshrl.u32 %v2794_v47, 16  ;;  %v2808_v50 = vadd.s32 %v2807_v0, %v2797_v20  ;;  %v2550_v60 = vmul.f32 %v2549_v23, %v2547_v40  ;;  %v2821_v41 = vshrl.u32 %v2816_v38, 16 }
 0x34b   :  { %v2830_v11 = vadd.s32 %v2829_v29, %v2819_v17  ;;  %v7783_v36 = vsub.s32 32, %v3063_v12  ;;  %v7787_v19 = vmul.f32 %v7764_v49, %v7764_v49  ;;  %v2828_v26 = vadd.s32 %v2824_v37, %v2820_v58 }
 0x34c   :  { %v2809_v45 = vadd.s32 %v2808_v50, %v2799_v62  ;;  %v3057_v30 = vor.u32 8388608, %v7745_v8  ;;  %v2832_v48 = vmul.u32 %v7731_v33, %v2778_v21  ;;  %v3066_v59 = vshll.u32 %v9535_v25, %v3063_v12 }
 0x34d   :  { %v2831_v14 = vadd.s32 %v2830_v11, %v2821_v41  ;;  %v3067_v47 = vshrl.u32 %v9526_v55, %v7783_v36  ;;  %v9588_v51 = vand.u32 2147483647, %v9587_v44  ;;  %v3069_v38 = vshll.u32 %v9526_v55, %v3063_v12 }
 0x34e   :  { %vm2834_vm5 = vc.u32 %v2809_v45, %v2828_v26  ;;  %v3070_v8 = vshrl.u32 %v9527_v24, %v7783_v36  ;;  %v3073_v33 = vshrl.u32 %v9558_v32, %v7783_v36  ;;  %v2551_v4 = vxor.u32 2147483648, %v2550_v60 }
 0x34f   :  { %vm7796_vm8 = vcmp.le.f32.partialorder %v9588_v51, 0.7853982  ;;  %v2835_v58 = vadd.s32 1, %v2831_v14  ;;  %v7805_v37 = vshrl.u32 %v3061_v15, 5  ;;  %v3072_v39 = vshll.u32 %v9527_v24, %v3063_v12 }
 0x350   :  { %v3068_v22 = vor.u32 %v3067_v47, %v3066_v59  ;;  %v7808_v40 = vor.u32 %v3070_v8, %v3069_v38  ;;  %v3075_v57 = vshll.u32 %v9558_v32, %v3063_v12  ;;  %v3076_v27 = vshrl.u32 %v9582_v46, %v7783_v36 }
 0x351   :  { %v2836_v20 = vsel %vm2834_vm5, %v2835_v58, %v2831_v14  ;;  %v3074_v0 = vor.u32 %v3073_v33, %v3072_v39  ;;  %v3078_v56 = vshll.u32 %v9582_v46, %v3063_v12  ;;  %v3079_v23 = vshrl.u32 %v9583_v61, %v7783_v36 }
 0x352   :  { %v2246_v15 = vsel %vm7723_vm13, 0, %v2244_v16  ;;  %v2837_v17 = vadd.s32 %v2836_v20, %v2832_v48  ;;  %v3077_v29 = vor.u32 %v3076_v27, %v3075_v57  ;;  %v7818_v21 = vshll.u32 %v3057_v30, 8 }
 0x353   :  { %v2552_v62 = vsel %vm2431_vm3, %v2551_v4, %v2550_v60  ;;  %v3080_v50 = vor.u32 %v3079_v23, %v3078_v56  ;;  %vm3081_vm15 = vcmp.lt.s32.totalorder %v7805_v37, 1  ;;  %vm3084_vm1 = vcmp.lt.s32.totalorder %v7805_v37, 4 }
 0x354   :  { %v2838_v41 = vadd.s32 536870912, %v2837_v17  ;;  %vm3083_vm10 = vcmp.lt.s32.totalorder %v7805_v37, 3  ;;  %v3089_v13 = vsel %vm3081_vm15, %v3068_v22, %v7808_v40  ;;  %v3090_v12 = vsel %vm3084_vm1, %v3077_v29, 920167782 }
 0x355   :  { %v2255_v16 = vmul.f32 -0.00019511016, %v7787_v19  ;;  %vm3082_vm13 = vcmp.lt.s32.totalorder %v7805_v37, 2  ;;  %v3091_v60 = vsel %vm3083_vm10, %v3074_v0, %v3090_v12  ;;  %v3093_v11 = vsel %vm3081_vm15, %v7808_v40, %v3074_v0 }
 0x356   :  { %v7838_v14 = vshrl.u32 %v2838_v41, 30  ;;  %v3092_v48 = vsel %vm3082_vm13, %v3089_v13, %v3091_v60  ;;  %v3094_v59 = vsel %vm3084_vm1, %v3080_v50, 1326507024  ;;  %v7848_v51 = vsel %vm7796_vm8, %v9587_v44, %v2552_v62 }
 0x357   :  { %v3095_v38 = vsel %vm3083_vm10, %v3077_v29, %v3094_v59  ;;  %v3123_v8 = vshrl.u32 %v3092_v48, 16  ;;  %v7852_v33 = vadd.s32 3, %v2246_v15  ;;  %v3122_v39 = vand.u32 65535, %v3092_v48 }
 0x358   :  { %v2840_v4 = vshll.u32 %v7838_v14, 30  ;;  %v3096_v58 = vsel %vm3082_vm13, %v3093_v11, %v3095_v38  ;;  %v7857_v57 = vadd.f32 0.008332121, %v2255_v16  ;;  %v3098_v27 = vand.u32 65535, %v7818_v21 }
 0x359   :  { %v3100_v20 = vand.u32 65535, %v3096_v58  ;;  %v3101_v56 = vshrl.u32 %v3096_v58, 16  ;;  %v7862_v23 = vmul.f32 %v7848_v51, %v7848_v51  ;;  %v3099_v15 = vshrl.u32 %v7818_v21, 16 }
 0x35a   :  { %v2841_v29 = vsub.s32 %v2837_v17, %v2840_v4  ;;  %v7866_v62 = vand.u32 3, %v7685_v9  ;;  %v2833_v50 = vadd.s32 %v2828_v26, %v2809_v45  ;;  %v3065_v41 = vshrl.u32 %v9535_v25, %v7783_v36 }
 0x35b   :  { %v3103_v13 = vmul.u32 %v3101_v56, %v3098_v27  ;;  %v3125_v12 = vmul.u32 %v3123_v8, %v3098_v27  ;;  %v3104_v60 = vmul.u32 %v3100_v20, %v3099_v15  ;;  %v3126_v11 = vmul.u32 %v3122_v39, %v3099_v15 }
 0x35c   :  { %vm2842_vm4 = vcmp.lt.s32.totalorder %v2841_v29, 0  ;;  %v2843_v16 = vsub.s32 0, %v2841_v29  ;;  %v3085_v48 = vsel %vm3081_vm15, %v3065_v41, %v3068_v22  ;;  %v3086_v17 = vsel %vm3084_vm1, %v3074_v0, 2102212464 }
 0x35d   :  { %v3102_v59 = vmul.u32 %v3100_v20, %v3098_v27  ;;  %v3106_v38 = vshll.u32 %v3103_v13, 16  ;;  %v3105_v4 = vmul.u32 %v3101_v56, %v3099_v15  ;;  %v3108_v45 = vshll.u32 %v3104_v60, 16 }
 0x35e   :  { %v2844_v9 = vsel %vm2842_vm4, %v2843_v16, %v2841_v29  ;;  %v3124_v26 = vmul.u32 %v3122_v39, %v3098_v27  ;;  %v3128_v30 = vshll.u32 %v3125_v12, 16  ;;  %v3087_v47 = vsel %vm3083_vm10, %v7808_v40, %v3086_v17 }
 0x35f   :  { %v2845_v58 = vclz %v2844_v9  ;;  %vm3110_vm11 = vc.u32 %v3102_v59, %v3106_v38  ;;  %v3112_v36 = vadd.s32 %v3106_v38, %v3102_v59  ;;  %v3127_v22 = vmul.u32 %v3123_v8, %v3099_v15 }
 0x360   :  { %v3111_v2 = vsel %vm3110_vm11, 1, %v9534_v31  ;;  %v3130_v41 = vshll.u32 %v3126_v11, 16  ;;  %vm3132_vm12 = vc.u32 %v3124_v26, %v3128_v30  ;;  %v3134_v27 = vadd.s32 %v3128_v30, %v3124_v26 }
 0x361   :  { %v5476_v61 = vadd.s32 4294967294, %v2845_v58  ;;  %v3113_v0 = vadd.s32 %v3111_v2, %v3105_v4  ;;  %vm3114_vm6 = vc.u32 %v3112_v36, %v3108_v45  ;;  %v3133_v39 = vsel %vm3132_vm12, 1, %v9534_v31 }
 0x362   :  { %v3115_v20 = vsel %vm3114_vm6, 1, %v9534_v31  ;;  %v3023_v56 = vmul.f32 -0.001358992, %v7569_v63  ;;  %v3107_v16 = vshrl.u32 %v3103_v13, 16  ;;  %v3135_v38 = vadd.s32 %v3133_v39, %v3127_v22 }
 0x363   :  { %vm5477_vm7 = vcmp.lt.s32.totalorder %v5476_v61, 0  ;;  %v3117_v59 = vadd.s32 %v3115_v20, %v3113_v0  ;;  %v2565_v40 = vmul.f32 -0.00019511016, %v7862_v23  ;;  %vm3136_vm14 = vc.u32 %v3134_v27, %v3130_v41 }
 0x364   :  { %v2848_v17 = vsel %vm5477_vm7, 0, %v5476_v61  ;;  %v3024_v8 = vadd.f32 0.041655596, %v3023_v56  ;;  %v3088_v9 = vsel %vm3082_vm13, %v3085_v48, %v3087_v47  ;;  %v3109_v45 = vshrl.u32 %v3104_v60, 16 }
 0x365   :  { %v2849_v15 = vsub.s32 32, %v2848_v17  ;;  %v2853_v2 = vsub.s32 4294967266, %v2848_v17  ;;  %v3118_v4 = vadd.s32 %v3117_v59, %v3107_v16  ;;  %v3129_v58 = vshrl.u32 %v3125_v12, 16 }
 0x366   :  { %v3137_v30 = vsel %vm3136_vm14, 1, %v9534_v31  ;;  %v3025_v26 = vmul.f32 %v3024_v8, %v7569_v63  ;;  %v2850_v13 = vshll.u32 %v2841_v29, %v2848_v17  ;;  %v7886_v20 = vadd.f32 0.008332121, %v2565_v40 }
 0x367   :  { %v2851_v36 = vshrl.u32 %v2833_v50, %v2849_v15  ;;  %v2854_v22 = vadd.s32 127, %v2853_v2  ;;  %v3139_v0 = vadd.s32 %v3137_v30, %v3135_v38  ;;  %v7888_v61 = vadd.s32 %v3118_v4, %v3109_v45 }
 0x368   :  { %v3026_v39 = vadd.f32 -0.4999988, %v3025_v26  ;;  %v2713_v56 = vmul.f32 -0.001358992, %v7499_v42  ;;  %v3131_v48 = vshrl.u32 %v3126_v11, 16  ;;  %vm3037_vm0 = vweird.f32 %v7214_v7 }
 0x369   :  { %v2852_v37 = vor.u32 %v2851_v36, %v2850_v13  ;;  %v2855_v47 = vshll.u32 %v2854_v22, 23  ;;  %v3140_v60 = vadd.s32 %v3139_v0, %v3129_v58  ;;  %vm2741_vm2 = vcmp.lt.s32.totalorder %v7628_v3, 0  ;;  %v9595_v13 = vld [vmem:[#allocation7_spill] sm:$0xff] }
 0x36a   :  { %v7893_v12 = vadd.s32 %v3134_v27, %v3130_v41  ;;  %v3142_v29 = vmul.u32 %v7818_v21, %v3088_v9  ;;  %v3027_v50 = vmul.f32 %v3026_v39, %v7569_v63  ;;  %v2714_v16 = vadd.f32 0.041655596, %v2713_v56 }
 0x36b   :  { %v9591_v59 = vand.u32 2147483647, %v7628_v3  ;;  %v2856_v40 = vor.u32 4788187, %v2855_v47  ;;  %v3141_v11 = vadd.s32 %v3140_v60, %v3131_v48  ;;  %vm3040_vm15 = vcmp.lt.s32.totalorder %v7866_v62, 2 }
 0x36c   :  { %vm3041_vm1 = vcmp.eq.s32.totalorder %v7866_v62, 0  ;;  %vm3144_vm10 = vc.u32 %v7888_v61, %v7893_v12  ;;  %v3028_v41 = vadd.f32 1.0, %v3027_v50  ;;  %v2715_v21 = vmul.f32 %v2714_v16, %v7499_v42 }
 0x36d   :  { %vm7899_vm5 = vcmp.le.f32.partialorder %v9591_v59, 0.7853982  ;;  %v2403_v63 = vmul.f32 -0.001358992, %v7406_v53  ;;  %v2857_v27 = vand.u32 2147483647, %v2856_v40  ;;  %v2859_v17 = vcvt.s32.f32 %v2852_v37 }
 0x36e   :  { %v3145_v8 = vadd.s32 1, %v3141_v11  ;;  %vm3044_vm13 = vcmp.eq.s32.totalorder %v7866_v62, 2  ;;  %v9594_v15 = vxor.u32 2147483648, %v7690_v54  ;;  %v3045_v9 = vxor.u32 2147483648, %v3028_v41 }
 0x36f   :  { %v2716_v4 = vadd.f32 -0.4999988, %v2715_v21  ;;  %v2404_v45 = vadd.f32 0.041655596, %v2403_v63  ;;  %v2860_v58 = vmul.f32 %v2859_v17, %v2857_v27  ;;  %vm2727_vm4 = vweird.f32 %v7084_v10  ;;  %v9597_v63 = vld [vmem:[#allocation9_spill] sm:$0xff] }
 0x370   :  { %v3043_v2 = vsel %vm3041_vm1, %v3028_v41, %v9594_v15  ;;  %v3146_v30 = vsel %vm3144_vm10, %v3145_v8, %v3141_v11  ;;  %v2729_v26 = vand.u32 3, %v7676_v52  ;;  %v2093_v36 = vmul.f32 -0.001358992, %v9595_v13 }
 0x371   :  { %v3147_v22 = vadd.s32 %v3146_v30, %v3142_v29  ;;  %v3046_v0 = vsel %vm3044_vm13, %v3045_v9, %v7690_v54  ;;  %v2717_v39 = vmul.f32 %v2716_v4, %v7499_v42  ;;  %v2405_v56 = vmul.f32 %v2404_v45, %v7406_v53 }
 0x372   :  { %v2861_v37 = vxor.u32 2147483648, %v2860_v58  ;;  %v3047_v47 = vsel %vm3040_vm15, %v3043_v2, %v3046_v0  ;;  %v2419_v48 = vand.u32 3, %v7671_v35  ;;  %v2094_v60 = vadd.f32 0.041655596, %v2093_v36  ;;  %v9598_v0 = vld [vmem:[#allocation11_spill] sm:$0xff] }
 0x373   :  { %v3148_v50 = vadd.s32 536870912, %v3147_v22  ;;  %v3048_v52 = vsel %vm3037_vm0, nan, %v3047_v47  ;;  %v2718_v16 = vadd.f32 1.0, %v2717_v39  ;;  %v2406_v59 = vadd.f32 -0.4999988, %v2405_v56  ;;  %v9599_v39 = vld [vmem:[#allocation12_spill] sm:$0xff] }
 0x374   :  { %v2862_v54 = vsel %vm2741_vm2, %v2861_v37, %v2860_v58  ;;  %v7925_v29 = vand.u32 4294901760, %v3048_v52  ;;  %vm2731_vm11 = vcmp.eq.s32.totalorder %v2729_v26, 0  ;;  %v2095_v42 = vmul.f32 %v2094_v60, %v9595_v13 }
 0x375   :  { %v7931_v62 = vsel %vm7899_vm5, %v7628_v3, %v2862_v54  ;;  %v7933_v35 = vshrl.u32 %v3148_v50, 30  ;;  %v9596_v7 = vxor.u32 2147483648, %v7683_v1  ;;  %v2735_v11 = vxor.u32 2147483648, %v2718_v16 }
 0x376   :  { %v7939_v41 = vmul.f32 %v7931_v62, %v7931_v62  ;;  %3250 = vmatpush.msrb.mxu0 %v7925_v29  ;;  %3401 = vmatpush.msrb.mxu3 %v7925_v29  ;;  %vm2734_vm6 = vcmp.eq.s32.totalorder %v2729_v26, 2  ;;  %v2407_v21 = vmul.f32 %v2406_v59, %v7406_v53  ;;  %vm2417_vm12 = vweird.f32 %v9597_v63 }
 0x377   :  { %v2733_v40 = vsel %vm2731_vm11, %v2718_v16, %v9596_v7  ;;  %v2096_v27 = vadd.f32 -0.4999988, %v2095_v42  ;;  %v2553_v17 = vsub.s32 4, %v7678_v34  ;;  %v3150_v8 = vshll.u32 %v7933_v35, 30 }
 0x378   :  { %vm2730_vm7 = vcmp.lt.s32.totalorder %v2729_v26, 2  ;;  %v2736_v15 = vsel %vm2734_vm6, %v2735_v11, %v7683_v1  ;;  %v2875_v2 = vmul.f32 -0.00019511016, %v7939_v41  ;;  %v2408_v4 = vadd.f32 1.0, %v2407_v21 }
 0x379   :  { %v2737_v9 = vsel %vm2730_vm7, %v2733_v40, %v2736_v15  ;;  %v2097_v45 = vmul.f32 %v2096_v27, %v9595_v13  ;;  %v2257_v58 = vmul.f32 %v7857_v57, %v7787_v19  ;;  %v2567_v53 = vmul.f32 %v7886_v20, %v7862_v23 }
 0x37a   :  { %v7954_v30 = vsub.s32 %v3147_v22, %v3150_v8  ;;  %v2738_v36 = vsel %vm2727_vm4, nan, %v2737_v9  ;;  %v2863_v26 = vsub.s32 4, %v7838_v14  ;;  %vm2421_vm14 = vcmp.eq.s32.totalorder %v2419_v48, 0 }
 0x37b   :  { %v7959_v1 = vand.u32 4294901760, %v2738_v36  ;;  %vm2107_vm0 = vweird.f32 %v9598_v0  ;;  %v2109_v13 = vand.u32 3, %v9599_v39  ;;  %v9600_v20 = vxor.u32 2147483648, %v7661_v43  ;;  %v5484_v39 = vld [vmem:[%s9437_s2 + $0x20] sm:$0xff]  ;;  %v5485_v0 = vld [vmem:[%s9437_s2 + $0x28] sm:$0xff] }
 0x37c   :  { %vm3152_vm15 = vcmp.lt.s32.totalorder %v7954_v30, 0  ;;  %v3153_v57 = vsub.s32 0, %v7954_v30  ;;  %v2425_v56 = vxor.u32 2147483648, %v2408_v4  ;;  %v7970_v10 = vsel %vm2431_vm3, %v2553_v17, %v7678_v34 }
 0x37d   :  { %v2423_v22 = vsel %vm2421_vm14, %v2408_v4, %v9600_v20  ;;  %v2876_v37 = vadd.f32 0.008332121, %v2875_v2  ;;  %3252 = vmatpush.msrb.mxu0 %v7959_v1  ;;  %3403 = vmatpush.msrb.mxu3 %v7959_v1  ;;  %vm2424_vm1 = vcmp.eq.s32.totalorder %v2419_v48, 2  ;;  %v2098_v47 = vadd.f32 1.0, %v2097_v45 }
 0x37e   :  { %v2258_v60 = vadd.f32 -0.16666654, %v2257_v58  ;;  %v3154_v50 = vsel %vm3152_vm15, %v3153_v57, %v7954_v30  ;;  %vm2420_vm10 = vcmp.lt.s32.totalorder %v2419_v48, 2  ;;  %v2426_v16 = vsel %vm2424_vm1, %v2425_v56, %v7661_v43 }
 0x37f   :  { %v2568_v59 = vadd.f32 -0.16666654, %v2567_v53  ;;  %v3155_v54 = vclz %v3154_v50  ;;  %v2427_v42 = vsel %vm2420_vm10, %v2423_v22, %v2426_v16  ;;  %vm2111_vm13 = vcmp.eq.s32.totalorder %v2109_v13, 0 }
 0x380   :  { %v7979_v34 = vsel %vm2741_vm2, %v2863_v26, %v7838_v14  ;;  %v2428_v7 = vsel %vm2417_vm12, nan, %v2427_v42  ;;  %v9601_v40 = vxor.u32 2147483648, %v7592_v18  ;;  %v2115_v21 = vxor.u32 2147483648, %v2098_v47 }
 0x381   :  { %v2877_v48 = vmul.f32 %v2876_v37, %v7939_v41  ;;  %v5482_v27 = vadd.s32 4294967294, %v3155_v54  ;;  %v7986_v43 = vand.u32 4294901760, %v2428_v7  ;;  %vm2114_vm3 = vcmp.eq.s32.totalorder %v2109_v13, 2 }
 0x382   :  { %v2113_v11 = vsel %vm2111_vm13, %v2098_v47, %v9601_v40  ;;  %v2556_v17 = vsel %vm7796_vm8, 0, %v7970_v10  ;;  %v3303_v14 = vsub.f32 %v3048_v52, %v7925_v29  ;;  %vm2110_vm2 = vcmp.lt.s32.totalorder %v2109_v13, 2  ;;  %v5486_v40 = vld [vmem:[%s9437_s2 + $0x30] sm:$0xff] }
 0x383   :  { %v2116_v63 = vsel %vm2114_vm3, %v2115_v21, %v7592_v18  ;;  %v7994_v8 = vmul.f32 %v2258_v60, %v7787_v19  ;;  %v7997_v15 = vmul.f32 %v2568_v59, %v7862_v23  ;;  %vm5483_vm4 = vcmp.lt.s32.totalorder %v5482_v27, 0  ;;  %3254 = vmatpush.msrb.mxu0 %v7986_v43  ;;  %3405 = vmatpush.msrb.mxu3 %v7986_v43  ;;  %v5536_v10 = vld [vmem:[%s9435_s0 + $0x10] sm:$0xff] }
 0x384   :  { %v2117_v2 = vsel %vm2110_vm2, %v2113_v11, %v2116_v63  ;;  %v2866_v9 = vsel %vm7899_vm5, 0, %v7979_v34  ;;  %v3143_v52 = vadd.s32 %v7893_v12, %v7888_v61  ;;  %v3158_v18 = vsel %vm5483_vm4, 0, %v5482_v27  ;;  %3357 = vmatpush.msrb.mxu2 %v3303_v14 }
 0x385   :  { %v2118_v4 = vsel %vm2107_vm0, nan, %v2117_v2  ;;  %v2878_v45 = vadd.f32 -0.16666654, %v2877_v48  ;;  %vm3051_vm11 = vcmp.lt.s32.totalorder %v7680_v6, 0  ;;  %v3159_v58 = vsub.s32 32, %v3158_v18 }
 0x386   :  { %v3163_v53 = vsub.s32 4294967266, %v3158_v18  ;;  %v3173_v26 = vsub.s32 4, %v7933_v35  ;;  %v3309_v13 = vsub.f32 %v2738_v36, %v7959_v1  ;;  %v8014_v57 = vand.u32 4294901760, %v2118_v4 }
 0x387   :  { %v3315_v61 = vsub.f32 %v2428_v7, %v7986_v43  ;;  %v3304_v12 = vand.u32 4294901760, %v3303_v14  ;;  %v3160_v20 = vshll.u32 %v7954_v30, %v3158_v18  ;;  %v3161_v22 = vshrl.u32 %v3143_v52, %v3159_v58  ;;  %v5487_v18 = vld [vmem:[%s9437_s2 + $0x38] sm:$0xff] }
 0x388   :  { %v3164_v56 = vadd.s32 127, %v3163_v53  ;;  %v3226_v37 = vsel %vm9509_vm9, %v5484_v39, 0  ;;  %v9602_v47 = vand.u32 2147483647, %v7680_v6  ;;  %3360 = vmatpush.msrb.mxu2 %v3309_v13  ;;  %3256 = vmatpush.msrb.mxu0 %v8014_v57  ;;  %v3321_v50 = vsub.f32 %v2118_v4, %v8014_v57 }
 0x389   :  { %v3305_v36 = vsub.f32 %v3303_v14, %v3304_v12  ;;  %v3310_v16 = vand.u32 4294901760, %v3309_v13  ;;  %v8030_v59 = vand.u32 4294901760, %v3226_v37  ;;  %v3162_v30 = vor.u32 %v3161_v22, %v3160_v20  ;;  %3407 = vmatpush.msrb.mxu3 %v8014_v57 }
 0x38a   :  { %vm8024_vm6 = vcmp.le.f32.partialorder %v9602_v47, 0.7853982  ;;  %v3165_v54 = vshll.u32 %v3164_v56, 23  ;;  %3448 = vmatpush.msra.mxu0 %v3304_v12  ;;  %v3316_v42 = vand.u32 4294901760, %v3315_v61  ;;  %v3229_v7 = vsel %vm9509_vm9, %v5485_v0, 0  ;;  %3363 = vmatpush.msrb.mxu2 %v3315_v61 }
 0x38b   :  { %v3306_v11 = vand.u32 4294901760, %v3305_v36  ;;  %v3311_v21 = vsub.f32 %v3309_v13, %v3310_v16  ;;  %v8038_v48 = vsub.f32 %v3226_v37, %v8030_v59  ;;  %v3322_v27 = vand.u32 4294901760, %v3321_v50 }
 0x38c   :  { %v2879_v14 = vmul.f32 %v2878_v45, %v7939_v41  ;;  %v3166_v63 = vor.u32 4788187, %v3165_v54  ;;  %3452 = vmatpush.msra.mxu0 %v3310_v16  ;;  %v3317_v2 = vsub.f32 %v3315_v61, %v3316_v42  ;;  %v8041_v52 = vand.u32 4294901760, %v3229_v7  ;;  %3366 = vmatpush.msrb.mxu2 %v3321_v50 }
 0x38d   :  { %3307 = vmatpush.msrb.mxu1 %v3306_v11  ;;  %v3312_v4 = vand.u32 4294901760, %v3311_v21  ;;  %v8047_v58 = vand.u32 4294901760, %v8038_v48  ;;  %v3323_v53 = vsub.f32 %v3321_v50, %v3322_v27  ;;  %v3232_v39 = vsel %vm9509_vm9, %v5486_v40, 0  ;;  %3369 = vmatmul.f32.vlgmr.msrb.gmra.mxu2 %v8038_v48 }
 0x38e   :  { %v3167_v13 = vand.u32 2147483647, %v3166_v63  ;;  %v3169_v45 = vcvt.s32.f32 %v3162_v30  ;;  %3456 = vmatpush.msra.mxu0 %v3316_v42  ;;  %v8052_v61 = vsub.f32 %v3229_v7, %v8041_v52  ;;  %v8054_v12 = vand.u32 4294901760, %v3232_v39 }
 0x38f   :  { %v3174_v0 = vsel %vm3051_vm11, %v3173_v26, %v7933_v35  ;;  %3313 = vmatpush.msrb.mxu1 %v3312_v4  ;;  %v3318_v20 = vand.u32 4294901760, %v3317_v2  ;;  %v3260_v22 = vsub.f32 %v8038_v48, %v8047_v58  ;;  %3411 = vmatmul.f32.vlgmr.msrb.gmra.mxu3 %v8047_v58  ;;  %v3235_v56 = vsel %vm9509_vm9, %v5487_v18, 0 }
 0x390   :  { %v2260_v37 = vadd.f32 1.0, %v7994_v8  ;;  %v2570_v47 = vadd.f32 1.0, %v7997_v15  ;;  %v3170_v36 = vmul.f32 %v3169_v45, %v3167_v13  ;;  %3460 = vmatpush.msra.mxu0 %v3322_v27  ;;  %v8066_v50 = vand.u32 4294901760, %v8052_v61 }
 0x391   :  { %v2880_v16 = vadd.f32 1.0, %v2879_v14  ;;  %3319 = vmatpush.msrb.mxu1 %v3318_v20  ;;  %v8068_v35 = vand.u32 4294901760, %v3260_v22  ;;  %v3324_v26 = vand.u32 4294901760, %v3323_v53  ;;  %v8071_v30 = vsub.f32 %v3232_v39, %v8054_v12 }
 0x392   :  { %v2883_v8 = vadd.s32 3, %v2866_v9  ;;  %v3171_v54 = vxor.u32 2147483648, %v3170_v36  ;;  %v3176_v15 = vsel %vm8024_vm6, 0, %v3174_v0  ;;  %v8079_v42 = vand.u32 4294901760, %v3235_v56  ;;  %v5537_v0 = vld [vmem:[%s9435_s0 + $0x18] sm:$0xff] }
 0x393   :  { %3262 = vmatmul.f32.vlgmr.msrb.gmra.mxu0 %v8068_v35  ;;  %3325 = vmatpush.msrb.mxu1 %v3324_v26  ;;  %v3268_v7 = vsub.f32 %v8052_v61, %v8066_v50  ;;  %v2868_v40 = vmul.f32 -0.001358992, %v7939_v41  ;;  %v2558_v11 = vmul.f32 -0.001358992, %v7862_v23  ;;  %v8087_v38 = vmul.f32 %v2260_v37, %v7764_v49  ;;  %v5538_v37 = vld [vmem:[%s9435_s0 + $0x8] sm:$0xff] }
 0x394   :  { %v8090_v34 = vmul.f32 %v2570_v47, %v7848_v51  ;;  %v2573_v9 = vadd.s32 3, %v2556_v17  ;;  %v3172_v21 = vsel %vm3051_vm11, %v3171_v54, %v3170_v36  ;;  %3327 = vmatmul.f32.vlgmr.msrb.gmra.mxu1 %v8030_v59  ;;  %v5574_v27 = vmov 2  }
 0x395   :  { %5534 = vset.pattern.permute.xlu1 %v5574_v27  ;;  %v8100_v14 = vmul.f32 %v2880_v16, %v7931_v62  ;;  %v8105_v49 = vsel %vm8024_vm6, %v7680_v6, %v3172_v21  ;;  %3491 = vmatpush.msra.mxu1 %v7925_v29  ;;  %v8109_v5 = vand.u32 4294901760, %v8071_v30  ;;  %v2869_v51 = vadd.f32 0.041655596, %v2868_v40 }
 0x396   :  { %3218 = vperm.xlu1 %5534, %v5536_v10   ;;  %v3177_v62 = vmul.f32 %v8105_v49, %v8105_v49  ;;  %v3193_v17 = vadd.s32 3, %v3176_v15  ;;  %3374 = vmatmul.f32.gmra.mxu2 %v8052_v61  ;;  %v8118_v60 = vsub.f32 %v3235_v56, %v8079_v42  ;;  %v8120_v63 = vand.u32 3, %v2883_v8 }
 0x397   :  { %5533 = vset.pattern.permute.xlu0 %v5574_v27  ;;  %3493 = vmatpush.msra.mxu1 %v7959_v1  ;;  %v8123_v29 = vand.u32 4294901760, %v3268_v7  ;;  %v2870_v2 = vmul.f32 %v2869_v51, %v7939_v41  ;;  %v2559_v18 = vadd.f32 0.041655596, %v2558_v11  ;;  %v2248_v4 = vmul.f32 -0.001358992, %v7787_v19 }
 0x398   :  { %3417 = vmatmul.f32.gmra.mxu3 %v8066_v50  ;;  %v2267_v53 = vxor.u32 2147483648, %v8087_v38  ;;  %v2577_v39 = vxor.u32 2147483648, %v8090_v34  ;;  %v3185_v13 = vmul.f32 -0.00019511016, %v3177_v62  ;;  %v3178_v45 = vmul.f32 -0.001358992, %v3177_v62  ;;  %3222 = vperm.xlu0 %5533, %v5537_v0  }
 0x399   :  { %5535 = vset.pattern.permute.xlu2 %v5574_v27  ;;  %v2887_v1 = vxor.u32 2147483648, %v8100_v14  ;;  %3495 = vmatpush.msra.mxu1 %v7986_v43  ;;  %v3276_v20 = vsub.f32 %v8071_v30, %v8109_v5  ;;  %v2871_v22 = vadd.f32 -0.4999988, %v2870_v2  ;;  %v2560_v56 = vmul.f32 %v2559_v18, %v7862_v23  ;;  %v5539_v27 = vld [vmem:[%s9435_s0] sm:$0xff] }
 0x39a   :  { %3214 = vperm.xlu2 %5535, %v5538_v37   ;;  %v3186_v47 = vadd.f32 0.008332121, %v3185_v13  ;;  %v3179_v36 = vadd.f32 0.041655596, %v3178_v45  ;;  %v8141_v16 = vand.u32 3, %v3193_v17  ;;  %v8144_v26 = vand.u32 4294901760, %v8118_v60 }
 0x39b   :  { %vm2882_vm8 = vweird.f32 %v7628_v3  ;;  %3270 = vmatmul.f32.gmra.mxu0 %v8123_v29  ;;  %3497 = vmatpush.msra.mxu1 %v8014_v57  ;;  %v2872_v43 = vmul.f32 %v2871_v22, %v7939_v41  ;;  %vm2885_vm5 = vcmp.lt.s32.totalorder %v8120_v63, 2  ;;  %v2561_v8 = vadd.f32 -0.4999988, %v2560_v56 }
 0x39c   :  { %v2249_v54 = vadd.f32 0.041655596, %v2248_v4  ;;  %v3187_v15 = vmul.f32 %v3186_v47, %v3177_v62  ;;  %3331 = vmatmul.f32.gmra.mxu1 %v8041_v52  ;;  %v3180_v7 = vmul.f32 %v3179_v36, %v3177_v62  ;;  %vm2886_vm12 = vcmp.eq.s32.totalorder %v8120_v63, 0 }
 0x39d   :  { %vm2572_vm7 = vweird.f32 %v9587_v44  ;;  %v2574_v40 = vand.u32 3, %v2573_v9  ;;  %v8154_v11 = vand.u32 4294901760, %v3276_v20  ;;  %v2873_v21 = vadd.f32 1.0, %v2872_v43 }
 0x39e   :  { %v2562_v57 = vmul.f32 %v2561_v8, %v7862_v23  ;;  %v2250_v41 = vmul.f32 %v2249_v54, %v7787_v19  ;;  %3210 = vperm.xlu1 %5534, %v5539_v27   ;;  %v3188_v51 = vadd.f32 -0.16666654, %v3187_v15  ;;  %3379 = vmatmul.f32.gmra.mxu2 %v8071_v30  ;;  %v3181_v10 = vadd.f32 -0.4999988, %v3180_v7 }
 0x39f   :  { %v3284_v17 = vsub.f32 %v8118_v60, %v8144_v26  ;;  %vm2889_vm14 = vcmp.eq.s32.totalorder %v8120_v63, 2  ;;  %v2888_v9 = vsel %vm2886_vm12, %v2873_v21, %v2887_v1  ;;  %v2890_v23 = vxor.u32 2147483648, %v2873_v21 }
 0x3a0   :  { %3423 = vmatmul.f32.gmra.mxu3 %v8109_v5  ;;  %v2563_v2 = vadd.f32 1.0, %v2562_v57  ;;  %v2251_v18 = vadd.f32 -0.4999988, %v2250_v41  ;;  %v3189_v4 = vmul.f32 %v3188_v51, %v3177_v62  ;;  %v3182_v13 = vmul.f32 %v3181_v10, %v3177_v62 }
 0x3a1   :  { %vm2576_vm0 = vcmp.eq.s32.totalorder %v2574_v40, 0  ;;  %vm2262_vm15 = vweird.f32 %v7361_v28  ;;  %v2264_v45 = vand.u32 3, %v7852_v33  ;;  %v2891_v0 = vsel %vm2889_vm14, %v2890_v23, %v8100_v14 }
 0x3a2   :  { %v2578_v20 = vsel %vm2576_vm0, %v2563_v2, %v2577_v39  ;;  %v2580_v22 = vxor.u32 2147483648, %v2563_v2  ;;  %v2252_v56 = vmul.f32 %v2251_v18, %v7787_v19  ;;  %v3190_v37 = vadd.f32 1.0, %v3189_v4 }
 0x3a3   :  { %v3183_v47 = vadd.f32 1.0, %v3182_v13  ;;  %v2892_v1 = vsel %vm2885_vm5, %v2888_v9, %v2891_v0  ;;  %vm2579_vm1 = vcmp.eq.s32.totalorder %v2574_v40, 2  ;;  %3278 = vmatmul.f32.gmra.mxu0 %v8154_v11  ;;  %vm2575_vm10 = vcmp.lt.s32.totalorder %v2574_v40, 2 }
 0x3a4   :  { %v2893_v62 = vsel %vm2882_vm8, nan, %v2892_v1  ;;  %v2581_v33 = vsel %vm2579_vm1, %v2580_v22, %v8090_v34  ;;  %v2253_v36 = vadd.f32 1.0, %v2252_v56  ;;  %v3191_v14 = vmul.f32 %v3190_v37, %v8105_v49  ;;  %3335 = vmatmul.f32.gmra.mxu1 %v8054_v12 }
 0x3a5   :  { %v3200_v19 = vxor.u32 2147483648, %v3183_v47  ;;  %v2582_v39 = vsel %vm2575_vm10, %v2578_v20, %v2581_v33  ;;  %vm2266_vm13 = vcmp.eq.s32.totalorder %v2264_v45, 0  ;;  %vm3195_vm3 = vcmp.lt.s32.totalorder %v8141_v16, 2 }
 0x3a6   :  { %v2583_v63 = vsel %vm2572_vm7, nan, %v2582_v39  ;;  %v2268_v3 = vsel %vm2266_vm13, %v2253_v36, %v2267_v53  ;;  %v2270_v43 = vxor.u32 2147483648, %v2253_v36  ;;  %v3197_v8 = vxor.u32 2147483648, %v3191_v14  ;;  %3384 = vmatmul.f32.gmra.mxu2 %v8118_v60 }
 0x3a7   :  { %vm3196_vm2 = vcmp.eq.s32.totalorder %v8141_v16, 0  ;;  %v3529_v34 = vand.u32 4294901760, %v2893_v62  ;;  %vm2269_vm4 = vcmp.eq.s32.totalorder %v2264_v45, 2  ;;  %vm3199_vm11 = vcmp.eq.s32.totalorder %v8141_v16, 2 }
 0x3a8   :  { %v8186_v49 = vand.u32 4294901760, %v3284_v17  ;;  %vm2265_vm6 = vcmp.lt.s32.totalorder %v2264_v45, 2  ;;  %v2271_v54 = vsel %vm2269_vm4, %v2270_v43, %v8087_v38  ;;  %3429 = vmatmul.f32.gmra.mxu3 %v8144_v26  ;;  %v3198_v44 = vsel %vm3196_vm2, %v3183_v47, %v3197_v8 }
 0x3a9   :  { %v3201_v15 = vsel %vm3199_vm11, %v3200_v19, %v3191_v14  ;;  %v3531_v53 = vand.u32 4294901760, %v2583_v63  ;;  %v2272_v7 = vsel %vm2265_vm6, %v2268_v3, %v2271_v54  ;;  %vm3192_vm8 = vweird.f32 %v7680_v6 }
 0x3aa   :  { %v3202_v40 = vsel %vm3195_vm3, %v3198_v44, %v3201_v15  ;;  %v2273_v21 = vsel %vm2262_vm15, nan, %v2272_v7  ;;  %v3587_v41 = vsub.f32 %v2893_v62, %v3529_v34 }
 0x3ab   :  { %v3203_v57 = vsel %vm3192_vm8, nan, %v3202_v40  ;;  %v3533_v27 = vand.u32 4294901760, %v2273_v21  ;;  %3286 = vmatmul.f32.gmra.mxu0 %v8186_v49  ;;  %v3593_v38 = vsub.f32 %v2583_v63, %v3531_v53 }
 0x3ac   :  { %v3527_v51 = vand.u32 4294901760, %v3203_v57  ;;  %3339 = vmatmul.f32.gmra.mxu1 %v8079_v42  ;;  %v3588_v6 = vand.u32 4294901760, %v3587_v41 }
 0x3ad   :  { %v3599_v17 = vsub.f32 %v2273_v21, %v3533_v27  ;;  %v3594_v28 = vand.u32 4294901760, %v3593_v38 }
 0x3ae   :  { %3528 = vmatpush.msra.mxu2 %v3527_v51  ;;  %3679 = vmatpush.msrb.mxu1 %v3527_v51  ;;  %v3581_v10 = vsub.f32 %v3203_v57, %v3527_v51  ;;  %v3589_v23 = vsub.f32 %v3587_v41, %v3588_v6 }
 0x3af   :  { %v3600_v2 = vand.u32 4294901760, %v3599_v17  ;;  %v3595_v4 = vsub.f32 %v3593_v38, %v3594_v28 }
 0x3b0   :  { %3530 = vmatpush.msra.mxu2 %v3529_v34  ;;  %3635 = vmatpush.msrb.mxu0 %v3581_v10  ;;  %v3582_v16 = vand.u32 4294901760, %v3581_v10  ;;  %v3590_v13 = vand.u32 4294901760, %v3589_v23 }
 0x3b1   :  { %3681 = vmatpush.msrb.mxu1 %v3529_v34  ;;  %v3601_v45 = vsub.f32 %v3599_v17, %v3600_v2  ;;  %v3596_v0 = vand.u32 4294901760, %v3595_v4 }
 0x3b2   :  { %3532 = vmatpush.msra.mxu2 %v3531_v53  ;;  %3638 = vmatpush.msrb.mxu0 %v3587_v41  ;;  %v3583_v9 = vsub.f32 %v3581_v10, %v3582_v16  ;;  %v9606_v41 = vmov 1326507024  }
 0x3b3   :  { %3683 = vmatpush.msrb.mxu1 %v3531_v53  ;;  %3462 = vmatmul.f32.vlgmr.msra.gmra.mxu0 %v8030_v59  ;;  %v3602_v20 = vand.u32 4294901760, %v3601_v45 }
 0x3b4   :  { %3534 = vmatpush.msra.mxu2 %v3533_v27  ;;  %3641 = vmatpush.msrb.mxu0 %v3593_v38  ;;  %v3584_v18 = vand.u32 4294901760, %v3583_v9 }
 0x3b5   :  { %3685 = vmatpush.msrb.mxu1 %v3533_v27  ;;  %3540 = vmatmul.f32.vlgmr.msra.gmra.mxu2 %v8068_v35 }
 0x3b6   :  { %3726 = vmatpush.msrb.mxu2 %v3582_v16  ;;  %3585 = vmatpush.msra.mxu3 %v3584_v18 }
 0x3b7   :  { %3644 = vmatpush.msrb.mxu0 %v3599_v17  ;;  %3499 = vmatmul.f32.vlgmr.msra.gmra.mxu1 %v8030_v59 }
 0x3b8   :  { %3730 = vmatpush.msrb.mxu2 %v3588_v6  ;;  %3591 = vmatpush.msra.mxu3 %v3590_v13 }
 0x3ba   :  { %3734 = vmatpush.msrb.mxu2 %v3594_v28  ;;  %3597 = vmatpush.msra.mxu3 %v3596_v0 }
 0x3bb   :  { %3466 = vmatmul.f32.gmra.mxu0 %v8041_v52 }
 0x3bc   :  { %3738 = vmatpush.msrb.mxu2 %v3600_v2  ;;  %3603 = vmatpush.msra.mxu3 %v3602_v20 }
 0x3bd   :  { %3548 = vmatmul.f32.gmra.mxu2 %v8123_v29  ;;  %3605 = vmatmul.f32.vlgmr.msra.gmra.mxu3 %v8030_v59 }
 0x3be   :  { %3769 = vmatpush.msrb.mxu3 %v3527_v51 }
 0x3bf   :  { %3503 = vmatmul.f32.gmra.mxu1 %v8041_v52 }
 0x3c0   :  { %3771 = vmatpush.msrb.mxu3 %v3529_v34 }
 0x3c2   :  { %3773 = vmatpush.msrb.mxu3 %v3531_v53 }
 0x3c3   :  { %3470 = vmatmul.f32.gmra.mxu0 %v8054_v12 }
 0x3c4   :  { %3775 = vmatpush.msrb.mxu3 %v3533_v27 }
 0x3c5   :  { %3556 = vmatmul.f32.gmra.mxu2 %v8154_v11  ;;  %3609 = vmatmul.f32.gmra.mxu3 %v8041_v52 }
 0x3c7   :  { %3507 = vmatmul.f32.gmra.mxu1 %v8054_v12 }
 0x3cb   :  { %3474 = vmatmul.f32.gmra.mxu0 %v8079_v42 }
 0x3cd   :  { %3564 = vmatmul.f32.gmra.mxu2 %v8186_v49  ;;  %3613 = vmatmul.f32.gmra.mxu3 %v8054_v12 }
 0x3cf   :  { %3511 = vmatmul.f32.gmra.mxu1 %v8079_v42 }
 0x3d3   :  { %3647 = vmatmul.f32.vlgmr.msrb.gmra.mxu0 %v8038_v48 }
 0x3d5   :  { %3740 = vmatmul.f32.vlgmr.msrb.gmra.mxu2 %v8030_v59  ;;  %3617 = vmatmul.f32.gmra.mxu3 %v8079_v42 }
 0x3d7   :  { %3689 = vmatmul.f32.vlgmr.msrb.gmra.mxu1 %v8047_v58 }
 0x3db   :  { %3652 = vmatmul.f32.gmra.mxu0 %v8052_v61 }
 0x3dd   :  { %3744 = vmatmul.f32.gmra.mxu2 %v8041_v52  ;;  %3777 = vmatmul.f32.vlgmr.msrb.gmra.mxu3 %v8030_v59 }
 0x3df   :  { %3695 = vmatmul.f32.gmra.mxu1 %v8066_v50 }
 0x3e3   :  { %3657 = vmatmul.f32.gmra.mxu0 %v8071_v30 }
 0x3e5   :  { %3748 = vmatmul.f32.gmra.mxu2 %v8054_v12  ;;  %3781 = vmatmul.f32.gmra.mxu3 %v8041_v52 }
 0x3e7   :  { %3701 = vmatmul.f32.gmra.mxu1 %v8109_v5 }
 0x3eb   :  { %3662 = vmatmul.f32.gmra.mxu0 %v8118_v60 }
 0x3ed   :  { %3752 = vmatmul.f32.gmra.mxu2 %v8079_v42  ;;  %3785 = vmatmul.f32.gmra.mxu3 %v8054_v12 }
 0x3ef   :  { %3707 = vmatmul.f32.gmra.mxu1 %v8144_v26 }
 0x3f5   :  { %3789 = vmatmul.f32.gmra.mxu3 %v8079_v42 }
 0x408   :  { %v8233_v52 = vpop.permute.xlu1 %3218 }
 0x410   :  { %v3263_v59 = vpop.f32.mrf.mxu0  ;;  %v8239_v30 = vpop.permute.xlu1 %3210 }
 0x411   :  { %v3328_v48 = vpop.f32.mrf.mxu1  ;;  %v3264_v12 = vadd.f32 %v3263_v59, %v8239_v30  ;;  %v3370_v29 = vpop.f32.mrf.mxu2 }
 0x412   :  { %v3412_v11 = vpop.f32.mrf.mxu3 }
 0x413   :  { %v3329_v42 = vadd.f32 %v3328_v48, %v3264_v12 }
 0x415   :  { %v3371_v26 = vadd.f32 %v3370_v29, %v3329_v42 }
 0x417   :  { %v3413_v22 = vadd.f32 %v3412_v11, %v3371_v26 }
 0x418   :  { %v8229_v58 = vpop.f32.mrf.mxu0 }
 0x419   :  { %v8231_v61 = vpop.f32.mrf.mxu1 }
 0x420   :  { %v8235_v50 = vpop.f32.mrf.mxu0 }
 0x421   :  { %v8237_v35 = vpop.f32.mrf.mxu1 }
 0x428   :  { %v8242_v5 = vpop.f32.mrf.mxu0 }
 0x429   :  { %v8244_v60 = vpop.f32.mrf.mxu1 }
 0x430   :  { %v3463_v56 = vpop.f32.mrf.mxu0 }
 0x431   :  { %v3464_v47 = vadd.f32 %v3463_v56, %v3413_v22 }
 0x434   :  { %v3500_v37 = vpop.f32.mrf.mxu1 }
 0x435   :  { %v8246_v1 = vadd.f32 %v3500_v37, %v3464_v47 }
 0x437   :  { %9605 = vst [vmem:[#allocation8_spill] sm:$0xff] %v8246_v1  ;;  %v3796_v62 = vand.u32 2139095040, %v8246_v1  ;;  %v3793_v14 = vand.u32 2147483647, %v8246_v1 }
 0x439   :  { %v3797_v33 = vshrl.u32 %v3796_v62, 23  ;;  %v3800_v39 = vand.u32 8388607, %v3793_v14 }
 0x43b   :  { %v5488_v36 = vadd.s32 4294967169, %v3797_v33  ;;  %v3801_v8 = vor.u32 8388608, %v3800_v39 }
 0x43d   :  { %v3803_v19 = vadd.s32 1, %v5488_v36  ;;  %v8265_v16 = vshll.u32 %v3801_v8, 8 }
 0x43f   :  { %vm3804_vm5 = vcmp.gt.s32.totalorder %v3803_v19, 0  ;;  %v3842_v0 = vand.u32 65535, %v8265_v16  ;;  %v3843_v20 = vshrl.u32 %v8265_v16, 16 }
 0x440   :  { %v3805_v63 = vsel %vm3804_vm5, %v3803_v19, 0 }
 0x441   :  { %v3807_v3 = vand.u32 31, %v3805_v63  ;;  %v8252_v34 = vshrl.u32 %v3805_v63, 5 }
 0x443   :  { %v3808_v43 = vsub.s32 32, %v3807_v3  ;;  %v3810_v49 = vshll.u32 %v9535_v25, %v3807_v3  ;;  %v3813_v54 = vshll.u32 %v9526_v55, %v3807_v3  ;;  %v3816_v53 = vshll.u32 %v9527_v24, %v3807_v3 }
 0x444   :  { %v3819_v40 = vshll.u32 %v9558_v32, %v3807_v3  ;;  %v3822_v57 = vshll.u32 %v9582_v46, %v3807_v3  ;;  %vm3825_vm12 = vcmp.lt.s32.totalorder %v8252_v34, 1  ;;  %vm3828_vm7 = vcmp.lt.s32.totalorder %v8252_v34, 4 }
 0x445   :  { %v3811_v44 = vshrl.u32 %v9526_v55, %v3808_v43  ;;  %v3814_v15 = vshrl.u32 %v9527_v24, %v3808_v43  ;;  %v3817_v7 = vshrl.u32 %v9558_v32, %v3808_v43  ;;  %v3820_v21 = vshrl.u32 %v9582_v46, %v3808_v43 }
 0x446   :  { %v3823_v27 = vshrl.u32 %v9606_v41, %v3808_v43  ;;  %vm3827_vm14 = vcmp.lt.s32.totalorder %v8252_v34, 3  ;;  %vm3826_vm0 = vcmp.lt.s32.totalorder %v8252_v34, 2  ;;  %v3280_v34 = vadd.f32 %v8235_v50, %v8233_v52 }
 0x447   :  { %v3812_v51 = vor.u32 %v3811_v44, %v3810_v49  ;;  %v3815_v38 = vor.u32 %v3814_v15, %v3813_v54  ;;  %v3818_v10 = vor.u32 %v3817_v7, %v3816_v53  ;;  %v3821_v17 = vor.u32 %v3820_v21, %v3819_v40  ;;  %v8289_v49 = vpop.permute.xlu2 %3214 }
 0x448   :  { %v3824_v6 = vor.u32 %v3823_v27, %v3822_v57  ;;  %v3809_v40 = vshrl.u32 %v9535_v25, %v3808_v43 }
 0x449   :  { %v3833_v28 = vsel %vm3825_vm12, %v3812_v51, %v3815_v38  ;;  %v3837_v9 = vsel %vm3825_vm12, %v3815_v38, %v3818_v10  ;;  %v3834_v23 = vsel %vm3828_vm7, %v3821_v17, 920167782  ;;  %v3830_v15 = vsel %vm3828_vm7, %v3818_v10, 2102212464 }
 0x44a   :  { %v3838_v2 = vsel %vm3828_vm7, %v3824_v6, 1326507024  ;;  %v3835_v18 = vsel %vm3827_vm14, %v3818_v10, %v3834_v23  ;;  %v3831_v10 = vsel %vm3827_vm14, %v3815_v38, %v3830_v15 }
 0x44b   :  { %v3839_v4 = vsel %vm3827_vm14, %v3821_v17, %v3838_v2  ;;  %v3836_v13 = vsel %vm3826_vm0, %v3833_v28, %v3835_v18  ;;  %v3272_v17 = vadd.f32 %v8229_v58, %v8289_v49 }
 0x44c   :  { %v3840_v45 = vsel %vm3826_vm0, %v3837_v9, %v3839_v4  ;;  %v3866_v12 = vand.u32 65535, %v3836_v13  ;;  %v3867_v42 = vshrl.u32 %v3836_v13, 16  ;;  %v3829_v9 = vsel %vm3825_vm12, %v3809_v40, %v3812_v51 }
 0x44d   :  { %v3844_v59 = vand.u32 65535, %v3840_v45  ;;  %v3845_v48 = vshrl.u32 %v3840_v45, 16  ;;  %v3333_v45 = vadd.f32 %v8231_v61, %v3272_v17  ;;  %v3832_v58 = vsel %vm3826_vm0, %v3829_v9, %v3831_v10 }
 0x44e   :  { %v3869_v11 = vmul.u32 %v3867_v42, %v3842_v0  ;;  %v3870_v22 = vmul.u32 %v3866_v12, %v3843_v20  ;;  %v3868_v62 = vmul.u32 %v3866_v12, %v3842_v0  ;;  %v3871_v39 = vmul.u32 %v3867_v42, %v3843_v20  ;;  %v3418_v12 = vpop.f32.mrf.mxu3 }
 0x44f   :  { %v3847_v29 = vmul.u32 %v3845_v48, %v3842_v0  ;;  %v3848_v26 = vmul.u32 %v3844_v59, %v3843_v20  ;;  %v3846_v56 = vmul.u32 %v3844_v59, %v3842_v0  ;;  %v3849_v47 = vmul.u32 %v3845_v48, %v3843_v20  ;;  %v3375_v20 = vpop.f32.mrf.mxu2 }
 0x450   :  { %v3872_v33 = vshll.u32 %v3869_v11, 16  ;;  %v3874_v3 = vshll.u32 %v3870_v22, 16  ;;  %v3873_v6 = vshrl.u32 %v3869_v11, 16  ;;  %v3875_v18 = vshrl.u32 %v3870_v22, 16 }
 0x451   :  { %v3850_v37 = vshll.u32 %v3847_v29, 16  ;;  %v3852_v36 = vshll.u32 %v3848_v26, 16  ;;  %v3851_v21 = vshrl.u32 %v3847_v29, 16  ;;  %v3853_v23 = vshrl.u32 %v3848_v26, 16  ;;  %v3467_v26 = vpop.f32.mrf.mxu0 }
 0x452   :  { %vm3876_vm1 = vc.u32 %v3868_v62, %v3872_v33  ;;  %v3878_v8 = vadd.s32 %v3872_v33, %v3868_v62  ;;  %v3886_v38 = vmul.u32 %v8265_v16, %v3832_v58  ;;  %v3376_v48 = vadd.f32 %v3375_v20, %v3333_v45 }
 0x453   :  { %vm3854_vm15 = vc.u32 %v3846_v56, %v3850_v37  ;;  %v3856_v19 = vadd.s32 %v3850_v37, %v3846_v56  ;;  %v3877_v44 = vsel %vm3876_vm1, 1, %v9534_v31  ;;  %v3504_v37 = vpop.f32.mrf.mxu1  ;;  %v3337_v33 = vadd.f32 %v8237_v35, %v3280_v34 }
 0x454   :  { %v3855_v63 = vsel %vm3854_vm15, 1, %v9534_v31  ;;  %v3879_v7 = vadd.s32 %v3877_v44, %v3871_v39  ;;  %vm3880_vm13 = vc.u32 %v3878_v8, %v3874_v3  ;;  %v8305_v13 = vadd.s32 %v3878_v8, %v3874_v3 }
 0x455   :  { %v3857_v54 = vadd.s32 %v3855_v63, %v3849_v47  ;;  %vm3858_vm10 = vc.u32 %v3856_v19, %v3852_v36  ;;  %v3881_v27 = vsel %vm3880_vm13, 1, %v9534_v31  ;;  %v3419_v11 = vadd.f32 %v3418_v12, %v3376_v48 }
 0x456   :  { %v3859_v53 = vsel %vm3858_vm10, 1, %v9534_v31  ;;  %v3883_v28 = vadd.s32 %v3881_v27, %v3879_v7  ;;  %v3424_v44 = vpop.f32.mrf.mxu3 }
 0x457   :  { %v3861_v57 = vadd.s32 %v3859_v53, %v3857_v54  ;;  %v3468_v61 = vadd.f32 %v3467_v26, %v3419_v11  ;;  %v3380_v63 = vpop.f32.mrf.mxu2 }
 0x458   :  { %v3884_v4 = vadd.s32 %v3883_v28, %v3873_v6  ;;  %v3381_v8 = vadd.f32 %v3380_v63, %v3337_v33 }
 0x459   :  { %v3862_v2 = vadd.s32 %v3861_v57, %v3851_v21  ;;  %v8318_v47 = vadd.f32 %v3504_v37, %v3468_v61  ;;  %v3471_v7 = vpop.f32.mrf.mxu0 }
 0x45a   :  { %v3885_v0 = vadd.s32 %v3884_v4, %v3875_v18  ;;  %v3425_v40 = vadd.f32 %v3424_v44, %v3381_v8  ;;  %v8371_v8 = vpop.permute.xlu0 %3222 }
 0x45b   :  { %v8303_v43 = vadd.s32 %v3862_v2, %v3853_v23  ;;  %9607 = vst [vmem:[#allocation10_spill] sm:$0xff] %v8318_v47  ;;  %v4106_v16 = vand.u32 2139095040, %v8318_v47  ;;  %v9492_v54 = vand.u32 2147483647, %v8318_v47  ;;  %v3508_v57 = vpop.f32.mrf.mxu1 }
 0x45c   :  { %v3889_v51 = vadd.s32 1, %v3885_v0  ;;  %v3472_v17 = vadd.f32 %v3471_v7, %v3425_v40 }
 0x45d   :  { %vm3888_vm3 = vc.u32 %v8303_v43, %v8305_v13  ;;  %v4107_v19 = vshrl.u32 %v4106_v16, 23  ;;  %v4110_v35 = vand.u32 8388607, %v9492_v54 }
 0x45e   :  { %v3890_v59 = vsel %vm3888_vm3, %v3889_v51, %v3885_v0  ;;  %v8330_v9 = vadd.f32 %v3508_v57, %v3472_v17  ;;  %v3288_v17 = vadd.f32 %v8242_v5, %v8371_v8 }
 0x45f   :  { %v3891_v42 = vadd.s32 %v3890_v59, %v3886_v38  ;;  %v5494_v3 = vadd.s32 4294967169, %v4107_v19  ;;  %v4111_v6 = vor.u32 8388608, %v4110_v35 }
 0x460   :  { %9608 = vst [vmem:[#allocation6_spill] sm:$0xff] %v8330_v9  ;;  %v4416_v33 = vand.u32 2139095040, %v8330_v9 }
 0x461   :  { %v3892_v29 = vadd.s32 536870912, %v3891_v42  ;;  %v4113_v15 = vadd.s32 1, %v5494_v3 }
 0x462   :  { %v4417_v35 = vshrl.u32 %v4416_v33, 23 }
 0x463   :  { %v8313_v22 = vshrl.u32 %v3892_v29, 30  ;;  %vm4114_vm4 = vcmp.gt.s32.totalorder %v4113_v15, 0  ;;  %v8346_v29 = vshll.u32 %v4111_v6, 8 }
 0x464   :  { %v4115_v21 = vsel %vm4114_vm4, %v4113_v15, 0 }
 0x465   :  { %v3894_v56 = vshll.u32 %v8313_v22, 30  ;;  %v4117_v27 = vand.u32 31, %v4115_v21  ;;  %v8334_v23 = vshrl.u32 %v4115_v21, 5  ;;  %v4152_v3 = vand.u32 65535, %v8346_v29 }
 0x466   :  { %v4153_v44 = vshrl.u32 %v8346_v29, 16  ;;  %v3887_v21 = vadd.s32 %v8305_v13, %v8303_v43 }
 0x467   :  { %v8320_v62 = vsub.s32 %v3891_v42, %v3894_v56  ;;  %v4118_v28 = vsub.s32 32, %v4117_v27  ;;  %v4120_v2 = vshll.u32 %v9535_v25, %v4117_v27  ;;  %v4123_v18 = vshll.u32 %v9526_v55, %v4117_v27 }
 0x468   :  { %v4126_v58 = vshll.u32 %v9527_v24, %v4117_v27  ;;  %v4129_v51 = vshll.u32 %v9558_v32, %v4117_v27  ;;  %v4132_v38 = vshll.u32 %v9582_v46, %v4117_v27  ;;  %vm4135_vm6 = vcmp.lt.s32.totalorder %v8334_v23, 1 }
 0x469   :  { %vm3896_vm2 = vcmp.lt.s32.totalorder %v8320_v62, 0  ;;  %v3897_v36 = vsub.s32 0, %v8320_v62  ;;  %v4121_v4 = vshrl.u32 %v9526_v55, %v4118_v28  ;;  %v4124_v45 = vshrl.u32 %v9527_v24, %v4118_v28 }
 0x46a   :  { %v4127_v0 = vshrl.u32 %v9558_v32, %v4118_v28  ;;  %v4130_v20 = vshrl.u32 %v9582_v46, %v4118_v28  ;;  %v4133_v59 = vshrl.u32 %v9606_v41, %v4118_v28  ;;  %vm4138_vm8 = vcmp.lt.s32.totalorder %v8334_v23, 4 }
 0x46b   :  { %v3898_v39 = vsel %vm3896_vm2, %v3897_v36, %v8320_v62  ;;  %v4122_v48 = vor.u32 %v4121_v4, %v4120_v2  ;;  %v4125_v12 = vor.u32 %v4124_v45, %v4123_v18  ;;  %vm4137_vm5 = vcmp.lt.s32.totalorder %v8334_v23, 3 }
 0x46c   :  { %v3899_v50 = vclz %v3898_v39  ;;  %v4128_v42 = vor.u32 %v4127_v0, %v4126_v58  ;;  %v4131_v11 = vor.u32 %v4130_v20, %v4129_v51  ;;  %v4134_v61 = vor.u32 %v4133_v59, %v4132_v38 }
 0x46d   :  { %v4143_v34 = vsel %vm4135_vm6, %v4122_v48, %v4125_v12  ;;  %vm4136_vm12 = vcmp.lt.s32.totalorder %v8334_v23, 2  ;;  %v9491_v4 = vand.u32 2147483647, %v8330_v9  ;;  %v4119_v45 = vshrl.u32 %v9535_v25, %v4118_v28 }
 0x46e   :  { %v5489_v53 = vadd.s32 4294967294, %v3899_v50  ;;  %v4147_v56 = vsel %vm4135_vm6, %v4125_v12, %v4128_v42  ;;  %v4144_v37 = vsel %vm4138_vm8, %v4131_v11, 920167782  ;;  %v4148_v16 = vsel %vm4138_vm8, %v4134_v61, 1326507024 }
 0x46f   :  { %v4145_v36 = vsel %vm4137_vm5, %v4128_v42, %v4144_v37  ;;  %v4149_v19 = vsel %vm4137_vm5, %v4131_v11, %v4148_v16  ;;  %v4140_v58 = vsel %vm4138_vm8, %v4128_v42, 2102212464  ;;  %v5500_v38 = vadd.s32 4294967169, %v4417_v35 }
 0x470   :  { %vm5490_vm11 = vcmp.lt.s32.totalorder %v5489_v53, 0  ;;  %v4146_v63 = vsel %vm4136_vm12, %v4143_v34, %v4145_v36  ;;  %v4150_v50 = vsel %vm4136_vm12, %v4147_v56, %v4149_v19  ;;  %v4139_v11 = vsel %vm4135_vm6, %v4119_v45, %v4122_v48 }
 0x471   :  { %v8332_v10 = vsel %vm5490_vm11, 0, %v5489_v53  ;;  %v4154_v15 = vand.u32 65535, %v4150_v50  ;;  %v4155_v53 = vshrl.u32 %v4150_v50, 16  ;;  %v4177_v7 = vshrl.u32 %v4146_v63, 16 }
 0x472   :  { %v3907_v26 = vsub.s32 4294967266, %v8332_v10  ;;  %v4176_v40 = vand.u32 65535, %v4146_v63  ;;  %v3903_v6 = vsub.s32 32, %v8332_v10  ;;  %v4141_v37 = vsel %vm4137_vm5, %v4125_v12, %v4140_v58 }
 0x473   :  { %v4157_v57 = vmul.u32 %v4155_v53, %v4152_v3  ;;  %v4158_v27 = vmul.u32 %v4154_v15, %v4153_v44  ;;  %v4179_v18 = vmul.u32 %v4177_v7, %v4152_v3  ;;  %v4156_v0 = vmul.u32 %v4154_v15, %v4152_v3 }
 0x474   :  { %v3908_v39 = vadd.s32 127, %v3907_v26  ;;  %v4159_v20 = vmul.u32 %v4155_v53, %v4153_v44  ;;  %v4180_v43 = vmul.u32 %v4176_v40, %v4153_v44  ;;  %v4178_v26 = vmul.u32 %v4176_v40, %v4152_v3 }
 0x475   :  { %v4160_v51 = vshll.u32 %v4157_v57, 16  ;;  %v4182_v13 = vshll.u32 %v4179_v18, 16  ;;  %v4162_v59 = vshll.u32 %v4158_v27, 16  ;;  %v4181_v34 = vmul.u32 %v4177_v7, %v4153_v44 }
 0x476   :  { %v3909_v2 = vshll.u32 %v3908_v39, 23  ;;  %v4184_v28 = vshll.u32 %v4180_v43, 16  ;;  %v4423_v36 = vadd.s32 1, %v5500_v38  ;;  %v4161_v19 = vshrl.u32 %v4157_v57, 16  ;;  %v3385_v38 = vpop.f32.mrf.mxu2 }
 0x477   :  { %vm4164_vm7 = vc.u32 %v4156_v0, %v4160_v51  ;;  %v4166_v5 = vadd.s32 %v4160_v51, %v4156_v0  ;;  %vm4186_vm0 = vc.u32 %v4178_v26, %v4182_v13  ;;  %v4188_v42 = vadd.s32 %v4182_v13, %v4178_v26 }
 0x478   :  { %v4165_v61 = vsel %vm4164_vm7, 1, %v9534_v31  ;;  %v4187_v33 = vsel %vm4186_vm0, 1, %v9534_v31  ;;  %v4163_v48 = vshrl.u32 %v4158_v27, 16  ;;  %v4420_v3 = vand.u32 8388607, %v9491_v4 }
 0x479   :  { %v4167_v56 = vadd.s32 %v4165_v61, %v4159_v20  ;;  %vm4168_vm14 = vc.u32 %v4166_v5, %v4162_v59  ;;  %v4189_v63 = vadd.s32 %v4187_v33, %v4181_v34  ;;  %vm4190_vm15 = vc.u32 %v4188_v42, %v4184_v28 }
 0x47a   :  { %v4169_v16 = vsel %vm4168_vm14, 1, %v9534_v31  ;;  %v4191_v50 = vsel %vm4190_vm15, 1, %v9534_v31  ;;  %vm4424_vm1 = vcmp.gt.s32.totalorder %v4423_v36, 0  ;;  %v4183_v15 = vshrl.u32 %v4179_v18, 16 }
 0x47b   :  { %v4171_v39 = vadd.s32 %v4169_v16, %v4167_v56  ;;  %v4193_v53 = vadd.s32 %v4191_v50, %v4189_v63  ;;  %v4425_v12 = vsel %vm4424_vm1, %v4423_v36, 0  ;;  %v3904_v7 = vshll.u32 %v8320_v62, %v8332_v10 }
 0x47c   :  { %v3905_v40 = vshrl.u32 %v3887_v21, %v3903_v6  ;;  %v3341_v35 = vadd.f32 %v8244_v60, %v3288_v17  ;;  %v4427_v57 = vand.u32 31, %v4425_v12  ;;  %v3910_v45 = vor.u32 4788187, %v3909_v2  ;;  %v3430_v6 = vpop.f32.mrf.mxu3 }
 0x47d   :  { %v4172_v44 = vadd.s32 %v4171_v39, %v4161_v19  ;;  %v4185_v27 = vshrl.u32 %v4180_v43, 16  ;;  %v4194_v0 = vadd.s32 %v4193_v53, %v4183_v15  ;;  %v4142_v51 = vsel %vm4136_vm12, %v4139_v11, %v4141_v37 }
 0x47e   :  { %v8400_v20 = vadd.s32 %v4188_v42, %v4184_v28  ;;  %v4421_v18 = vor.u32 8388608, %v4420_v3  ;;  %v8402_v13 = vsub.s32 32, %v4427_v57  ;;  %v8404_v62 = vshrl.u32 %v4425_v12, 5 }
 0x47f   :  { %v8396_v58 = vadd.s32 %v4172_v44, %v4163_v48  ;;  %v4195_v59 = vadd.s32 %v4194_v0, %v4185_v27  ;;  %v4430_v60 = vshll.u32 %v9535_v25, %v4427_v57  ;;  %v4433_v10 = vshll.u32 %v9526_v55, %v4427_v57 }
 0x480   :  { %v4431_v23 = vshrl.u32 %v9526_v55, %v8402_v13  ;;  %v4434_v21 = vshrl.u32 %v9527_v24, %v8402_v13  ;;  %v4436_v17 = vshll.u32 %v9527_v24, %v4427_v57  ;;  %v4437_v43 = vshrl.u32 %v9558_v32, %v8402_v13 }
 0x481   :  { %vm4198_vm10 = vc.u32 %v8396_v58, %v8400_v20  ;;  %v4199_v2 = vadd.s32 1, %v4195_v59  ;;  %v4439_v5 = vshll.u32 %v9558_v32, %v4427_v57  ;;  %v4440_v26 = vshrl.u32 %v9582_v46, %v8402_v13 }
 0x482   :  { %v4196_v11 = vmul.u32 %v8346_v29, %v4142_v51  ;;  %v8421_v61 = vor.u32 %v4431_v23, %v4430_v60  ;;  %v8423_v34 = vor.u32 %v4434_v21, %v4433_v10  ;;  %v4442_v28 = vshll.u32 %v9582_v46, %v4427_v57  ;;  %v8457_v57 = vpop.f32.mrf.mxu2  ;;  %v3475_v60 = vpop.f32.mrf.mxu0 }
 0x483   :  { %v4200_v56 = vsel %vm4198_vm10, %v4199_v2, %v4195_v59  ;;  %v8426_v42 = vor.u32 %v4437_v43, %v4436_v17  ;;  %v4441_v37 = vor.u32 %v4440_v26, %v4439_v5  ;;  %v4443_v16 = vshrl.u32 %v9606_v41, %v8402_v13  ;;  %v3512_v26 = vpop.f32.mrf.mxu1 }
 0x484   :  { %v3906_v33 = vor.u32 %v3905_v40, %v3904_v7  ;;  %v4201_v36 = vadd.s32 %v4200_v56, %v4196_v11  ;;  %vm4445_vm13 = vcmp.lt.s32.totalorder %v8404_v62, 1  ;;  %v3386_v19 = vadd.f32 %v3385_v38, %v3341_v35  ;;  %v8463_v23 = vpop.f32.mrf.mxu3 }
 0x485   :  { %v4444_v39 = vor.u32 %v4443_v16, %v4442_v28  ;;  %vm4448_vm3 = vcmp.lt.s32.totalorder %v8404_v62, 4  ;;  %v4453_v29 = vsel %vm4445_vm13, %v8421_v61, %v8423_v34  ;;  %v8436_v63 = vshll.u32 %v4421_v18, 8 }
 0x486   :  { %v4202_v48 = vadd.s32 536870912, %v4201_v36  ;;  %vm4447_vm2 = vcmp.lt.s32.totalorder %v8404_v62, 3  ;;  %v4454_v50 = vsel %vm4448_vm3, %v4441_v37, 920167782  ;;  %v4457_v3 = vsel %vm4445_vm13, %v8423_v34, %v8426_v42 }
 0x487   :  { %v3911_v44 = vand.u32 2147483647, %v3910_v45  ;;  %vm4446_vm4 = vcmp.lt.s32.totalorder %v8404_v62, 2  ;;  %v4455_v15 = vsel %vm4447_vm2, %v8426_v42, %v4454_v50  ;;  %v4458_v53 = vsel %vm4448_vm3, %v4444_v39, 1326507024 }
 0x488   :  { %v3913_v12 = vcvt.s32.f32 %v3906_v33  ;;  %v8451_v7 = vshrl.u32 %v4202_v48, 30  ;;  %v4456_v40 = vsel %vm4446_vm4, %v4453_v29, %v4455_v15  ;;  %v4459_v35 = vsel %vm4447_vm2, %v4441_v37, %v4458_v53 }
 0x489   :  { %v4460_v45 = vsel %vm4446_vm4, %v4457_v3, %v4459_v35  ;;  %v4462_v27 = vand.u32 65535, %v8436_v63  ;;  %v4486_v0 = vand.u32 65535, %v4456_v40  ;;  %v4487_v51 = vshrl.u32 %v4456_v40, 16 }
 0x48a   :  { %v4204_v18 = vshll.u32 %v8451_v7, 30  ;;  %v4464_v38 = vand.u32 65535, %v4460_v45  ;;  %v4465_v59 = vshrl.u32 %v4460_v45, 16  ;;  %v3914_v10 = vmul.f32 %v3913_v12, %v3911_v44 }
 0x48b   :  { %v4463_v21 = vshrl.u32 %v8436_v63, 16  ;;  %v4489_v17 = vmul.u32 %v4487_v51, %v4462_v27  ;;  %v3431_v2 = vadd.f32 %v3430_v6, %v3386_v19  ;;  %vm3795_vm11 = vcmp.lt.s32.totalorder %v8246_v1, 0 }
 0x48c   :  { %v8467_v43 = vsub.s32 %v4201_v36, %v4204_v18  ;;  %v4467_v5 = vmul.u32 %v4465_v59, %v4462_v27  ;;  %v4466_v33 = vmul.u32 %v4464_v38, %v4462_v27  ;;  %v3915_v29 = vxor.u32 2147483648, %v3914_v10 }
 0x48d   :  { %v4468_v11 = vmul.u32 %v4464_v38, %v4463_v21  ;;  %v4490_v28 = vmul.u32 %v4486_v0, %v4463_v21  ;;  %v4492_v56 = vshll.u32 %v4489_v17, 16  ;;  %v3476_v37 = vadd.f32 %v3475_v60, %v3431_v2 }
 0x48e   :  { %vm4206_vm6 = vcmp.lt.s32.totalorder %v8467_v43, 0  ;;  %v4207_v16 = vsub.s32 0, %v8467_v43  ;;  %v4470_v39 = vshll.u32 %v4467_v5, 16  ;;  %v4488_v48 = vmul.u32 %v4486_v0, %v4462_v27  ;;  %v8478_v27 = vpop.f32.mrf.mxu2 }
 0x48f   :  { %v4491_v50 = vmul.u32 %v4487_v51, %v4463_v21  ;;  %v8471_v6 = vadd.f32 %v3512_v26, %v3476_v37  ;;  %v4469_v19 = vmul.u32 %v4465_v59, %v4463_v21  ;;  %v4472_v36 = vshll.u32 %v4468_v11, 16  ;;  %v8493_v26 = vpop.f32.mrf.mxu3 }
 0x490   :  { %vm4474_vm8 = vc.u32 %v4466_v33, %v4470_v39  ;;  %v4476_v3 = vadd.s32 %v4470_v39, %v4466_v33  ;;  %v4208_v44 = vsel %vm4206_vm6, %v4207_v16, %v8467_v43  ;;  %v4494_v53 = vshll.u32 %v4490_v28, 16 }
 0x491   :  { %9609 = vst [vmem:[#allocation7_spill] sm:$0xff] %v8471_v6  ;;  %v4475_v15 = vsel %vm4474_vm8, 1, %v9534_v31  ;;  %vm4496_vm5 = vc.u32 %v4488_v48, %v4492_v56  ;;  %v4498_v35 = vadd.s32 %v4492_v56, %v4488_v48  ;;  %v3916_v45 = vsel %vm3795_vm11, %v3915_v29, %v3914_v10 }
 0x492   :  { %v4477_v12 = vadd.s32 %v4475_v15, %v4469_v19  ;;  %vm4478_vm12 = vc.u32 %v4476_v3, %v4472_v36  ;;  %v4497_v40 = vsel %vm4496_vm5, 1, %v9534_v31  ;;  %v4450_v0 = vsel %vm4448_vm3, %v8426_v42, 2102212464 }
 0x493   :  { %v4479_v51 = vsel %vm4478_vm12, 1, %v9534_v31  ;;  %v4499_v18 = vadd.s32 %v4497_v40, %v4491_v50  ;;  %v4209_v38 = vclz %v4208_v44  ;;  %v4471_v59 = vshrl.u32 %v4467_v5, 16 }
 0x494   :  { %v4481_v60 = vadd.s32 %v4479_v51, %v4477_v12  ;;  %vm4500_vm7 = vc.u32 %v4498_v35, %v4494_v53  ;;  %vm8486_vm14 = vcmp.le.f32.partialorder %v3793_v14, 0.7853982  ;;  %v4429_v10 = vshrl.u32 %v9535_v25, %v8402_v13 }
 0x495   :  { %v4501_v2 = vsel %vm4500_vm7, 1, %v9534_v31  ;;  %v4726_v42 = vand.u32 2139095040, %v8471_v6  ;;  %v4473_v56 = vshrl.u32 %v4468_v11, 16  ;;  %v4493_v5 = vshrl.u32 %v4489_v17, 16 }
 0x496   :  { %v4482_v37 = vadd.s32 %v4481_v60, %v4471_v59  ;;  %v4503_v16 = vadd.s32 %v4501_v2, %v4499_v18  ;;  %v8499_v14 = vsel %vm8486_vm14, %v8246_v1, %v3916_v45  ;;  %v4449_v33 = vsel %vm4445_vm13, %v4429_v10, %v8421_v61  ;;  %v8520_v15 = vpop.f32.mrf.mxu2 }
 0x497   :  { %v4451_v13 = vsel %vm4447_vm2, %v8423_v34, %v4450_v0  ;;  %v4727_v39 = vshrl.u32 %v4726_v42, 23  ;;  %v5495_v29 = vadd.s32 4294967294, %v4209_v38  ;;  %v4495_v11 = vshrl.u32 %v4490_v28, 16  ;;  %v8526_v51 = vpop.f32.mrf.mxu3 }
 0x498   :  { %v8507_v48 = vadd.s32 %v4482_v37, %v4473_v56  ;;  %v4504_v17 = vadd.s32 %v4503_v16, %v4493_v5  ;;  %v8509_v50 = vadd.s32 %v4498_v35, %v4494_v53  ;;  %v8513_v36 = vmul.f32 %v8499_v14, %v8499_v14 }
 0x499   :  { %v5506_v19 = vadd.s32 4294967169, %v4727_v39  ;;  %v4452_v61 = vsel %vm4446_vm4, %v4449_v33, %v4451_v13  ;;  %vm5496_vm15 = vcmp.lt.s32.totalorder %v5495_v29, 0  ;;  %v9490_v40 = vand.u32 2147483647, %v8471_v6 }
 0x49a   :  { %v4505_v3 = vadd.s32 %v4504_v17, %v4495_v11  ;;  %vm4508_vm0 = vc.u32 %v8507_v48, %v8509_v50  ;;  %v4506_v28 = vmul.u32 %v8436_v63, %v4452_v61  ;;  %v3929_v53 = vmul.f32 -0.00019511016, %v8513_v36 }
 0x49b   :  { %v4733_v34 = vadd.s32 1, %v5506_v19  ;;  %v8524_v62 = vsel %vm5496_vm15, 0, %v5495_v29  ;;  %v3542_v63 = vadd.f32 %v8457_v57, %v8239_v30  ;;  %v4730_v10 = vand.u32 8388607, %v9490_v40 }
 0x49c   :  { %v4509_v44 = vadd.s32 1, %v4505_v3  ;;  %v3930_v59 = vadd.f32 0.008332121, %v3929_v53  ;;  %v4217_v60 = vsub.s32 4294967266, %v8524_v62  ;;  %v3917_v53 = vsub.s32 4, %v8313_v22 }
 0x49d   :  { %vm4734_vm1 = vcmp.gt.s32.totalorder %v4733_v34, 0  ;;  %v4731_v11 = vor.u32 8388608, %v4730_v10  ;;  %v4197_v10 = vadd.s32 %v8400_v20, %v8396_v58 }
 0x49e   :  { %v4510_v12 = vsel %vm4508_vm0, %v4509_v44, %v4505_v3  ;;  %v4735_v35 = vsel %vm4734_vm1, %v4733_v34, 0  ;;  %v4218_v3 = vadd.s32 127, %v4217_v60  ;;  %v4213_v60 = vsub.s32 32, %v8524_v62 }
 0x49f   :  { %v4511_v45 = vadd.s32 %v4510_v12, %v4506_v28  ;;  %v4737_v0 = vand.u32 31, %v4735_v35  ;;  %v8550_v13 = vshrl.u32 %v4735_v35, 5  ;;  %v8561_v28 = vpop.f32.mrf.mxu2  ;;  %vm4415_vm1 = vcmp.lt.s32.totalorder %v8330_v9, 0 }
 0x4a1   :  { %v4512_v18 = vadd.s32 536870912, %v4511_v45  ;;  %v8528_v38 = vsub.s32 32, %v4737_v0  ;;  %v4740_v42 = vshll.u32 %v9535_v25, %v4737_v0  ;;  %v4743_v37 = vshll.u32 %v9526_v55, %v4737_v0 }
 0x4a2   :  { %v4746_v39 = vshll.u32 %v9527_v24, %v4737_v0  ;;  %v4749_v29 = vshll.u32 %v9558_v32, %v4737_v0  ;;  %v4752_v61 = vshll.u32 %v9582_v46, %v4737_v0  ;;  %vm4755_vm10 = vcmp.lt.s32.totalorder %v8550_v13, 1  ;;  %v8571_v0 = vpop.f32.mrf.mxu3 }
 0x4a3   :  { %v8535_v2 = vshrl.u32 %v4512_v18, 30  ;;  %v4741_v56 = vshrl.u32 %v9526_v55, %v8528_v38  ;;  %v4744_v5 = vshrl.u32 %v9527_v24, %v8528_v38  ;;  %v4747_v30 = vshrl.u32 %v9558_v32, %v8528_v38 }
 0x4a4   :  { %v4750_v57 = vshrl.u32 %v9582_v46, %v8528_v38  ;;  %v4753_v16 = vshrl.u32 %v9606_v41, %v8528_v38  ;;  %v3931_v18 = vmul.f32 %v3930_v59, %v8513_v36  ;;  %vm4758_vm13 = vcmp.lt.s32.totalorder %v8550_v13, 4  ;;  %v3648_v59 = vpop.f32.mrf.mxu0 }
 0x4a5   :  { %v4514_v33 = vshll.u32 %v8535_v2, 30  ;;  %v8554_v17 = vor.u32 %v4741_v56, %v4740_v42  ;;  %v8556_v19 = vor.u32 %v4744_v5, %v4743_v37  ;;  %v8559_v34 = vor.u32 %v4747_v30, %v4746_v39  ;;  %v3690_v30 = vpop.f32.mrf.mxu1 }
 0x4a6   :  { %v4751_v44 = vor.u32 %v4750_v57, %v4749_v29  ;;  %v4754_v35 = vor.u32 %v4753_v16, %v4752_v61  ;;  %v3607_v42 = vadd.f32 %v8463_v23, %v3542_v63  ;;  %v8579_v56 = vshll.u32 %v4731_v11, 8 }
 0x4a7   :  { %v8564_v12 = vsub.s32 %v4511_v45, %v4514_v33  ;;  %v4763_v45 = vsel %vm4755_vm10, %v8554_v17, %v8556_v19  ;;  %v4219_v37 = vshll.u32 %v4218_v3, 23  ;;  %vm4757_vm3 = vcmp.lt.s32.totalorder %v8550_v13, 3 }
 0x4a8   :  { %v4764_v58 = vsel %vm4758_vm13, %v4751_v44, 920167782  ;;  %v4767_v20 = vsel %vm4755_vm10, %v8556_v19, %v8559_v34  ;;  %vm4756_vm2 = vcmp.lt.s32.totalorder %v8550_v13, 2  ;;  %v4768_v5 = vsel %vm4758_vm13, %v4754_v35, 1326507024 }
 0x4a9   :  { %v4517_v23 = vsub.s32 0, %v8564_v12  ;;  %v4765_v63 = vsel %vm4757_vm3, %v8559_v34, %v4764_v58  ;;  %vm4516_vm4 = vcmp.lt.s32.totalorder %v8564_v12, 0  ;;  %v4769_v16 = vsel %vm4757_vm3, %v4751_v44, %v4768_v5 }
 0x4aa   :  { %v4766_v57 = vsel %vm4756_vm2, %v4763_v45, %v4765_v63  ;;  %v3649_v33 = vadd.f32 %v3648_v59, %v3607_v42  ;;  %v4214_v39 = vshll.u32 %v8467_v43, %v8524_v62  ;;  %v4215_v29 = vshrl.u32 %v4197_v10, %v4213_v60  ;;  %v3741_v59 = vpop.f32.mrf.mxu2 }
 0x4ab   :  { %v4770_v11 = vsel %vm4756_vm2, %v4767_v20, %v4769_v16  ;;  %v4797_v61 = vshrl.u32 %v4766_v57, 16  ;;  %v4772_v3 = vand.u32 65535, %v8579_v56  ;;  %v4220_v4 = vor.u32 4788187, %v4219_v37 }
 0x4ac   :  { %v4774_v35 = vand.u32 65535, %v4770_v11  ;;  %v4775_v58 = vshrl.u32 %v4770_v11, 16  ;;  %v3691_v40 = vadd.f32 %v3690_v30, %v3649_v33  ;;  %v4518_v45 = vsel %vm4516_vm4, %v4517_v23, %v8564_v12  ;;  %v3778_v23 = vpop.f32.mrf.mxu3 }
 0x4ad   :  { %v4773_v63 = vshrl.u32 %v8579_v56, 16  ;;  %v4796_v44 = vand.u32 65535, %v4766_v57  ;;  %v8610_v43 = vsel %vm3795_vm11, %v3917_v53, %v8313_v22  ;;  %v4216_v62 = vor.u32 %v4215_v29, %v4214_v39 }
 0x4ae   :  { %v4777_v42 = vmul.u32 %v4775_v58, %v4772_v3  ;;  %v4799_v60 = vmul.u32 %v4797_v61, %v4772_v3  ;;  %v3550_v20 = vadd.f32 %v8478_v27, %v8289_v49  ;;  %v4519_v5 = vclz %v4518_v45 }
 0x4af   :  { %v4778_v10 = vmul.u32 %v4774_v35, %v4773_v63  ;;  %v4776_v37 = vmul.u32 %v4774_v35, %v4772_v3  ;;  %v3932_v16 = vadd.f32 -0.16666654, %v3931_v18  ;;  %v4221_v33 = vand.u32 2147483647, %v4220_v4 }
 0x4b0   :  { %v4780_v30 = vshll.u32 %v4777_v42, 16  ;;  %v4800_v57 = vmul.u32 %v4796_v44, %v4773_v63  ;;  %v3742_v11 = vadd.f32 %v3741_v59, %v3691_v40  ;;  %v4779_v54 = vmul.u32 %v4775_v58, %v4773_v63 }
 0x4b1   :  { %v4782_v6 = vshll.u32 %v4778_v10, 16  ;;  %v4223_v22 = vcvt.s32.f32 %v4216_v62  ;;  %v4802_v39 = vshll.u32 %v4799_v60, 16  ;;  %vm4105_vm11 = vcmp.lt.s32.totalorder %v8318_v47, 0 }
 0x4b2   :  { %vm4784_vm6 = vc.u32 %v4776_v37, %v4780_v30  ;;  %v4786_v1 = vadd.s32 %v4780_v30, %v4776_v37  ;;  %v8615_v29 = vadd.f32 %v3778_v23, %v3742_v11  ;;  %v5501_v49 = vadd.s32 4294967294, %v4519_v5  ;;  %v3653_v23 = vpop.f32.mrf.mxu0 }
 0x4b3   :  { %v4785_v53 = vsel %vm4784_vm6, 1, %v9534_v31  ;;  %v4798_v35 = vmul.u32 %v4796_v44, %v4772_v3  ;;  %v4224_v18 = vmul.f32 %v4223_v22, %v4221_v33  ;;  %v4781_v4 = vshrl.u32 %v4777_v42, 16 }
 0x4b4   :  { %v4787_v27 = vadd.s32 %v4785_v53, %v4779_v54  ;;  %vm4788_vm8 = vc.u32 %v4786_v1, %v4782_v6  ;;  %v4801_v58 = vmul.u32 %v4797_v61, %v4773_v63  ;;  %v4804_v59 = vshll.u32 %v4800_v57, 16 }
 0x4b5   :  { %v4789_v40 = vsel %vm4788_vm8, 1, %v9534_v31  ;;  %vm4806_vm5 = vc.u32 %v4798_v35, %v4802_v39  ;;  %v4808_v62 = vadd.s32 %v4802_v39, %v4798_v35  ;;  %v3933_v37 = vmul.f32 %v3932_v16, %v8513_v36 }
 0x4b6   :  { %v4791_v45 = vadd.s32 %v4789_v40, %v4787_v27  ;;  %v3611_v30 = vadd.f32 %v8493_v26, %v3550_v20  ;;  %v4760_v5 = vsel %vm4758_vm13, %v8559_v34, 2102212464  ;;  %v4807_v1 = vsel %vm4806_vm5, 1, %v9534_v31 }
 0x4b7   :  { %vm5502_vm12 = vcmp.lt.s32.totalorder %v5501_v49, 0  ;;  %v4809_v6 = vadd.s32 %v4807_v1, %v4801_v58  ;;  %vm4810_vm7 = vc.u32 %v4808_v62, %v4804_v59  ;;  %v4227_v61 = vsub.s32 4, %v8451_v7 }
 0x4b8   :  { %v4792_v54 = vadd.s32 %v4791_v45, %v4781_v4  ;;  %v4739_v3 = vshrl.u32 %v9535_v25, %v8528_v38  ;;  %v4783_v63 = vshrl.u32 %v4778_v10, 16  ;;  %v4811_v44 = vsel %vm4810_vm7, 1, %v9534_v31 }
 0x4b9   :  { %v4225_v42 = vxor.u32 2147483648, %v4224_v18  ;;  %v4803_v26 = vshrl.u32 %v4799_v60, 16  ;;  %v4813_v20 = vadd.s32 %v4811_v44, %v4809_v6  ;;  %v3951_v34 = vand.u32 2139095040, %v8615_v29  ;;  %v3696_v60 = vpop.f32.mrf.mxu1  ;;  %v3782_v6 = vpop.f32.mrf.mxu3 }
 0x4ba   :  { %v8630_v16 = vsel %vm5502_vm12, 0, %v5501_v49  ;;  %v4759_v33 = vsel %vm4755_vm10, %v4739_v3, %v8554_v17  ;;  %v4761_v11 = vsel %vm4757_vm3, %v8556_v19, %v4760_v5  ;;  %v8638_v38 = vadd.s32 %v4792_v54, %v4783_v63 }
 0x4bb   :  { %v3934_v10 = vadd.f32 1.0, %v3933_v37  ;;  %v4805_v22 = vshrl.u32 %v4800_v57, 16  ;;  %v4814_v53 = vadd.s32 %v4813_v20, %v4803_v26  ;;  %v3952_v39 = vshrl.u32 %v3951_v34, 23 }
 0x4bc   :  { %v3920_v49 = vsel %vm8486_vm14, 0, %v8610_v43  ;;  %v4228_v27 = vsel %vm4105_vm11, %v4227_v61, %v8451_v7  ;;  %v8646_v17 = vadd.s32 %v4808_v62, %v4804_v59  ;;  %v3654_v35 = vadd.f32 %v3653_v23, %v3611_v30  ;;  %v3745_v59 = vpop.f32.mrf.mxu2 }
 0x4bd   :  { %v4527_v19 = vsub.s32 4294967266, %v8630_v16  ;;  %v4762_v4 = vsel %vm4756_vm2, %v4759_v33, %v4761_v11  ;;  %v4815_v57 = vadd.s32 %v4814_v53, %v4805_v22  ;;  %v5491_v40 = vadd.s32 4294967169, %v3952_v39 }
 0x4be   :  { %v4226_v58 = vsel %vm4105_vm11, %v4225_v42, %v4224_v18  ;;  %vm4818_vm14 = vc.u32 %v8638_v38, %v8646_v17  ;;  %v3697_v21 = vadd.f32 %v3696_v60, %v3654_v35  ;;  %v8656_v43 = vmul.f32 %v3934_v10, %v8499_v14 }
 0x4bf   :  { %v9613_v7 = vand.u32 2147483647, %v8318_v47  ;;  %v4819_v13 = vadd.s32 1, %v4815_v57  ;;  %v3958_v62 = vadd.s32 1, %v5491_v40  ;;  %v8664_v37 = vadd.s32 3, %v3920_v49 }
 0x4c0   :  { %9612 = vst [vmem:[#allocation9_spill] sm:$0xff] %v8656_v43  ;;  %v3558_v30 = vadd.f32 %v8520_v15, %v8233_v52  ;;  %v4816_v14 = vmul.u32 %v8579_v56, %v4762_v4  ;;  %v4528_v1 = vadd.s32 127, %v4527_v19  ;;  %v3746_v3 = vadd.f32 %v3745_v59, %v3697_v21 }
 0x4c1   :  { %vm8660_vm0 = vcmp.le.f32.partialorder %v9613_v7, 0.7853982  ;;  %v4820_v54 = vsel %vm4818_vm14, %v4819_v13, %v4815_v57  ;;  %vm3959_vm15 = vcmp.gt.s32.totalorder %v3958_v62, 0  ;;  %v9498_v63 = vand.u32 2147483647, %v8615_v29 }
 0x4c2   :  { %v4230_v18 = vsel %vm8660_vm0, 0, %v4228_v27  ;;  %v8674_v5 = vsel %vm8660_vm0, %v8318_v47, %v4226_v58  ;;  %v4821_v61 = vadd.s32 %v4820_v54, %v4816_v14  ;;  %v3960_v44 = vsel %vm3959_vm15, %v3958_v62, 0 }
 0x4c3   :  { %v8678_v26 = vadd.s32 3, %v4230_v18  ;;  %v3566_v52 = vadd.f32 %v8561_v28, %v8371_v8  ;;  %v3962_v15 = vand.u32 31, %v3960_v44  ;;  %v4507_v56 = vadd.s32 %v8509_v50, %v8507_v48 }
 0x4c4   :  { %v4822_v20 = vadd.s32 536870912, %v4821_v61  ;;  %v8686_v23 = vadd.f32 %v8526_v51, %v3558_v30  ;;  %v8688_v34 = vadd.f32 %v3782_v6, %v3746_v3  ;;  %v8692_v33 = vmul.f32 %v8674_v5, %v8674_v5 }
 0x4c5   :  { %v4523_v11 = vsub.s32 32, %v8630_v16  ;;  %v4537_v8 = vsub.s32 4, %v8535_v2  ;;  %v8696_v28 = vsub.s32 32, %v3962_v15  ;;  %v4529_v10 = vshll.u32 %v4528_v1, 23 }
 0x4c6   :  { %v3955_v48 = vand.u32 8388607, %v9498_v63  ;;  %v3965_v50 = vshll.u32 %v9535_v25, %v3962_v15  ;;  %v3968_v51 = vshll.u32 %v9526_v55, %v3962_v15  ;;  %v8702_v22 = vshrl.u32 %v4822_v20, 30 }
 0x4c7   :  { %v3966_v53 = vshrl.u32 %v9526_v55, %v8696_v28  ;;  %v3969_v60 = vshrl.u32 %v9527_v24, %v8696_v28  ;;  %v3972_v39 = vshrl.u32 %v9558_v32, %v8696_v28  ;;  %v8710_v49 = vshrl.u32 %v3960_v44, 5 }
 0x4c8   :  { %v3974_v27 = vshll.u32 %v9558_v32, %v3962_v15  ;;  %v3975_v35 = vshrl.u32 %v9582_v46, %v8696_v28  ;;  %v4261_v19 = vand.u32 2139095040, %v8688_v34  ;;  %v9616_v4 = vand.u32 2147483647, %v8330_v9 }
 0x4c9   :  { %v3967_v40 = vor.u32 %v3966_v53, %v3965_v50  ;;  %v3970_v58 = vor.u32 %v3969_v60, %v3968_v51  ;;  %v3971_v21 = vshll.u32 %v9527_v24, %v3962_v15  ;;  %v3978_v7 = vshrl.u32 %v9606_v41, %v8696_v28 }
 0x4ca   :  { %vm8718_vm10 = vcmp.le.f32.partialorder %v9616_v4, 0.7853982  ;;  %v4525_v45 = vshrl.u32 %v4507_v56, %v4523_v11  ;;  %v3956_v13 = vor.u32 8388608, %v3955_v48  ;;  %v3976_v59 = vor.u32 %v3975_v35, %v3974_v27 }
 0x4cb   :  { %v3977_v62 = vshll.u32 %v9582_v46, %v3962_v15  ;;  %v4239_v18 = vmul.f32 -0.00019511016, %v8692_v33  ;;  %v4824_v30 = vshll.u32 %v8702_v22, 30  ;;  %v8729_v14 = vadd.f32 %v8571_v0, %v3566_v52 }
 0x4cc   :  { %v3973_v1 = vor.u32 %v3972_v39, %v3971_v21  ;;  %v4524_v54 = vshll.u32 %v8564_v12, %v8630_v16  ;;  %vm3980_vm13 = vcmp.lt.s32.totalorder %v8710_v49, 1  ;;  %v4262_v3 = vshrl.u32 %v4261_v19, 23 }
 0x4cd   :  { %v3979_v6 = vor.u32 %v3978_v7, %v3977_v62  ;;  %v4530_v44 = vor.u32 4788187, %v4529_v10  ;;  %v8737_v15 = vsel %vm4415_vm1, %v4537_v8, %v8535_v2  ;;  %vm3983_vm3 = vcmp.lt.s32.totalorder %v8710_v49, 4 }
 0x4ce   :  { %v3988_v0 = vsel %vm3980_vm13, %v3967_v40, %v3970_v58  ;;  %v4526_v52 = vor.u32 %v4525_v45, %v4524_v54  ;;  %vm3982_vm2 = vcmp.lt.s32.totalorder %v8710_v49, 3  ;;  %v3989_v12 = vsel %vm3983_vm3, %v3976_v59, 920167782 }
 0x4cf   :  { %v8745_v16 = vshll.u32 %v3956_v13, 8  ;;  %v8747_v56 = vsub.s32 %v4821_v61, %v4824_v30  ;;  %vm3981_vm4 = vcmp.lt.s32.totalorder %v8710_v49, 2  ;;  %v3990_v2 = vsel %vm3982_vm2, %v3973_v1, %v3989_v12 }
 0x4d0   :  { %v3992_v20 = vsel %vm3980_vm13, %v3970_v58, %v3973_v1  ;;  %v4240_v11 = vadd.f32 0.008332121, %v4239_v18  ;;  %v3991_v8 = vsel %vm3981_vm4, %v3988_v0, %v3990_v2  ;;  %v3993_v10 = vsel %vm3983_vm3, %v3979_v6, 1326507024 }
 0x4d1   :  { %v5497_v48 = vadd.s32 4294967169, %v4262_v3  ;;  %v4531_v50 = vand.u32 2147483647, %v4530_v44  ;;  %v3994_v61 = vsel %vm3982_vm2, %v3976_v59, %v3993_v10  ;;  %v4021_v51 = vand.u32 65535, %v3991_v8 }
 0x4d2   :  { %v4022_v53 = vshrl.u32 %v3991_v8, 16  ;;  %v4533_v60 = vcvt.s32.f32 %v4526_v52  ;;  %v4540_v39 = vsel %vm8718_vm10, 0, %v8737_v15  ;;  %v3995_v27 = vsel %vm3981_vm4, %v3992_v20, %v3994_v61 }
 0x4d3   :  { %v3997_v35 = vand.u32 65535, %v8745_v16  ;;  %v4827_v19 = vsub.s32 0, %v8747_v56  ;;  %v3998_v4 = vshrl.u32 %v8745_v16, 16  ;;  %v3999_v21 = vand.u32 65535, %v3995_v27 }
 0x4d4   :  { %v4000_v7 = vshrl.u32 %v3995_v27, 16  ;;  %vm4826_vm6 = vcmp.lt.s32.totalorder %v8747_v56, 0  ;;  %v3985_v45 = vsel %vm3983_vm3, %v3973_v1, 2102212464  ;;  %v4268_v59 = vadd.s32 1, %v5497_v48 }
 0x4d5   :  { %v4024_v13 = vmul.u32 %v4022_v53, %v3997_v35  ;;  %v4241_v62 = vmul.f32 %v4240_v11, %v8692_v33  ;;  %v8772_v18 = vmul.f32 %v4533_v60, %v4531_v50  ;;  %v3964_v30 = vshrl.u32 %v9535_v25, %v8696_v28 }
 0x4d6   :  { %v4025_v54 = vmul.u32 %v4021_v51, %v3998_v4  ;;  %v4002_v6 = vmul.u32 %v4000_v7, %v3997_v35  ;;  %v4003_v3 = vmul.u32 %v3999_v21, %v3998_v4  ;;  %v9497_v0 = vand.u32 2147483647, %v8688_v34 }
 0x4d7   :  { %v4027_v44 = vshll.u32 %v4024_v13, 16  ;;  %v4828_v52 = vsel %vm4826_vm6, %v4827_v19, %v8747_v56  ;;  %v3984_v1 = vsel %vm3980_vm13, %v3964_v30, %v3967_v40  ;;  %v3986_v12 = vsel %vm3982_vm2, %v3970_v58, %v3985_v45 }
 0x4d8   :  { %v4023_v2 = vmul.u32 %v4021_v51, %v3997_v35  ;;  %v4001_v20 = vmul.u32 %v3999_v21, %v3997_v35  ;;  %v4005_v11 = vshll.u32 %v4002_v6, 16  ;;  %v4026_v8 = vmul.u32 %v4022_v53, %v3998_v4 }
 0x4d9   :  { %vm4269_vm11 = vcmp.gt.s32.totalorder %v4268_v59, 0  ;;  %v4004_v28 = vmul.u32 %v4000_v7, %v3998_v4  ;;  %v4007_v10 = vshll.u32 %v4003_v3, 16  ;;  %v4029_v48 = vshll.u32 %v4025_v54, 16 }
 0x4da   :  { %vm4031_vm8 = vc.u32 %v4023_v2, %v4027_v44  ;;  %vm4009_vm5 = vc.u32 %v4001_v20, %v4005_v11  ;;  %v4011_v50 = vadd.s32 %v4005_v11, %v4001_v20  ;;  %v4033_v60 = vadd.s32 %v4027_v44, %v4023_v2 }
 0x4db   :  { %v4032_v61 = vsel %vm4031_vm8, 1, %v9534_v31  ;;  %v4829_v27 = vclz %v4828_v52  ;;  %v4010_v40 = vsel %vm4009_vm5, 1, %v9534_v31  ;;  %v4265_v58 = vand.u32 8388607, %v9497_v0 }
 0x4dc   :  { %v4034_v19 = vadd.s32 %v4032_v61, %v4026_v8  ;;  %v3987_v51 = vsel %vm3981_vm4, %v3984_v1, %v3986_v12  ;;  %v4012_v53 = vadd.s32 %v4010_v40, %v4004_v28  ;;  %vm4013_vm12 = vc.u32 %v4011_v50, %v4007_v10  ;;  %v3658_v40 = vpop.f32.mrf.mxu0 }
 0x4dd   :  { %vm4035_vm7 = vc.u32 %v4033_v60, %v4029_v48  ;;  %v4014_v35 = vsel %vm4013_vm12, 1, %v9534_v31  ;;  %v4028_v4 = vshrl.u32 %v4024_v13, 16  ;;  %v4270_v7 = vsel %vm4269_vm11, %v4268_v59, 0 }
 0x4de   :  { %v4036_v21 = vsel %vm4035_vm7, 1, %v9534_v31  ;;  %v4006_v45 = vshrl.u32 %v4002_v6, 16  ;;  %v4016_v30 = vadd.s32 %v4014_v35, %v4012_v53  ;;  %v4272_v52 = vand.u32 31, %v4270_v7 }
 0x4df   :  { %v4038_v44 = vadd.s32 %v4036_v21, %v4034_v19  ;;  %v4242_v2 = vadd.f32 -0.16666654, %v4241_v62  ;;  %v4535_v20 = vxor.u32 2147483648, %v8772_v18  ;;  %v5507_v11 = vadd.s32 4294967294, %v4829_v27 }
 0x4e0   :  { %v4008_v49 = vshrl.u32 %v4003_v3, 16  ;;  %v4017_v1 = vadd.s32 %v4016_v30, %v4006_v45  ;;  %v4030_v12 = vshrl.u32 %v4025_v54, 16  ;;  %v8792_v28 = vsub.s32 32, %v4272_v52 }
 0x4e1   :  { %v4039_v8 = vadd.s32 %v4038_v44, %v4028_v4  ;;  %v8794_v10 = vadd.s32 %v4033_v60, %v4029_v48  ;;  %v4041_v13 = vmul.u32 %v8745_v16, %v3987_v51  ;;  %v4266_v50 = vor.u32 8388608, %v4265_v58 }
 0x4e2   :  { %v4275_v59 = vshll.u32 %v9535_v25, %v4272_v52  ;;  %v8798_v6 = vadd.s32 %v4017_v1, %v4008_v49  ;;  %v4276_v62 = vshrl.u32 %v9526_v55, %v8792_v28  ;;  %v4278_v3 = vshll.u32 %v9526_v55, %v4272_v52 }
 0x4e3   :  { %v4040_v61 = vadd.s32 %v4039_v8, %v4030_v12  ;;  %v4279_v54 = vshrl.u32 %v9527_v24, %v8792_v28  ;;  %v4281_v27 = vshll.u32 %v9527_v24, %v4272_v52  ;;  %v4282_v48 = vshrl.u32 %v9558_v32, %v8792_v28  ;;  %v3702_v8 = vpop.f32.mrf.mxu1 }
 0x4e4   :  { %v4285_v16 = vshrl.u32 %v9582_v46, %v8792_v28  ;;  %vm5508_vm14 = vcmp.lt.s32.totalorder %v5507_v11, 0  ;;  %vm4043_vm0 = vc.u32 %v8798_v6, %v8794_v10  ;;  %v4284_v19 = vshll.u32 %v9558_v32, %v4272_v52 }
 0x4e5   :  { %v4044_v60 = vadd.s32 1, %v4040_v61  ;;  %v8813_v58 = vshrl.u32 %v4270_v7, 5  ;;  %v8815_v51 = vor.u32 %v4276_v62, %v4275_v59  ;;  %v8817_v53 = vor.u32 %v4279_v54, %v4278_v3  ;;  %v3749_v54 = vpop.f32.mrf.mxu2 }
 0x4e6   :  { %v8819_v35 = vor.u32 %v4282_v48, %v4281_v27  ;;  %v4286_v21 = vor.u32 %v4285_v16, %v4284_v19  ;;  %v4287_v45 = vshll.u32 %v9582_v46, %v4272_v52  ;;  %v4288_v30 = vshrl.u32 %v9606_v41, %v8792_v28 }
 0x4e7   :  { %v4045_v4 = vsel %vm4043_vm0, %v4044_v60, %v4040_v61  ;;  %v4243_v44 = vmul.f32 %v4242_v2, %v8692_v33  ;;  %v8829_v7 = vadd.s32 3, %v4540_v39  ;;  %v3659_v1 = vadd.f32 %v3658_v40, %v8686_v23 }
 0x4e8   :  { %v4046_v49 = vadd.s32 %v4045_v4, %v4041_v13  ;;  %v4536_v12 = vsel %vm4415_vm1, %v4535_v20, %v8772_v18  ;;  %v8836_v52 = vsel %vm5508_vm14, 0, %v5507_v11  ;;  %v4289_v59 = vor.u32 %v4288_v30, %v4287_v45  ;;  %v3786_v30 = vpop.f32.mrf.mxu3 }
 0x4e9   :  { %v8838_v61 = vshll.u32 %v4266_v50, 8  ;;  %vm4290_vm15 = vcmp.lt.s32.totalorder %v8813_v58, 1  ;;  %vm4292_vm13 = vcmp.lt.s32.totalorder %v8813_v58, 3  ;;  %vm4293_vm3 = vcmp.lt.s32.totalorder %v8813_v58, 4 }
 0x4ea   :  { %v4047_v2 = vadd.s32 536870912, %v4046_v49  ;;  %v4298_v23 = vsel %vm4290_vm15, %v8815_v51, %v8817_v53  ;;  %v4299_v15 = vsel %vm4293_vm3, %v4286_v21, 920167782  ;;  %v4302_v39 = vsel %vm4290_vm15, %v8817_v53, %v8819_v35 }
 0x4eb   :  { %v4303_v18 = vsel %vm4293_vm3, %v4289_v59, 1326507024  ;;  %v4837_v20 = vsub.s32 4294967266, %v8836_v52  ;;  %v3703_v13 = vadd.f32 %v3702_v8, %v3659_v1  ;;  %v4300_v50 = vsel %vm4292_vm13, %v8819_v35, %v4299_v15 }
 0x4ec   :  { %v8856_v11 = vshrl.u32 %v4047_v2, 30  ;;  %v8861_v62 = vadd.f32 1.0, %v4243_v44  ;;  %v8866_v3 = vsel %vm8718_vm10, %v8330_v9, %v4536_v12  ;;  %vm4291_vm1 = vcmp.lt.s32.totalorder %v8813_v58, 2 }
 0x4ed   :  { %v4304_v27 = vsel %vm4292_vm13, %v4286_v21, %v4303_v18  ;;  %v4301_v16 = vsel %vm4291_vm1, %v4298_v23, %v4300_v50  ;;  %v4307_v40 = vand.u32 65535, %v8838_v61  ;;  %v4833_v57 = vsub.s32 32, %v8836_v52 }
 0x4ee   :  { %v4049_v48 = vshll.u32 %v8856_v11, 30  ;;  %v4305_v60 = vsel %vm4291_vm1, %v4302_v39, %v4304_v27  ;;  %v4308_v19 = vshrl.u32 %v8838_v61, 16  ;;  %v4817_v21 = vadd.s32 %v8646_v17, %v8638_v38 }
 0x4ef   :  { %v4309_v4 = vand.u32 65535, %v4305_v60  ;;  %v4310_v45 = vshrl.u32 %v4305_v60, 16  ;;  %v4838_v44 = vadd.s32 127, %v4837_v20  ;;  %v3750_v12 = vadd.f32 %v3749_v54, %v3703_v13 }
 0x4f0   :  { %v8881_v1 = vsub.s32 %v4046_v49, %v4049_v48  ;;  %v8885_v8 = vmul.f32 %v8866_v3, %v8866_v3  ;;  %v4332_v23 = vshrl.u32 %v4301_v16, 16  ;;  %v4331_v39 = vand.u32 65535, %v4301_v16 }
 0x4f1   :  { %v4312_v59 = vmul.u32 %v4310_v45, %v4307_v40  ;;  %v4313_v2 = vmul.u32 %v4309_v4, %v4308_v19  ;;  %v8889_v18 = vadd.f32 %v3786_v30, %v3750_v12  ;;  %v4834_v38 = vshll.u32 %v8747_v56, %v8836_v52 }
 0x4f2   :  { %vm4051_vm10 = vcmp.lt.s32.totalorder %v8881_v1, 0  ;;  %v4052_v15 = vsub.s32 0, %v8881_v1  ;;  %v4835_v17 = vshrl.u32 %v4817_v21, %v4833_v57  ;;  %v4311_v49 = vmul.u32 %v4309_v4, %v4307_v40 }
 0x4f3   :  { %v4315_v20 = vshll.u32 %v4312_v59, 16  ;;  %v4839_v13 = vshll.u32 %v4838_v44, 23  ;;  %v4314_v54 = vmul.u32 %v4310_v45, %v4308_v19  ;;  %v4317_v27 = vshll.u32 %v4313_v2, 16 }
 0x4f4   :  { %v4053_v50 = vsel %vm4051_vm10, %v4052_v15, %v8881_v1  ;;  %v4334_v42 = vmul.u32 %v4332_v23, %v4307_v40  ;;  %v4333_v16 = vmul.u32 %v4331_v39, %v4307_v40  ;;  %v4335_v30 = vmul.u32 %v4331_v39, %v4308_v19 }
 0x4f5   :  { %v4054_v48 = vclz %v4053_v50  ;;  %vm4319_vm2 = vc.u32 %v4311_v49, %v4315_v20  ;;  %v4321_v60 = vadd.s32 %v4315_v20, %v4311_v49  ;;  %v4571_v12 = vand.u32 2139095040, %v8889_v18 }
 0x4f6   :  { %v4320_v0 = vsel %vm4319_vm2, 1, %v9534_v31  ;;  %v4337_v52 = vshll.u32 %v4334_v42, 16  ;;  %v4274_v57 = vshrl.u32 %v9535_v25, %v8792_v28  ;;  %v4295_v4 = vsel %vm4293_vm3, %v8819_v35, 2102212464 }
 0x4f7   :  { %v5492_v63 = vadd.s32 4294967294, %v4054_v48  ;;  %v4322_v56 = vadd.s32 %v4320_v0, %v4314_v54  ;;  %vm4323_vm4 = vc.u32 %v4321_v60, %v4317_v27  ;;  %v4316_v45 = vshrl.u32 %v4312_v59, 16 }
 0x4f8   :  { %v4324_v21 = vsel %vm4323_vm4, 1, %v9534_v31  ;;  %v4336_v15 = vmul.u32 %v4332_v23, %v4308_v19  ;;  %vm4341_vm6 = vc.u32 %v4333_v16, %v4337_v52  ;;  %v4343_v40 = vadd.s32 %v4337_v52, %v4333_v16  ;;  %v3663_v19 = vpop.f32.mrf.mxu0 }
 0x4f9   :  { %v4326_v44 = vadd.s32 %v4324_v21, %v4322_v56  ;;  %vm5493_vm11 = vcmp.lt.s32.totalorder %v5492_v63, 0  ;;  %v4339_v39 = vshll.u32 %v4335_v30, 16  ;;  %v4342_v0 = vsel %vm4341_vm6, 1, %v9534_v31 }
 0x4fa   :  { %v4572_v49 = vshrl.u32 %v4571_v12, 23  ;;  %v4836_v20 = vor.u32 %v4835_v17, %v4834_v38  ;;  %v4840_v50 = vor.u32 4788187, %v4839_v13  ;;  %v4294_v28 = vsel %vm4290_vm15, %v4274_v57, %v8815_v51 }
 0x4fb   :  { %v4327_v54 = vadd.s32 %v4326_v44, %v4316_v45  ;;  %v4296_v35 = vsel %vm4292_vm13, %v8817_v53, %v4295_v4  ;;  %v4344_v59 = vadd.s32 %v4342_v0, %v4336_v15  ;;  %vm4345_vm8 = vc.u32 %v4343_v40, %v4339_v39  ;;  %v3708_v4 = vpop.f32.mrf.mxu1 }
 0x4fc   :  { %v5503_v23 = vadd.s32 4294967169, %v4572_v49  ;;  %v8909_v27 = vsel %vm5493_vm11, 0, %v5492_v63  ;;  %v4318_v48 = vshrl.u32 %v4313_v2, 16  ;;  %v4346_v60 = vsel %vm4345_vm8, 1, %v9534_v31 }
 0x4fd   :  { %v9499_v38 = vand.u32 2147483647, %v8889_v18  ;;  %v4549_v17 = vmul.f32 -0.00019511016, %v8885_v8  ;;  %v4338_v13 = vshrl.u32 %v4334_v42, 16  ;;  %v4348_v51 = vadd.s32 %v4346_v60, %v4344_v59 }
 0x4fe   :  { %v4578_v16 = vadd.s32 1, %v5503_v23  ;;  %v4841_v12 = vand.u32 2147483647, %v4840_v50  ;;  %v4297_v53 = vsel %vm4291_vm1, %v4294_v28, %v4296_v35  ;;  %v8916_v56 = vadd.s32 %v4327_v54, %v4318_v48 }
 0x4ff   :  { %v3664_v52 = vadd.f32 %v3663_v19, %v8729_v14  ;;  %v4062_v63 = vsub.s32 4294967266, %v8909_v27  ;;  %v4340_v2 = vshrl.u32 %v4335_v30, 16  ;;  %v4349_v57 = vadd.s32 %v4348_v51, %v4338_v13 }
 0x500   :  { %vm4579_vm5 = vcmp.gt.s32.totalorder %v4578_v16, 0  ;;  %v4843_v45 = vcvt.s32.f32 %v4836_v20  ;;  %v8920_v21 = vadd.s32 %v4343_v40, %v4339_v39  ;;  %v4575_v42 = vand.u32 8388607, %v9499_v38  ;;  %v9619_v40 = vld [vmem:[#allocation7_spill] sm:$0xff] }
 0x501   :  { %v4580_v44 = vsel %vm4579_vm5, %v4578_v16, 0  ;;  %v8926_v58 = vmul.f32 %v8861_v62, %v8674_v5  ;;  %v4550_v15 = vadd.f32 0.008332121, %v4549_v17  ;;  %v4350_v0 = vadd.s32 %v4349_v57, %v4340_v2 }
 0x502   :  { %v4582_v14 = vand.u32 31, %v4580_v44  ;;  %v4844_v49 = vmul.f32 %v4843_v45, %v4841_v12  ;;  %v4351_v30 = vmul.u32 %v8838_v61, %v4297_v53  ;;  %vm4353_vm12 = vc.u32 %v8916_v56, %v8920_v21  ;;  %v3753_v53 = vpop.f32.mrf.mxu2 }
 0x503   :  { %v3709_v20 = vadd.f32 %v3708_v4, %v3664_v52  ;;  %vm4725_vm7 = vcmp.lt.s32.totalorder %v9619_v40, 0  ;;  %v4058_v39 = vsub.s32 32, %v8909_v27  ;;  %v4063_v50 = vadd.s32 127, %v4062_v63 }
 0x504   :  { %v4354_v28 = vadd.s32 1, %v4350_v0  ;;  %v8933_v54 = vsub.s32 32, %v4582_v14  ;;  %v4576_v5 = vor.u32 8388608, %v4575_v42  ;;  %v8935_v62 = vshrl.u32 %v4580_v44, 5 }
 0x505   :  { %v4585_v35 = vshll.u32 %v9535_v25, %v4582_v14  ;;  %v4588_v59 = vshll.u32 %v9526_v55, %v4582_v14  ;;  %v4591_v48 = vshll.u32 %v9527_v24, %v4582_v14  ;;  %v4594_v13 = vshll.u32 %v9558_v32, %v4582_v14 }
 0x506   :  { %v4355_v61 = vsel %vm4353_vm12, %v4354_v28, %v4350_v0  ;;  %v4586_v19 = vshrl.u32 %v9526_v55, %v8933_v54  ;;  %v4589_v23 = vshrl.u32 %v9527_v24, %v8933_v54  ;;  %v4592_v17 = vshrl.u32 %v9558_v32, %v8933_v54 }
 0x507   :  { %v4356_v60 = vadd.s32 %v4355_v61, %v4351_v30  ;;  %v4595_v51 = vshrl.u32 %v9582_v46, %v8933_v54  ;;  %v9620_v16 = vand.u32 2147483647, %v9619_v40  ;;  %v4597_v2 = vshll.u32 %v9582_v46, %v4582_v14 }
 0x508   :  { %v8955_v52 = vor.u32 %v4586_v19, %v4585_v35  ;;  %v8957_v63 = vor.u32 %v4589_v23, %v4588_v59  ;;  %v4598_v57 = vshrl.u32 %v9606_v41, %v8933_v54  ;;  %v4845_v4 = vxor.u32 2147483648, %v4844_v49 }
 0x509   :  { %vm8951_vm14 = vcmp.le.f32.partialorder %v9620_v16, 0.7853982  ;;  %v4064_v45 = vshll.u32 %v4063_v50, 23  ;;  %v4357_v42 = vadd.s32 536870912, %v4356_v60  ;;  %v4596_v44 = vor.u32 %v4595_v51, %v4594_v13 }
 0x50a   :  { %v4551_v0 = vmul.f32 %v4550_v15, %v8885_v8  ;;  %v4042_v30 = vadd.s32 %v8794_v10, %v8798_v6  ;;  %v8965_v28 = vor.u32 %v4592_v17, %v4591_v48  ;;  %v4599_v35 = vor.u32 %v4598_v57, %v4597_v2  ;;  %v3790_v6 = vpop.f32.mrf.mxu3 }
 0x50b   :  { %v8967_v61 = vshrl.u32 %v4357_v42, 30  ;;  %v3754_v59 = vadd.f32 %v3753_v53, %v3709_v20  ;;  %vm4600_vm0 = vcmp.lt.s32.totalorder %v8935_v62, 1  ;;  %vm4603_vm15 = vcmp.lt.s32.totalorder %v8935_v62, 4 }
 0x50c   :  { %v4060_v14 = vshrl.u32 %v4042_v30, %v4058_v39  ;;  %v4608_v50 = vsel %vm4600_vm0, %v8955_v52, %v8957_v63  ;;  %v4609_v15 = vsel %vm4603_vm15, %v4596_v44, 920167782  ;;  %v8977_v10 = vshll.u32 %v4576_v5, 8 }
 0x50d   :  { %v4846_v19 = vsel %vm4725_vm7, %v4845_v4, %v4844_v49  ;;  %v4065_v20 = vor.u32 4788187, %v4064_v45  ;;  %v4359_v23 = vshll.u32 %v8967_v61, 30  ;;  %vm4602_vm13 = vcmp.lt.s32.totalorder %v8935_v62, 3 }
 0x50e   :  { %v4059_v39 = vshll.u32 %v8881_v1, %v8909_v27  ;;  %vm4601_vm3 = vcmp.lt.s32.totalorder %v8935_v62, 2  ;;  %v4610_v48 = vsel %vm4602_vm13, %v8965_v28, %v4609_v15  ;;  %v4613_v5 = vsel %vm4603_vm15, %v4599_v35, 1326507024 }
 0x50f   :  { %v8991_v17 = vsub.s32 %v4356_v60, %v4359_v23  ;;  %v4611_v49 = vsel %vm4601_vm3, %v4608_v50, %v4610_v48  ;;  %v4612_v13 = vsel %vm4600_vm0, %v8957_v63, %v8965_v28  ;;  %v8999_v1 = vadd.f32 %v3790_v6, %v3754_v59 }
 0x510   :  { %v4061_v27 = vor.u32 %v4060_v14, %v4059_v39  ;;  %v4614_v51 = vsel %vm4602_vm13, %v4596_v44, %v4613_v5  ;;  %v4617_v16 = vand.u32 65535, %v8977_v10  ;;  %v4642_v53 = vshrl.u32 %v4611_v49, 16 }
 0x511   :  { %v9007_v60 = vsel %vm8951_vm14, %v9619_v40, %v4846_v19  ;;  %v4066_v2 = vand.u32 2147483647, %v4065_v20  ;;  %vm4361_vm1 = vcmp.lt.s32.totalorder %v8991_v17, 0  ;;  %v4362_v57 = vsub.s32 0, %v8991_v17 }
 0x512   :  { %v4615_v4 = vsel %vm4601_vm3, %v4612_v13, %v4614_v51  ;;  %v4618_v45 = vshrl.u32 %v8977_v10, 16  ;;  %v4641_v42 = vand.u32 65535, %v4611_v49  ;;  %v4644_v44 = vmul.u32 %v4642_v53, %v4617_v16 }
 0x513   :  { %v4363_v30 = vsel %vm4361_vm1, %v4362_v57, %v8991_v17  ;;  %v4619_v35 = vand.u32 65535, %v4615_v4  ;;  %v4620_v59 = vshrl.u32 %v4615_v4, 16  ;;  %v4881_v14 = vand.u32 2139095040, %v8999_v1 }
 0x514   :  { %v9016_v50 = vadd.f32 -0.16666654, %v4551_v0  ;;  %v4068_v15 = vcvt.s32.f32 %v4061_v27  ;;  %v4364_v6 = vclz %v4363_v30  ;;  %v4647_v19 = vshll.u32 %v4644_v44, 16 }
 0x515   :  { %v9020_v20 = vmul.f32 %v9007_v60, %v9007_v60  ;;  %v4352_v23 = vadd.s32 %v8920_v21, %v8916_v56  ;;  %v4622_v39 = vmul.u32 %v4620_v59, %v4617_v16  ;;  %v4623_v48 = vmul.u32 %v4619_v35, %v4618_v45 }
 0x516   :  { %v9024_v5 = vmul.f32 %v4068_v15, %v4066_v2  ;;  %v5498_v49 = vadd.s32 4294967294, %v4364_v6  ;;  %v4584_v13 = vshrl.u32 %v9535_v25, %v8933_v54  ;;  %v4643_v0 = vmul.u32 %v4641_v42, %v4617_v16 }
 0x517   :  { %v4621_v51 = vmul.u32 %v4619_v35, %v4617_v16  ;;  %v4625_v27 = vshll.u32 %v4622_v39, 16  ;;  %v4645_v57 = vmul.u32 %v4641_v42, %v4618_v45  ;;  %v4882_v4 = vshrl.u32 %v4881_v14, 23 }
 0x518   :  { %vm5499_vm10 = vcmp.lt.s32.totalorder %v5498_v49, 0  ;;  %v4624_v30 = vmul.u32 %v4620_v59, %v4618_v45  ;;  %v4627_v38 = vshll.u32 %v4623_v48, 16  ;;  %vm4651_vm2 = vc.u32 %v4643_v0, %v4647_v19 }
 0x519   :  { %v4367_v43 = vsel %vm5499_vm10, 0, %v5498_v49  ;;  %vm4629_vm4 = vc.u32 %v4621_v51, %v4625_v27  ;;  %v4631_v56 = vadd.s32 %v4625_v27, %v4621_v51  ;;  %v4653_v21 = vadd.s32 %v4647_v19, %v4643_v0 }
 0x51a   :  { %v4368_v47 = vsub.s32 32, %v4367_v43  ;;  %v4372_v2 = vsub.s32 4294967266, %v4367_v43  ;;  %v4630_v15 = vsel %vm4629_vm4, 1, %v9534_v31  ;;  %v4646_v6 = vmul.u32 %v4642_v53, %v4618_v45 }
 0x51b   :  { %v4632_v9 = vadd.s32 %v4630_v15, %v4624_v30  ;;  %vm4633_vm6 = vc.u32 %v4631_v56, %v4627_v38  ;;  %v4649_v54 = vshll.u32 %v4645_v57, 16  ;;  %v4652_v16 = vsel %vm4651_vm2, 1, %v9534_v31 }
 0x51c   :  { %v4373_v42 = vadd.s32 127, %v4372_v2  ;;  %v4605_v35 = vsel %vm4603_vm15, %v8965_v28, 2102212464  ;;  %v4634_v59 = vsel %vm4633_vm6, 1, %v9534_v31  ;;  %v4654_v14 = vadd.s32 %v4652_v16, %v4646_v6 }
 0x51d   :  { %v4370_v49 = vshrl.u32 %v4352_v23, %v4368_v47  ;;  %v4626_v19 = vshrl.u32 %v4622_v39, 16  ;;  %v4636_v0 = vadd.s32 %v4634_v59, %v4632_v9  ;;  %vm4655_vm11 = vc.u32 %v4653_v21, %v4649_v54 }
 0x51e   :  { %v4374_v51 = vshll.u32 %v4373_v42, 23  ;;  %v4648_v27 = vshrl.u32 %v4644_v44, 16  ;;  %v4656_v53 = vsel %vm4655_vm11, 1, %v9534_v31  ;;  %v5509_v38 = vadd.s32 4294967169, %v4882_v4 }
 0x51f   :  { %v4369_v45 = vshll.u32 %v8991_v17, %v4367_v43  ;;  %v4628_v30 = vshrl.u32 %v4623_v48, 16  ;;  %v4637_v56 = vadd.s32 %v4636_v0, %v4626_v19  ;;  %v4658_v2 = vadd.s32 %v4656_v53, %v4654_v14 }
 0x520   :  { %v4375_v15 = vor.u32 4788187, %v4374_v51  ;;  %v4604_v28 = vsel %vm4600_vm0, %v4584_v13, %v8955_v52  ;;  %v4606_v47 = vsel %vm4602_vm13, %v8957_v63, %v4605_v35  ;;  %v4888_v9 = vadd.s32 1, %v5509_v38 }
 0x521   :  { %v4371_v23 = vor.u32 %v4370_v49, %v4369_v45  ;;  %v9042_v44 = vadd.s32 %v4637_v56, %v4628_v30  ;;  %v4650_v39 = vshrl.u32 %v4645_v57, 16  ;;  %v4659_v4 = vadd.s32 %v4658_v2, %v4648_v27 }
 0x522   :  { %v4070_v43 = vxor.u32 2147483648, %v9024_v5  ;;  %v9045_v17 = vadd.s32 %v4653_v21, %v4649_v54  ;;  %v9506_v48 = vand.u32 2147483647, %v8999_v1  ;;  %vm4889_vm8 = vcmp.gt.s32.totalorder %v4888_v9, 0 }
 0x523   :  { %v4376_v6 = vand.u32 2147483647, %v4375_v15  ;;  %v4607_v52 = vsel %vm4601_vm3, %v4604_v28, %v4606_v47  ;;  %v4660_v13 = vadd.s32 %v4659_v4, %v4650_v39  ;;  %v4890_v16 = vsel %vm4889_vm8, %v4888_v9, 0 }
 0x524   :  { %v9623_v42 = vand.u32 2147483647, %v8615_v29  ;;  %vm4663_vm12 = vc.u32 %v9042_v44, %v9045_v17  ;;  %v4892_v21 = vand.u32 31, %v4890_v16  ;;  %v4553_v54 = vmul.f32 %v9016_v50, %v8885_v8 }
 0x525   :  { %vm3950_vm0 = vcmp.lt.s32.totalorder %v8615_v29, 0  ;;  %v4378_v62 = vcvt.s32.f32 %v4371_v23  ;;  %v4664_v35 = vadd.s32 1, %v4660_v13  ;;  %v4859_v59 = vmul.f32 -0.00019511016, %v9020_v20 }
 0x526   :  { %vm9053_vm5 = vcmp.le.f32.partialorder %v9623_v42, 0.7853982  ;;  %v4071_v14 = vsel %vm3950_vm0, %v4070_v43, %v9024_v5  ;;  %v4661_v49 = vmul.u32 %v8977_v10, %v4607_v52  ;;  %v9067_v19 = vsub.s32 32, %v4892_v21 }
 0x527   :  { %v4379_v0 = vmul.f32 %v4378_v62, %v4376_v6  ;;  %v4665_v51 = vsel %vm4663_vm12, %v4664_v35, %v4660_v13  ;;  %v4885_v27 = vand.u32 8388607, %v9506_v48  ;;  %v9071_v50 = vshrl.u32 %v4890_v16, 5 }
 0x528   :  { %v4666_v53 = vadd.s32 %v4665_v51, %v4661_v49  ;;  %v4895_v38 = vshll.u32 %v9535_v25, %v4892_v21  ;;  %v4896_v45 = vshrl.u32 %v9526_v55, %v9067_v19  ;;  %v4898_v30 = vshll.u32 %v9526_v55, %v4892_v21 }
 0x529   :  { %vm4260_vm15 = vcmp.lt.s32.totalorder %v8688_v34, 0  ;;  %v4899_v10 = vshrl.u32 %v9527_v24, %v9067_v19  ;;  %v4902_v5 = vshrl.u32 %v9558_v32, %v9067_v19  ;;  %v4904_v56 = vshll.u32 %v9558_v32, %v4892_v21 }
 0x52a   :  { %v4905_v2 = vshrl.u32 %v9582_v46, %v9067_v19  ;;  %v4667_v15 = vadd.s32 536870912, %v4666_v53  ;;  %v4901_v28 = vshll.u32 %v9527_v24, %v4892_v21  ;;  %v4907_v47 = vshll.u32 %v9582_v46, %v4892_v21 }
 0x52b   :  { %v4908_v55 = vshrl.u32 %v9606_v41, %v9067_v19  ;;  %v9092_v9 = vsel %vm9053_vm5, %v8615_v29, %v4071_v14  ;;  %v4886_v23 = vor.u32 8388608, %v4885_v27  ;;  %v9094_v39 = vor.u32 %v4896_v45, %v4895_v38 }
 0x52c   :  { %9626 = vst [vmem:[#allocation11_spill] sm:$0xff] %v9092_v9  ;;  %v4906_v32 = vor.u32 %v4905_v2, %v4904_v56  ;;  %v9096_v4 = vshrl.u32 %v4667_v15, 30  ;;  %v9098_v43 = vor.u32 %v4899_v10, %v4898_v30  ;;  %v9100_v6 = vor.u32 %v4902_v5, %v4901_v28 }
 0x52d   :  { %v4909_v24 = vor.u32 %v4908_v55, %v4907_v47  ;;  %v9102_v46 = vadd.f32 1.0, %v4553_v54  ;;  %v4847_v41 = vsub.s32 4, %v8702_v22  ;;  %v4860_v52 = vadd.f32 0.008332121, %v4859_v59 }
 0x52e   :  { %v9627_v13 = vand.u32 2147483647, %v8688_v34  ;;  %v9113_v42 = vmul.f32 %v9092_v9, %v9092_v9  ;;  %v4380_v21 = vxor.u32 2147483648, %v4379_v0  ;;  %v4669_v62 = vshll.u32 %v9096_v4, 30 }
 0x52f   :  { %vm4913_vm3 = vcmp.lt.s32.totalorder %v9071_v50, 4  ;;  %vm4910_vm1 = vcmp.lt.s32.totalorder %v9071_v50, 1  ;;  %v9122_v59 = vshll.u32 %v4886_v23, 8  ;;  %vm4912_vm10 = vcmp.lt.s32.totalorder %v9071_v50, 3 }
 0x530   :  { %vm9107_vm13 = vcmp.le.f32.partialorder %v9627_v13, 0.7853982  ;;  %v4919_v54 = vsel %vm4913_vm3, %v4906_v32, 920167782  ;;  %v4923_v35 = vsel %vm4913_vm3, %v4909_v24, 1326507024  ;;  %v4670_v14 = vsub.s32 %v4666_v53, %v4669_v62 }
 0x531   :  { %v4918_v49 = vsel %vm4910_vm1, %v9094_v39, %v9098_v43  ;;  %v4922_v51 = vsel %vm4910_vm1, %v9098_v43, %v9100_v6  ;;  %v9136_v27 = vsel %vm4725_vm7, %v4847_v41, %v8702_v22  ;;  %v4861_v38 = vmul.f32 %v4860_v52, %v9020_v20 }
 0x532   :  { %v4920_v53 = vsel %vm4912_vm10, %v9100_v6, %v4919_v54  ;;  %v4924_v45 = vsel %vm4912_vm10, %v4906_v32, %v4923_v35  ;;  %v4381_v30 = vsel %vm4260_vm15, %v4380_v21, %v4379_v0  ;;  %vm4671_vm2 = vcmp.lt.s32.totalorder %v4670_v14, 0 }
 0x533   :  { %v4672_v10 = vsub.s32 0, %v4670_v14  ;;  %vm4911_vm4 = vcmp.lt.s32.totalorder %v9071_v50, 2  ;;  %v4084_v5 = vmul.f32 -0.00019511016, %v9113_v42  ;;  %v4927_v2 = vand.u32 65535, %v9122_v59 }
 0x534   :  { %v4921_v22 = vsel %vm4911_vm4, %v4918_v49, %v4920_v53  ;;  %v4925_v56 = vsel %vm4911_vm4, %v4922_v51, %v4924_v45  ;;  %v4928_v28 = vshrl.u32 %v9122_v59, 16  ;;  %v9157_v0 = vsel %vm9107_vm13, %v8688_v34, %v4381_v30 }
 0x535   :  { %v4673_v15 = vsel %vm4671_vm2, %v4672_v10, %v4670_v14  ;;  %v4929_v47 = vand.u32 65535, %v4925_v56  ;;  %v4930_v55 = vshrl.u32 %v4925_v56, 16  ;;  %9630 = vst [vmem:[#allocation12_spill] sm:$0xff] %v9157_v0  ;;  %v4951_v32 = vand.u32 65535, %v4921_v22 }
 0x536   :  { %v4674_v23 = vclz %v4673_v15  ;;  %v4952_v24 = vshrl.u32 %v4921_v22, 16  ;;  %v4862_v52 = vadd.f32 -0.16666654, %v4861_v38  ;;  %v4085_v62 = vadd.f32 0.008332121, %v4084_v5 }
 0x537   :  { %v4932_v13 = vmul.u32 %v4930_v55, %v4927_v2  ;;  %v4933_v21 = vmul.u32 %v4929_v47, %v4928_v28  ;;  %v4662_v54 = vadd.s32 %v9045_v17, %v9042_v44  ;;  %v4894_v49 = vshrl.u32 %v9535_v25, %v9067_v19 }
 0x538   :  { %v5504_v35 = vadd.s32 4294967294, %v4674_v23  ;;  %v9168_v51 = vmul.f32 %v9157_v0, %v9157_v0  ;;  %v4931_v53 = vmul.u32 %v4929_v47, %v4927_v2  ;;  %v4954_v30 = vmul.u32 %v4952_v24, %v4927_v2 }
 0x539   :  { %v4935_v45 = vshll.u32 %v4932_v13, 16  ;;  %v4934_v10 = vmul.u32 %v4930_v55, %v4928_v28  ;;  %v4937_v38 = vshll.u32 %v4933_v21, 16  ;;  %v4953_v22 = vmul.u32 %v4951_v32, %v4927_v2 }
 0x53a   :  { %vm5505_vm7 = vcmp.lt.s32.totalorder %v5504_v35, 0  ;;  %v4955_v15 = vmul.u32 %v4951_v32, %v4928_v28  ;;  %v4936_v23 = vshrl.u32 %v4932_v13, 16  ;;  %v4956_v48 = vmul.u32 %v4952_v24, %v4928_v28 }
 0x53b   :  { %v4677_v56 = vsel %vm5505_vm7, 0, %v5504_v35  ;;  %vm4939_vm6 = vc.u32 %v4931_v53, %v4935_v45  ;;  %v4941_v5 = vadd.s32 %v4935_v45, %v4931_v53  ;;  %v4957_v63 = vshll.u32 %v4954_v30, 16 }
 0x53c   :  { %v4678_v44 = vsub.s32 32, %v4677_v56  ;;  %v4682_v17 = vsub.s32 4294967266, %v4677_v56  ;;  %v4940_v25 = vsel %vm4939_vm6, 1, %v9534_v31  ;;  %v4679_v47 = vshll.u32 %v4670_v14, %v4677_v56 }
 0x53d   :  { %v4942_v19 = vadd.s32 %v4940_v25, %v4934_v10  ;;  %vm4943_vm11 = vc.u32 %v4941_v5, %v4937_v38  ;;  %v4959_v2 = vshll.u32 %v4955_v15, 16  ;;  %vm4961_vm8 = vc.u32 %v4953_v22, %v4957_v63 }
 0x53e   :  { %v4680_v41 = vshrl.u32 %v4662_v54, %v4678_v44  ;;  %v4683_v0 = vadd.s32 127, %v4682_v17  ;;  %v4944_v55 = vsel %vm4943_vm11, 1, %v9534_v31  ;;  %v4963_v35 = vadd.s32 %v4957_v63, %v4953_v22 }
 0x53f   :  { %v4946_v9 = vadd.s32 %v4944_v55, %v4942_v19  ;;  %v4915_v13 = vsel %vm4913_vm3, %v9100_v6, 2102212464  ;;  %v4962_v45 = vsel %vm4961_vm8, 1, %v9534_v31  ;;  %vm4570_vm12 = vcmp.lt.s32.totalorder %v8889_v18, 0 }
 0x540   :  { %v4681_v53 = vor.u32 %v4680_v41, %v4679_v47  ;;  %v4684_v32 = vshll.u32 %v4683_v0, 23  ;;  %v4964_v14 = vadd.s32 %v4962_v45, %v4956_v48  ;;  %vm4965_vm2 = vc.u32 %v4963_v35, %v4959_v2 }
 0x541   :  { %v4947_v28 = vadd.s32 %v4946_v9, %v4936_v23  ;;  %v4852_v24 = vmul.f32 -0.001358992, %v9020_v20  ;;  %v4863_v54 = vmul.f32 %v4862_v52, %v9020_v20  ;;  %v9631_v10 = vand.u32 2147483647, %v8889_v18 }
 0x542   :  { %v4685_v0 = vor.u32 4788187, %v4684_v32  ;;  %v4938_v41 = vshrl.u32 %v4933_v21, 16  ;;  %v4966_v6 = vsel %vm4965_vm2, 1, %v9534_v31  ;;  %v4086_v38 = vmul.f32 %v4085_v62, %v9113_v42 }
 0x543   :  { %vm9181_vm7 = vcmp.le.f32.partialorder %v9631_v10, 0.7853982  ;;  %v4914_v48 = vsel %vm4910_vm1, %v4894_v49, %v9094_v39  ;;  %v4958_v9 = vshrl.u32 %v4954_v30, 16  ;;  %v4968_v22 = vadd.s32 %v4966_v6, %v4964_v14 }
 0x544   :  { %v4686_v56 = vand.u32 2147483647, %v4685_v0  ;;  %v4688_v52 = vcvt.s32.f32 %v4681_v53  ;;  %v4916_v5 = vsel %vm4912_vm10, %v9098_v43, %v4915_v13  ;;  %v9193_v44 = vadd.s32 %v4947_v28, %v4938_v41 }
 0x545   :  { %v4394_v21 = vmul.f32 -0.00019511016, %v9168_v51  ;;  %v4960_v17 = vshrl.u32 %v4955_v15, 16  ;;  %v4969_v31 = vadd.s32 %v4968_v22, %v4958_v9  ;;  %v4853_v23 = vadd.f32 0.041655596, %v4852_v24 }
 0x546   :  { %v4864_v62 = vadd.f32 1.0, %v4863_v54  ;;  %v4072_v25 = vsub.s32 4, %v8856_v11  ;;  %v4689_v19 = vmul.f32 %v4688_v52, %v4686_v56  ;;  %v4967_v39 = vadd.s32 %v4963_v35, %v4959_v2 }
 0x547   :  { %v4382_v49 = vsub.s32 4, %v8967_v61  ;;  %v4917_v30 = vsel %vm4911_vm4, %v4914_v48, %v4916_v5  ;;  %v4970_v47 = vadd.s32 %v4969_v31, %v4960_v17  ;;  %v4542_v43 = vmul.f32 -0.001358992, %v8885_v8 }
 0x548   :  { %v4087_v55 = vadd.f32 -0.16666654, %v4086_v38  ;;  %v4690_v53 = vxor.u32 2147483648, %v4689_v19  ;;  %vm4973_vm3 = vc.u32 %v9193_v44, %v4967_v39  ;;  %v4232_v15 = vmul.f32 -0.001358992, %v8692_v33 }
 0x549   :  { %v4395_v32 = vadd.f32 0.008332121, %v4394_v21  ;;  %v4974_v13 = vadd.s32 1, %v4970_v47  ;;  %v4854_v45 = vmul.f32 %v4853_v23, %v9020_v20  ;;  %v4543_v28 = vadd.f32 0.041655596, %v4542_v43 }
 0x54a   :  { %v4691_v2 = vsel %vm4570_vm12, %v4690_v53, %v4689_v19  ;;  %v4971_v50 = vmul.u32 %v9122_v59, %v4917_v30  ;;  %v4233_v35 = vadd.f32 0.041655596, %v4232_v15  ;;  %v3922_v14 = vmul.f32 -0.001358992, %v8513_v36 }
 0x54b   :  { %v4692_v24 = vsub.s32 4, %v9096_v4  ;;  %v9212_v54 = vsel %vm9181_vm7, %v8889_v18, %v4691_v2  ;;  %v4975_v10 = vsel %vm4973_vm3, %v4974_v13, %v4970_v47  ;;  %v4544_v0 = vmul.f32 %v4543_v28, %v8885_v8 }
 0x54c   :  { %v9217_v41 = vmul.f32 %v9212_v54, %v9212_v54  ;;  %v4976_v6 = vadd.s32 %v4975_v10, %v4971_v50  ;;  %v4234_v59 = vmul.f32 %v4233_v35, %v8692_v33  ;;  %v3923_v38 = vadd.f32 0.041655596, %v3922_v14 }
 0x54d   :  { %v9222_v48 = vmul.f32 %v9102_v46, %v8866_v3  ;;  %v9227_v9 = vsel %vm3950_vm0, %v4072_v25, %v8856_v11  ;;  %v4396_v22 = vmul.f32 %v4395_v32, %v9168_v51  ;;  %v4855_v56 = vadd.f32 -0.4999988, %v4854_v45 }
 0x54e   :  { %v9231_v52 = vmul.f32 %v4864_v62, %v9007_v60  ;;  %v4977_v5 = vadd.s32 536870912, %v4976_v6  ;;  %v4545_v21 = vadd.f32 -0.4999988, %v4544_v0  ;;  %v3924_v17 = vmul.f32 %v3923_v38, %v8513_v36  ;;  %v9636_v0 = vld [vmem:[#allocation10_spill] sm:$0xff] }
 0x54f   :  { %v9634_v3 = vsel %vm8951_vm14, 0, %v9136_v27  ;;  %v4088_v31 = vmul.f32 %v4087_v55, %v9113_v42  ;;  %v9242_v11 = vsel %vm4260_vm15, %v4382_v49, %v8967_v61  ;;  %v4235_v23 = vadd.f32 -0.4999988, %v4234_v59  ;;  %v9637_v59 = vld [vmem:[#allocation8_spill] sm:$0xff] }
 0x550   :  { %v4867_v46 = vadd.s32 3, %v9634_v3  ;;  %v9247_v60 = vsel %vm4570_vm12, %v4692_v24, %v9096_v4  ;;  %v4704_v62 = vmul.f32 -0.00019511016, %v9217_v41  ;;  %v9250_v25 = vshrl.u32 %v4977_v5, 30 }
 0x551   :  { %v3925_v12 = vadd.f32 -0.4999988, %v3924_v17  ;;  %v4561_v27 = vxor.u32 2147483648, %v9222_v48  ;;  %v4075_v19 = vsel %vm9053_vm5, 0, %v9227_v9  ;;  %v4397_v30 = vadd.f32 -0.16666654, %v4396_v22 }
 0x552   :  { %v4856_v61 = vmul.f32 %v4855_v56, %v9020_v20  ;;  %v4871_v49 = vxor.u32 2147483648, %v9231_v52  ;;  %v4385_v4 = vsel %vm9107_vm13, 0, %v9242_v11  ;;  %v4979_v47 = vshll.u32 %v9250_v25, 30 }
 0x553   :  { %v4546_v43 = vmul.f32 %v4545_v21, %v8885_v8  ;;  %v9263_v55 = vadd.f32 1.0, %v4088_v31  ;;  %v4695_v53 = vsel %vm9181_vm7, 0, %v9247_v60  ;;  %v4868_v15 = vand.u32 3, %v4867_v46  ;;  %v9651_v60 = vld [vmem:[#allocation12_spill] sm:$0xff] }
 0x554   :  { %v4236_v32 = vmul.f32 %v4235_v23, %v8692_v33  ;;  %v4705_v20 = vadd.f32 0.008332121, %v4704_v62  ;;  %v9269_v13 = vsub.s32 %v4976_v6, %v4979_v47  ;;  %v4558_v45 = vand.u32 3, %v8829_v7 }
 0x555   :  { %v3926_v28 = vmul.f32 %v3925_v12, %v8513_v36  ;;  %v9274_v2 = vmul.f32 %v4397_v30, %v9168_v51  ;;  %v4857_v8 = vadd.f32 1.0, %v4856_v61  ;;  %v4248_v50 = vand.u32 3, %v8678_v26  ;;  %v9635_v26 = vld [vmem:[#allocation6_spill] sm:$0xff]  ;;  %v9639_v12 = vld [vmem:[#allocation9_spill] sm:$0xff] }
 0x556   :  { %v3938_v35 = vand.u32 3, %v8664_v37  ;;  %v4972_v14 = vadd.s32 %v4967_v39, %v9193_v44  ;;  %vm4981_vm14 = vcmp.lt.s32.totalorder %v9269_v13, 0  ;;  %v4982_v33 = vsub.s32 0, %v9269_v13 }
 0x557   :  { %v4547_v24 = vadd.f32 1.0, %v4546_v43  ;;  %vm4870_vm1 = vcmp.eq.s32.totalorder %v4868_v15, 0  ;;  %vm4873_vm10 = vcmp.eq.s32.totalorder %v4868_v15, 2  ;;  %v4237_v36 = vadd.f32 1.0, %v4236_v32 }
 0x558   :  { %v4706_v7 = vmul.f32 %v4705_v20, %v9217_v41  ;;  %v4983_v10 = vsel %vm4981_vm14, %v4982_v33, %v9269_v13  ;;  %v3927_v37 = vadd.f32 1.0, %v3926_v28  ;;  %v4874_v39 = vxor.u32 2147483648, %v4857_v8 }
 0x559   :  { %v4984_v44 = vclz %v4983_v10  ;;  %vm4560_vm11 = vcmp.eq.s32.totalorder %v4558_v45, 0  ;;  %vm4563_vm8 = vcmp.eq.s32.totalorder %v4558_v45, 2  ;;  %vm4246_vm12 = vweird.f32 %v9636_v0 }
 0x55a   :  { %v4564_v6 = vxor.u32 2147483648, %v4547_v24  ;;  %vm4249_vm2 = vcmp.lt.s32.totalorder %v4248_v50, 2  ;;  %vm4250_vm3 = vcmp.eq.s32.totalorder %v4248_v50, 0  ;;  %vm4253_vm9 = vcmp.eq.s32.totalorder %v4248_v50, 2 }
 0x55b   :  { %v5510_v38 = vadd.s32 4294967294, %v4984_v44  ;;  %v4254_v22 = vxor.u32 2147483648, %v4237_v36  ;;  %vm3939_vm15 = vcmp.lt.s32.totalorder %v3938_v35, 2  ;;  %vm3940_vm14 = vcmp.eq.s32.totalorder %v3938_v35, 0 }
 0x55c   :  { %v4707_v56 = vadd.f32 -0.16666654, %v4706_v7  ;;  %v4875_v5 = vsel %vm4873_vm10, %v4874_v39, %v9231_v52  ;;  %vm3943_vm4 = vcmp.eq.s32.totalorder %v3938_v35, 2  ;;  %v3944_v21 = vxor.u32 2147483648, %v3927_v37 }
 0x55d   :  { %vm5511_vm6 = vcmp.lt.s32.totalorder %v5510_v38, 0  ;;  %v4872_v17 = vsel %vm4870_vm1, %v4857_v8, %v4871_v49  ;;  %v4565_v3 = vsel %vm4563_vm8, %v4564_v6, %v9222_v48  ;;  %v4255_v46 = vsel %vm4253_vm9, %v4254_v22, %v8926_v58 }
 0x55e   :  { %v4987_v31 = vsel %vm5511_vm6, 0, %v5510_v38  ;;  %vm9638_vm0 = vcmp.lt.s32.totalorder %v4868_v15, 2  ;;  %v4562_v62 = vsel %vm4560_vm11, %v4547_v24, %v4561_v27  ;;  %v3945_v30 = vsel %vm3943_vm4, %v3944_v21, %v9639_v12 }
 0x55f   :  { %v4876_v23 = vsel %vm9638_vm0, %v4872_v17, %v4875_v5  ;;  %v4988_v61 = vsub.s32 32, %v4987_v31  ;;  %v4989_v52 = vshll.u32 %v9269_v13, %v4987_v31  ;;  %v4992_v47 = vsub.s32 4294967266, %v4987_v31 }
 0x560   :  { %vm9640_vm10 = vweird.f32 %v9619_v40  ;;  %vm9641_vm1 = vcmp.lt.s32.totalorder %v4558_v45, 2  ;;  %v9642_v32 = vxor.u32 2147483648, %v8926_v58  ;;  %v9643_v20 = vxor.u32 2147483648, %v9639_v12  ;;  %v5033_v45 = vld [vmem:[%s9438_s3] sm:$0x1] }
 0x561   :  { %v4877_v43 = vsel %vm9640_vm10, nan, %v4876_v23  ;;  %v4566_v48 = vsel %vm9641_vm1, %v4562_v62, %v4565_v3  ;;  %v4990_v28 = vshrl.u32 %v4972_v14, %v4988_v61  ;;  %v4993_v8 = vadd.s32 127, %v4992_v47 }
 0x562   :  { %v9299_v49 = vand.u32 4294901760, %v4877_v43  ;;  %v4252_v15 = vsel %vm4250_vm3, %v4237_v36, %v9642_v32  ;;  %v3942_v27 = vsel %vm3940_vm14, %v3927_v37, %v9643_v20  ;;  %vm9644_vm9 = vweird.f32 %v9635_v26 }
 0x563   :  { %v4567_v13 = vsel %vm9644_vm9, nan, %v4566_v48  ;;  %v4256_v40 = vsel %vm4249_vm2, %v4252_v15, %v4255_v46  ;;  %v3946_v24 = vsel %vm3939_vm15, %v3942_v27, %v3945_v30  ;;  %vm4880_vm0 = vcmp.lt.s32.totalorder %v8999_v1, 0 }
 0x564   :  { %5052 = vmatpush.msra.mxu0 %v9299_v49  ;;  %5152 = vmatpush.msra.mxu3 %v9299_v49  ;;  %v9316_v58 = vand.u32 4294901760, %v4567_v13  ;;  %v5081_v33 = vsub.f32 %v4877_v43, %v9299_v49  ;;  %v4257_v14 = vsel %vm4246_vm12, nan, %v4256_v40  ;;  %v4991_v50 = vor.u32 %v4990_v28, %v4989_v52  ;;  %v9650_v28 = vld [vmem:[#allocation11_spill] sm:$0xff] }
 0x565   :  { %v4994_v36 = vshll.u32 %v4993_v8, 23  ;;  %v9323_v7 = vand.u32 4294901760, %v4257_v14  ;;  %vm9645_vm4 = vweird.f32 %v9637_v59  ;;  %vm9646_vm6 = vcmask 261120  }
 0x566   :  { %v3947_v10 = vsel %vm9645_vm4, nan, %v3946_v24  ;;  %5054 = vmatpush.msra.mxu0 %v9316_v58  ;;  %5123 = vmatpush.msra.mxu2 %v5081_v33  ;;  %v5087_v26 = vsub.f32 %v4567_v13, %v9316_v58  ;;  %v5082_v44 = vand.u32 4294901760, %v5081_v33  ;;  %v5037_v35 = vsel %vm9646_vm6, %v5033_v45, 0 }
 0x567   :  { %v9329_v37 = vand.u32 4294901760, %v3947_v10  ;;  %v4708_v39 = vmul.f32 %v4707_v56, %v9217_v41  ;;  %v9647_v0 = vand.u32 2147483647, %v8999_v1  ;;  %v4995_v59 = vor.u32 4788187, %v4994_v36  ;;  %5154 = vmatpush.msra.mxu3 %v9316_v58 }
 0x568   :  { %v5093_v38 = vsub.f32 %v4257_v14, %v9323_v7  ;;  %v9341_v22 = vand.u32 4294901760, %v5037_v35  ;;  %v4998_v5 = vcvt.s32.f32 %v4991_v50  ;;  %5056 = vmatpush.msra.mxu0 %v9323_v7  ;;  %5126 = vmatpush.msra.mxu2 %v5087_v26  ;;  %v5083_v21 = vsub.f32 %v5081_v33, %v5082_v44 }
 0x569   :  { %vm9335_vm15 = vcmp.le.f32.partialorder %v9647_v0, 0.7853982  ;;  %v5099_v56 = vsub.f32 %v3947_v10, %v9329_v37  ;;  %v5088_v17 = vand.u32 4294901760, %v5087_v26  ;;  %v4996_v3 = vand.u32 2147483647, %v4995_v59  ;;  %5156 = vmatpush.msra.mxu3 %v9323_v7 }
 0x56a   :  { %v5094_v46 = vand.u32 4294901760, %v5093_v38  ;;  %v9347_v31 = vsub.f32 %v5037_v35, %v9341_v22  ;;  %v4697_v23 = vmul.f32 -0.001358992, %v9217_v41  ;;  %v5002_v62 = vsub.s32 4, %v9250_v25  ;;  %5058 = vmatpush.msra.mxu0 %v9329_v37  ;;  %5129 = vmatpush.msra.mxu2 %v5093_v38 }
 0x56b   :  { %v5084_v12 = vand.u32 4294901760, %v5083_v21  ;;  %v5089_v30 = vsub.f32 %v5087_v26, %v5088_v17  ;;  %v5100_v61 = vand.u32 4294901760, %v5099_v56  ;;  %v4399_v52 = vadd.f32 1.0, %v9274_v2  ;;  %5158 = vmatpush.msra.mxu3 %v9329_v37 }
 0x56c   :  { %v4709_v47 = vadd.f32 1.0, %v4708_v39  ;;  %v4999_v43 = vmul.f32 %v4998_v5, %v4996_v3  ;;  %5181 = vmatpush.msrb.mxu0 %v5082_v44  ;;  %v5095_v48 = vsub.f32 %v5093_v38, %v5094_v46  ;;  %5132 = vmatpush.msra.mxu2 %v5099_v56  ;;  %v9355_v20 = vand.u32 4294901760, %v9347_v31 }
 0x56d   :  { %5085 = vmatpush.msra.mxu1 %v5084_v12  ;;  %v5090_v32 = vand.u32 4294901760, %v5089_v30  ;;  %v5101_v15 = vsub.f32 %v5099_v56, %v5100_v61  ;;  %v4698_v27 = vadd.f32 0.041655596, %v4697_v23  ;;  %v9359_v8 = vmul.f32 %v9263_v55, %v9650_v28  ;;  %5135 = vmatmul.f32.vlgmr.msra.gmra.mxu2 %v9347_v31 }
 0x56e   :  { %v4712_v2 = vadd.s32 3, %v4695_v53  ;;  %v5000_v13 = vxor.u32 2147483648, %v4999_v43  ;;  %5185 = vmatpush.msrb.mxu0 %v5088_v17  ;;  %v4387_v40 = vmul.f32 -0.001358992, %v9168_v51  ;;  %v5003_v45 = vsel %vm4880_vm0, %v5002_v62, %v9250_v25  ;;  %5162 = vmatmul.f32.vlgmr.msra.gmra.mxu3 %v9355_v20 }
 0x56f   :  { %5091 = vmatpush.msra.mxu1 %v5090_v32  ;;  %v5096_v33 = vand.u32 4294901760, %v5095_v48  ;;  %v5062_v55 = vsub.f32 %v9347_v31, %v9355_v20  ;;  %v4699_v63 = vmul.f32 %v4698_v27, %v9217_v41  ;;  %v9375_v53 = vmul.f32 %v4399_v52, %v9651_v60 }
 0x570   :  { %v4710_v14 = vmul.f32 %v4709_v47, %v9212_v54  ;;  %v5001_v24 = vsel %vm4880_vm0, %v5000_v13, %v4999_v43  ;;  %5189 = vmatpush.msrb.mxu0 %v5094_v46  ;;  %v5102_v50 = vand.u32 4294901760, %v5101_v15  ;;  %v4388_v26 = vadd.f32 0.041655596, %v4387_v40 }
 0x571   :  { %v9383_v25 = vsel %vm9335_vm15, %v8999_v1, %v5001_v24  ;;  %5097 = vmatpush.msra.mxu1 %v5096_v33  ;;  %v9385_v36 = vand.u32 4294901760, %v5062_v55  ;;  %v4700_v10 = vadd.f32 -0.4999988, %v4699_v63  ;;  %v4092_v54 = vadd.s32 3, %v4075_v19 }
 0x572   :  { %v4402_v44 = vadd.s32 3, %v4385_v4  ;;  %v5005_v35 = vsel %vm9335_vm15, 0, %v5003_v45  ;;  %v5006_v39 = vmul.f32 %v9383_v25, %v9383_v25  ;;  %5193 = vmatpush.msrb.mxu0 %v5100_v61  ;;  %v4713_v0 = vand.u32 3, %v4712_v2 }
 0x573   :  { %5103 = vmatpush.msra.mxu1 %v5102_v50  ;;  %5064 = vmatmul.f32.vlgmr.msra.gmra.mxu0 %v9385_v36  ;;  %v4701_v57 = vmul.f32 %v4700_v10, %v9217_v41  ;;  %v4389_v9 = vmul.f32 %v4388_v26, %v9168_v51  ;;  %v4077_v16 = vmul.f32 -0.001358992, %v9113_v42  ;;  %v4096_v11 = vxor.u32 2147483648, %v9359_v8 }
 0x574   :  { %v4716_v19 = vxor.u32 2147483648, %v4710_v14  ;;  %v5014_v4 = vmul.f32 -0.00019511016, %v5006_v39  ;;  %v5007_v6 = vmul.f32 -0.001358992, %v5006_v39  ;;  %v4406_v59 = vxor.u32 2147483648, %v9375_v53  ;;  %5105 = vmatmul.f32.vlgmr.msra.gmra.mxu1 %v9341_v22 }
 0x575   :  { %5212 = vmatpush.msrb.mxu1 %v9299_v49  ;;  %v4702_v38 = vadd.f32 1.0, %v4701_v57  ;;  %v4390_v5 = vadd.f32 -0.4999988, %v4389_v9  ;;  %v4078_v21 = vadd.f32 0.041655596, %v4077_v16  ;;  %v5022_v56 = vadd.s32 3, %v5005_v35 }
 0x576   :  { %v5015_v41 = vadd.f32 0.008332121, %v5014_v4  ;;  %v5008_v17 = vadd.f32 0.041655596, %v5007_v6  ;;  %v4403_v3 = vand.u32 3, %v4402_v44  ;;  %vm4715_vm5 = vcmp.eq.s32.totalorder %v4713_v0, 0 }
 0x577   :  { %5214 = vmatpush.msrb.mxu1 %v9316_v58  ;;  %v4719_v46 = vxor.u32 2147483648, %v4702_v38  ;;  %v4391_v23 = vmul.f32 %v4390_v5, %v9168_v51  ;;  %v4079_v49 = vmul.f32 %v4078_v21, %v9113_v42  ;;  %vm4714_vm13 = vcmp.lt.s32.totalorder %v4713_v0, 2 }
 0x578   :  { %v5016_v62 = vmul.f32 %v5015_v41, %v5006_v39  ;;  %v5009_v12 = vmul.f32 %v5008_v17, %v5006_v39  ;;  %v4717_v30 = vsel %vm4715_vm5, %v4702_v38, %v4716_v19  ;;  %vm4718_vm7 = vcmp.eq.s32.totalorder %v4713_v0, 2 }
 0x579   :  { %5216 = vmatpush.msrb.mxu1 %v9323_v7  ;;  %v4392_v61 = vadd.f32 1.0, %v4391_v23  ;;  %v4080_v52 = vadd.f32 -0.4999988, %v4079_v49  ;;  %v4093_v47 = vand.u32 3, %v4092_v54  ;;  %v4720_v48 = vsel %vm4718_vm7, %v4719_v46, %v4710_v14 }
 0x57a   :  { %v5017_v43 = vadd.f32 -0.16666654, %v5016_v62  ;;  %v5010_v58 = vadd.f32 -0.4999988, %v5009_v12  ;;  %vm4405_vm11 = vcmp.eq.s32.totalorder %v4403_v3, 0  ;;  %v4721_v32 = vsel %vm4714_vm13, %v4717_v30, %v4720_v48 }
 0x57b   :  { %5218 = vmatpush.msrb.mxu1 %v9329_v37  ;;  %v4407_v51 = vsel %vm4405_vm11, %v4392_v61, %v4406_v59  ;;  %v4409_v15 = vxor.u32 2147483648, %v4392_v61  ;;  %v4081_v27 = vmul.f32 %v4080_v52, %v9113_v42  ;;  %5195 = vmatmul.f32.vlgmr.msrb.gmra.mxu0 %v9341_v22  ;;  %vm4711_vm8 = vweird.f32 %v8889_v18 }
 0x57c   :  { %v5018_v7 = vmul.f32 %v5017_v43, %v5006_v39  ;;  %v5011_v28 = vmul.f32 %v5010_v58, %v5006_v39  ;;  %vm4408_vm12 = vcmp.eq.s32.totalorder %v4403_v3, 2  ;;  %vm4404_vm2 = vcmp.lt.s32.totalorder %v4403_v3, 2  ;;  %5220 = vmatmul.f32.vlgmr.msrb.gmra.mxu1 %v9341_v22 }
 0x57d   :  { %v4410_v2 = vsel %vm4408_vm12, %v4409_v15, %v9375_v53  ;;  %v4082_v13 = vadd.f32 1.0, %v4081_v27  ;;  %vm4095_vm3 = vcmp.eq.s32.totalorder %v4093_v47, 0  ;;  %v4722_v45 = vsel %vm4711_vm8, nan, %v4721_v32 }
 0x57e   :  { %v5019_v37 = vadd.f32 1.0, %v5018_v7  ;;  %v5012_v40 = vadd.f32 1.0, %v5011_v28  ;;  %v4411_v33 = vsel %vm4404_vm2, %v4407_v51, %v4410_v2  ;;  %v5023_v55 = vand.u32 3, %v5022_v56 }
 0x57f   :  { %vm4401_vm14 = vweird.f32 %v8688_v34  ;;  %v4097_v42 = vsel %vm4095_vm3, %v4082_v13, %v4096_v11  ;;  %v4099_v63 = vxor.u32 2147483648, %v4082_v13  ;;  %vm4098_vm10 = vcmp.eq.s32.totalorder %v4093_v47, 2 }
 0x580   :  { %v5020_v60 = vmul.f32 %v5019_v37, %v9383_v25  ;;  %v5029_v18 = vxor.u32 2147483648, %v5012_v40  ;;  %v4412_v14 = vsel %vm4401_vm14, nan, %v4411_v33  ;;  %v5238_v24 = vand.u32 4294901760, %v4722_v45 }
 0x581   :  { %vm4094_vm1 = vcmp.lt.s32.totalorder %v4093_v47, 2  ;;  %v4100_v53 = vsel %vm4098_vm10, %v4099_v63, %v9359_v8  ;;  %vm4091_vm9 = vweird.f32 %v8615_v29  ;;  %vm5025_vm0 = vcmp.eq.s32.totalorder %v5023_v55, 0 }
 0x582   :  { %v5026_v50 = vxor.u32 2147483648, %v5020_v60  ;;  %v4101_v10 = vsel %vm4094_vm1, %v4097_v42, %v4100_v53  ;;  %vm5028_vm4 = vcmp.eq.s32.totalorder %v5023_v55, 2  ;;  %v5240_v26 = vand.u32 4294901760, %v4412_v14 }
 0x583   :  { %v4102_v54 = vsel %vm4091_vm9, nan, %v4101_v10  ;;  %vm5024_vm6 = vcmp.lt.s32.totalorder %v5023_v55, 2  ;;  %v5030_v44 = vsel %vm5028_vm4, %v5029_v18, %v5020_v60  ;;  %vm5021_vm15 = vweird.f32 %v8999_v1 }
 0x584   :  { %v5027_v34 = vsel %vm5025_vm0, %v5012_v40, %v5026_v50  ;;  %v5272_v35 = vsub.f32 %v4722_v45, %v5238_v24  ;;  %v5242_v39 = vand.u32 4294901760, %v4102_v54  ;;  %v5278_v9 = vsub.f32 %v4412_v14, %v5240_v26 }
 0x585   :  { %v5031_v25 = vsel %vm5024_vm6, %v5027_v34, %v5030_v44  ;;  %vm5412_vm5 = vcmask 1040384   ;;  %v9652_v37 = vlaneseq }
 0x586   :  { %v5032_v57 = vsel %vm5021_vm15, nan, %v5031_v25  ;;  %v5284_v29 = vsub.f32 %v4102_v54, %v5242_v39  ;;  %v5273_v16 = vand.u32 4294901760, %v5272_v35  ;;  %v5279_v19 = vand.u32 4294901760, %v5278_v9 }
 0x587   :  { %v5236_v0 = vand.u32 4294901760, %v5032_v57  ;;  %vm5417_vm13 = vcmp.lt.s32.totalorder %v9652_v37, 256 }
 0x588   :  { %v5274_v1 = vsub.f32 %v5272_v35, %v5273_v16  ;;  %v5285_v6 = vand.u32 4294901760, %v5284_v29  ;;  %v5280_v38 = vsub.f32 %v5278_v9, %v5279_v19 }
 0x589   :  { %5237 = vmatpush.msrb.mxu2 %v5236_v0  ;;  %5337 = vmatpush.msra.mxu1 %v5236_v0  ;;  %v5266_v8 = vsub.f32 %v5032_v57, %v5236_v0 }
 0x58a   :  { %v5275_v5 = vand.u32 4294901760, %v5274_v1  ;;  %v5286_v21 = vsub.f32 %v5284_v29, %v5285_v6  ;;  %v5281_v41 = vand.u32 4294901760, %v5280_v38 }
 0x58b   :  { %5239 = vmatpush.msrb.mxu2 %v5238_v24  ;;  %5308 = vmatpush.msra.mxu0 %v5266_v8  ;;  %v5267_v11 = vand.u32 4294901760, %v5266_v8 }
 0x58c   :  { %5339 = vmatpush.msra.mxu1 %v5238_v24  ;;  %v5287_v56 = vand.u32 4294901760, %v5286_v21 }
 0x58d   :  { %5241 = vmatpush.msrb.mxu2 %v5240_v26  ;;  %5311 = vmatpush.msra.mxu0 %v5272_v35  ;;  %v5268_v4 = vsub.f32 %v5266_v8, %v5267_v11 }
 0x58e   :  { %5341 = vmatpush.msra.mxu1 %v5240_v26 }
 0x58f   :  { %5243 = vmatpush.msrb.mxu2 %v5242_v39  ;;  %5314 = vmatpush.msra.mxu0 %v5278_v9  ;;  %v5269_v59 = vand.u32 4294901760, %v5268_v4 }
 0x590   :  { %5343 = vmatpush.msra.mxu1 %v5242_v39  ;;  %5249 = vmatmul.f32.vlgmr.msrb.gmra.mxu2 %v9385_v36 }
 0x591   :  { %5366 = vmatpush.msra.mxu2 %v5267_v11  ;;  %5270 = vmatpush.msrb.mxu3 %v5269_v59 }
 0x592   :  { %5317 = vmatpush.msra.mxu0 %v5284_v29  ;;  %5347 = vmatmul.f32.vlgmr.msra.gmra.mxu1 %v9355_v20  ;;  %v5035_v20 = vstv %s9439_s4  ;;  %s5575_s4 = smov [#allocation3]  }
 0x593   :  { %5370 = vmatpush.msra.mxu2 %v5273_v16  ;;  %5320 = vmatmul.f32.vlgmr.msra.gmra.mxu0 %v9347_v31  ;;  %s5425_s7 = sshll.u32 %s5575_s4, 4  ;;  %s5426_s7 = int_to_ptr.vmem [resolvable:$true] %s5425_s7 }
 0x594   :  { %5276 = vmatpush.msrb.mxu3 %v5275_v5 }
 0x595   :  { %5374 = vmatpush.msra.mxu2 %v5279_v19 }
 0x596   :  { %5282 = vmatpush.msrb.mxu3 %v5281_v41 }
 0x597   :  { %5378 = vmatpush.msra.mxu2 %v5285_v6 }
 0x598   :  { %5288 = vmatpush.msrb.mxu3 %v5287_v56  ;;  %5380 = vmatmul.f32.vlgmr.msra.gmra.mxu2 %v9341_v22 }
 0x599   :  { %5290 = vmatmul.f32.vlgmr.msrb.gmra.mxu3 %v9341_v22 }
 0x59a   :  { %5397 = vmatpush.msra.mxu3 %v5236_v0 }
 0x59c   :  { %5399 = vmatpush.msra.mxu3 %v5238_v24 }
 0x59e   :  { %5401 = vmatpush.msra.mxu3 %v5240_v26 }
 0x5a0   :  { %5403 = vmatpush.msra.mxu3 %v5242_v39 }
 0x5a1   :  { %5405 = vmatmul.f32.vlgmr.msra.gmra.mxu3 %v9341_v22 }
 0x5f0   :  { %v5065_v31 = vpop.f32.mrf.mxu0  ;;  %v5136_v36 = vpop.f32.mrf.mxu2 }
 0x5f1   :  { %v5106_v17 = vpop.f32.mrf.mxu1  ;;  %v5163_v3 = vpop.f32.mrf.mxu3  ;;  %v5066_v23 = vadd.f32 %v5065_v31, %v5035_v20 }
 0x5f3   :  { %v5107_v12 = vadd.f32 %v5106_v17, %v5066_v23 }
 0x5f5   :  { %v5137_v61 = vadd.f32 %v5136_v36, %v5107_v12 }
 0x5f7   :  { %v5164_v22 = vadd.f32 %v5163_v3, %v5137_v61 }
 0x5f8   :  { %v5196_v46 = vpop.f32.mrf.mxu0 }
 0x5f9   :  { %v5221_v49 = vpop.f32.mrf.mxu1  ;;  %v5197_v15 = vadd.f32 %v5196_v46, %v5164_v22 }
 0x5fb   :  { %v5222_v2 = vadd.f32 %v5221_v49, %v5197_v15 }
 0x60f   :  { %v5348_v58 = vpop.f32.mrf.mxu1 }
 0x610   :  { %v5321_v47 = vpop.f32.mrf.mxu0 }
 0x613   :  { %v5250_v62 = vpop.f32.mrf.mxu2 }
 0x614   :  { %v5251_v30 = vadd.f32 %v5250_v62, %v5035_v20 }
 0x61b   :  { %v5381_v32 = vpop.f32.mrf.mxu2 }
 0x61c   :  { %v5291_v52 = vpop.f32.mrf.mxu3 }
 0x61d   :  { %v5292_v43 = vadd.f32 %v5291_v52, %v5251_v30 }
 0x61f   :  { %v5322_v48 = vadd.f32 %v5321_v47, %v5292_v43 }
 0x621   :  { %v5349_v51 = vadd.f32 %v5348_v58, %v5322_v48 }
 0x623   :  { %v5382_v27 = vadd.f32 %v5381_v32, %v5349_v51 }
 0x624   :  { %v5406_v7 = vpop.f32.mrf.mxu3 }
 0x625   :  { %v5407_v28 = vadd.f32 %v5406_v7, %v5382_v27 }
 0x627   :  { %v5411_v13 = vrot.slane %v5407_v28, 7 }
 0x629   :  { %v5413_v40 = vsel %vm5412_vm5, %v5222_v2, %v5411_v13 }
 0x62a   :  { %5419 = vst.msk [vmem:[#allocation3] sm:$0x3] %vm5417_vm13, %v5413_v40 }
 0x62b   :  { %5430 = dma.vmem_to_hbm [thread:$0]  %s5426_s7, 32, %s5428_s10, [#allocation4]  }
 0x62c   :  { %5564 = dma.done.wait [#allocation4], 32  }
 0x62d   :  { %5565 = vsyncadd [#allocation4], 4294967264 }
 0x62e   :  { %5435 = vsyncpa [#allocation4], 1 }

</bundles_post_ra>
